<compile_context>
chip_gen: v7x
topology: tpu7x:2x2x1
jax: 0.10.0
libtpu: 0.0.40
codegen_flags: <defaults>
</compile_context>

<pallas_src>
import functools
import math

import jax
import jax.numpy as jnp
from jax.experimental import pallas as pl
from jax.experimental.pallas import tpu as pltpu

INV_SQRT2 = 1.0 / math.sqrt(2.0)
BN_EPS = 1e-5
LANE = 128


def _round_up(x, m):
    return (x + m - 1) // m * m


# ----------------------------- in-kernel helpers -----------------------------

def _erf(x):
    # Abramowitz & Stegun 7.1.26 (max abs err ~1.5e-7); add/mul/exp only, so it
    # lowers cleanly on Mosaic (the exp lands on the EUP slot).
    p = 0.3275911
    a1, a2, a3, a4, a5 = (0.254829592, -0.284496736, 1.421413741,
                          -1.453152027, 1.061405429)
    ax = jnp.abs(x)
    t = 1.0 / (1.0 + p * ax)
    poly = ((((a5 * t + a4) * t + a3) * t + a2) * t + a1) * t
    y = 1.0 - poly * jnp.exp(-ax * ax)
    return jnp.where(x >= 0, y, -y)


def _gelu_exact(x):
    # nn.GELU() default (erf-based).  Kept in f32 (v5e has no bf16 VPU/EUP path).
    return 0.5 * x * (1.0 + _erf(x * INV_SQRT2))


# --------------------------------- kernel -------------------------------------

def _unet_down_kernel(x1t_ref, mask_ref, *rest, th, wd, ow1p, has_res_stream):
    # x1t_ref : (1, 1, th+2, ow1p, 9*Cin) bf16 -- conv1 taps for this row tile,
    #           K-packed (tap-major), including the 1-row recompute halo needed
    #           by conv2 plus right padding up to a sublane multiple.
    # mask_ref: (1, th+2, ow1p, 1) f32 -- 1 inside the image, 0 on SAME-padding
    #           positions of the conv1-output grid (so conv2 sees zero padding).
    # rest    : [res_ref,] w1(9Cin,Cp), s1(1,Cp), t1(1,Cp), w2(9Cp,Cp), s2, t2, o_ref
    if has_res_stream:
        res_ref, w1_ref, s1_ref, t1_ref, w2_ref, s2_ref, t2_ref, o_ref = rest
    else:
        w1_ref, s1_ref, t1_ref, w2_ref, s2_ref, t2_ref, o_ref = rest
        res_ref = None
    cp = w1_ref.shape[-1]
    oh1 = th + 2
    k1 = x1t_ref.shape[-1]                            # 9 * Cin

    # ---- conv1 + BN + GELU over the (th+2, ow1p) extended grid: ONE MXU matmul
    lhs1 = x1t_ref[0, 0].reshape(oh1 * ow1p, k1)      # aligned collapse (ow1p % 8 == 0)
    acc1 = jnp.dot(lhs1, w1_ref[...], preferred_element_type=jnp.float32)
    x1 = _gelu_exact(acc1 * s1_ref[...] + t1_ref[...]).reshape(oh1, ow1p, cp)
    # zero conv1 values that fall outside the image (= conv2's SAME zero padding)
    x1 = x1 * mask_ref[0]

    # ---- conv2 + BN + GELU: 9 taps packed along K (one matmul, K = 9*Cp)
    x1b = x1.astype(jnp.bfloat16)
    cols = [x1b[:, dx:dx + wd, :] for dx in range(3)]        # hoisted sublane shifts
    taps2 = jnp.concatenate(
        [cols[dx][dy:dy + th] for dy in range(3) for dx in range(3)], axis=-1)
    acc2 = jnp.dot(taps2.reshape(th * wd, 9 * cp), w2_ref[...],
                   preferred_element_type=jnp.float32)
    y2 = _gelu_exact(acc2 * s2_ref[...] + t2_ref[...])       # (th*wd, Cp) f32

    # ---- residual + 1/sqrt(2) + 2x2 max-pool, fused epilogue
    if res_ref is not None:                                  # in_c == out_c: resid = x
        res = res_ref[0].astype(jnp.float32)
    else:                                                    # resid = conv1 output (VMEM)
        res = x1[1:1 + th, 1:1 + wd, :].reshape(th * wd, cp)
    s = (res + y2) * INV_SQRT2
    s4 = s.reshape(th // 2, 2, wd // 2, 2, cp)
    p = jnp.maximum(jnp.maximum(s4[:, 0, :, 0, :], s4[:, 0, :, 1, :]),
                    jnp.maximum(s4[:, 1, :, 0, :], s4[:, 1, :, 1, :]))
    o_ref[0] = p.reshape((th // 2) * (wd // 2), cp).astype(o_ref.dtype)


# --------------------------------- wrappers -----------------------------------

def _choose_tile_h(N, H, W, max_rows=1024):
    # Largest even divisor of H with th*W <= max_rows.  If N == 1 prefer th < H so
    # the "parallel" grid has >= 2 steps (v7x has 2 TensorCores per chip).
    cands = [t for t in range(2, H + 1, 2) if H % t == 0 and t * W <= max_rows]
    if not cands:
        cands = [2]
    if N == 1:
        sub = [t for t in cands if t < H]
        if sub:
            cands = sub
    return max(cands)


def _build_conv1_taps(x_nhwc, th, ow1p):
    # Conv1 taps, K-packed:  taps[n, i, j, (dy*3+dx)*C + c] = x_pad[n, i+dy, j+dx, c]
    # over the conv1-OUTPUT extended grid (rows -1..H, cols -1..W of the image,
    # width right-padded to ow1p).  The 9x expansion is of the tiny Cin-channel
    # input only; the 128-channel x1 intermediate never touches HBM.
    N, H, W, C = x_nhwc.shape
    n_t = H // th
    extra = ow1p - (W + 2)
    xp = jnp.pad(x_nhwc, ((0, 0), (2, 2), (2, 2 + extra), (0, 0)))
    taps = jnp.concatenate(
        [xp[:, dy:dy + H + 2, dx:dx + ow1p, :] for dy in range(3) for dx in range(3)],
        axis=-1)                                               # (N, H+2, ow1p, 9C)
    if n_t == 1:
        return taps[:, None]
    # TODO(synk): for n_t > 1 this materializes overlapping row tiles (2 halo rows
    # each); an overlapping-window BlockSpec (pl.Element along H) would avoid it.
    return jnp.stack([taps[:, t * th: t * th + th + 2] for t in range(n_t)], axis=1)


def _build_valid_mask(H, W, th, ow1p, n_t):
    # 1.0 where the conv1-output position is inside the image, else 0.0.
    r = jnp.arange(th + 2)[None, :, None]
    t = jnp.arange(n_t)[:, None, None]
    g = t * th + r - 1                                         # global conv1-output row
    row_ok = (g >= 0) & (g <= H - 1)
    c = jnp.arange(ow1p)[None, None, :]
    col_ok = (c >= 1) & (c <= W)
    m = (row_ok & col_ok).astype(jnp.float32)                  # (n_t, th+2, ow1p)
    return m[..., None]                                        # (n_t, th+2, ow1p, 1)


def unet_down_forward(params, x_nchw):
    in_c, out_c = params["in_channels"], params["out_channels"]
    N, _, H, W = x_nchw.shape
    assert H % 2 == 0 and W % 2 == 0, "MaxPool2d(2) requires even spatial dims"
    assert W % 8 == 0, "kernel assumes sublane-aligned width"   # TODO(synk): general W
    cp = _round_up(out_c, LANE)
    th = _choose_tile_h(N, H, W)
    n_t = H // th
    ow1p = _round_up(W + 2, 8)

    x = jnp.transpose(x_nchw, (0, 2, 3, 1)).astype(jnp.bfloat16)      # NCHW -> NHWC
    x1_taps = _build_conv1_taps(x, th, ow1p)                          # (N,n_t,th+2,ow1p,9Cin)
    mask = _build_valid_mask(H, W, th, ow1p, n_t)                     # (n_t,th+2,ow1p,1)

    has_res_stream = (in_c == out_c)
    args = [x1_taps, mask]
    in_specs = [
        pl.BlockSpec((1, 1, th + 2, ow1p, 9 * in_c), lambda n, t: (n, t, 0, 0, 0)),
        pl.BlockSpec((1, th + 2, ow1p, 1), lambda n, t: (t, 0, 0, 0)),
    ]
    if has_res_stream:
        resid = jnp.pad(x, ((0, 0), (0, 0), (0, 0), (0, cp - in_c))).reshape(N, H * W, cp)
        args.append(resid)
        in_specs.append(pl.BlockSpec((1, th * W, cp), lambda n, t: (n, t, 0)))
    args += [params["w1p"], params["s1p"], params["t1p"],
             params["w2p"], params["s2p"], params["t2p"]]
    a_spec = pl.BlockSpec((1, cp), lambda n, t: (0, 0))
    in_specs += [pl.BlockSpec((9 * in_c, cp), lambda n, t: (0, 0)), a_spec, a_spec,
                 pl.BlockSpec((9 * cp, cp), lambda n, t: (0, 0)), a_spec, a_spec]

    kern = functools.partial(_unet_down_kernel, th=th, wd=W, ow1p=ow1p,
                             has_res_stream=has_res_stream)
    out = pl.pallas_call(
        kern,
        out_shape=jax.ShapeDtypeStruct((N, (H // 2) * (W // 2), cp), jnp.float32),
        grid_spec=pltpu.PrefetchScalarGridSpec(
            num_scalar_prefetch=0,
            grid=(N, n_t),
            in_specs=in_specs,
            out_specs=pl.BlockSpec((1, (th // 2) * (W // 2), cp),
                                   lambda n, t: (n, t, 0)),
        ),
        compiler_params=pltpu.CompilerParams(
            dimension_semantics=("parallel", "parallel")),
    )(*args)

    y = out.reshape(N, H // 2, W // 2, cp)[..., :out_c]               # strip lane padding
    return jnp.transpose(y, (0, 3, 1, 2))                             # NHWC -> NCHW


# ----------------------------- parameters / model -----------------------------

def _pack_conv1_weight(w_oihw, cp):
    # (Cout,Cin,3,3) -> (3,3,Cin,Cout) -> (9*Cin, Cp) bf16, zero-padded out-channels.
    cout = w_oihw.shape[0]
    cin = w_oihw.shape[1]
    wm = jnp.transpose(w_oihw, (2, 3, 1, 0))
    wm = jnp.pad(wm, ((0, 0), (0, 0), (0, 0), (0, cp - cout)))
    return wm.reshape(9 * cin, cp).astype(jnp.bfloat16)


def _pack_conv2_weight(w_oihw, cp):
    # (Cout,Cin,3,3) -> (3,3,Cin,Cout) -> pad both channel dims to Cp -> (9*Cp, Cp) bf16.
    cout = w_oihw.shape[0]
    cin = w_oihw.shape[1]
    wm = jnp.transpose(w_oihw, (2, 3, 1, 0))
    wm = jnp.pad(wm, ((0, 0), (0, 0), (0, cp - cin), (0, cp - cout)))
    return wm.reshape(9 * cp, cp).astype(jnp.bfloat16)


def _pack_affine(scale, shift, cp):
    c = scale.shape[0]
    s = jnp.pad(scale, (0, cp - c)).reshape(1, cp).astype(jnp.float32)
    t = jnp.pad(shift, (0, cp - c)).reshape(1, cp).astype(jnp.float32)
    return s, t


def init_unet_down_params(key, in_channels, out_channels):
    ks = jax.random.split(key, 12)

    def conv_w(k, cout, cin):
        bound = 1.0 / math.sqrt(cin * 9)          # PyTorch Conv2d default bound
        return jax.random.uniform(k, (cout, cin, 3, 3), jnp.float32, -bound, bound)

    def conv_b(k, cout, cin):
        bound = 1.0 / math.sqrt(cin * 9)
        return jax.random.uniform(k, (cout,), jnp.float32, -bound, bound)

    def bn(k0, k1, k2, k3, c):
        gamma = 1.0 + 0.1 * jax.random.normal(k0, (c,), jnp.float32)
        beta = 0.1 * jax.random.normal(k1, (c,), jnp.float32)
        mean = 0.1 * jax.random.normal(k2, (c,), jnp.float32)
        var = 1.0 + 0.1 * jnp.abs(jax.random.normal(k3, (c,), jnp.float32))
        return gamma, beta, mean, var

    w1 = conv_w(ks[0], out_channels, in_channels)
    b1 = conv_b(ks[1], out_channels, in_channels)
    g1, be1, m1, v1 = bn(ks[2], ks[3], ks[4], ks[5], out_channels)

    w2 = conv_w(ks[6], out_channels, out_channels)
    b2 = conv_b(ks[7], out_channels, out_channels)
    g2, be2, m2, v2 = bn(ks[8], ks[9], ks[10], ks[11], out_channels)

    # Fold conv bias + eval-mode BatchNorm into a per-channel affine (scale, shift).
    s1 = g1 / jnp.sqrt(v1 + BN_EPS)
    t1 = (b1 - m1) * s1 + be1
    s2 = g2 / jnp.sqrt(v2 + BN_EPS)
    t2 = (b2 - m2) * s2 + be2

    cp = _round_up(out_channels, LANE)
    w1p = _pack_conv1_weight(w1, cp)              # (9*Cin, Cp) bf16
    w2p = _pack_conv2_weight(w2, cp)              # (9*Cp,  Cp) bf16
    s1p, t1p = _pack_affine(s1, t1, cp)
    s2p, t2p = _pack_affine(s2, t2, cp)

    return dict(w1=w1, s1=s1, t1=t1, w2=w2, s2=s2, t2=t2,
                w1p=w1p, s1p=s1p, t1p=t1p, w2p=w2p, s2p=s2p, t2p=t2p,
                in_channels=in_channels, out_channels=out_channels)


# --------------------------- pure-JAX reference (f32) -------------------------

def _ref_conv_bn_gelu(x_nhwc, w_oihw, scale, shift):
    y = jax.lax.conv_general_dilated(
        x_nhwc, jnp.transpose(w_oihw, (2, 3, 1, 0)), (1, 1), "SAME",
        dimension_numbers=("NHWC", "HWIO", "NHWC"))
    y = y * scale + shift
    return 0.5 * y * (1.0 + jax.lax.erf(y * INV_SQRT2))


def unet_down_reference(params, x_nchw):
    x = jnp.transpose(x_nchw, (0, 2, 3, 1)).astype(jnp.float32)
    x1 = _ref_conv_bn_gelu(x, params["w1"], params["s1"], params["t1"])
    x2 = _ref_conv_bn_gelu(x1, params["w2"], params["s2"], params["t2"])
    resid = x if params["in_channels"] == params["out_channels"] else x1
    s = (resid + x2) * INV_SQRT2
    p = jnp.maximum(jnp.maximum(s[:, 0::2, 0::2, :], s[:, 0::2, 1::2, :]),
                    jnp.maximum(s[:, 1::2, 0::2, :], s[:, 1::2, 1::2, :]))
    return jnp.transpose(p, (0, 3, 1, 2))


# ----------------------------------- main -------------------------------------

if __name__ == "__main__":
    key = jax.random.PRNGKey(0)
    k_param, k_x = jax.random.split(key)

    in_channels, out_channels = 4, 8
    N, H, W = 2, 16, 16

    params = init_unet_down_params(k_param, in_channels, out_channels)
    x = jax.random.normal(k_x, (N, in_channels, H, W), dtype=jnp.float32)  # NCHW input

    fwd = jax.jit(lambda xx: unet_down_forward(params, xx))
    out = jax.block_until_ready(fwd(x))

    assert out.shape == (N, out_channels, H // 2, W // 2), out.shape
    assert out.dtype == jnp.float32
    assert bool(jnp.all(jnp.isfinite(out)))

    # loose sanity check vs f32 reference (bf16 MXU operands -> ~1e-2 abs error)
    ref = unet_down_reference(params, x)
    max_err = float(jnp.max(jnp.abs(out - ref)))
    assert max_err < 1e-1, f"max abs err vs reference: {max_err}"

    print("KERNEL_OK")
</pallas_src>

<mosaic_0001>
module attributes {stable_mosaic.version = 11 : i64} {
  func.func @_unet_down_kernel(%arg0: i32, %arg1: i32, %arg2: memref<1x1x18x24x36xbf16, #tpu.memory_space<vmem>>, %arg3: memref<1x18x24x1xf32, #tpu.memory_space<vmem>>, %arg4: memref<36x128xbf16, #tpu.memory_space<vmem>>, %arg5: memref<1x128xf32, #tpu.memory_space<vmem>>, %arg6: memref<1x128xf32, #tpu.memory_space<vmem>>, %arg7: memref<1152x128xbf16, #tpu.memory_space<vmem>>, %arg8: memref<1x128xf32, #tpu.memory_space<vmem>>, %arg9: memref<1x128xf32, #tpu.memory_space<vmem>>, %arg10: memref<1x64x128xf32, #tpu.memory_space<vmem>>) attributes {dimension_semantics = [#tpu.dimension_semantics<parallel>, #tpu.dimension_semantics<parallel>], iteration_bounds = array<i64: 2, 1>, scalar_prefetch = 0 : i64, scratch_operands = 0 : i64, tpu.core_type = #tpu.core_type<tc>, window_params = [{transform_indices = @transform_0, window_bounds = array<i64: 1, 1, 18, 24, 36>}, {transform_indices = @transform_1, window_bounds = array<i64: 1, 18, 24, 1>}, {pipeline_mode = #tpu.pipeline_mode<synchronous>, transform_indices = @transform_2, window_bounds = array<i64: 36, 128>}, {pipeline_mode = #tpu.pipeline_mode<synchronous>, transform_indices = @transform_3, window_bounds = array<i64: 1, 128>}, {pipeline_mode = #tpu.pipeline_mode<synchronous>, transform_indices = @transform_4, window_bounds = array<i64: 1, 128>}, {pipeline_mode = #tpu.pipeline_mode<synchronous>, transform_indices = @transform_5, window_bounds = array<i64: 1152, 128>}, {pipeline_mode = #tpu.pipeline_mode<synchronous>, transform_indices = @transform_6, window_bounds = array<i64: 1, 128>}, {pipeline_mode = #tpu.pipeline_mode<synchronous>, transform_indices = @transform_7, window_bounds = array<i64: 1, 128>}, {transform_indices = @transform_8, window_bounds = array<i64: 1, 64, 128>}]} {
    %c0 = arith.constant 0 : index
    %c0_0 = arith.constant 0 : index
    %c0_1 = arith.constant 0 : index
    %c0_2 = arith.constant 0 : index
    %c0_3 = arith.constant 0 : index
    %0 = vector.load %arg2[%c0, %c0_0, %c0_1, %c0_2, %c0_3] : memref<1x1x18x24x36xbf16, #tpu.memory_space<vmem>>, vector<1x1x18x24x36xbf16>
    %1 = vector.shape_cast %0 : vector<1x1x18x24x36xbf16> to vector<18x24x36xbf16>
    %2 = vector.shape_cast %1 : vector<18x24x36xbf16> to vector<432x36xbf16>
    %c0_4 = arith.constant 0 : index
    %c0_5 = arith.constant 0 : index
    %3 = vector.load %arg4[%c0_4, %c0_5] : memref<36x128xbf16, #tpu.memory_space<vmem>>, vector<36x128xbf16>
    %cst = arith.constant dense<0.000000e+00> : vector<432x128xf32>
    %4 = tpu.matmul %2, %3, %cst {dimension_numbers = #tpu.dot_dimension_numbers<[1], [0], [0], [1], [0, 0, 1, 1], [], []>} : vector<432x36xbf16>, vector<36x128xbf16>, vector<432x128xf32> -> vector<432x128xf32>
    %c0_6 = arith.constant 0 : index
    %c0_7 = arith.constant 0 : index
    %5 = vector.load %arg5[%c0_6, %c0_7] : memref<1x128xf32, #tpu.memory_space<vmem>>, vector<1x128xf32>
    %6 = vector.broadcast %5 : vector<1x128xf32> to vector<432x128xf32>
    %7 = arith.mulf %4, %6 : vector<432x128xf32>
    %c0_8 = arith.constant 0 : index
    %c0_9 = arith.constant 0 : index
    %8 = vector.load %arg6[%c0_8, %c0_9] : memref<1x128xf32, #tpu.memory_space<vmem>>, vector<1x128xf32>
    %9 = vector.broadcast %8 : vector<1x128xf32> to vector<432x128xf32>
    %10 = arith.addf %7, %9 : vector<432x128xf32>
    %cst_10 = arith.constant 5.000000e-01 : f32
    %11 = vector.broadcast %cst_10 : f32 to vector<432x128xf32>
    %12 = arith.mulf %11, %10 : vector<432x128xf32>
    %cst_11 = arith.constant 0.707106769 : f32
    %13 = vector.broadcast %cst_11 : f32 to vector<432x128xf32>
    %14 = arith.mulf %10, %13 : vector<432x128xf32>
    %15 = math.absf %14 : vector<432x128xf32>
    %cst_12 = arith.constant 0.327591091 : f32
    %16 = vector.broadcast %cst_12 : f32 to vector<432x128xf32>
    %17 = arith.mulf %16, %15 : vector<432x128xf32>
    %cst_13 = arith.constant 1.000000e+00 : f32
    %18 = vector.broadcast %cst_13 : f32 to vector<432x128xf32>
    %19 = arith.addf %18, %17 : vector<432x128xf32>
    %cst_14 = arith.constant 1.000000e+00 : f32
    %20 = vector.broadcast %cst_14 : f32 to vector<432x128xf32>
    %21 = arith.divf %20, %19 : vector<432x128xf32>
    %cst_15 = arith.constant 1.06140542 : f32
    %22 = vector.broadcast %cst_15 : f32 to vector<432x128xf32>
    %23 = arith.mulf %22, %21 : vector<432x128xf32>
    %cst_16 = arith.constant -1.45315206 : f32
    %24 = vector.broadcast %cst_16 : f32 to vector<432x128xf32>
    %25 = arith.addf %23, %24 : vector<432x128xf32>
    %26 = arith.mulf %25, %21 : vector<432x128xf32>
    %cst_17 = arith.constant 1.42141378 : f32
    %27 = vector.broadcast %cst_17 : f32 to vector<432x128xf32>
    %28 = arith.addf %26, %27 : vector<432x128xf32>
    %29 = arith.mulf %28, %21 : vector<432x128xf32>
    %cst_18 = arith.constant -0.284496725 : f32
    %30 = vector.broadcast %cst_18 : f32 to vector<432x128xf32>
    %31 = arith.addf %29, %30 : vector<432x128xf32>
    %32 = arith.mulf %31, %21 : vector<432x128xf32>
    %cst_19 = arith.constant 0.254829586 : f32
    %33 = vector.broadcast %cst_19 : f32 to vector<432x128xf32>
    %34 = arith.addf %32, %33 : vector<432x128xf32>
    %35 = arith.mulf %34, %21 : vector<432x128xf32>
    %cst_20 = arith.constant 0.000000e+00 : f32
    %36 = vector.broadcast %cst_20 : f32 to vector<432x128xf32>
    %37 = arith.subf %36, %15 : vector<432x128xf32>
    %38 = arith.mulf %37, %15 : vector<432x128xf32>
    %39 = math.exp %38 : vector<432x128xf32>
    %40 = arith.mulf %35, %39 : vector<432x128xf32>
    %cst_21 = arith.constant 1.000000e+00 : f32
    %41 = vector.broadcast %cst_21 : f32 to vector<432x128xf32>
    %42 = arith.subf %41, %40 : vector<432x128xf32>
    %cst_22 = arith.constant 0.000000e+00 : f32
    %43 = vector.broadcast %cst_22 : f32 to vector<432x128xf32>
    %44 = arith.cmpf oge, %14, %43 : vector<432x128xf32>
    %cst_23 = arith.constant 0.000000e+00 : f32
    %45 = vector.broadcast %cst_23 : f32 to vector<432x128xf32>
    %46 = arith.subf %45, %42 : vector<432x128xf32>
    %47 = arith.select %44, %42, %46 : vector<432x128xi1>, vector<432x128xf32>
    %cst_24 = arith.constant 1.000000e+00 : f32
    %48 = vector.broadcast %cst_24 : f32 to vector<432x128xf32>
    %49 = arith.addf %48, %47 : vector<432x128xf32>
    %50 = arith.mulf %12, %49 : vector<432x128xf32>
    %51 = vector.shape_cast %50 : vector<432x128xf32> to vector<18x24x128xf32>
    %c0_25 = arith.constant 0 : index
    %c0_26 = arith.constant 0 : index
    %c0_27 = arith.constant 0 : index
    %c0_28 = arith.constant 0 : index
    %52 = vector.load %arg3[%c0_25, %c0_26, %c0_27, %c0_28] : memref<1x18x24x1xf32, #tpu.memory_space<vmem>>, vector<1x18x24x1xf32>
    %53 = vector.shape_cast %52 : vector<1x18x24x1xf32> to vector<18x24x1xf32>
    %54 = vector.broadcast %53 : vector<18x24x1xf32> to vector<18x24x128xf32>
    %55 = arith.mulf %51, %54 : vector<18x24x128xf32>
    %56 = arith.truncf %55 : vector<18x24x128xf32> to vector<18x24x128xbf16>
    %57 = vector.extract_strided_slice %56 {offsets = [0, 0, 0], sizes = [18, 16, 128], strides = [1, 1, 1]} : vector<18x24x128xbf16> to vector<18x16x128xbf16>
    %58 = vector.extract_strided_slice %56 {offsets = [0, 1, 0], sizes = [18, 16, 128], strides = [1, 1, 1]} : vector<18x24x128xbf16> to vector<18x16x128xbf16>
    %59 = vector.extract_strided_slice %56 {offsets = [0, 2, 0], sizes = [18, 16, 128], strides = [1, 1, 1]} : vector<18x24x128xbf16> to vector<18x16x128xbf16>
    %60 = vector.extract_strided_slice %57 {offsets = [0, 0, 0], sizes = [16, 16, 128], strides = [1, 1, 1]} : vector<18x16x128xbf16> to vector<16x16x128xbf16>
    %61 = vector.extract_strided_slice %58 {offsets = [0, 0, 0], sizes = [16, 16, 128], strides = [1, 1, 1]} : vector<18x16x128xbf16> to vector<16x16x128xbf16>
    %62 = vector.extract_strided_slice %59 {offsets = [0, 0, 0], sizes = [16, 16, 128], strides = [1, 1, 1]} : vector<18x16x128xbf16> to vector<16x16x128xbf16>
    %63 = vector.extract_strided_slice %57 {offsets = [1, 0, 0], sizes = [16, 16, 128], strides = [1, 1, 1]} : vector<18x16x128xbf16> to vector<16x16x128xbf16>
    %64 = vector.extract_strided_slice %58 {offsets = [1, 0, 0], sizes = [16, 16, 128], strides = [1, 1, 1]} : vector<18x16x128xbf16> to vector<16x16x128xbf16>
    %65 = vector.extract_strided_slice %59 {offsets = [1, 0, 0], sizes = [16, 16, 128], strides = [1, 1, 1]} : vector<18x16x128xbf16> to vector<16x16x128xbf16>
    %66 = vector.extract_strided_slice %57 {offsets = [2, 0, 0], sizes = [16, 16, 128], strides = [1, 1, 1]} : vector<18x16x128xbf16> to vector<16x16x128xbf16>
    %67 = vector.extract_strided_slice %58 {offsets = [2, 0, 0], sizes = [16, 16, 128], strides = [1, 1, 1]} : vector<18x16x128xbf16> to vector<16x16x128xbf16>
    %68 = vector.extract_strided_slice %59 {offsets = [2, 0, 0], sizes = [16, 16, 128], strides = [1, 1, 1]} : vector<18x16x128xbf16> to vector<16x16x128xbf16>
    %69 = tpu.concatenate %60, %61, %62, %63, %64, %65, %66, %67, %68 in 2 : vector<16x16x128xbf16>, vector<16x16x128xbf16>, vector<16x16x128xbf16>, vector<16x16x128xbf16>, vector<16x16x128xbf16>, vector<16x16x128xbf16>, vector<16x16x128xbf16>, vector<16x16x128xbf16>, vector<16x16x128xbf16> -> vector<16x16x1152xbf16>
    %70 = vector.shape_cast %69 : vector<16x16x1152xbf16> to vector<256x1152xbf16>
    %c0_29 = arith.constant 0 : index
    %c0_30 = arith.constant 0 : index
    %71 = vector.load %arg7[%c0_29, %c0_30] : memref<1152x128xbf16, #tpu.memory_space<vmem>>, vector<1152x128xbf16>
    %cst_31 = arith.constant dense<0.000000e+00> : vector<256x128xf32>
    %72 = tpu.matmul %70, %71, %cst_31 {dimension_numbers = #tpu.dot_dimension_numbers<[1], [0], [0], [1], [0, 0, 1, 1], [], []>} : vector<256x1152xbf16>, vector<1152x128xbf16>, vector<256x128xf32> -> vector<256x128xf32>
    %c0_32 = arith.constant 0 : index
    %c0_33 = arith.constant 0 : index
    %73 = vector.load %arg8[%c0_32, %c0_33] : memref<1x128xf32, #tpu.memory_space<vmem>>, vector<1x128xf32>
    %74 = vector.broadcast %73 : vector<1x128xf32> to vector<256x128xf32>
    %75 = arith.mulf %72, %74 : vector<256x128xf32>
    %c0_34 = arith.constant 0 : index
    %c0_35 = arith.constant 0 : index
    %76 = vector.load %arg9[%c0_34, %c0_35] : memref<1x128xf32, #tpu.memory_space<vmem>>, vector<1x128xf32>
    %77 = vector.broadcast %76 : vector<1x128xf32> to vector<256x128xf32>
    %78 = arith.addf %75, %77 : vector<256x128xf32>
    %cst_36 = arith.constant 5.000000e-01 : f32
    %79 = vector.broadcast %cst_36 : f32 to vector<256x128xf32>
    %80 = arith.mulf %79, %78 : vector<256x128xf32>
    %cst_37 = arith.constant 0.707106769 : f32
    %81 = vector.broadcast %cst_37 : f32 to vector<256x128xf32>
    %82 = arith.mulf %78, %81 : vector<256x128xf32>
    %83 = math.absf %82 : vector<256x128xf32>
    %cst_38 = arith.constant 0.327591091 : f32
    %84 = vector.broadcast %cst_38 : f32 to vector<256x128xf32>
    %85 = arith.mulf %84, %83 : vector<256x128xf32>
    %cst_39 = arith.constant 1.000000e+00 : f32
    %86 = vector.broadcast %cst_39 : f32 to vector<256x128xf32>
    %87 = arith.addf %86, %85 : vector<256x128xf32>
    %cst_40 = arith.constant 1.000000e+00 : f32
    %88 = vector.broadcast %cst_40 : f32 to vector<256x128xf32>
    %89 = arith.divf %88, %87 : vector<256x128xf32>
    %cst_41 = arith.constant 1.06140542 : f32
    %90 = vector.broadcast %cst_41 : f32 to vector<256x128xf32>
    %91 = arith.mulf %90, %89 : vector<256x128xf32>
    %cst_42 = arith.constant -1.45315206 : f32
    %92 = vector.broadcast %cst_42 : f32 to vector<256x128xf32>
    %93 = arith.addf %91, %92 : vector<256x128xf32>
    %94 = arith.mulf %93, %89 : vector<256x128xf32>
    %cst_43 = arith.constant 1.42141378 : f32
    %95 = vector.broadcast %cst_43 : f32 to vector<256x128xf32>
    %96 = arith.addf %94, %95 : vector<256x128xf32>
    %97 = arith.mulf %96, %89 : vector<256x128xf32>
    %cst_44 = arith.constant -0.284496725 : f32
    %98 = vector.broadcast %cst_44 : f32 to vector<256x128xf32>
    %99 = arith.addf %97, %98 : vector<256x128xf32>
    %100 = arith.mulf %99, %89 : vector<256x128xf32>
    %cst_45 = arith.constant 0.254829586 : f32
    %101 = vector.broadcast %cst_45 : f32 to vector<256x128xf32>
    %102 = arith.addf %100, %101 : vector<256x128xf32>
    %103 = arith.mulf %102, %89 : vector<256x128xf32>
    %cst_46 = arith.constant 0.000000e+00 : f32
    %104 = vector.broadcast %cst_46 : f32 to vector<256x128xf32>
    %105 = arith.subf %104, %83 : vector<256x128xf32>
    %106 = arith.mulf %105, %83 : vector<256x128xf32>
    %107 = math.exp %106 : vector<256x128xf32>
    %108 = arith.mulf %103, %107 : vector<256x128xf32>
    %cst_47 = arith.constant 1.000000e+00 : f32
    %109 = vector.broadcast %cst_47 : f32 to vector<256x128xf32>
    %110 = arith.subf %109, %108 : vector<256x128xf32>
    %cst_48 = arith.constant 0.000000e+00 : f32
    %111 = vector.broadcast %cst_48 : f32 to vector<256x128xf32>
    %112 = arith.cmpf oge, %82, %111 : vector<256x128xf32>
    %cst_49 = arith.constant 0.000000e+00 : f32
    %113 = vector.broadcast %cst_49 : f32 to vector<256x128xf32>
    %114 = arith.subf %113, %110 : vector<256x128xf32>
    %115 = arith.select %112, %110, %114 : vector<256x128xi1>, vector<256x128xf32>
    %cst_50 = arith.constant 1.000000e+00 : f32
    %116 = vector.broadcast %cst_50 : f32 to vector<256x128xf32>
    %117 = arith.addf %116, %115 : vector<256x128xf32>
    %118 = arith.mulf %80, %117 : vector<256x128xf32>
    %119 = vector.extract_strided_slice %55 {offsets = [1, 1, 0], sizes = [16, 16, 128], strides = [1, 1, 1]} : vector<18x24x128xf32> to vector<16x16x128xf32>
    %120 = vector.shape_cast %119 : vector<16x16x128xf32> to vector<256x128xf32>
    %121 = arith.addf %120, %118 : vector<256x128xf32>
    %cst_51 = arith.constant 0.707106769 : f32
    %122 = vector.broadcast %cst_51 : f32 to vector<256x128xf32>
    %123 = arith.mulf %121, %122 : vector<256x128xf32>
    %124 = vector.shape_cast %123 : vector<256x128xf32> to vector<8x2x8x2x128xf32>
    %125 = vector.extract_strided_slice %124 {offsets = [0, 0, 0, 0, 0], sizes = [8, 1, 8, 1, 128], strides = [1, 1, 1, 1, 1]} : vector<8x2x8x2x128xf32> to vector<8x1x8x1x128xf32>
    %126 = vector.shape_cast %125 : vector<8x1x8x1x128xf32> to vector<8x8x128xf32>
    %127 = vector.extract_strided_slice %124 {offsets = [0, 0, 0, 1, 0], sizes = [8, 1, 8, 1, 128], strides = [1, 1, 1, 1, 1]} : vector<8x2x8x2x128xf32> to vector<8x1x8x1x128xf32>
    %128 = vector.shape_cast %127 : vector<8x1x8x1x128xf32> to vector<8x8x128xf32>
    %129 = arith.maximumf %126, %128 : vector<8x8x128xf32>
    %130 = vector.extract_strided_slice %124 {offsets = [0, 1, 0, 0, 0], sizes = [8, 1, 8, 1, 128], strides = [1, 1, 1, 1, 1]} : vector<8x2x8x2x128xf32> to vector<8x1x8x1x128xf32>
    %131 = vector.shape_cast %130 : vector<8x1x8x1x128xf32> to vector<8x8x128xf32>
    %132 = vector.extract_strided_slice %124 {offsets = [0, 1, 0, 1, 0], sizes = [8, 1, 8, 1, 128], strides = [1, 1, 1, 1, 1]} : vector<8x2x8x2x128xf32> to vector<8x1x8x1x128xf32>
    %133 = vector.shape_cast %132 : vector<8x1x8x1x128xf32> to vector<8x8x128xf32>
    %134 = arith.maximumf %131, %133 : vector<8x8x128xf32>
    %135 = arith.maximumf %129, %134 : vector<8x8x128xf32>
    %136 = vector.shape_cast %135 : vector<8x8x128xf32> to vector<64x128xf32>
    %c0_52 = arith.constant 0 : index
    %c0_53 = arith.constant 0 : index
    %c0_54 = arith.constant 0 : index
    %137 = vector.load %arg10[%c0_52, %c0_53, %c0_54] : memref<1x64x128xf32, #tpu.memory_space<vmem>>, vector<1x64x128xf32>
    %138 = vector.shape_cast %137 : vector<1x64x128xf32> to vector<64x128xf32>
    %139 = vector.shape_cast %136 : vector<64x128xf32> to vector<1x64x128xf32>
    tpu.vector_store %arg10[%c0_52, %c0_53, %c0_54], %139 {strides = array<i32>} : memref<1x64x128xf32, #tpu.memory_space<vmem>>, vector<1x64x128xf32>,
    return
  }
  func.func @transform_0(%arg0: i32, %arg1: i32) -> (i32, i32, i32, i32, i32) {
    %c0_i32 = arith.constant 0 : i32
    %c0_i32_0 = arith.constant 0 : i32
    %c0_i32_1 = arith.constant 0 : i32
    %c0_i32_2 = arith.constant 0 : i32
    return %arg0, %arg1, %c0_i32, %c0_i32_0, %c0_i32_1 : i32, i32, i32, i32, i32
  }
  func.func @transform_1(%arg0: i32, %arg1: i32) -> (i32, i32, i32, i32) {
    %c0_i32 = arith.constant 0 : i32
    %c0_i32_0 = arith.constant 0 : i32
    %c0_i32_1 = arith.constant 0 : i32
    %c0_i32_2 = arith.constant 0 : i32
    return %arg1, %c0_i32, %c0_i32_0, %c0_i32_1 : i32, i32, i32, i32
  }
  func.func @transform_2(%arg0: i32, %arg1: i32) -> (i32, i32) {
    %c0_i32 = arith.constant 0 : i32
    %c0_i32_0 = arith.constant 0 : i32
    %c0_i32_1 = arith.constant 0 : i32
    return %c0_i32, %c0_i32_0 : i32, i32
  }
  func.func @transform_3(%arg0: i32, %arg1: i32) -> (i32, i32) {
    %c0_i32 = arith.constant 0 : i32
    %c0_i32_0 = arith.constant 0 : i32
    %c0_i32_1 = arith.constant 0 : i32
    return %c0_i32, %c0_i32_0 : i32, i32
  }
  func.func @transform_4(%arg0: i32, %arg1: i32) -> (i32, i32) {
    %c0_i32 = arith.constant 0 : i32
    %c0_i32_0 = arith.constant 0 : i32
    %c0_i32_1 = arith.constant 0 : i32
    return %c0_i32, %c0_i32_0 : i32, i32
  }
  func.func @transform_5(%arg0: i32, %arg1: i32) -> (i32, i32) {
    %c0_i32 = arith.constant 0 : i32
    %c0_i32_0 = arith.constant 0 : i32
    %c0_i32_1 = arith.constant 0 : i32
    return %c0_i32, %c0_i32_0 : i32, i32
  }
  func.func @transform_6(%arg0: i32, %arg1: i32) -> (i32, i32) {
    %c0_i32 = arith.constant 0 : i32
    %c0_i32_0 = arith.constant 0 : i32
    %c0_i32_1 = arith.constant 0 : i32
    return %c0_i32, %c0_i32_0 : i32, i32
  }
  func.func @transform_7(%arg0: i32, %arg1: i32) -> (i32, i32) {
    %c0_i32 = arith.constant 0 : i32
    %c0_i32_0 = arith.constant 0 : i32
    %c0_i32_1 = arith.constant 0 : i32
    return %c0_i32, %c0_i32_0 : i32, i32
  }
  func.func @transform_8(%arg0: i32, %arg1: i32) -> (i32, i32, i32) {
    %c0_i32 = arith.constant 0 : i32
    %c0_i32_0 = arith.constant 0 : i32
    return %arg0, %arg1, %c0_i32 : i32, i32, i32
  }
}

</mosaic_0001>

<bundles_post_ra>
// kernel: _lambda_.1
= control target key start
LH: loop header
LB: loop body
LE: loop exit
PB: predicated region body
PF: predicated region fallthrough
CT: control target
= control target key end

     0   :  { %s9077_s27 = smov 0   ;;  %s9079_s28 = smov 0   ;;  %s13569_s0 = inlined_call_operand.vmem [shape: bf16[2,1,18,24,36], index: 0, kind: input, shape index: {}]   ;;  %s13570_s1 = inlined_call_operand.vmem [shape: f32[1,18,24,1], index: 1, kind: input, shape index: {}]   ;;  %s13571_s2 = inlined_call_operand.vmem [shape: bf16[36,128], index: 2, kind: input, shape index: {}]   ;;  %s13572_s3 = inlined_call_operand.vmem [shape: f32[1,128], index: 3, kind: input, shape index: {}]   ;;  %s13573_s4 = inlined_call_operand.vmem [shape: f32[1,128], index: 4, kind: input, shape index: {}]   ;;  %s13574_s5 = inlined_call_operand.vmem [shape: bf16[1152,128], index: 5, kind: input, shape index: {}]   ;;  %s13575_s6 = inlined_call_operand.vmem [shape: f32[1,128], index: 6, kind: input, shape index: {}]   ;;  %s13576_s7 = inlined_call_operand.vmem [shape: f32[1,128], index: 7, kind: input, shape index: {}]   ;;  %s13577_s8 = inlined_call_operand.vmem [shape: f32[2,64,128], index: 8, kind: output, shape index: {}]  }
   0x1   :  { %s9081_s29 = smov 0  }
   0x2 LB: > { %s30_s30 = sadd.s32 1, %s9022_s28  ;;  %p7583_p0 = scmp.ge.s32.totalorder %s9026_s29, 1  ;;  %s9026_s29 = sphi %s9081_s29, %s18_s29   ;;  %s9022_s28 = sphi %s9079_s28, %s14033_s28   ;;  %s9018_s27 = sphi %s9077_s27, %s14032_s27  }
   0x3   : > { %p32_p1 = scmp.ge.s32.totalorder %s30_s30, 2  ;;  %p292_p2 = scmp.lt.s32.totalorder %s9026_s29, 3 }
   0x5   : > { %s14035_s30 = smov (%p32_p1, %s30_s30), 0  ;;  %p293_p3 = pnand %p7583_p0, %p292_p2 }
   0x7   : > { %296 = sbr.rel (%p293_p3) target bundleno = 1524 (0x5f4), region = 52 }
   0xe   : > { %v8546_v0 = vld [vmem:[%s13571_s2] sm:$0xff]   ;;  %v9028_v1 = vmov 0.0   ;;  %v8547_v2 = vld [vmem:[%s13571_s2 + $0x8] sm:$0xff]   ;;  %v8548_v3 = vld [vmem:[%s13571_s2 + $0x10] ss:$0 sps:$4 sm:$0x33]  }
   0xf   : > { %8353 = vmatprep.subr.bf16.mxu0 %v9028_v1  ;;  %vm9029_vm0 = vmmov 0   ;;  %p339_p4 = scmp.lt.s32.totalorder %s9018_s27, 1  ;;  %v2488_v4 = vld [vmem:[%s13570_s1] sm:$0xff]  ;;  %v2490_v5 = vld [vmem:[%s13570_s1 + $0x10] sm:$0xff]  ;;  %vm655_vm1 = vcmask 1041408   ;;  %v9030_v6 = vmov 0  }
  0x10   : > { %8354 = vmatpush3.bf16.msra.mxu0 %v8546_v0  ;;  %8359 = vmatprep.mubr.msk.bf16.mxu0 %vm9029_vm0, %v9028_v1  ;;  %v2489_v7 = vld [vmem:[%s13570_s1 + $0x8] sm:$0xff]  ;;  %v2491_v8 = vld [vmem:[%s13570_s1 + $0x18] sm:$0xff]  ;;  %v657_v9 = vsel %vm655_vm1, %v8548_v3, 0  ;;  %v2492_v10 = vld [vmem:[%s13570_s1 + $0x20] sm:$0xff]  ;;  %vm573_vm2 = vcmask 293888   ;;  %vm3143_vm8 = vcmask 1046528  }
  0x11   : > { %8355 = vmatprep.subr.bf16.mxu0 %v9028_v1  ;;  %8544 = vset.pattern.permute.xlu0 %v9030_v6  ;;  %s14037_s27 = smov (!%p339_p4, %s9018_s27), 1  ;;  %v2493_v12 = vld [vmem:[%s13570_s1 + $0x28] sm:$0xff]  ;;  %v2494_v13 = vld [vmem:[%s13570_s1 + $0x30] sm:$0xff]  ;;  %v2495_v14 = vld [vmem:[%s13570_s1 + $0x38] sm:$0xff] }
  0x12   : > { %8545 = vset.pattern.permute.xlu1 %v9030_v6  ;;  %2544 = vperm.xlu0 %8544, %v2488_v4   ;;  %s8515_s23 = smul.u32 216, %s14037_s27  ;;  %v2496_v16 = vld [vmem:[%s13570_s1 + $0x40] sm:$0xff]  ;;  %v2497_v17 = vld [vmem:[%s13570_s1 + $0x48] sm:$0xff]  ;;  %v2498_v18 = vld [vmem:[%s13570_s1 + $0x50] sm:$0xff] }
  0x13   : > { %2554 = vperm.xlu1 %8545, %v2490_v5   ;;  %v2499_v19 = vld [vmem:[%s13570_s1 + $0x58] sm:$0xff]  ;;  %v2500_v21 = vld [vmem:[%s13570_s1 + $0x60] sm:$0xff]  ;;  %v2501_v22 = vld [vmem:[%s13570_s1 + $0x68] sm:$0xff] }
  0x14   : > { %8356 = vmatpush3.bf16.msra.mxu0 %v8547_v2  ;;  %s9130_s10 = scalar_lea.vmem %s13569_s0, %s8515_s23  ;;  %v2502_v23 = vld [vmem:[%s13570_s1 + $0x70] sm:$0xff]  ;;  %v2503_v24 = vld [vmem:[%s13570_s1 + $0x78] sm:$0xff]  ;;  %v2504_v26 = vld [vmem:[%s13570_s1 + $0x80] sm:$0xff] }
  0x15   : > { %8357 = vmatprep.subr.bf16.mxu0 %v9028_v1  ;;  %v8549_v11 = vld [vmem:[%s9130_s10] sm:$0xff]   ;;  %v8550_v15 = vld [vmem:[%s9130_s10 + $0x8] sm:$0xff]   ;;  %v8551_v20 = vld [vmem:[%s9130_s10 + $0x10] sm:$0xff]  }
  0x16   : > { %2549 = vperm.xlu0 %8544, %v2489_v7   ;;  %v8552_v25 = vld [vmem:[%s9130_s10 + $0x18] sm:$0xff]   ;;  %v2505_v27 = vld [vmem:[%s13570_s1 + $0x88] sm:$0xff]  ;;  %v2506_v28 = vld [vmem:[%s13570_s1 + $0x90] sm:$0xff] }
  0x17   : > { %2559 = vperm.xlu1 %8545, %v2491_v8   ;;  %v2507_v29 = vld [vmem:[%s13570_s1 + $0x98] sm:$0xff]  ;;  %v8553_v30 = vld [vmem:[%s9130_s10 + $0x20] sm:$0xff]   ;;  %v2509_v32 = vld [vmem:[%s13570_s1 + $0xa8] sm:$0xff] }
  0x18   : > { %8358 = vmatpush3.bf16.msra.mxu0 %v657_v9  ;;  %v2508_v31 = vld [vmem:[%s13570_s1 + $0xa0] sm:$0xff]  ;;  %v2510_v33 = vld [vmem:[%s13570_s1 + $0xb0] sm:$0xff]  ;;  %v2511_v34 = vld [vmem:[%s13570_s1 + $0xb8] sm:$0xff] }
  0x19   : > { %v8554_v35 = vld [vmem:[%s9130_s10 + $0x28] sm:$0xff]   ;;  %v2512_v36 = vld [vmem:[%s13570_s1 + $0xc0] sm:$0xff]  ;;  %v2514_v38 = vld [vmem:[%s13570_s1 + $0xd0] sm:$0xff] }
  0x1a   : > { %2564 = vperm.xlu0 %8544, %v2492_v10   ;;  %v2513_v37 = vld [vmem:[%s13570_s1 + $0xc8] sm:$0xff]  ;;  %v2515_v39 = vld [vmem:[%s13570_s1 + $0xd8] sm:$0xff]  ;;  %v8555_v40 = vld [vmem:[%s9130_s10 + $0x30] sm:$0xff]  }
  0x1b   : > { %8360 = vmatmul.mubr.msk.bf16.vlgmr.msra.gmra.mrb[0].mxu0 %vm573_vm2, %v8549_v11  ;;  %2569 = vperm.xlu1 %8545, %v2493_v12   ;;  %v2516_v41 = vld [vmem:[%s13570_s1 + $0xe0] sm:$0xff]  ;;  %v2517_v42 = vld [vmem:[%s13570_s1 + $0xe8] sm:$0xff]  ;;  %v2518_v43 = vld [vmem:[%s13570_s1 + $0xf0] sm:$0xff] }
  0x1c   : > { %8363 = vmatprep.mubr.msk.bf16.mxu0 %vm9029_vm0, %v9028_v1  ;;  %v2519_v44 = vld [vmem:[%s13570_s1 + $0xf8] sm:$0xff]  ;;  %v2520_v46 = vld [vmem:[%s13570_s1 + $0x100] sm:$0xff]  ;;  %v2521_v47 = vld [vmem:[%s13570_s1 + $0x108] sm:$0xff] }
  0x1d   : > { %v8556_v45 = vld [vmem:[%s9130_s10 + $0x38] sm:$0xff]   ;;  %v2522_v48 = vld [vmem:[%s13570_s1 + $0x110] sm:$0xff]  ;;  %v8557_v50 = vld [vmem:[%s9130_s10 + $0x40] sm:$0xff]  }
  0x1e   : > { %2574 = vperm.xlu0 %8544, %v2494_v13   ;;  %v2523_v49 = vld [vmem:[%s13570_s1 + $0x118] sm:$0xff]  ;;  %v2524_v51 = vld [vmem:[%s13570_s1 + $0x120] sm:$0xff]  ;;  %v2525_v52 = vld [vmem:[%s13570_s1 + $0x128] sm:$0xff] }
  0x1f   : > { %2579 = vperm.xlu1 %8545, %v2495_v14   ;;  %v2526_v53 = vld [vmem:[%s13570_s1 + $0x130] sm:$0xff]  ;;  %v2527_v54 = vld [vmem:[%s13570_s1 + $0x138] sm:$0xff]  ;;  %v8558_v55 = vld [vmem:[%s9130_s10 + $0x48] sm:$0xff]  }
  0x20   : > { %v2528_v56 = vld [vmem:[%s13570_s1 + $0x140] sm:$0xff]  ;;  %v2529_v57 = vld [vmem:[%s13570_s1 + $0x148] sm:$0xff]  ;;  %v2530_v58 = vld [vmem:[%s13570_s1 + $0x150] sm:$0xff] }
  0x21   : > { %v2531_v59 = vld [vmem:[%s13570_s1 + $0x158] sm:$0xff]  ;;  %v8559_v60 = vld [vmem:[%s9130_s10 + $0x50] sm:$0xff]   ;;  %v2532_v61 = vld [vmem:[%s13570_s1 + $0x160] sm:$0xff] }
  0x22   : > { %2584 = vperm.xlu0 %8544, %v2496_v16   ;;  %v2533_v62 = vld [vmem:[%s13570_s1 + $0x168] sm:$0xff]  ;;  %v2534_v63 = vld [vmem:[%s13570_s1 + $0x170] sm:$0xff]  ;;  %v2535_v0 = vld [vmem:[%s13570_s1 + $0x178] sm:$0xff] }
  0x23   : > { %8364 = vmatmul.mubr.msk.bf16.gmra.mrb[4].mxu0 %vm573_vm2, %v8550_v15  ;;  %2589 = vperm.xlu1 %8545, %v2497_v17   ;;  %v8560_v2 = vld [vmem:[%s9130_s10 + $0x58] sm:$0xff]   ;;  %v2536_v3 = vld [vmem:[%s13570_s1 + $0x180] sm:$0xff]  ;;  %v2537_v4 = vld [vmem:[%s13570_s1 + $0x188] sm:$0xff] }
  0x24   : > { %8367 = vmatprep.mubr.msk.bf16.mxu0 %vm9029_vm0, %v9028_v1  ;;  %v2538_v5 = vld [vmem:[%s13570_s1 + $0x190] sm:$0xff]  ;;  %v2539_v6 = vld [vmem:[%s13570_s1 + $0x198] sm:$0xff]  ;;  %v8561_v7 = vld [vmem:[%s9130_s10 + $0x60] sm:$0xff]  }
  0x25   : > { %v2540_v8 = vld [vmem:[%s13570_s1 + $0x1a0] sm:$0xff]  ;;  %v2541_v9 = vld [vmem:[%s13570_s1 + $0x1a8] sm:$0xff]  ;;  %v8563_v11 = vld [vmem:[%s9130_s10 + $0x70] sm:$0xff]  }
  0x26   : > { %2594 = vperm.xlu0 %8544, %v2498_v18   ;;  %v8562_v10 = vld [vmem:[%s9130_s10 + $0x68] sm:$0xff]   ;;  %v8564_v12 = vld [vmem:[%s9130_s10 + $0x78] sm:$0xff]   ;;  %v8565_v13 = vld [vmem:[%s9130_s10 + $0x80] sm:$0xff]  }
  0x27   : > { %2599 = vperm.xlu1 %8545, %v2499_v19   ;;  %v8566_v14 = vld [vmem:[%s9130_s10 + $0x88] sm:$0xff]   ;;  %v8567_v15 = vld [vmem:[%s9130_s10 + $0x90] sm:$0xff]   ;;  %v8568_v16 = vld [vmem:[%s9130_s10 + $0x98] sm:$0xff]  }
  0x28   : > { %v8576_v17 = vld [vmem:[%s13574_s5 + $0x40] sm:$0xff]  }
  0x29   : > { %v8577_v18 = vld [vmem:[%s13574_s5] sm:$0xff]   ;;  %7881 = vmatprep.subr.bf16.mxu1 %v8576_v17 }
  0x2a   : > { %2604 = vperm.xlu0 %8544, %v2500_v21   ;;  %7882 = vmatpush3.bf16.msra.mxu1 %v8577_v18  ;;  %v8569_v19 = vld [vmem:[%s9130_s10 + $0xa0] sm:$0xff]   ;;  %v8579_v21 = vld [vmem:[%s13574_s5 + $0x8] sm:$0xff]  }
  0x2b   : > { %8368 = vmatmul.mubr.msk.bf16.gmra.mrb[8].mxu0 %vm573_vm2, %v8551_v20  ;;  %2609 = vperm.xlu1 %8545, %v2501_v22   ;;  %v8578_v20 = vld [vmem:[%s13574_s5 + $0x48] sm:$0xff]  }
  0x2c   : > { %8371 = vmatprep.mubr.msk.bf16.mxu0 %vm9029_vm0, %v9028_v1  ;;  %7883 = vmatprep.subr.bf16.mxu1 %v8578_v20  ;;  %v8570_v22 = vld [vmem:[%s9130_s10 + $0xa8] sm:$0xff]  }
  0x2e   : > { %2614 = vperm.xlu0 %8544, %v2502_v23   ;;  %7884 = vmatpush3.bf16.msra.mxu1 %v8579_v21  ;;  %v8580_v23 = vld [vmem:[%s13574_s5 + $0x50] sm:$0xff]  }
  0x2f   : > { %2619 = vperm.xlu1 %8545, %v2503_v24   ;;  %v8581_v24 = vld [vmem:[%s13574_s5 + $0x10] sm:$0xff]   ;;  %7885 = vmatprep.subr.bf16.mxu1 %v8580_v23 }
  0x30   : > { %v8605_v21 = vld [vmem:[%s13574_s5 + $0x130] sm:$0xff]  }
  0x32   : > { %2624 = vperm.xlu0 %8544, %v2504_v26   ;;  %v8583_v26 = vld [vmem:[%s13574_s5 + $0x100] sm:$0xff]   ;;  %7886 = vmatpush3.bf16.msra.mxu1 %v8581_v24 }
  0x33   : > { %8372 = vmatmul.mubr.msk.bf16.gmra.mrb[12].mxu0 %vm573_vm2, %v8552_v25  ;;  %2629 = vperm.xlu1 %8545, %v2505_v27   ;;  %v8582_v25 = vld [vmem:[%s13574_s5 + $0x140] sm:$0xff]   ;;  %v8584_v27 = vld [vmem:[%s13574_s5 + $0x58] sm:$0xff]  }
  0x34   : > { %8375 = vmatprep.mubr.msk.bf16.mxu0 %vm9029_vm0, %v9028_v1  ;;  %8105 = vmatprep.subr.bf16.mxu0 %v8582_v25 }
  0x35   : > { %8106 = vmatpush3.bf16.msra.mxu0 %v8583_v26  ;;  %7887 = vmatprep.subr.bf16.mxu1 %v8584_v27  ;;  %v8606_v27 = vld [vmem:[%s13574_s5 + $0x178] sm:$0xff]  }
  0x36   : > { %2634 = vperm.xlu0 %8544, %v2506_v28   ;;  %v8585_v28 = vld [vmem:[%s13574_s5 + $0x18] sm:$0xff]  }
  0x37   : > { %2639 = vperm.xlu1 %8545, %v2507_v29   ;;  %v8586_v29 = vld [vmem:[%s13574_s5 + $0x148] sm:$0xff]   ;;  %7888 = vmatpush3.bf16.msra.mxu1 %v8585_v28 }
  0x38   : > { %8107 = vmatprep.subr.bf16.mxu0 %v8586_v29 }
  0x3a   : > { %2644 = vperm.xlu0 %8544, %v2508_v31   ;;  %v8571_v31 = vld [vmem:[%s9130_s10 + $0xb0] sm:$0xff]  }
  0x3b   : > { %8376 = vmatmul.mubr.msk.bf16.gmra.mrb[16].mxu0 %vm573_vm2, %v8553_v30  ;;  %2649 = vperm.xlu1 %8545, %v2509_v32   ;;  %v8587_v30 = vld [vmem:[%s13574_s5 + $0x108] sm:$0xff]   ;;  %v8588_v32 = vld [vmem:[%s13574_s5 + $0x60] sm:$0xff]  }
  0x3c   : > { %8379 = vmatprep.mubr.msk.bf16.mxu0 %vm9029_vm0, %v9028_v1  ;;  %8108 = vmatpush3.bf16.msra.mxu0 %v8587_v30 }
  0x3d   : > { %7889 = vmatprep.subr.bf16.mxu1 %v8588_v32  ;;  %v8607_v32 = vld [vmem:[%s13574_s5 + $0x138] sm:$0xff]  }
  0x3e   : > { %2654 = vperm.xlu0 %8544, %v2510_v33   ;;  %v8589_v33 = vld [vmem:[%s13574_s5 + $0x20] sm:$0xff]  }
  0x3f   : > { %2659 = vperm.xlu1 %8545, %v2511_v34   ;;  %v8590_v34 = vld [vmem:[%s13574_s5 + $0x150] sm:$0xff]   ;;  %7890 = vmatpush3.bf16.msra.mxu1 %v8589_v33 }
  0x40   : > { %8109 = vmatprep.subr.bf16.mxu0 %v8590_v34 }
  0x42   : > { %2664 = vperm.xlu0 %8544, %v2512_v36   ;;  %v8572_v36 = vld [vmem:[%s9130_s10 + $0xb8] sm:$0xff]  }
  0x43   : > { %8380 = vmatmul.mubr.msk.bf16.gmra.mrb[20].mxu0 %vm573_vm2, %v8554_v35  ;;  %2669 = vperm.xlu1 %8545, %v2513_v37   ;;  %v8591_v35 = vld [vmem:[%s13574_s5 + $0x110] sm:$0xff]   ;;  %v8592_v37 = vld [vmem:[%s13574_s5 + $0x68] sm:$0xff]  }
  0x44   : > { %8383 = vmatprep.mubr.msk.bf16.mxu0 %vm9029_vm0, %v9028_v1  ;;  %8110 = vmatpush3.bf16.msra.mxu0 %v8591_v35 }
  0x45   : > { %7891 = vmatprep.subr.bf16.mxu1 %v8592_v37 }
  0x46   : > { %2674 = vperm.xlu0 %8544, %v2514_v38   ;;  %v8593_v38 = vld [vmem:[%s13574_s5 + $0x28] sm:$0xff]  }
  0x47   : > { %2679 = vperm.xlu1 %8545, %v2515_v39   ;;  %v8594_v39 = vld [vmem:[%s13574_s5 + $0x158] sm:$0xff]   ;;  %7892 = vmatpush3.bf16.msra.mxu1 %v8593_v38 }
  0x48   : > { %8111 = vmatprep.subr.bf16.mxu0 %v8594_v39 }
  0x4a   : > { %2684 = vperm.xlu0 %8544, %v2516_v41   ;;  %v8596_v41 = vld [vmem:[%s13574_s5 + $0x70] sm:$0xff]  }
  0x4b   : > { %8384 = vmatmul.mubr.msk.bf16.gmra.mrb[24].mxu0 %vm573_vm2, %v8555_v40  ;;  %2689 = vperm.xlu1 %8545, %v2517_v42   ;;  %v8595_v40 = vld [vmem:[%s13574_s5 + $0x118] sm:$0xff]   ;;  %v8573_v42 = vld [vmem:[%s9130_s10 + $0xc0] sm:$0xff]  }
  0x4c   : > { %8387 = vmatprep.mubr.msk.bf16.mxu0 %vm9029_vm0, %v9028_v1  ;;  %8112 = vmatpush3.bf16.msra.mxu0 %v8595_v40 }
  0x4d   : > { %7893 = vmatprep.subr.bf16.mxu1 %v8596_v41 }
  0x4e   : > { %2694 = vperm.xlu0 %8544, %v2518_v43   ;;  %v8597_v43 = vld [vmem:[%s13574_s5 + $0x30] sm:$0xff]  }
  0x4f   : > { %2699 = vperm.xlu1 %8545, %v2519_v44   ;;  %7894 = vmatpush3.bf16.msra.mxu1 %v8597_v43  ;;  %v8598_v44 = vld [vmem:[%s13574_s5 + $0x160] sm:$0xff]  }
  0x50   : > { %8113 = vmatprep.subr.bf16.mxu0 %v8598_v44 }
  0x52   : > { %2704 = vperm.xlu0 %8544, %v2520_v46   ;;  %v8574_v46 = vld [vmem:[%s9130_s10 + $0xc8] sm:$0xff]  }
  0x53   : > { %8388 = vmatmul.mubr.msk.bf16.gmra.mrb[28].mxu0 %vm573_vm2, %v8556_v45  ;;  %2709 = vperm.xlu1 %8545, %v2521_v47   ;;  %v8599_v45 = vld [vmem:[%s13574_s5 + $0x120] sm:$0xff]   ;;  %v8575_v47 = vld [vmem:[%s9130_s10 + $0xd0] sm:$0xff]   ;;  %s7850_s10 = sshll.u32 %s14037_s27, 6 }
  0x54   : > { %8391 = vmatprep.mubr.msk.bf16.mxu0 %vm9029_vm0, %v9028_v1  ;;  %8114 = vmatpush3.bf16.msra.mxu0 %v8599_v45  ;;  %s12444_s13 = scalar_lea.vmem %s13577_s8, %s7850_s10 }
  0x56   : > { %2714 = vperm.xlu0 %8544, %v2522_v48   ;;  %v8600_v48 = vld [vmem:[%s13574_s5 + $0x78] sm:$0xff]  }
  0x57   : > { %2719 = vperm.xlu1 %8545, %v2523_v49   ;;  %v8601_v49 = vld [vmem:[%s13574_s5 + $0x38] sm:$0xff]   ;;  %7895 = vmatprep.subr.bf16.mxu1 %v8600_v48 }
  0x58   : > { %7896 = vmatpush3.bf16.msra.mxu1 %v8601_v49 }
  0x5a   : > { %2724 = vperm.xlu0 %8544, %v2524_v51   ;;  %v9472_v51 = vld [vmem:[%s13572_s3] ss:$0 sm:$0xff] }
  0x5b   : > { %8392 = vmatmul.mubr.msk.bf16.gmra.mrb[32].mxu0 %vm573_vm2, %v8557_v50  ;;  %2729 = vperm.xlu1 %8545, %v2525_v52   ;;  %v8602_v50 = vld [vmem:[%s13574_s5 + $0x168] sm:$0xff]  }
  0x5c   : > { %8395 = vmatprep.mubr.msk.bf16.mxu0 %vm9029_vm0, %v9028_v1  ;;  %8115 = vmatprep.subr.bf16.mxu0 %v8602_v50 }
  0x5e   : > { %2734 = vperm.xlu0 %8544, %v2526_v53   ;;  %v9477_v53 = vld [vmem:[%s13573_s4] ss:$0 sm:$0xff] }
  0x5f   : > { %2739 = vperm.xlu1 %8545, %v2527_v54  }
  0x62   : > { %2744 = vperm.xlu0 %8544, %v2528_v56  }
  0x63   : > { %8396 = vmatmul.mubr.msk.bf16.gmra.mrb[36].mxu0 %vm573_vm2, %v8558_v55  ;;  %2749 = vperm.xlu1 %8545, %v2529_v57  }
  0x64   : > { %8399 = vmatprep.mubr.msk.bf16.mxu0 %vm9029_vm0, %v9028_v1 }
  0x66   : > { %2754 = vperm.xlu0 %8544, %v2530_v58  }
  0x67   : > { %2759 = vperm.xlu1 %8545, %v2531_v59  }
  0x6a   : > { %2764 = vperm.xlu0 %8544, %v2532_v61  }
  0x6b   : > { %8400 = vmatmul.mubr.msk.bf16.gmra.mrb[40].mxu0 %vm573_vm2, %v8559_v60  ;;  %2769 = vperm.xlu1 %8545, %v2533_v62  }
  0x6c   : > { %8403 = vmatprep.mubr.msk.bf16.mxu0 %vm9029_vm0, %v9028_v1 }
  0x6e   : > { %2774 = vperm.xlu0 %8544, %v2534_v63  }
  0x6f   : > { %2779 = vperm.xlu1 %8545, %v2535_v0  }
  0x72   : > { %2784 = vperm.xlu0 %8544, %v2536_v3  }
  0x73   : > { %8404 = vmatmul.mubr.msk.bf16.gmra.mrb[44].mxu0 %vm573_vm2, %v8560_v2  ;;  %2789 = vperm.xlu1 %8545, %v2537_v4  }
  0x74   : > { %8407 = vmatprep.mubr.msk.bf16.mxu0 %vm9029_vm0, %v9028_v1 }
  0x76   : > { %2794 = vperm.xlu0 %8544, %v2538_v5  }
  0x77   : > { %2799 = vperm.xlu1 %8545, %v2539_v6  }
  0x7a   : > { %2804 = vperm.xlu0 %8544, %v2540_v8  }
  0x7b   : > { %8408 = vmatmul.mubr.msk.bf16.gmra.mrb[48].mxu0 %vm573_vm2, %v8561_v7  ;;  %2809 = vperm.xlu1 %8545, %v2541_v9  }
  0x7c   : > { %8411 = vmatprep.mubr.msk.bf16.mxu0 %vm9029_vm0, %v9028_v1 }
  0x83   : > { %8412 = vmatmul.mubr.msk.bf16.gmra.mrb[52].mxu0 %vm573_vm2, %v8562_v10 }
  0x84   : > { %8415 = vmatprep.mubr.msk.bf16.mxu0 %vm9029_vm0, %v9028_v1 }
  0x8b   : > { %8416 = vmatmul.mubr.msk.bf16.gmra.mrb[56].mxu0 %vm573_vm2, %v8563_v11 }
  0x8c   : > { %8419 = vmatprep.mubr.msk.bf16.mxu0 %vm9029_vm0, %v9028_v1 }
  0x93   : > { %8420 = vmatmul.mubr.msk.bf16.gmra.mrb[60].mxu0 %vm573_vm2, %v8564_v12 }
  0x94   : > { %8423 = vmatprep.mubr.msk.bf16.mxu0 %vm9029_vm0, %v9028_v1 }
  0x9b   : > { %8424 = vmatmul.mubr.msk.bf16.gmra.mrb[64].mxu0 %vm573_vm2, %v8565_v13 }
  0x9c   : > { %8427 = vmatprep.mubr.msk.bf16.mxu0 %vm9029_vm0, %v9028_v1 }
  0xa3   : > { %8428 = vmatmul.mubr.msk.bf16.gmra.mrb[68].mxu0 %vm573_vm2, %v8566_v14 }
  0xa4   : > { %8431 = vmatprep.mubr.msk.bf16.mxu0 %vm9029_vm0, %v9028_v1 }
  0xab   : > { %8432 = vmatmul.mubr.msk.bf16.gmra.mrb[72].mxu0 %vm573_vm2, %v8567_v15  ;;  %v8604_v15 = vld [vmem:[%s13574_s5 + $0x170] sm:$0xff]  }
  0xac   : > { %8435 = vmatprep.mubr.msk.bf16.mxu0 %vm9029_vm0, %v9028_v1 }
  0xb3   : > { %8436 = vmatmul.mubr.msk.bf16.gmra.mrb[76].mxu0 %vm573_vm2, %v8568_v16 }
  0xb4   : > { %8439 = vmatprep.mubr.msk.bf16.mxu0 %vm9029_vm0, %v9028_v1 }
  0xbb   : > { %8440 = vmatmul.mubr.msk.bf16.gmra.mrb[80].mxu0 %vm573_vm2, %v8569_v19 }
  0xbc   : > { %8443 = vmatprep.mubr.msk.bf16.mxu0 %vm9029_vm0, %v9028_v1 }
  0xc3   : > { %8444 = vmatmul.mubr.msk.bf16.gmra.mrb[84].mxu0 %vm573_vm2, %v8570_v22 }
  0xc4   : > { %8447 = vmatprep.mubr.msk.bf16.mxu0 %vm9029_vm0, %v9028_v1 }
  0xcb   : > { %8448 = vmatmul.mubr.msk.bf16.gmra.mrb[88].mxu0 %vm573_vm2, %v8571_v31 }
  0xcc   : > { %8451 = vmatprep.mubr.msk.bf16.mxu0 %vm9029_vm0, %v9028_v1 }
  0xd3   : > { %8452 = vmatmul.mubr.msk.bf16.gmra.mrb[92].mxu0 %vm573_vm2, %v8572_v36 }
  0xd4   : > { %8455 = vmatprep.mubr.msk.bf16.mxu0 %vm9029_vm0, %v9028_v1 }
  0xdb   : > { %8456 = vmatmul.mubr.msk.bf16.gmra.mrb[96].mxu0 %vm573_vm2, %v8573_v42 }
  0xdc   : > { %8459 = vmatprep.mubr.msk.bf16.mxu0 %vm9029_vm0, %v9028_v1 }
  0xe3   : > { %8460 = vmatmul.mubr.msk.bf16.gmra.mrb[100].mxu0 %vm573_vm2, %v8574_v46 }
  0xe4   : > { %8463 = vmatprep.mubr.msk.bf16.mxu0 %vm9029_vm0, %v9028_v1  ;;  %v8603_v1 = vld [vmem:[%s13574_s5 + $0x128] sm:$0xff]  }
  0xe5   : > { %8116 = vmatpush3.bf16.msra.mxu0 %v8603_v1 }
  0xe6   : > { %8117 = vmatprep.subr.bf16.mxu0 %v8604_v15 }
  0xe9   : > { %8118 = vmatpush3.bf16.msra.mxu0 %v8605_v21 }
  0xea   : > { %8119 = vmatprep.subr.bf16.mxu0 %v8606_v27 }
  0xeb   : > { %8464 = vmatmul.mubr.msk.bf16.gmra.mrb[104].mxu0 %vm573_vm2, %v8575_v47  ;;  %vm2902_vm2 = vsmask.f32 7424 }
  0xed   : > { %8120 = vmatpush3.bf16.msra.mxu0 %v8607_v32 }
  0xee   : > { %v693_v52 = vpop.f32.mrb[0].mxu0 }
  0xef   : > { %v915_v54 = vmul.f32 %v9472_v51, %v693_v52  ;;  %v8361_v55 = vpop.f32.mrb[1].mxu0 }
  0xf0   : > { %v696_v56 = vpop.f32.mrb[2].mxu0 }
  0xf1   : > { %v976_v57 = vadd.f32 %v9477_v53, %v915_v54  ;;  %v916_v58 = vmul.f32 %v9472_v51, %v696_v56  ;;  %v8362_v59 = vpop.f32.mrb[3].mxu0 }
  0xf3   : > { %v9482_v60 = vmul.f32 0.70710677, %v976_v57  ;;  %v9485_v61 = vadd.f32 %v9477_v53, %v916_v58  ;;  %v9546_v48 = vmul.f32 0.5, %v976_v57 }
  0xf5   : > { %v1138_v62 = vand.u32 2147483647, %v9482_v60  ;;  %v9489_v63 = vmul.f32 0.70710677, %v9485_v61  ;;  %vm2218_vm3 = vcmp.ge.f32.partialorder %v9482_v60, 0.0 }
  0xf6   : > { %v701_v0 = vpop.f32.mrb[4].mxu0 }
  0xf7   : > { %v1192_v2 = vmul.f32 0.3275911, %v1138_v62  ;;  %v1139_v3 = vand.u32 2147483647, %v9489_v63  ;;  %v917_v4 = vmul.f32 %v9472_v51, %v701_v0  ;;  %v8365_v5 = vpop.f32.mrb[5].mxu0  ;;  %v1894_v22 = vsub.f32 0.0, %v1138_v62 }
  0xf8   : > { %v704_v8 = vpop.f32.mrb[6].mxu0  ;;  %vm2219_vm4 = vcmp.ge.f32.partialorder %v9489_v63, 0.0 }
  0xf9   : > { %v1246_v6 = vadd.f32 1.0, %v1192_v2  ;;  %v1193_v7 = vmul.f32 0.3275911, %v1139_v3  ;;  %v9494_v9 = vadd.f32 %v9477_v53, %v917_v4  ;;  %v918_v10 = vmul.f32 %v9472_v51, %v704_v8  ;;  %v8366_v11 = vpop.f32.mrb[7].mxu0 }
  0xfa   : > { %v1895_v28 = vsub.f32 0.0, %v1139_v3  ;;  %v1948_v35 = vmul.f32 %v1894_v22, %v1138_v62 }
  0xfb   : > { %8648 = vrcp.f32 %v1246_v6  ;;  %v1247_v12 = vadd.f32 1.0, %v1193_v7  ;;  %v9498_v13 = vmul.f32 0.70710677, %v9494_v9  ;;  %v9501_v14 = vadd.f32 %v9477_v53, %v918_v10 }
  0xfc   : > { %v1949_v40 = vmul.f32 %v1895_v28, %v1139_v3  ;;  %v2002_v47 = vmul.f32 1.442695, %v1948_v35 }
  0xfd   : > { %8650 = vrcp.f32 %v1247_v12  ;;  %v9507_v16 = vand.u32 2147483647, %v9498_v13  ;;  %v9510_v17 = vmul.f32 0.70710677, %v9501_v14  ;;  %vm2220_vm9 = vcmp.ge.f32.partialorder %v9498_v13, 0.0 }
  0xfe   : > { %v709_v18 = vpop.f32.mrb[8].mxu0  ;;  %v2004_v58 = vmul.f32 1.442695, %v1949_v40 }
  0xff   : > { %v919_v19 = vmul.f32 %v9472_v51, %v709_v18  ;;  %v8369_v20 = vpop.f32.mrb[9].mxu0  ;;  %v1194_v23 = vmul.f32 0.3275911, %v9507_v16  ;;  %v9518_v24 = vand.u32 2147483647, %v9510_v17  ;;  %v1896_v57 = vsub.f32 0.0, %v9507_v16 }
 0x100   : > { %v712_v26 = vpop.f32.mrb[10].mxu0  ;;  %v9569_v18 = vmul.f32 0.5, %v9485_v61  ;;  %vm2221_vm5 = vcmp.ge.f32.partialorder %v9510_v17, 0.0 }
 0x101   : > { %v9521_v25 = vadd.f32 %v9477_v53, %v919_v19  ;;  %v1248_v29 = vadd.f32 1.0, %v1194_v23  ;;  %v1195_v30 = vmul.f32 0.3275911, %v9518_v24  ;;  %v8370_v31 = vpop.f32.mrb[11].mxu0  ;;  %v920_v34 = vmul.f32 %v9472_v51, %v712_v26 }
 0x102   : > { %v1897_v5 = vsub.f32 0.0, %v9518_v24  ;;  %v1950_v21 = vmul.f32 %v1896_v57, %v9507_v16 }
 0x103   : > { %v9531_v33 = vmul.f32 0.70710677, %v9521_v25  ;;  %8652 = vrcp.f32 %v1248_v29  ;;  %v1249_v36 = vadd.f32 1.0, %v1195_v30  ;;  %v9538_v39 = vadd.f32 %v9477_v53, %v920_v34 }
 0x104   : > { %v1951_v28 = vmul.f32 %v1897_v5, %v9518_v24  ;;  %v9578_v29 = vmul.f32 0.5, %v9501_v14 }
 0x105   : > { %v9534_v37 = vpop.eup %8648  ;;  %v1142_v38 = vand.u32 2147483647, %v9531_v33  ;;  %8654 = vrcp.f32 %v1249_v36  ;;  %v9542_v44 = vmul.f32 0.70710677, %v9538_v39  ;;  %vm2222_vm6 = vcmp.ge.f32.partialorder %v9531_v33, 0.0 }
 0x106   : > { %v1408_v41 = vmul.f32 1.0614054, %v9534_v37  ;;  %v717_v42 = vpop.f32.mrb[12].mxu0 }
 0x107   : > { %v1196_v43 = vmul.f32 0.3275911, %v1142_v38  ;;  %v8373_v45 = vpop.f32.mrb[13].mxu0  ;;  %v9544_v46 = vpop.eup %8650  ;;  %v921_v50 = vmul.f32 %v9472_v51, %v717_v42  ;;  %v1143_v55 = vand.u32 2147483647, %v9542_v44  ;;  %v1898_v8 = vsub.f32 0.0, %v1142_v38 }
 0x108   : > { %v1462_v49 = vadd.f32 -1.4531521, %v1408_v41  ;;  %v720_v1 = vpop.f32.mrb[14].mxu0  ;;  %v1409_v52 = vmul.f32 1.0614054, %v9544_v46  ;;  %vm2223_vm7 = vcmp.ge.f32.partialorder %v9542_v44, 0.0 }
 0x109   : > { %v1250_v54 = vadd.f32 1.0, %v1196_v43  ;;  %v8374_v56 = vpop.f32.mrb[15].mxu0  ;;  %v9553_v62 = vadd.f32 %v9477_v53, %v921_v50  ;;  %v922_v0 = vmul.f32 %v9472_v51, %v720_v1  ;;  %v1197_v3 = vmul.f32 0.3275911, %v1143_v55 }
 0x10a   : > { %v1516_v59 = vmul.f32 %v9534_v37, %v1462_v49  ;;  %v1463_v2 = vadd.f32 -1.4531521, %v1409_v52  ;;  %v1952_v34 = vmul.f32 %v1898_v8, %v1142_v38  ;;  %v1899_v40 = vsub.f32 0.0, %v1143_v55 }
 0x10b   : > { %8656 = vrcp.f32 %v1250_v54  ;;  %v9559_v6 = vmul.f32 0.70710677, %v9553_v62  ;;  %v1251_v10 = vadd.f32 1.0, %v1197_v3  ;;  %v9563_v11 = vadd.f32 %v9477_v53, %v922_v0 }
 0x10c   : > { %8658 = vpow2.f32 %v2002_v47  ;;  %v1570_v4 = vadd.f32 1.4214138, %v1516_v59  ;;  %v1517_v7 = vmul.f32 %v9544_v46, %v1463_v2  ;;  %v2006_v42 = vmul.f32 1.442695, %v1950_v21 }
 0x10d   : > { %v9565_v12 = vpop.eup %8652  ;;  %8660 = vpow2.f32 %v2004_v58  ;;  %v9572_v19 = vand.u32 2147483647, %v9559_v6  ;;  %v9585_v16 = vmul.f32 0.70710677, %v9563_v11  ;;  %v2008_v49 = vmul.f32 1.442695, %v1951_v28 }
 0x10e   : > { %v1624_v15 = vmul.f32 %v9534_v37, %v1570_v4  ;;  %v725_v20 = vpop.f32.mrb[16].mxu0  ;;  %v1571_v22 = vadd.f32 1.4214138, %v1517_v7  ;;  %v1410_v23 = vmul.f32 1.0614054, %v9565_v12  ;;  %8662 = vrcp.f32 %v1251_v10 }
 0x10f   : > { %v8377_v26 = vpop.f32.mrb[17].mxu0  ;;  %v1198_v61 = vmul.f32 0.3275911, %v9572_v19  ;;  %v9581_v30 = vpop.eup %8654  ;;  %v9593_v47 = vand.u32 2147483647, %v9585_v16  ;;  %v1953_v3 = vmul.f32 %v1899_v40, %v1143_v55  ;;  %v923_v10 = vmul.f32 %v9472_v51, %v725_v20 }
 0x110   : > { %v1678_v27 = vadd.f32 -0.28449672, %v1624_v15  ;;  %v1625_v31 = vmul.f32 %v9544_v46, %v1571_v22  ;;  %v1464_v32 = vadd.f32 -1.4531521, %v1410_v23  ;;  %v9587_v35 = vpop.f32.mrb[18].mxu0  ;;  %vm2224_vm10 = vcmp.ge.f32.partialorder %v9559_v6, 0.0 }
 0x111   : > { %v1411_v24 = vmul.f32 1.0614054, %v9581_v30  ;;  %v1252_v14 = vadd.f32 1.0, %v1198_v61  ;;  %v8378_v41 = vpop.f32.mrb[19].mxu0  ;;  %v2010_v56 = vmul.f32 1.442695, %v1952_v34 }
 0x112   : > { %v1732_v36 = vmul.f32 %v9534_v37, %v1678_v27  ;;  %v1679_v43 = vadd.f32 -0.28449672, %v1625_v31  ;;  %v1518_v45 = vmul.f32 %v9565_v12, %v1464_v32  ;;  %v1199_v58 = vmul.f32 0.3275911, %v9593_v47 }
 0x113   : > { %v1465_v50 = vadd.f32 -1.4531521, %v1411_v24  ;;  %8664 = vrcp.f32 %v1252_v14  ;;  %v1900_v61 = vsub.f32 0.0, %v9572_v19  ;;  %v2012_v40 = vmul.f32 1.442695, %v1953_v3 }
 0x114   : > { %v1786_v38 = vadd.f32 0.2548296, %v1732_v36  ;;  %v1733_v52 = vmul.f32 %v9544_v46, %v1679_v43  ;;  %v1572_v54 = vadd.f32 1.4214138, %v1518_v45  ;;  %v1253_v8 = vadd.f32 1.0, %v1199_v58 }
 0x115   : > { %v9595_v1 = vpop.eup %8656  ;;  %v1519_v2 = vmul.f32 %v9581_v30, %v1465_v50  ;;  %8666 = vpow2.f32 %v2008_v49  ;;  %v9618_v14 = vadd.f32 %v9477_v53, %v923_v10  ;;  %v1954_v50 = vmul.f32 %v1900_v61, %v9572_v19 }
 0x116   : > { %v8659_v59 = vpop.eup %8658  ;;  %v1840_v0 = vmul.f32 %v9534_v37, %v1786_v38  ;;  %v1412_v57 = vmul.f32 1.0614054, %v9595_v1  ;;  %v9603_v4 = vpop.f32.mrb[20].mxu0  ;;  %v1787_v5 = vadd.f32 0.2548296, %v1733_v52  ;;  %v1626_v7 = vmul.f32 %v9565_v12, %v1572_v54 }
 0x117   : > { %v8381_v15 = vpop.f32.mrb[21].mxu0  ;;  %v8661_v21 = vpop.eup %8660  ;;  %v1573_v23 = vadd.f32 1.4214138, %v1519_v2  ;;  %8668 = vrcp.f32 %v1253_v8  ;;  %v9633_v19 = vmul.f32 0.70710677, %v9618_v14  ;;  %vm2225_vm11 = vcmp.ge.f32.partialorder %v9585_v16, 0.0 }
 0x118   : > { %v2110_v22 = vmul.f32 %v8659_v59, %v1840_v0  ;;  %v1466_v37 = vadd.f32 -1.4531521, %v1412_v57  ;;  %v9608_v26 = vpop.f32.mrb[22].mxu0  ;;  %v9610_v27 = vpop.eup %8662  ;;  %v1841_v55 = vmul.f32 %v9544_v46, %v1787_v5  ;;  %v1680_v28 = vadd.f32 -0.28449672, %v1626_v7 }
 0x119   : > { %v8382_v31 = vpop.f32.mrb[23].mxu0  ;;  %v1627_v34 = vmul.f32 %v9581_v30, %v1573_v23  ;;  %v1413_v36 = vmul.f32 1.0614054, %v9610_v27  ;;  %8670 = vpow2.f32 %v2006_v42  ;;  %v1901_v59 = vsub.f32 0.0, %v9593_v47  ;;  %v2545_v0 = vpop.permute.xlu0 %2544 }
 0x11a   : > { %v2164_v20 = vsub.f32 1.0, %v2110_v22  ;;  %v1520_v32 = vmul.f32 %v9595_v1, %v1466_v37  ;;  %v2111_v24 = vmul.f32 %v8661_v21, %v1841_v55  ;;  %8672 = vpow2.f32 %v2010_v56 }
 0x11b   : > { %v1681_v43 = vadd.f32 -0.28449672, %v1627_v34  ;;  %v1734_v38 = vmul.f32 %v9565_v12, %v1680_v28  ;;  %v1467_v49 = vadd.f32 -1.4531521, %v1413_v36  ;;  %8674 = vpow2.f32 %v2012_v40 }
 0x11c   : > { %v2272_v41 = vsub.f32 0.0, %v2164_v20  ;;  %v1574_v46 = vadd.f32 1.4214138, %v1520_v32  ;;  %v2165_v45 = vsub.f32 1.0, %v2111_v24  ;;  %v2014_v34 = vmul.f32 1.442695, %v1954_v50 }
 0x11d   : > { %v9622_v52 = vpop.eup %8664  ;;  %v1735_v58 = vmul.f32 %v9581_v30, %v1681_v43  ;;  %v1521_v3 = vmul.f32 %v9610_v27, %v1467_v49  ;;  %v1788_v21 = vadd.f32 0.2548296, %v1734_v38  ;;  %v1955_v63 = vmul.f32 %v1901_v59, %v9593_v47 }
 0x11e   : > { %v2326_v42 = vsel %vm2218_vm3, %v2164_v20, %v2272_v41  ;;  %v1628_v54 = vmul.f32 %v9595_v1, %v1574_v46  ;;  %v9629_v56 = vpop.f32.mrb[24].mxu0  ;;  %v2273_v2 = vsub.f32 0.0, %v2165_v45  ;;  %v1414_v8 = vmul.f32 1.0614054, %v9622_v52 }
 0x11f   : > { %v2380_v57 = vadd.f32 1.0, %v2326_v42  ;;  %v8385_v5 = vpop.f32.mrb[25].mxu0  ;;  %v1789_v60 = vadd.f32 0.2548296, %v1735_v58  ;;  %v1575_v22 = vadd.f32 1.4214138, %v1521_v3  ;;  %v8667_v23 = vpop.eup %8666  ;;  %v1842_v38 = vmul.f32 %v9565_v12, %v1788_v21 }
 0x120   : > { %v1682_v7 = vadd.f32 -0.28449672, %v1628_v54  ;;  %v2327_v15 = vsel %vm2219_vm4, %v2165_v45, %v2273_v2  ;;  %v9640_v37 = vpop.f32.mrb[26].mxu0  ;;  %v1468_v31 = vadd.f32 -1.4531521, %v1414_v8  ;;  %v2550_v45 = vpop.permute.xlu0 %2549  ;;  %8676 = vpow2.f32 %v2014_v34 }
 0x121   : > { %v2434_v10 = vmul.f32 %v2380_v57, %v9546_v48  ;;  %v2381_v55 = vadd.f32 1.0, %v2327_v15  ;;  %v1843_v61 = vmul.f32 %v9581_v30, %v1789_v60  ;;  %v8386_v20 = vpop.f32.mrb[27].mxu0  ;;  %v9644_v32 = vpop.eup %8668  ;;  %v1629_v48 = vmul.f32 %v9610_v27, %v1575_v22 }
 0x122   : > { %v1736_v28 = vmul.f32 %v9595_v1, %v1682_v7  ;;  %v9649_v36 = vand.u32 2147483647, %v9633_v19  ;;  %v1522_v46 = vmul.f32 %v9622_v52, %v1468_v31  ;;  %v1415_v42 = vmul.f32 1.0614054, %v9644_v32 }
 0x123   : > { %v2435_v24 = vmul.f32 %v2381_v55, %v9569_v18  ;;  %v2113_v41 = vmul.f32 %v8667_v23, %v1843_v61  ;;  %v8671_v43 = vpop.eup %8670  ;;  %v2812_v30 = vmul.f32 %v2545_v0, %v2434_v10  ;;  %v1683_v49 = vadd.f32 -0.28449672, %v1629_v48  ;;  %v9664_v10 = vpop.permute.xlu1 %2554 }
 0x124   : > { %v1790_v40 = vadd.f32 0.2548296, %v1736_v28  ;;  %v8673_v50 = vpop.eup %8672  ;;  %v1576_v59 = vadd.f32 1.4214138, %v1522_v46  ;;  %v1469_v2 = vadd.f32 -1.4531521, %v1415_v42  ;;  %v924_v22 = vmul.f32 %v9472_v51, %v9587_v35 }
 0x125   : > { %v2813_v54 = vmul.f32 %v2550_v45, %v2435_v24  ;;  %v2167_v58 = vsub.f32 1.0, %v2113_v41  ;;  %v1737_v18 = vmul.f32 %v9610_v27, %v1683_v49  ;;  %v1200_v0 = vmul.f32 0.3275911, %v9649_v36  ;;  %v8675_v55 = vpop.eup %8674 }
 0x126   : > { %v1844_v47 = vmul.f32 %v9595_v1, %v1790_v40  ;;  %v9656_v57 = vpop.f32.mrb[28].mxu0  ;;  %v2016_v60 = vmul.f32 1.442695, %v1955_v63  ;;  %v1630_v15 = vmul.f32 %v9622_v52, %v1576_v59  ;;  %v1523_v21 = vmul.f32 %v9644_v32, %v1469_v2 }
 0x127   : > { %v8389_v3 = vpop.f32.mrb[29].mxu0  ;;  %v9660_v5 = vpack.c.bf16 %v2813_v54, %v2812_v30  ;;  %v2275_v7 = vsub.f32 0.0, %v2167_v58  ;;  %v1791_v1 = vadd.f32 0.2548296, %v1737_v18  ;;  %v9670_v28 = vmul.f32 %v8671_v43, %v1842_v38  ;;  %v2560_v33 = vpop.permute.xlu1 %2559 }
 0x128   : > { %v2114_v12 = vmul.f32 %v8673_v50, %v1844_v47  ;;  %v9662_v8 = vpop.f32.mrb[30].mxu0  ;;  %v1254_v20 = vadd.f32 1.0, %v1200_v0  ;;  %v1684_v63 = vadd.f32 -0.28449672, %v1630_v15  ;;  %v1577_v24 = vadd.f32 1.4214138, %v1523_v21 }
 0x129   : > { %13671 = vst [vmem:[#allocation2_spill] sm:$0xff] %v9660_v5  ;;  %v8390_v23 = vpop.f32.mrb[31].mxu0  ;;  %v2329_v31 = vsel %vm2221_vm5, %v2167_v58, %v2275_v7  ;;  %v1845_v34 = vmul.f32 %v9610_v27, %v1791_v1  ;;  %8678 = vpow2.f32 %v2016_v60  ;;  %v2166_v17 = vsub.f32 1.0, %v9670_v28 }
 0x12a   : > { %v2168_v61 = vsub.f32 1.0, %v2114_v12  ;;  %v2383_v48 = vadd.f32 1.0, %v2329_v31  ;;  %v1738_v46 = vmul.f32 %v9622_v52, %v1684_v63  ;;  %v1631_v43 = vmul.f32 %v9644_v32, %v1577_v24  ;;  %v8677_v59 = vpop.eup %8676  ;;  %v2565_v12 = vpop.permute.xlu0 %2564 }
 0x12b   : > { %v2115_v41 = vmul.f32 %v8675_v55, %v1845_v34  ;;  %v1034_v30 = vmul.f32 0.5, %v9521_v25  ;;  %v9682_v27 = vadd.f32 %v9477_v53, %v924_v22  ;;  %8680 = vrcp.f32 %v1254_v20 }
 0x12c   : > { %v2276_v40 = vsub.f32 0.0, %v2168_v61  ;;  %v2437_v35 = vmul.f32 %v2383_v48, %v9578_v29  ;;  %v1792_v50 = vadd.f32 0.2548296, %v1738_v46  ;;  %v1685_v47 = vadd.f32 -0.28449672, %v1631_v43 }
 0x12d   : > { %v2169_v42 = vsub.f32 1.0, %v2115_v41  ;;  %v1035_v25 = vmul.f32 0.5, %v9538_v39  ;;  %v9693_v60 = vmul.f32 0.70710677, %v9682_v27  ;;  %v925_v1 = vmul.f32 %v9472_v51, %v9603_v4 }
 0x12e   : > { %v2330_v45 = vsel %vm2222_vm6, %v2168_v61, %v2276_v40  ;;  %v9684_v38 = vpop.f32.mrb[32].mxu0  ;;  %v2815_v54 = vmul.f32 %v2560_v33, %v2437_v35  ;;  %v1846_v0 = vmul.f32 %v9622_v52, %v1792_v50  ;;  %v1739_v7 = vmul.f32 %v9644_v32, %v1685_v47  ;;  %v2570_v35 = vpop.permute.xlu1 %2569 }
 0x12f   : > { %v2384_v49 = vadd.f32 1.0, %v2330_v45  ;;  %v8393_v29 = vpop.f32.mrb[33].mxu0  ;;  %v2277_v2 = vsub.f32 0.0, %v2169_v42  ;;  %v2274_v15 = vsub.f32 0.0, %v2166_v17  ;;  %v1147_v52 = vand.u32 2147483647, %v9693_v60 }
 0x130   : > { %v9686_v58 = vpop.f32.mrb[34].mxu0  ;;  %v2116_v23 = vmul.f32 %v8677_v59, %v1846_v0  ;;  %v5618_v39 = vrot.slane %v2815_v54, 1  ;;  %v1793_v28 = vadd.f32 0.2548296, %v1739_v7  ;;  %v9701_v20 = vadd.f32 %v9477_v53, %v925_v1 }
 0x131   : > { %v2438_v18 = vmul.f32 %v2384_v49, %v1034_v30  ;;  %v8394_v3 = vpop.f32.mrb[35].mxu0  ;;  %v2331_v22 = vsel %vm2223_vm7, %v2169_v42, %v2277_v2  ;;  %v1201_v63 = vmul.f32 0.3275911, %v1147_v52  ;;  %v2328_v13 = vsel %vm2220_vm9, %v2166_v17, %v2274_v15 }
 0x132   : > { %v2385_v55 = vadd.f32 1.0, %v2331_v22  ;;  %v2170_v31 = vsub.f32 1.0, %v2116_v23  ;;  %v1847_v4 = vmul.f32 %v9644_v32, %v1793_v28  ;;  %v926_v32 = vmul.f32 %v9472_v51, %v9608_v26 }
 0x133   : > { %v2816_v21 = vmul.f32 %v2565_v12, %v2438_v18  ;;  %v8679_v48 = vpop.eup %8678  ;;  %v1255_v45 = vadd.f32 1.0, %v1201_v63  ;;  %v9720_v50 = vmul.f32 0.70710677, %v9701_v20  ;;  %v1036_v59 = vmul.f32 0.5, %v9553_v62 }
 0x134   : > { %v2439_v34 = vmul.f32 %v2385_v55, %v1035_v25  ;;  %v2278_v41 = vsub.f32 0.0, %v2170_v31  ;;  %v2117_v30 = vmul.f32 %v8679_v48, %v1847_v4  ;;  %v2382_v26 = vadd.f32 1.0, %v2328_v13  ;;  %v2575_v55 = vpop.permute.xlu0 %2574 }
 0x135   : > { %v9698_v61 = vpack.c.bf16 %v2816_v21, %v2815_v54  ;;  %v5619_v44 = vrot.slane %v2816_v21, 1  ;;  %v9717_v49 = vpop.eup %8680  ;;  %8682 = vrcp.f32 %v1255_v45  ;;  %v9725_v18 = vand.u32 2147483647, %v9720_v50 }
 0x136   : > { %v9704_v24 = vpop.f32.mrb[36].mxu0  ;;  %v9711_v43 = vmul.f32 %v2570_v35, %v2439_v34  ;;  %v2332_v42 = vsel %vm2224_vm10, %v2170_v31, %v2278_v41  ;;  %v2171_v47 = vsub.f32 1.0, %v2117_v30  ;;  %v1416_v17 = vmul.f32 1.0614054, %v9717_v49  ;;  %v2580_v35 = vpop.permute.xlu1 %2579 }
 0x137   : > { %13672 = vst [vmem:[#allocation3_spill] sm:$0xff] %v9698_v61  ;;  %v9708_v40 = vsel %vm3143_vm8, %v5618_v39, %v5619_v44  ;;  %v8397_v46 = vpop.f32.mrb[37].mxu0  ;;  %v2386_v54 = vadd.f32 1.0, %v2332_v42  ;;  %v9732_v2 = vadd.f32 %v9477_v53, %v926_v32  ;;  %v1202_v12 = vmul.f32 0.3275911, %v9725_v18 }
 0x138   : > { %13673 = vst [vmem:[#allocation4_spill] sm:$0xff] %v9708_v40  ;;  %v9715_v33 = vpop.f32.mrb[38].mxu0  ;;  %v5621_v6 = vrot.slane %v9711_v43, 1  ;;  %v2279_v3 = vsub.f32 0.0, %v2171_v47  ;;  %v1032_v7 = vmul.f32 0.5, %v9494_v9  ;;  %v1037_v1 = vmul.f32 0.5, %v9563_v11 }
 0x139   : > { %v8398_v29 = vpop.f32.mrb[39].mxu0  ;;  %v2440_v0 = vmul.f32 %v2386_v54, %v1036_v59  ;;  %v1903_v21 = vsub.f32 0.0, %v1147_v52  ;;  %v1256_v22 = vadd.f32 1.0, %v1202_v12  ;;  %v9741_v31 = vmul.f32 0.70710677, %v9732_v2 }
 0x13a   : > { %v9728_v25 = vsel %vm3143_vm8, %v5619_v44, %v5621_v6  ;;  %v2333_v15 = vsel %vm2225_vm11, %v2171_v47, %v2279_v3  ;;  %v2436_v39 = vmul.f32 %v2382_v26, %v1032_v7  ;;  %v1470_v44 = vadd.f32 -1.4531521, %v1416_v17 }
 0x13b   : > { %13674 = vst [vmem:[#allocation5_spill] sm:$0xff] %v9728_v25  ;;  %v2387_v28 = vadd.f32 1.0, %v2333_v15  ;;  %v2818_v9 = vmul.f32 %v2575_v55, %v2440_v0  ;;  %8684 = vrcp.f32 %v1256_v22  ;;  %v927_v16 = vmul.f32 %v9472_v51, %v9629_v56 }
 0x13c   : > { %v928_v11 = vmul.f32 %v9472_v51, %v9640_v37  ;;  %v1149_v63 = vand.u32 2147483647, %v9741_v31  ;;  %v1957_v41 = vmul.f32 %v1903_v21, %v1147_v52  ;;  %v1902_v45 = vsub.f32 0.0, %v9649_v36 }
 0x13d   : > { %v2441_v4 = vmul.f32 %v2387_v28, %v1037_v1  ;;  %v9751_v46 = vadd.f32 %v9477_v53, %v927_v16  ;;  %v2814_v37 = vmul.f32 %v9664_v10, %v2436_v39  ;;  %v5623_v42 = vrot.slane %v2818_v9, 1 }
 0x13e   : > { %v9737_v62 = vpop.f32.mrb[40].mxu0  ;;  %v1203_v32 = vmul.f32 0.3275911, %v1149_v63  ;;  %v9757_v13 = vadd.f32 %v9477_v53, %v928_v11  ;;  %v1524_v29 = vmul.f32 %v9717_v49, %v1470_v44  ;;  %v2020_v17 = vmul.f32 1.442695, %v1957_v41 }
 0x13f   : > { %v8401_v23 = vpop.f32.mrb[41].mxu0  ;;  %v9753_v30 = vmul.f32 %v2580_v35, %v2441_v4  ;;  %v9759_v56 = vpop.eup %8682  ;;  %v9764_v52 = vmul.f32 0.70710677, %v9751_v46  ;;  %v1904_v0 = vsub.f32 0.0, %v9725_v18  ;;  %v929_v3 = vmul.f32 %v9472_v51, %v9656_v57 }
 0x140   : > { %v9743_v48 = vpop.f32.mrb[42].mxu0  ;;  %v1417_v47 = vmul.f32 1.0614054, %v9759_v56  ;;  %v1257_v59 = vadd.f32 1.0, %v1203_v32  ;;  %v9783_v15 = vmul.f32 0.70710677, %v9757_v13  ;;  %v9787_v22 = vpack.c.bf16 %v2814_v37, %v2814_v37 }
 0x141   : > { %v8402_v34 = vpop.f32.mrb[43].mxu0  ;;  %13675 = vst [vmem:[#allocation6_spill] sm:$0xff] %v9753_v30  ;;  %v9767_v6 = vpack.c.bf16 %v9753_v30, %v2818_v9  ;;  %v13578_v54 = vrot.slane %v9753_v30, 1  ;;  %v1150_v10 = vand.u32 2147483647, %v9764_v52  ;;  %v1956_v23 = vmul.f32 %v1902_v45, %v9649_v36 }
 0x142   : > { %v1471_v1 = vadd.f32 -1.4531521, %v1417_v47  ;;  %8686 = vrcp.f32 %v1257_v59  ;;  %13678 = vst [vmem:[#allocation9_spill] sm:$0xff] %v9787_v22  ;;  %v1578_v57 = vadd.f32 1.4214138, %v1524_v29  ;;  %v1958_v16 = vmul.f32 %v1904_v0, %v9725_v18 }
 0x143   : > { %13676 = vst [vmem:[#allocation7_spill] sm:$0xff] %v9767_v6  ;;  %v9780_v7 = vsel %vm3143_vm8, %v5623_v42, %v13578_v54  ;;  %v1204_v39 = vmul.f32 0.3275911, %v1150_v10  ;;  %v9792_v44 = vand.u32 2147483647, %v9783_v15  ;;  %v1905_v11 = vsub.f32 0.0, %v1149_v63 }
 0x144   : > { %13677 = vst [vmem:[#allocation8_spill] sm:$0xff] %v9780_v7  ;;  %v1525_v28 = vmul.f32 %v9759_v56, %v1471_v1  ;;  %v9798_v4 = vadd.f32 %v9477_v53, %v929_v3  ;;  %8688 = vpow2.f32 %v2020_v17  ;;  %v2911_v45 = vshll.u32 %v9787_v22, 16 }
 0x145   : > { %v9794_v9 = vpop.eup %8684  ;;  %v1258_v34 = vadd.f32 1.0, %v1204_v39  ;;  %v1205_v41 = vmul.f32 0.3275911, %v9792_v44  ;;  %v2018_v32 = vmul.f32 1.442695, %v1956_v23  ;;  %v930_v37 = vmul.f32 %v9472_v51, %v9662_v8 }
 0x146   : > { %v9771_v26 = vpop.f32.mrb[44].mxu0  ;;  %v1579_v35 = vadd.f32 1.4214138, %v1525_v28  ;;  %v1418_v36 = vmul.f32 1.0614054, %v9794_v9  ;;  %v1632_v18 = vmul.f32 %v9717_v49, %v1578_v57  ;;  %v9810_v17 = vmul.f32 0.5, %v9618_v14 }
 0x147   : > { %v8405_v12 = vpop.f32.mrb[45].mxu0  ;;  %8690 = vrcp.f32 %v1258_v34  ;;  %v1259_v47 = vadd.f32 1.0, %v1205_v41  ;;  %v2022_v0 = vmul.f32 1.442695, %v1958_v16  ;;  %v1959_v3 = vmul.f32 %v1905_v11, %v1149_v63 }
 0x148   : > { %v9785_v21 = vpop.f32.mrb[46].mxu0  ;;  %v1633_v42 = vmul.f32 %v9759_v56, %v1579_v35  ;;  %v1472_v29 = vadd.f32 -1.4531521, %v1418_v36  ;;  %v9813_v12 = vmul.f32 0.70710677, %v9798_v4  ;;  %v1906_v39 = vsub.f32 0.0, %v1150_v10 }
 0x149   : > { %v8406_v55 = vpop.f32.mrb[47].mxu0  ;;  %8692 = vrcp.f32 %v1259_v47  ;;  %v9819_v57 = vmul.f32 0.5, %v9682_v27  ;;  %v9825_v63 = vadd.f32 %v9477_v53, %v930_v37  ;;  %v9829_v11 = vrot.slane %v2911_v45, 1 }
 0x14a   : > { %v1687_v23 = vadd.f32 -0.28449672, %v1633_v42  ;;  %v1526_v8 = vmul.f32 %v9794_v9, %v1472_v29  ;;  %8694 = vpow2.f32 %v2018_v32  ;;  %v9822_v14 = vand.u32 2147483647, %v9813_v12 }
 0x14b   : > { %v1686_v34 = vadd.f32 -0.28449672, %v1632_v18  ;;  %8696 = vpow2.f32 %v2022_v0  ;;  %v2024_v27 = vmul.f32 1.442695, %v1959_v3  ;;  %v9835_v29 = vmul.f32 0.5, %v9701_v20 }
 0x14c   : > { %v9827_v16 = vpop.eup %8686  ;;  %v1741_v35 = vmul.f32 %v9759_v56, %v1687_v23  ;;  %v1580_v36 = vadd.f32 1.4214138, %v1526_v8  ;;  %v1206_v32 = vmul.f32 0.3275911, %v9822_v14  ;;  %v1960_v47 = vmul.f32 %v1906_v39, %v1150_v10 }
 0x14d   : > { %v1419_v41 = vmul.f32 1.0614054, %v9827_v16  ;;  %vm2227_vm12 = vcmp.ge.f32.partialorder %v9693_v60, 0.0  ;;  %v1907_v18 = vsub.f32 0.0, %v9792_v44  ;;  %v9841_v0 = vmul.f32 0.70710677, %v9825_v63 }
 0x14e   : > { %v9807_v59 = vpop.f32.mrb[48].mxu0  ;;  %v1795_v42 = vadd.f32 0.2548296, %v1741_v35  ;;  %v1634_v37 = vmul.f32 %v9794_v9, %v1580_v36  ;;  %v8689_v23 = vpop.eup %8688  ;;  %v931_v20 = vmul.f32 %v9472_v51, %v9684_v38  ;;  %v1740_v35 = vmul.f32 %v9717_v49, %v1686_v34 }
 0x14f   : > { %v8409_v1 = vpop.f32.mrb[49].mxu0  ;;  %v1473_v45 = vadd.f32 -1.4531521, %v1419_v41  ;;  %8698 = vpow2.f32 %v2024_v27  ;;  %v1153_v41 = vand.u32 2147483647, %v9841_v0  ;;  %v1961_v38 = vmul.f32 %v1907_v18, %v9792_v44 }
 0x150   : > { %v9816_v55 = vpop.f32.mrb[50].mxu0  ;;  %v1260_v1 = vadd.f32 1.0, %v1206_v32  ;;  %v1849_v3 = vmul.f32 %v9759_v56, %v1795_v42  ;;  %v1688_v8 = vadd.f32 -0.28449672, %v1634_v37  ;;  %v2026_v37 = vmul.f32 1.442695, %v1960_v47 }
 0x151   : > { %v8410_v28 = vpop.f32.mrb[51].mxu0  ;;  %v9851_v39 = vpop.eup %8690  ;;  %v1527_v36 = vmul.f32 %v9827_v16, %v1473_v45  ;;  %v1207_v7 = vmul.f32 0.3275911, %v1153_v41  ;;  %vm2228_vm13 = vcmp.ge.f32.partialorder %v9720_v50, 0.0  ;;  %vm2229_vm14 = vcmp.ge.f32.partialorder %v9741_v31, 0.0 }
 0x152   : > { %v9845_v28 = vmul.f32 0.5, %v9732_v2  ;;  %v2119_v56 = vmul.f32 %v8689_v23, %v1849_v3  ;;  %v1742_v42 = vmul.f32 %v9794_v9, %v1688_v8  ;;  %v1420_v2 = vmul.f32 1.0614054, %v9851_v39 }
 0x153   : > { %v1581_v51 = vadd.f32 1.4214138, %v1527_v36  ;;  %8700 = vrcp.f32 %v1260_v1  ;;  %v9861_v25 = vpop.eup %8692  ;;  %v9864_v23 = vadd.f32 %v9477_v53, %v931_v20  ;;  %v1794_v8 = vadd.f32 0.2548296, %v1740_v35 }
 0x154   : > { %v2173_v27 = vsub.f32 1.0, %v2119_v56  ;;  %v1796_v45 = vadd.f32 0.2548296, %v1742_v42  ;;  %v1474_v40 = vadd.f32 -1.4531521, %v1420_v2  ;;  %v8695_v3 = vpop.eup %8694  ;;  %v1261_v44 = vadd.f32 1.0, %v1207_v7 }
 0x155   : > { %v1635_v47 = vmul.f32 %v9827_v16, %v1581_v51  ;;  %v1421_v36 = vmul.f32 1.0614054, %v9861_v25  ;;  %8702 = vpow2.f32 %v2026_v37  ;;  %v8697_v56 = vpop.eup %8696  ;;  %v2028_v53 = vmul.f32 1.442695, %v1961_v38 }
 0x156   : > { %v9849_v10 = vpop.f32.mrb[52].mxu0  ;;  %v2281_v18 = vsub.f32 0.0, %v2173_v27  ;;  %v1850_v1 = vmul.f32 %v9794_v9, %v1796_v45  ;;  %8704 = vrcp.f32 %v1261_v44  ;;  %v9874_v51 = vmul.f32 0.70710677, %v9864_v23 }
 0x157   : > { %v8413_v32 = vpop.f32.mrb[53].mxu0  ;;  %v1689_v42 = vadd.f32 -0.28449672, %v1635_v47  ;;  %v1475_v2 = vadd.f32 -1.4531521, %v1421_v36  ;;  %v1909_v37 = vsub.f32 0.0, %v1153_v41  ;;  %v1848_v38 = vmul.f32 %v9717_v49, %v1794_v8  ;;  %v9894_v49 = vpop.permute.xlu0 %2584 }
 0x158   : > { %v9858_v54 = vpop.f32.mrb[54].mxu0  ;;  %v1528_v32 = vmul.f32 %v9851_v39, %v1474_v40  ;;  %v2335_v20 = vsel %vm2227_vm12, %v2173_v27, %v2281_v18  ;;  %v2120_v35 = vmul.f32 %v8697_v56, %v1850_v1  ;;  %v9883_v27 = vand.u32 2147483647, %v9874_v51 }
 0x159   : > { %v8414_v34 = vpop.f32.mrb[55].mxu0  ;;  %v2389_v30 = vadd.f32 1.0, %v2335_v20  ;;  %v1743_v9 = vmul.f32 %v9827_v16, %v1689_v42  ;;  %v1529_v40 = vmul.f32 %v9861_v25, %v1475_v2  ;;  %v8699_v44 = vpop.eup %8698  ;;  %v9889_v18 = vpack.c.bf16 %v9711_v43, %v9711_v43 }
 0x15a   : > { %v1582_v34 = vadd.f32 1.4214138, %v1528_v32  ;;  %v2174_v47 = vsub.f32 1.0, %v2120_v35  ;;  %v9892_v32 = vmul.f32 0.5, %v9751_v46  ;;  %8706 = vpow2.f32 %v2028_v53  ;;  %v2590_v53 = vpop.permute.xlu1 %2589 }
 0x15b   : > { %v1797_v1 = vadd.f32 0.2548296, %v1743_v9  ;;  %v1583_v56 = vadd.f32 1.4214138, %v1529_v40  ;;  %v2443_v8 = vmul.f32 %v2389_v30, %v9819_v57  ;;  %v1963_v9 = vmul.f32 %v1909_v37, %v1153_v41 }
 0x15c   : > { %v1636_v60 = vmul.f32 %v9851_v39, %v1582_v34  ;;  %v2282_v2 = vsub.f32 0.0, %v2174_v47  ;;  %v1208_v46 = vmul.f32 0.3275911, %v9883_v27  ;;  %v9903_v40 = vmul.f32 %v8695_v3, %v1848_v38 }
 0x15d   : > { %v9898_v35 = vpop.eup %8700  ;;  %v1851_v43 = vmul.f32 %v9827_v16, %v1797_v1  ;;  %v1637_v34 = vmul.f32 %v9861_v25, %v1583_v56  ;;  %v9909_v57 = vmul.f32 0.5, %v9757_v13  ;;  %v9914_v16 = vld [vmem:[%s13572_s3] ss:$0 sm:$0xff]  ;;  %v2821_v50 = vmul.f32 %v2590_v53, %v2443_v8 }
 0x15e   : > { %v9876_v7 = vpop.f32.mrb[56].mxu0  ;;  %v1690_v20 = vadd.f32 -0.28449672, %v1636_v60  ;;  %v932_v41 = vmul.f32 %v9914_v16, %v9686_v58  ;;  %v1422_v38 = vmul.f32 1.0614054, %v9898_v35  ;;  %vm2230_vm15 = vcmp.ge.f32.partialorder %v9764_v52, 0.0  ;;  %v2595_v58 = vpop.permute.xlu0 %2594 }
 0x15f   : > { %v8417_v45 = vpop.f32.mrb[57].mxu0  ;;  %v1691_v22 = vadd.f32 -0.28449672, %v1637_v34  ;;  %v8703_v3 = vpop.eup %8702  ;;  %vm2231_vm0 = vcmp.ge.f32.partialorder %v9783_v15, 0.0  ;;  %vm2226_vm1 = vcmp.ge.f32.partialorder %v9633_v19, 0.0  ;;  %vm2233_vm3 = vcmp.ge.f32.partialorder %v9841_v0, 0.0 }
 0x160   : > { %v9885_v36 = vpop.f32.mrb[58].mxu0  ;;  %v2336_v45 = vsel %vm2228_vm13, %v2174_v47, %v2282_v2  ;;  %v1744_v30 = vmul.f32 %v9851_v39, %v1690_v20  ;;  %v1262_v47 = vadd.f32 1.0, %v1208_v46  ;;  %v9921_v1 = vpop.eup %8704  ;;  %v2032_v20 = vmul.f32 1.442695, %v1963_v9 }
 0x161   : > { %v8418_v42 = vpop.f32.mrb[59].mxu0  ;;  %v2390_v60 = vadd.f32 1.0, %v2336_v45  ;;  %v1745_v2 = vmul.f32 %v9861_v25, %v1691_v22  ;;  %v1423_v34 = vmul.f32 1.0614054, %v9921_v1  ;;  %v1910_v46 = vsub.f32 0.0, %v9883_v27 }
 0x162   : > { %v2121_v42 = vmul.f32 %v8699_v44, %v1851_v43  ;;  %v1798_v37 = vadd.f32 0.2548296, %v1744_v30  ;;  %8708 = vrcp.f32 %v1262_v47  ;;  %vm2234_vm4 = vcmp.ge.f32.partialorder %v9874_v51, 0.0 }
 0x163   : > { %v2444_v44 = vmul.f32 %v2390_v60, %v9835_v29  ;;  %v1799_v29 = vadd.f32 0.2548296, %v1745_v2  ;;  %v9934_v60 = vld [vmem:[%s13573_s4] ss:$0 sm:$0xff]  ;;  %v1477_v47 = vadd.f32 -1.4531521, %v1423_v34  ;;  %8710 = vpow2.f32 %v2032_v20 }
 0x164   : > { %v2175_v56 = vsub.f32 1.0, %v2121_v42  ;;  %v1852_v8 = vmul.f32 %v9851_v39, %v1798_v37  ;;  %v9937_v22 = vadd.f32 %v9934_v60, %v932_v41  ;;  %v5628_v39 = vrot.slane %v2821_v50, 1 }
 0x165   : > { %v2822_v30 = vmul.f32 %v2595_v58, %v2444_v44  ;;  %v1476_v37 = vadd.f32 -1.4531521, %v1422_v38  ;;  %v1853_v58 = vmul.f32 %v9861_v25, %v1799_v29  ;;  %vm2232_vm9 = vcmp.ge.f32.partialorder %v9813_v12, 0.0 }
 0x166   : > { %v9919_v13 = vpop.f32.mrb[60].mxu0  ;;  %v2283_v53 = vsub.f32 0.0, %v2175_v56  ;;  %v2122_v42 = vmul.f32 %v8703_v3, %v1852_v8  ;;  %v1531_v3 = vmul.f32 %v9921_v1, %v1477_v47  ;;  %v1964_v8 = vmul.f32 %v1910_v46, %v9883_v27 }
 0x167   : > { %13679 = vst [vmem:[#allocation10_spill] sm:$0xff] %v9919_v13  ;;  %v8421_v43 = vpop.f32.mrb[61].mxu0  ;;  %v5629_v44 = vrot.slane %v2822_v30, 1  ;;  %v2172_v13 = vsub.f32 1.0, %v9903_v40  ;;  %v9953_v31 = vmul.f32 0.70710677, %v9937_v22  ;;  %v1530_v40 = vmul.f32 %v9898_v35, %v1476_v37 }
 0x168   : > { %v9929_v45 = vpop.f32.mrb[62].mxu0  ;;  %v9940_v43 = vpack.c.bf16 %v2822_v30, %v2821_v50  ;;  %v2337_v2 = vsel %vm2229_vm14, %v2175_v56, %v2283_v53  ;;  %v1585_v34 = vadd.f32 1.4214138, %v1531_v3  ;;  %v2600_v53 = vpop.permute.xlu1 %2599  ;;  %v2906_v27 = vshll.u32 %v9660_v5, 16 }
 0x169   : > { %13680 = vst [vmem:[#allocation11_spill] sm:$0xff] %v9929_v45  ;;  %v8422_v9 = vpop.f32.mrb[63].mxu0  ;;  %v8707_v45 = vpop.eup %8706  ;;  %v2391_v41 = vadd.f32 1.0, %v2337_v2  ;;  %v9949_v38 = vsel %vm3143_vm8, %v5628_v39, %v5629_v44  ;;  %v9960_v39 = vand.u32 2147483647, %v9953_v31  ;;  %vm2235_vm5 = vcmp.ge.f32.partialorder %v9953_v31, 0.0 }
 0x16a   : > { %13681 = vst [vmem:[#allocation12_spill] sm:$0xff] %v9940_v43  ;;  %v2176_v9 = vsub.f32 1.0, %v2122_v42  ;;  %13682 = vst [vmem:[#allocation13_spill] sm:$0xff] %v9949_v38  ;;  %v2123_v50 = vmul.f32 %v8707_v45, %v1853_v58  ;;  %v2280_v45 = vsub.f32 0.0, %v2172_v13  ;;  %v1639_v37 = vmul.f32 %v9921_v1, %v1585_v34 }
 0x16b   : > { %v2445_v25 = vmul.f32 %v2391_v41, %v9845_v28  ;;  %v2034_v58 = vmul.f32 1.442695, %v1964_v8  ;;  %v1209_v41 = vmul.f32 0.3275911, %v9960_v39 }
 0x16c   : > { %v2284_v56 = vsub.f32 0.0, %v2176_v9  ;;  %v2177_v29 = vsub.f32 1.0, %v2123_v50  ;;  %v9969_v20 = vpop.eup %8708  ;;  %v1584_v50 = vadd.f32 1.4214138, %v1530_v40  ;;  %v1693_v38 = vadd.f32 -0.28449672, %v1639_v37  ;;  %v2605_v37 = vpop.permute.xlu0 %2604 }
 0x16d   : > { %v9963_v42 = vmul.f32 %v2600_v53, %v2445_v25  ;;  %v3148_v40 = vrot.slane %v9889_v18, 1 }
 0x16e   : > { %v9957_v30 = vpop.f32.mrb[64].mxu0  ;;  %v2338_v28 = vsel %vm2230_vm15, %v2176_v9, %v2284_v56  ;;  %v2285_v2 = vsub.f32 0.0, %v2177_v29  ;;  %v1424_v9 = vmul.f32 1.0614054, %v9969_v20  ;;  %v1263_v56 = vadd.f32 1.0, %v1209_v41 }
 0x16f   : > { %v8425_v46 = vpop.f32.mrb[65].mxu0  ;;  %v2392_v47 = vadd.f32 1.0, %v2338_v28  ;;  %v5631_v3 = vrot.slane %v9963_v42, 1  ;;  %v1747_v53 = vmul.f32 %v9921_v1, %v1693_v38  ;;  %v2904_v28 = vshrl.u32 %v9660_v5, 16 }
 0x170   : > { %v2908_v46 = vrot.slane %v2906_v27, 1  ;;  %v2339_v52 = vsel %vm2231_vm0, %v2177_v29, %v2285_v2  ;;  %v1478_v27 = vadd.f32 -1.4531521, %v1424_v9  ;;  %8712 = vrcp.f32 %v1263_v56 }
 0x171   : > { %v2446_v25 = vmul.f32 %v2392_v47, %v9892_v32  ;;  %v9977_v34 = vsel %vm3143_vm8, %v5629_v44, %v5631_v3  ;;  %v2393_v8 = vadd.f32 1.0, %v2339_v52  ;;  %v2334_v32 = vsel %vm2226_vm1, %v2172_v13, %v2280_v45  ;;  %v2610_v44 = vpop.permute.xlu1 %2609  ;;  %v8711_v45 = vpop.eup %8710 }
 0x172   : > { %13683 = vst [vmem:[#allocation14_spill] sm:$0xff] %v9977_v34  ;;  %v1801_v47 = vadd.f32 0.2548296, %v1747_v53  ;;  %v2909_v2 = vor.u32 %v2908_v46, %v2904_v28  ;;  %v1908_v41 = vsub.f32 0.0, %v9822_v14  ;;  %v1532_v38 = vmul.f32 %v9969_v20, %v1478_v27 }
 0x173   : > { %v2824_v15 = vmul.f32 %v2605_v37, %v2446_v25  ;;  %v2447_v29 = vmul.f32 %v2393_v8, %v9909_v57  ;;  %8714 = vpow2.f32 %v2034_v58  ;;  %v933_v3 = vmul.f32 %v9914_v16, %v9704_v24  ;;  %v10001_v58 = vpop.f32.mrb[66].mxu0 }
 0x174   : > { %v1638_v19 = vmul.f32 %v9898_v35, %v1584_v50  ;;  %v1855_v13 = vmul.f32 %v9921_v1, %v1801_v47  ;;  %v2914_v57 = vsel %vm2902_vm2, %v2909_v2, %v9829_v11  ;;  %v1586_v46 = vadd.f32 1.4214138, %v1532_v38  ;;  %v8426_v8 = vpop.f32.mrb[67].mxu0 }
 0x175   : > { %v9989_v52 = vmul.f32 %v2610_v44, %v2447_v29  ;;  %v1911_v25 = vsub.f32 0.0, %v9960_v39  ;;  %3854 = vmatprep.mubr.bf16.mxu1 %v2914_v57  ;;  %v9997_v9 = vadd.f32 %v9934_v60, %v933_v3  ;;  %v934_v24 = vmul.f32 %v9914_v16, %v9715_v33 }
 0x176   : > { %v5633_v56 = vrot.slane %v2824_v15, 1  ;;  %v2125_v11 = vmul.f32 %v8711_v45, %v1855_v13  ;;  %3855 = vmatmul.mubr.bf16.vlgmr.msra.gmra.mrb[0].mxu1 %v9660_v5  ;;  %v2388_v53 = vadd.f32 1.0, %v2334_v32  ;;  %v1962_v28 = vmul.f32 %v1908_v41, %v9822_v14 }
 0x177   : > { %13684 = vst [vmem:[#allocation15_spill] sm:$0xff] %v9989_v52  ;;  %v10004_v50 = vpack.c.bf16 %v9989_v52, %v2824_v15  ;;  %v13581_v1 = vrot.slane %v9989_v52, 1  ;;  %v1640_v37 = vmul.f32 %v9969_v20, %v1586_v46  ;;  %v10011_v27 = vmul.f32 0.70710677, %v9997_v9 }
 0x178   : > { %v2179_v15 = vsub.f32 1.0, %v2125_v11  ;;  %v10019_v29 = vadd.f32 %v9934_v60, %v934_v24  ;;  %v3147_v47 = vrot.slane %v9698_v61, 1  ;;  %v2923_v32 = vshll.u32 %v9889_v18, 16 }
 0x179   : > { %13685 = vst [vmem:[#allocation16_spill] sm:$0xff] %v10004_v50  ;;  %v10016_v33 = vsel %vm3143_vm8, %v5633_v56, %v13581_v1  ;;  %v1694_v2 = vadd.f32 -0.28449672, %v1640_v37  ;;  %v1965_v14 = vmul.f32 %v1911_v25, %v9960_v39  ;;  %v1156_v44 = vand.u32 2147483647, %v10011_v27  ;;  %v10036_v39 = vpop.f32.mrb[68].mxu0 }
 0x17a   : > { %13686 = vst [vmem:[#allocation17_spill] sm:$0xff] %v10016_v33  ;;  %v1692_v41 = vadd.f32 -0.28449672, %v1638_v19  ;;  %v2287_v38 = vsub.f32 0.0, %v2179_v15  ;;  %v10026_v3 = vmul.f32 0.70710677, %v10019_v29  ;;  %v10029_v13 = vsel %vm3143_vm8, %v3147_v47, %v3148_v40  ;;  %v10031_v57 = vpop.eup %8712 }
 0x17b   : > { %13687 = vst [vmem:[#allocation18_spill] sm:$0xff] %v10029_v13  ;;  %v2442_v45 = vmul.f32 %v2388_v53, %v9810_v17  ;;  %v2030_v46 = vmul.f32 1.442695, %v1962_v28  ;;  %v1748_v18 = vmul.f32 %v9969_v20, %v1694_v2  ;;  %v1210_v24 = vmul.f32 0.3275911, %v1156_v44  ;;  %4176 = vmatprep.mubr.bf16.mxu0 %v10029_v13  ;;  %v8429_v40 = vpop.f32.mrb[69].mxu0 }
 0x17c   : > { %v1425_v19 = vmul.f32 1.0614054, %v10031_v57  ;;  %v10041_v25 = vand.u32 2147483647, %v10026_v3  ;;  %v2036_v8 = vmul.f32 1.442695, %v1965_v14  ;;  %v1746_v28 = vmul.f32 %v9898_v35, %v1692_v41 }
 0x17d   : > { %v8715_v56 = vpop.eup %8714  ;;  %v1802_v11 = vadd.f32 0.2548296, %v1748_v18  ;;  %v1264_v17 = vadd.f32 1.0, %v1210_v24  ;;  %v10043_v53 = vpop.f32.mrb[70].mxu0  ;;  %v2341_v37 = vsel %vm2233_vm3, %v2179_v15, %v2287_v38  ;;  %v2925_v0 = vrot.slane %v2923_v32, 1 }
 0x17e   : > { %13688 = vst [vmem:[#allocation19_spill] sm:$0xff] %v10043_v53  ;;  %v1479_v47 = vadd.f32 -1.4531521, %v1425_v19  ;;  %v1211_v2 = vmul.f32 0.3275911, %v10041_v25  ;;  %v8430_v1 = vpop.f32.mrb[71].mxu0  ;;  %v10048_v33 = vmul.f32 %v9894_v49, %v2442_v45  ;;  %v936_v19 = vmul.f32 %v9914_v16, %v9743_v48 }
 0x17f   : > { %v1856_v52 = vmul.f32 %v9969_v20, %v1802_v11  ;;  %8716 = vrcp.f32 %v1264_v17  ;;  %v1045_v14 = vmul.f32 0.5, %v9825_v63  ;;  %v2395_v40 = vadd.f32 1.0, %v2341_v37 }
 0x180   : > { %13689 = vst [vmem:[#allocation20_spill] sm:$0xff] %v10048_v33  ;;  %8718 = vpow2.f32 %v2030_v46  ;;  %v1533_v18 = vmul.f32 %v10031_v57, %v1479_v47  ;;  %v1265_v24 = vadd.f32 1.0, %v1211_v2  ;;  %v935_v1 = vmul.f32 %v9914_v16, %v9737_v62  ;;  %v10064_v62 = vpop.permute.xlu0 %2614 }
 0x181   : > { %v2126_v41 = vmul.f32 %v8715_v56, %v1856_v52  ;;  %v1800_v15 = vadd.f32 0.2548296, %v1746_v28  ;;  %8720 = vpow2.f32 %v2036_v8  ;;  %v2918_v49 = vshll.u32 %v9698_v61, 16 }
 0x182   : > { %v1587_v32 = vadd.f32 1.4214138, %v1533_v18  ;;  %v1912_v38 = vsub.f32 0.0, %v1156_v44  ;;  %8722 = vrcp.f32 %v1265_v24  ;;  %v10058_v63 = vadd.f32 %v9934_v60, %v935_v1 }
 0x183   : > { %v2180_v20 = vsub.f32 1.0, %v2126_v41  ;;  %v2916_v52 = vshrl.u32 %v9698_v61, 16  ;;  %v2920_v46 = vrot.slane %v2918_v49, 1  ;;  %v2449_v56 = vmul.f32 %v2395_v40, %v1045_v14  ;;  %v2620_v40 = vpop.permute.xlu1 %2619 }
 0x184   : > { %v1641_v45 = vmul.f32 %v10031_v57, %v1587_v32  ;;  %v10067_v8 = vmul.f32 0.70710677, %v10058_v63  ;;  %v937_v17 = vmul.f32 %v9914_v16, %v9771_v26  ;;  %v1854_v28 = vmul.f32 %v9898_v35, %v1800_v15 }
 0x185   : > { %v2288_v11 = vsub.f32 0.0, %v2180_v20  ;;  %v2921_v47 = vor.u32 %v2920_v46, %v2916_v52  ;;  %v10073_v2 = vadd.f32 %v9934_v60, %v936_v19  ;;  %v1966_v18 = vmul.f32 %v1912_v38, %v1156_v44  ;;  %v2625_v52 = vpop.permute.xlu0 %2624 }
 0x186   : > { %v1695_v37 = vadd.f32 -0.28449672, %v1641_v45  ;;  %v10078_v14 = vand.u32 2147483647, %v10067_v8  ;;  %v10081_v24 = vadd.f32 %v9934_v60, %v937_v17  ;;  %v1046_v26 = vmul.f32 0.5, %v9864_v23 }
 0x187   : > { %v2342_v48 = vsel %vm2234_vm4, %v2180_v20, %v2288_v11  ;;  %v2926_v1 = vsel %vm2902_vm2, %v2921_v47, %v2925_v0  ;;  %v2827_v32 = vmul.f32 %v2620_v40, %v2449_v56  ;;  %v1913_v51 = vsub.f32 0.0, %v10041_v25 }
 0x188   : > { %v2396_v41 = vadd.f32 1.0, %v2342_v48  ;;  %v1749_v35 = vmul.f32 %v10031_v57, %v1695_v37  ;;  %v1212_v44 = vmul.f32 0.3275911, %v10078_v14  ;;  %3862 = vmatprep.mubr.bf16.mxu1 %v2926_v1  ;;  %4177 = vmatmul.mubr.bf16.vlgmr.msra.gmra.mrb[108].mxu0 %v2926_v1  ;;  %v10091_v49 = vmul.f32 0.70710677, %v10073_v2 }
 0x189   : > { %v10086_v15 = vpop.eup %8716  ;;  %3863 = vmatmul.mubr.bf16.gmra.mrb[4].mxu1 %v9698_v61  ;;  %v10096_v0 = vmul.f32 0.70710677, %v10081_v24  ;;  %v2038_v19 = vmul.f32 1.442695, %v1966_v18  ;;  %vm2236_vm6 = vcmp.ge.f32.partialorder %v10011_v27, 0.0  ;;  %v2928_v53 = vshrl.u32 %v9767_v6, 16 }
 0x18a   : > { %v8719_v20 = vpop.eup %8718  ;;  %v2450_v38 = vmul.f32 %v2396_v41, %v1046_v26  ;;  %v1803_v23 = vadd.f32 0.2548296, %v1749_v35  ;;  %v1426_v45 = vmul.f32 1.0614054, %v10086_v15  ;;  %v1266_v56 = vadd.f32 1.0, %v1212_v44 }
 0x18b   : > { %v10098_v46 = vmul.f32 %v8719_v20, %v1854_v28  ;;  %v10101_v11 = vand.u32 2147483647, %v10091_v49  ;;  %v8721_v17 = vpop.eup %8720  ;;  %v10107_v40 = vand.u32 2147483647, %v10096_v0  ;;  %v5638_v41 = vrot.slane %v2827_v32, 1 }
 0x18c   : > { %v10103_v37 = vmul.f32 %v2625_v52, %v2450_v38  ;;  %v1857_v47 = vmul.f32 %v10031_v57, %v1803_v23  ;;  %v1480_v48 = vadd.f32 -1.4531521, %v1426_v45  ;;  %v10109_v26 = vpop.eup %8722  ;;  %v1967_v28 = vmul.f32 %v1913_v51, %v10041_v25 }
 0x18d   : > { %8724 = vrcp.f32 %v1266_v56  ;;  %v1213_v18 = vmul.f32 0.3275911, %v10101_v11  ;;  %v1427_v20 = vmul.f32 1.0614054, %v10109_v26  ;;  %v938_v23 = vmul.f32 %v9914_v16, %v9785_v21 }
 0x18e   : > { %v10114_v35 = vpack.c.bf16 %v10103_v37, %v2827_v32  ;;  %v13583_v1 = vrot.slane %v10103_v37, 1  ;;  %v2127_v44 = vmul.f32 %v8721_v17, %v1857_v47  ;;  %v1534_v57 = vmul.f32 %v10086_v15, %v1480_v48 }
 0x18f   : > { %8726 = vpow2.f32 %v2038_v19  ;;  %v1267_v38 = vadd.f32 1.0, %v1213_v18  ;;  %v1214_v45 = vmul.f32 0.3275911, %v10107_v40  ;;  %v1481_v52 = vadd.f32 -1.4531521, %v1427_v20 }
 0x190   : > { %13690 = vst [vmem:[#allocation21_spill] sm:$0xff] %v10114_v35  ;;  %v10124_v25 = vsel %vm3143_vm8, %v5638_v41, %v13583_v1  ;;  %v2181_v51 = vsub.f32 1.0, %v2127_v44  ;;  %v1588_v32 = vadd.f32 1.4214138, %v1534_v57  ;;  %v2040_v56 = vmul.f32 1.442695, %v1967_v28 }
 0x191   : > { %13691 = vst [vmem:[#allocation22_spill] sm:$0xff] %v10124_v25  ;;  %8728 = vrcp.f32 %v1267_v38  ;;  %v1047_v19 = vmul.f32 0.5, %v9937_v22  ;;  %v1268_v48 = vadd.f32 1.0, %v1214_v45  ;;  %v13587_v21 = vsub.f32 1.0, %v10098_v46  ;;  %v10135_v44 = vpop.f32.mrb[72].mxu0 }
 0x192   : > { %v2289_v17 = vsub.f32 0.0, %v2181_v51  ;;  %v1642_v47 = vmul.f32 %v10086_v15, %v1588_v32  ;;  %v1535_v41 = vmul.f32 %v10109_v26, %v1481_v52  ;;  %v10133_v18 = vadd.f32 %v9934_v60, %v938_v23  ;;  %13693 = vst [vmem:[#allocation24_spill] sm:$0xff] %v10135_v44  ;;  %v8433_v20 = vpop.f32.mrb[73].mxu0 }
 0x193   : > { %8730 = vrcp.f32 %v1268_v48  ;;  %v2871_v22 = vpack.c.bf16 %v10048_v33, %v10048_v33  ;;  %v1915_v45 = vsub.f32 0.0, %v10101_v11  ;;  %v3150_v23 = vrot.slane %v9767_v6, 1 }
 0x194   : > { %13692 = vst [vmem:[#allocation23_spill] sm:$0xff] %v10133_v18  ;;  %v2343_v57 = vsel %vm2235_vm5, %v2181_v51, %v2289_v17  ;;  %v1696_v28 = vadd.f32 -0.28449672, %v1642_v47  ;;  %v1589_v32 = vadd.f32 1.4214138, %v1535_v41  ;;  %8732 = vpow2.f32 %v2040_v56  ;;  %v10145_v51 = vpop.f32.mrb[74].mxu0 }
 0x195   : > { %v2397_v38 = vadd.f32 1.0, %v2343_v57  ;;  %v10142_v52 = vmul.f32 0.70710677, %v10133_v18  ;;  %v3151_v1 = vrot.slane %v2871_v22, 1  ;;  %13694 = vst [vmem:[#allocation25_spill] sm:$0xff] %v10145_v51  ;;  %v10151_v47 = vsub.f32 0.0, %v13587_v21 }
 0x196   : > { %v1750_v31 = vmul.f32 %v10086_v15, %v1696_v28  ;;  %v1643_v56 = vmul.f32 %v10109_v26, %v1589_v32  ;;  %v1914_v41 = vsub.f32 0.0, %v10078_v14  ;;  %v8434_v57 = vpop.f32.mrb[75].mxu0  ;;  %v2630_v28 = vpop.permute.xlu1 %2629  ;;  %v2930_v32 = vshll.u32 %v9767_v6, 16 }
 0x197   : > { %v10147_v17 = vpop.eup %8724  ;;  %v2451_v48 = vmul.f32 %v2397_v38, %v1047_v19  ;;  %v10157_v34 = vand.u32 2147483647, %v10142_v52  ;;  %v10160_v33 = vsel %vm3143_vm8, %v3150_v23, %v3151_v1  ;;  %v1969_v38 = vmul.f32 %v1915_v45, %v10101_v11 }
 0x198   : > { %v1804_v20 = vadd.f32 0.2548296, %v1750_v31  ;;  %v1428_v25 = vmul.f32 1.0614054, %v10147_v17  ;;  %13695 = vst [vmem:[#allocation26_spill] sm:$0xff] %v10160_v33  ;;  %4184 = vmatprep.mubr.bf16.mxu0 %v10160_v33  ;;  %v1916_v21 = vsub.f32 0.0, %v10107_v40 }
 0x199   : > { %v8727_v13 = vpop.eup %8726  ;;  %v10162_v5 = vmul.f32 %v2630_v28, %v2451_v48  ;;  %v1697_v19 = vadd.f32 -0.28449672, %v1643_v56  ;;  %v1215_v1 = vmul.f32 0.3275911, %v10157_v34  ;;  %v2932_v56 = vrot.slane %v2930_v32, 1 }
 0x19a   : > { %v1858_v31 = vmul.f32 %v10086_v15, %v1804_v20  ;;  %v1482_v57 = vadd.f32 -1.4531521, %v1428_v25  ;;  %v2935_v61 = vshll.u32 %v2871_v22, 16  ;;  %v13696_v15 = vrot.slane %v10103_v37, 1  ;;  %v8608_v22 = vld [vmem:[%s13574_s5 + $0xc0] sm:$0xff]  }
 0x19b   : > { %v10171_v23 = vpop.eup %8728  ;;  %v5641_v48 = vrot.slane %v10162_v5, 1  ;;  %v1751_v28 = vmul.f32 %v10109_v26, %v1697_v19  ;;  %v1269_v51 = vadd.f32 1.0, %v1215_v1  ;;  %v2044_v44 = vmul.f32 1.442695, %v1969_v38  ;;  %7993 = vmatprep.subr.bf16.mxu1 %v8608_v22 }
 0x19c   : > { %v2128_v11 = vmul.f32 %v8727_v13, %v1858_v31  ;;  %v1536_v45 = vmul.f32 %v10147_v17, %v1482_v57  ;;  %v1429_v33 = vmul.f32 1.0614054, %v10171_v23  ;;  %v1970_v13 = vmul.f32 %v1916_v21, %v10107_v40 }
 0x19d   : > { %v10180_v25 = vsel %vm3143_vm8, %v13696_v15, %v5641_v48  ;;  %v1805_v20 = vadd.f32 0.2548296, %v1751_v28  ;;  %v10183_v18 = vpop.eup %8730  ;;  %8734 = vrcp.f32 %v1269_v51  ;;  %v2933_v1 = vor.u32 %v2932_v56, %v2928_v53  ;;  %v8609_v48 = vld [vmem:[%s13574_s5 + $0x80] sm:$0xff]   ;;  %v10197_v51 = vpop.f32.mrb[76].mxu0 }
 0x19e   : > { %13697 = vst [vmem:[#allocation27_spill] sm:$0xff] %v10180_v25  ;;  %v2182_v19 = vsub.f32 1.0, %v2128_v11  ;;  %v1483_v32 = vadd.f32 -1.4531521, %v1429_v33  ;;  %v8733_v31 = vpop.eup %8732  ;;  %v1430_v57 = vmul.f32 1.0614054, %v10183_v18  ;;  %v939_v21 = vmul.f32 %v9914_v16, %v9807_v59  ;;  %7994 = vmatpush3.bf16.msra.mxu1 %v8609_v48 }
 0x19f   : > { %v1859_v37 = vmul.f32 %v10109_v26, %v1805_v20  ;;  %v2937_v38 = vrot.slane %v2935_v61, 1  ;;  %v1590_v33 = vadd.f32 1.4214138, %v1536_v45  ;;  %v1968_v26 = vmul.f32 %v1914_v41, %v10078_v14  ;;  %v8437_v53 = vpop.f32.mrb[77].mxu0 }
 0x1a0   : > { %v2290_v28 = vsub.f32 0.0, %v2182_v19  ;;  %v1537_v40 = vmul.f32 %v10171_v23, %v1483_v32  ;;  %v1484_v15 = vadd.f32 -1.4531521, %v1430_v57  ;;  %v2046_v20 = vmul.f32 1.442695, %v1970_v13 }
 0x1a1   : > { %v2129_v11 = vmul.f32 %v8733_v31, %v1859_v37  ;;  %v10201_v61 = vsel %vm2902_vm2, %v2933_v1, %v2937_v38  ;;  %v10208_v59 = vadd.f32 %v9934_v60, %v939_v21  ;;  %8736 = vpow2.f32 %v2044_v44 }
 0x1a2   : > { %13698 = vst [vmem:[#allocation28_spill] sm:$0xff] %v10201_v61  ;;  %v2344_v56 = vsel %vm2236_vm6, %v2182_v19, %v2290_v28  ;;  %v1591_v45 = vadd.f32 1.4214138, %v1537_v40  ;;  %3870 = vmatprep.mubr.bf16.mxu1 %v10201_v61  ;;  %4185 = vmatmul.mubr.bf16.gmra.mrb[112].mxu0 %v10201_v61  ;;  %v1538_v41 = vmul.f32 %v10183_v18, %v1484_v15  ;;  %v1048_v22 = vmul.f32 0.5, %v9997_v9  ;;  %v10226_v40 = vpop.f32.mrb[78].mxu0 }
 0x1a3   : > { %v2398_v32 = vadd.f32 1.0, %v2344_v56  ;;  %v2183_v14 = vsub.f32 1.0, %v2129_v11  ;;  %3871 = vmatmul.mubr.bf16.gmra.mrb[8].mxu1 %v9767_v6  ;;  %v1644_v27 = vmul.f32 %v10147_v17, %v1590_v33  ;;  %v10216_v13 = vmul.f32 0.70710677, %v10208_v59  ;;  %v8438_v53 = vpop.f32.mrb[79].mxu0  ;;  %v2635_v56 = vpop.permute.xlu0 %2634 }
 0x1a4   : > { %v1645_v19 = vmul.f32 %v10171_v23, %v1591_v45  ;;  %vm2237_vm7 = vcmp.ge.f32.partialorder %v10026_v3, 0.0  ;;  %v1592_v37 = vadd.f32 1.4214138, %v1538_v41  ;;  %v940_v44 = vmul.f32 %v9914_v16, %v9816_v55 }
 0x1a5   : > { %v2291_v31 = vsub.f32 0.0, %v2183_v14  ;;  %v2452_v57 = vmul.f32 %v2398_v32, %v1048_v22  ;;  %8738 = vpow2.f32 %v2046_v20  ;;  %v10222_v38 = vand.u32 2147483647, %v10216_v13  ;;  %v2640_v22 = vpop.permute.xlu1 %2639 }
 0x1a6   : > { %v1699_v1 = vadd.f32 -0.28449672, %v1645_v19  ;;  %v1049_v9 = vmul.f32 0.5, %v10019_v29  ;;  %v2042_v28 = vmul.f32 1.442695, %v1968_v26  ;;  %v1646_v33 = vmul.f32 %v10183_v18, %v1592_v37 }
 0x1a7   : > { %v2345_v48 = vsel %vm2237_vm7, %v2183_v14, %v2291_v31  ;;  %v10228_v3 = vpop.eup %8734  ;;  %v1698_v11 = vadd.f32 -0.28449672, %v1644_v27  ;;  %v1216_v15 = vmul.f32 0.3275911, %v10222_v38  ;;  %v10235_v26 = vadd.f32 %v9934_v60, %v940_v44 }
 0x1a8   : > { %v2399_v21 = vadd.f32 1.0, %v2345_v48  ;;  %v1753_v55 = vmul.f32 %v10171_v23, %v1699_v1  ;;  %v1700_v45 = vadd.f32 -0.28449672, %v1646_v33  ;;  %v1431_v29 = vmul.f32 1.0614054, %v10228_v3 }
 0x1a9   : > { %v2830_v20 = vmul.f32 %v2635_v56, %v2452_v57  ;;  %v1270_v41 = vadd.f32 1.0, %v1216_v15  ;;  %v13699_v27 = vsub.f32 1.0, %v10098_v46  ;;  %8740 = vpow2.f32 %v2042_v28 }
 0x1aa   : > { %v2453_v32 = vmul.f32 %v2399_v21, %v1049_v9  ;;  %v1807_v14 = vadd.f32 0.2548296, %v1753_v55  ;;  %v1754_v31 = vmul.f32 %v10183_v18, %v1700_v45  ;;  %v1752_v12 = vmul.f32 %v10147_v17, %v1698_v11  ;;  %v10256_v11 = vpop.f32.mrb[80].mxu0 }
 0x1ab   : > { %v2340_v19 = vsel %vm2232_vm9, %v13699_v27, %v10151_v47  ;;  %8742 = vrcp.f32 %v1270_v41  ;;  %v8737_v44 = vpop.eup %8736  ;;  %v1485_v9 = vadd.f32 -1.4531521, %v1431_v29  ;;  %v10246_v48 = vmul.f32 0.70710677, %v10235_v26  ;;  %v8441_v53 = vpop.f32.mrb[81].mxu0 }
 0x1ac   : > { %v10241_v37 = vmul.f32 %v2640_v22, %v2453_v32  ;;  %v1861_v1 = vmul.f32 %v10171_v23, %v1807_v14  ;;  %v1808_v57 = vadd.f32 0.2548296, %v1754_v31  ;;  %v10250_v46 = vpack.c.bf16 %v9963_v42, %v9963_v42  ;;  %v10269_v32 = vpop.f32.mrb[82].mxu0  ;;  %v10284_v53 = vpop.permute.xlu0 %2644 }
 0x1ad   : > { %v5643_v47 = vrot.slane %v2830_v20, 1  ;;  %v1044_v23 = vmul.f32 0.5, %v9798_v4  ;;  %v10261_v15 = vand.u32 2147483647, %v10246_v48  ;;  %v2394_v42 = vadd.f32 1.0, %v2340_v19  ;;  %v8442_v22 = vpop.f32.mrb[83].mxu0 }
 0x1ae   : > { %13700 = vst [vmem:[#allocation29_spill] sm:$0xff] %v10241_v37  ;;  %v10253_v28 = vpack.c.bf16 %v10241_v37, %v2830_v20  ;;  %v13592_v33 = vrot.slane %v10241_v37, 1  ;;  %v2131_v21 = vmul.f32 %v8737_v44, %v1861_v1  ;;  %v1862_v55 = vmul.f32 %v10183_v18, %v1808_v57 }
 0x1af   : > { %v8739_v56 = vpop.eup %8738  ;;  %v1917_v20 = vsub.f32 0.0, %v10157_v34  ;;  %v1806_v14 = vadd.f32 0.2548296, %v1752_v12  ;;  %v1539_v18 = vmul.f32 %v10228_v3, %v1485_v9  ;;  %v1217_v41 = vmul.f32 0.3275911, %v10261_v15 }
 0x1b0   : > { %13701 = vst [vmem:[#allocation30_spill] sm:$0xff] %v10253_v28  ;;  %v10266_v45 = vsel %vm3143_vm8, %v5643_v47, %v13592_v33  ;;  %v2185_v29 = vsub.f32 1.0, %v2131_v21  ;;  %v2132_v4 = vmul.f32 %v8739_v56, %v1862_v55  ;;  %v1051_v27 = vmul.f32 0.5, %v10073_v2 }
 0x1b1   : > { %13702 = vst [vmem:[#allocation31_spill] sm:$0xff] %v10266_v45  ;;  %v3153_v31 = vrot.slane %v9940_v43, 1  ;;  %v3154_v1 = vrot.slane %v10250_v46, 1  ;;  %vm2239_vm10 = vcmp.ge.f32.partialorder %v10091_v49, 0.0  ;;  %v1918_v57 = vsub.f32 0.0, %v10222_v38 }
 0x1b2   : > { %v2293_v19 = vsub.f32 0.0, %v2185_v29  ;;  %v2186_v44 = vsub.f32 1.0, %v2132_v4  ;;  %v1271_v47 = vadd.f32 1.0, %v1217_v41  ;;  %v1971_v21 = vmul.f32 %v1917_v20, %v10157_v34 }
 0x1b3   : > { %v10280_v9 = vsel %vm3143_vm8, %v3153_v31, %v3154_v1  ;;  %v941_v2 = vmul.f32 %v9914_v16, %v9849_v10  ;;  %v8741_v55 = vpop.eup %8740  ;;  %v1860_v56 = vmul.f32 %v10147_v17, %v1806_v14  ;;  %v1593_v4 = vadd.f32 1.4214138, %v1539_v18  ;;  %v2650_v31 = vpop.permute.xlu1 %2649 }
 0x1b4   : > { %v2347_v12 = vsel %vm2239_vm10, %v2185_v29, %v2293_v19  ;;  %13703 = vst [vmem:[#allocation32_spill] sm:$0xff] %v10280_v9  ;;  %v2294_v49 = vsub.f32 0.0, %v2186_v44  ;;  %4192 = vmatprep.mubr.bf16.mxu0 %v10280_v9  ;;  %vm2240_vm11 = vcmp.ge.f32.partialorder %v10096_v0, 0.0  ;;  %8744 = vrcp.f32 %v1271_v47 }
 0x1b5   : > { %v2401_v22 = vadd.f32 1.0, %v2347_v12  ;;  %v10288_v41 = vpop.eup %8742  ;;  %v10292_v34 = vadd.f32 %v9934_v60, %v941_v2  ;;  %v2448_v29 = vmul.f32 %v2394_v42, %v1044_v23  ;;  %v1972_v19 = vmul.f32 %v1918_v57, %v10222_v38 }
 0x1b6   : > { %v2348_v20 = vsel %vm2240_vm11, %v2186_v44, %v2294_v49  ;;  %v1052_v17 = vmul.f32 0.5, %v10081_v24  ;;  %v2048_v18 = vmul.f32 1.442695, %v1971_v21  ;;  %v1432_v1 = vmul.f32 1.0614054, %v10288_v41  ;;  %v2655_v44 = vpop.permute.xlu0 %2654 }
 0x1b7   : > { %v2455_v10 = vmul.f32 %v2401_v22, %v1051_v27  ;;  %v2402_v14 = vadd.f32 1.0, %v2348_v20  ;;  %v10297_v12 = vmul.f32 %v8741_v55, %v1860_v56  ;;  %v1647_v0 = vmul.f32 %v10228_v3, %v1593_v4 }
 0x1b8   : > { %v10301_v47 = vmul.f32 0.70710677, %v10292_v34  ;;  %v1486_v42 = vadd.f32 -1.4531521, %v1432_v1  ;;  %v2942_v27 = vshll.u32 %v9940_v43, 16  ;;  %v2947_v38 = vshll.u32 %v10250_v46, 16 }
 0x1b9   : > { %v2833_v33 = vmul.f32 %v2650_v31, %v2455_v10  ;;  %v2456_v23 = vmul.f32 %v2402_v14, %v1052_v17  ;;  %v2050_v24 = vmul.f32 1.442695, %v1972_v19  ;;  %v1919_v57 = vsub.f32 0.0, %v10261_v15 }
 0x1ba   : > { %v1164_v21 = vand.u32 2147483647, %v10301_v47  ;;  %v2940_v2 = vshrl.u32 %v9940_v43, 16  ;;  %v1540_v56 = vmul.f32 %v10288_v41, %v1486_v42  ;;  %v2944_v22 = vrot.slane %v2942_v27, 1 }
 0x1bb   : > { %v10308_v55 = vmul.f32 %v2655_v44, %v2456_v23  ;;  %v2949_v49 = vrot.slane %v2947_v38, 1  ;;  %v5648_v4 = vrot.slane %v2833_v33, 1  ;;  %v1701_v10 = vadd.f32 -0.28449672, %v1647_v0  ;;  %v8610_v0 = vld [vmem:[%s13574_s5 + $0xc8] sm:$0xff]  }
 0x1bc   : > { %v1218_v20 = vmul.f32 0.3275911, %v1164_v21  ;;  %v942_v46 = vmul.f32 %v9914_v16, %v9858_v54  ;;  %v1594_v17 = vadd.f32 1.4214138, %v1540_v56  ;;  %v2945_v14 = vor.u32 %v2944_v22, %v2940_v2  ;;  %v8611_v54 = vld [vmem:[%s13574_s5 + $0x88] sm:$0xff]   ;;  %7995 = vmatprep.subr.bf16.mxu1 %v8610_v0 }
 0x1bd   : > { %13704 = vst [vmem:[#allocation33_spill] sm:$0xff] %v10308_v55  ;;  %v10314_v19 = vpack.c.bf16 %v10308_v55, %v2833_v33  ;;  %v13593_v31 = vrot.slane %v10308_v55, 1  ;;  %8746 = vpow2.f32 %v2050_v24  ;;  %v1973_v1 = vmul.f32 %v1919_v57, %v10261_v15  ;;  %7996 = vmatpush3.bf16.msra.mxu1 %v8611_v54 }
 0x1be   : > { %v1272_v23 = vadd.f32 1.0, %v1218_v20  ;;  %v10319_v42 = vadd.f32 %v9934_v60, %v942_v46  ;;  %v10327_v33 = vpop.eup %8744  ;;  %v1648_v15 = vmul.f32 %v10288_v41, %v1594_v17  ;;  %v10336_v38 = vsel %vm2902_vm2, %v2945_v14, %v2949_v49 }
 0x1bf   : > { %13705 = vst [vmem:[#allocation34_spill] sm:$0xff] %v10314_v19  ;;  %v10332_v27 = vsel %vm3143_vm8, %v5648_v4, %v13593_v31  ;;  %13707 = vst [vmem:[#allocation36_spill] sm:$0xff] %v10336_v38  ;;  %v943_v44 = vmul.f32 %v9914_v16, %v9876_v7  ;;  %v1755_v24 = vmul.f32 %v10228_v3, %v1701_v10  ;;  %v1433_v57 = vmul.f32 1.0614054, %v10327_v33 }
 0x1c0   : > { %13706 = vst [vmem:[#allocation35_spill] sm:$0xff] %v10332_v27  ;;  %8748 = vrcp.f32 %v1272_v23  ;;  %3878 = vmatprep.mubr.bf16.mxu1 %v10336_v38  ;;  %4193 = vmatmul.mubr.bf16.gmra.mrb[116].mxu0 %v10336_v38  ;;  %v1702_v2 = vadd.f32 -0.28449672, %v1648_v15  ;;  %v1920_v56 = vsub.f32 0.0, %v1164_v21  ;;  %v10346_v22 = vmul.f32 0.70710677, %v10319_v42 }
 0x1c1   : > { %8750 = vpow2.f32 %v2048_v18  ;;  %3879 = vmatmul.mubr.bf16.gmra.mrb[12].mxu1 %v9940_v43  ;;  %v10349_v7 = vmul.f32 %v10064_v62, %v2448_v29  ;;  %v1487_v49 = vadd.f32 -1.4531521, %v1433_v57  ;;  %v10352_v4 = vadd.f32 %v9934_v60, %v943_v44 }
 0x1c2   : > { %v944_v10 = vmul.f32 %v9914_v16, %v9885_v36  ;;  %v2184_v18 = vsub.f32 1.0, %v10297_v12  ;;  %v1756_v20 = vmul.f32 %v10288_v41, %v1702_v2  ;;  %v2052_v46 = vmul.f32 1.442695, %v1973_v1 }
 0x1c3   : > { %13708 = vst [vmem:[#allocation37_spill] sm:$0xff] %v10349_v7  ;;  %v10359_v17 = vand.u32 2147483647, %v10346_v22  ;;  %v1809_v14 = vadd.f32 0.2548296, %v1755_v24  ;;  %v1541_v62 = vmul.f32 %v10327_v33, %v1487_v49  ;;  %v10369_v36 = vmul.f32 0.5, %v10058_v63 }
 0x1c4   : > { %v10363_v29 = vmul.f32 0.70710677, %v10352_v4  ;;  %v10366_v23 = vadd.f32 %v9934_v60, %v944_v10  ;;  %v1810_v16 = vadd.f32 0.2548296, %v1756_v20  ;;  %v1974_v12 = vmul.f32 %v1920_v56, %v1164_v21  ;;  %v10380_v63 = vpop.f32.mrb[84].mxu0 }
 0x1c5   : > { %v1219_v0 = vmul.f32 0.3275911, %v10359_v17  ;;  %vm2238_vm12 = vcmp.ge.f32.partialorder %v10067_v8, 0.0  ;;  %v10374_v1 = vmul.f32 0.5, %v10208_v59  ;;  %v1595_v54 = vadd.f32 1.4214138, %v1541_v62 }
 0x1c6   : > { %v10377_v15 = vand.u32 2147483647, %v10363_v29  ;;  %v2292_v44 = vsub.f32 0.0, %v2184_v18  ;;  %v1864_v60 = vmul.f32 %v10288_v41, %v1810_v16  ;;  %8752 = vpow2.f32 %v2052_v46  ;;  %v8445_v49 = vpop.f32.mrb[85].mxu0 }
 0x1c7   : > { %v1273_v24 = vadd.f32 1.0, %v1219_v0  ;;  %v8747_v57 = vpop.eup %8746  ;;  %v1863_v21 = vmul.f32 %v10228_v3, %v1809_v14  ;;  %v1649_v2 = vmul.f32 %v10327_v33, %v1595_v54  ;;  %v10386_v59 = vmul.f32 0.70710677, %v10366_v23  ;;  %v10389_v41 = vpop.f32.mrb[86].mxu0 }
 0x1c8   : > { %v1220_v56 = vmul.f32 0.3275911, %v10377_v15  ;;  %v2134_v10 = vmul.f32 %v8747_v57, %v1864_v60  ;;  %vm2242_vm13 = vcmp.ge.f32.partialorder %v10216_v13, 0.0  ;;  %v2054_v20 = vmul.f32 1.442695, %v1974_v12  ;;  %v8446_v14 = vpop.f32.mrb[87].mxu0 }
 0x1c9   : > { %8754 = vrcp.f32 %v1273_v24  ;;  %v1703_v62 = vadd.f32 -0.28449672, %v1649_v2  ;;  %v10394_v3 = vand.u32 2147483647, %v10386_v59  ;;  %v10398_v54 = vsel %vm2238_vm12, %v2184_v18, %v2292_v44 }
 0x1ca   : > { %v10391_v46 = vpop.eup %8748  ;;  %v1274_v16 = vadd.f32 1.0, %v1220_v56  ;;  %v2188_v60 = vsub.f32 1.0, %v2134_v10  ;;  %v10401_v57 = vmul.f32 0.5, %v10235_v26  ;;  %v1921_v31 = vsub.f32 0.0, %v10359_v17  ;;  %v10412_v10 = vpop.f32.mrb[88].mxu0 }
 0x1cb   : > { %v8751_v0 = vpop.eup %8750  ;;  %v1434_v12 = vmul.f32 1.0614054, %v10391_v46  ;;  %v1757_v2 = vmul.f32 %v10327_v33, %v1703_v62  ;;  %v1221_v56 = vmul.f32 0.3275911, %v10394_v3  ;;  %v2875_v8 = vpack.c.bf16 %v10349_v7, %v10349_v7 }
 0x1cc   : > { %v10404_v24 = vmul.f32 %v8751_v0, %v1863_v21  ;;  %8756 = vrcp.f32 %v1274_v16  ;;  %v2296_v49 = vsub.f32 0.0, %v2188_v60  ;;  %v1922_v26 = vsub.f32 0.0, %v10377_v15 }
 0x1cd   : > { %v1488_v14 = vadd.f32 -1.4531521, %v1434_v12  ;;  %v1811_v18 = vadd.f32 0.2548296, %v1757_v2  ;;  %8758 = vpow2.f32 %v2054_v20  ;;  %v1275_v44 = vadd.f32 1.0, %v1221_v56  ;;  %v8449_v12 = vpop.f32.mrb[89].mxu0 }
 0x1ce   : > { %v2350_v21 = vsel %vm2242_vm13, %v2188_v60, %v2296_v49  ;;  %vm2243_vm14 = vcmp.ge.f32.partialorder %v10246_v48, 0.0  ;;  %v3156_v16 = vrot.slane %v10004_v50, 1  ;;  %v3157_v0 = vrot.slane %v2875_v8, 1 }
 0x1cf   : > { %v1542_v62 = vmul.f32 %v10391_v46, %v1488_v14  ;;  %v1865_v20 = vmul.f32 %v10327_v33, %v1811_v18  ;;  %v10422_v2 = vmul.f32 0.5, %v10292_v34  ;;  %8760 = vrcp.f32 %v1275_v44  ;;  %v10433_v34 = vld [vmem:[%s13572_s3] ss:$0 sm:$0xff] }
 0x1d0   : > { %v8753_v56 = vpop.eup %8752  ;;  %v1975_v13 = vmul.f32 %v1921_v31, %v10359_v17  ;;  %v10426_v60 = vsel %vm3143_vm8, %v3156_v16, %v3157_v0  ;;  %v2954_v49 = vshll.u32 %v10004_v50, 16  ;;  %v2404_v14 = vadd.f32 1.0, %v2350_v21  ;;  %v13710_v33 = vld [vmem:[#allocation10_spill] sm:$0xff] }
 0x1d1   : > { %v1596_v27 = vadd.f32 1.4214138, %v1542_v62  ;;  %13709 = vst [vmem:[#allocation38_spill] sm:$0xff] %v10426_v60  ;;  %v2135_v45 = vmul.f32 %v8753_v56, %v1865_v20  ;;  %4200 = vmatprep.mubr.bf16.mxu0 %v10426_v60  ;;  %v2959_v12 = vshll.u32 %v2875_v8, 16  ;;  %v945_v18 = vmul.f32 %v10433_v34, %v13710_v33  ;;  %v13711_v20 = vld [vmem:[#allocation11_spill] sm:$0xff] }
 0x1d2   : > { %v1976_v17 = vmul.f32 %v1922_v26, %v10377_v15  ;;  %v2952_v21 = vshrl.u32 %v10004_v50, 16  ;;  %v2956_v62 = vrot.slane %v2954_v49, 1  ;;  %v946_v56 = vmul.f32 %v10433_v34, %v13711_v20  ;;  %v10448_v33 = vld [vmem:[%s13573_s4] ss:$0 sm:$0xff] }
 0x1d3   : > { %v10437_v44 = vpop.eup %8754  ;;  %v1650_v31 = vmul.f32 %v10391_v46, %v1596_v27  ;;  %v2189_v16 = vsub.f32 1.0, %v2135_v45  ;;  %v2961_v0 = vrot.slane %v2959_v12, 1  ;;  %v2056_v25 = vmul.f32 1.442695, %v1975_v13  ;;  %v10455_v45 = vpop.permute.xlu1 %2659 }
 0x1d4   : > { %v1435_v8 = vmul.f32 1.0614054, %v10437_v44  ;;  %v2957_v37 = vor.u32 %v2956_v62, %v2952_v21  ;;  %v10451_v27 = vadd.f32 %v10448_v33, %v945_v18  ;;  %v13712_v26 = vsub.f32 1.0, %v10404_v24 }
 0x1d5   : > { %v1704_v55 = vadd.f32 -0.28449672, %v1650_v31  ;;  %v2458_v12 = vmul.f32 %v2404_v14, %v10374_v1  ;;  %v2297_v31 = vsub.f32 0.0, %v2189_v16  ;;  %v2058_v20 = vmul.f32 1.442695, %v1976_v17  ;;  %v2665_v14 = vpop.permute.xlu0 %2664 }
 0x1d6   : > { %v10453_v15 = vpop.eup %8756  ;;  %v2295_v49 = vsub.f32 0.0, %v13712_v26  ;;  %v1489_v13 = vadd.f32 -1.4531521, %v1435_v8  ;;  %v10463_v7 = vsel %vm2902_vm2, %v2957_v37, %v2961_v0  ;;  %v10471_v1 = vmul.f32 0.70710677, %v10451_v27 }
 0x1d7   : > { %v1758_v21 = vmul.f32 %v10391_v46, %v1704_v55  ;;  %v1436_v62 = vmul.f32 1.0614054, %v10453_v15  ;;  %13713 = vst [vmem:[#allocation10_spill] sm:$0xff] %v10463_v7  ;;  %v8759_v18 = vpop.eup %8758  ;;  %v2351_v38 = vsel %vm2243_vm14, %v2189_v16, %v2297_v31  ;;  %3886 = vmatprep.mubr.bf16.mxu1 %v10463_v7  ;;  %4201 = vmatmul.mubr.bf16.gmra.mrb[120].mxu0 %v10463_v7  ;;  %vm2241_vm15 = vcmp.ge.f32.partialorder %v10142_v52, 0.0  ;;  %v8613_v52 = vld [vmem:[%s13574_s5 + $0x90] sm:$0xff]  }
 0x1d8   : > { %v1543_v61 = vmul.f32 %v10437_v44, %v1489_v13  ;;  %v10474_v55 = vadd.f32 %v10448_v33, %v946_v56  ;;  %v2405_v37 = vadd.f32 1.0, %v2351_v38  ;;  %8762 = vpow2.f32 %v2056_v25  ;;  %3887 = vmatmul.mubr.bf16.gmra.mrb[16].mxu1 %v10004_v50 }
 0x1d9   : > { %v1812_v17 = vadd.f32 0.2548296, %v1758_v21  ;;  %v1490_v48 = vadd.f32 -1.4531521, %v1436_v62  ;;  %v10478_v16 = vpop.eup %8760  ;;  %v2836_v8 = vmul.f32 %v2665_v14, %v2458_v12  ;;  %v1923_v26 = vsub.f32 0.0, %v10394_v3  ;;  %v10488_v21 = vpop.f32.mrb[90].mxu0 }
 0x1da   : > { %v1597_v0 = vadd.f32 1.4214138, %v1543_v61  ;;  %v10482_v31 = vand.u32 2147483647, %v10471_v1  ;;  %v2459_v56 = vmul.f32 %v2405_v37, %v10401_v57  ;;  %v1437_v25 = vmul.f32 1.0614054, %v10478_v16  ;;  %v2670_v62 = vpop.permute.xlu1 %2669 }
 0x1db   : > { %v1866_v13 = vmul.f32 %v10391_v46, %v1812_v17  ;;  %v1544_v38 = vmul.f32 %v10453_v15, %v1490_v48  ;;  %v10493_v12 = vmul.f32 0.70710677, %v10474_v55  ;;  %v10497_v14 = vpack.c.bf16 %v10162_v5, %v10162_v5  ;;  %v8450_v57 = vpop.f32.mrb[91].mxu0 }
 0x1dc   : > { %v1651_v7 = vmul.f32 %v10437_v44, %v1597_v0  ;;  %v1222_v61 = vmul.f32 0.3275911, %v10482_v31  ;;  %v10499_v46 = vmul.f32 %v2670_v62, %v2459_v56  ;;  %8764 = vpow2.f32 %v2058_v20 }
 0x1dd   : > { %v2136_v37 = vmul.f32 %v8759_v18, %v1866_v13  ;;  %v1598_v17 = vadd.f32 1.4214138, %v1544_v38  ;;  %v5653_v48 = vrot.slane %v2836_v8, 1  ;;  %v10502_v0 = vand.u32 2147483647, %v10493_v12  ;;  %v10511_v18 = vpop.f32.mrb[92].mxu0 }
 0x1de   : > { %v1705_v50 = vadd.f32 -0.28449672, %v1651_v7  ;;  %v1276_v43 = vadd.f32 1.0, %v1222_v61  ;;  %v10505_v60 = vpack.c.bf16 %v10499_v46, %v2836_v8  ;;  %v5654_v9 = vrot.slane %v10499_v46, 1  ;;  %v8453_v61 = vpop.f32.mrb[93].mxu0 }
 0x1df   : > { %v2190_v6 = vsub.f32 1.0, %v2136_v37  ;;  %v1652_v5 = vmul.f32 %v10453_v15, %v1598_v17  ;;  %v1491_v62 = vadd.f32 -1.4531521, %v1437_v25  ;;  %v3160_v20 = vrot.slane %v10497_v14, 1  ;;  %v8612_v37 = vld [vmem:[%s13574_s5 + $0xd0] sm:$0xff]  }
 0x1e0   : > { %13714 = vst [vmem:[#allocation11_spill] sm:$0xff] %v10505_v60  ;;  %v1759_v56 = vmul.f32 %v10437_v44, %v1705_v50  ;;  %8766 = vrcp.f32 %v1276_v43  ;;  %v10516_v7 = vsel %vm3143_vm8, %v5653_v48, %v5654_v9  ;;  %v1223_v38 = vmul.f32 0.3275911, %v10502_v0  ;;  %7997 = vmatprep.subr.bf16.mxu1 %v8612_v37 }
 0x1e1   : > { %13715 = vst [vmem:[#allocation39_spill] sm:$0xff] %v10516_v7  ;;  %v2298_v8 = vsub.f32 0.0, %v2190_v6  ;;  %v1706_v13 = vadd.f32 -0.28449672, %v1652_v5  ;;  %v13716_v57 = vsub.f32 1.0, %v10404_v24  ;;  %vm2244_vm0 = vcmp.ge.f32.partialorder %v10301_v47, 0.0  ;;  %7998 = vmatpush3.bf16.msra.mxu1 %v8613_v52 }
 0x1e2   : > { %v1813_v43 = vadd.f32 0.2548296, %v1759_v56  ;;  %v1977_v25 = vmul.f32 %v1923_v26, %v10394_v3  ;;  %v8763_v17 = vpop.eup %8762  ;;  %v1277_v61 = vadd.f32 1.0, %v1223_v38  ;;  %v3159_v24 = vrot.slane %v10114_v35, 1 }
 0x1e3   : > { %v10523_v50 = vsel %vm2241_vm15, %v13716_v57, %v2295_v49  ;;  %v2352_v48 = vsel %vm2244_vm0, %v2190_v6, %v2298_v8  ;;  %v1760_v5 = vmul.f32 %v10453_v15, %v1706_v13  ;;  %v10535_v49 = vpop.f32.mrb[94].mxu0  ;;  %v1545_v26 = vmul.f32 %v10478_v16, %v1491_v62 }
 0x1e4   : > { %13717 = vst [vmem:[#allocation40_spill] sm:$0xff] %v10535_v49  ;;  %v2406_v47 = vadd.f32 1.0, %v2352_v48  ;;  %v1867_v3 = vmul.f32 %v10437_v44, %v1813_v43  ;;  %v1924_v56 = vsub.f32 0.0, %v10482_v31  ;;  %v8454_v6 = vpop.f32.mrb[95].mxu0  ;;  %8768 = vrcp.f32 %v1277_v61  ;;  %v2675_v43 = vpop.permute.xlu0 %2674 }
 0x1e5   : > { %v1814_v8 = vadd.f32 0.2548296, %v1760_v5  ;;  %v10541_v13 = vsel %vm3143_vm8, %v3159_v24, %v3160_v20  ;;  %v947_v38 = vmul.f32 %v10433_v34, %v9957_v30  ;;  %v1057_v48 = vmul.f32 0.5, %v10319_v42 }
 0x1e6   : > { %13718 = vst [vmem:[#allocation41_spill] sm:$0xff] %v10541_v13  ;;  %v2460_v57 = vmul.f32 %v2406_v47, %v10422_v2  ;;  %v2137_v44 = vmul.f32 %v8763_v17, %v1867_v3  ;;  %vm2245_vm1 = vcmp.ge.f32.partialorder %v10346_v22, 0.0  ;;  %4208 = vmatprep.mubr.bf16.mxu0 %v10541_v13  ;;  %v8765_v62 = vpop.eup %8764  ;;  %v2060_v5 = vmul.f32 1.442695, %v1977_v25 }
 0x1e7   : > { %v1868_v37 = vmul.f32 %v10453_v15, %v1814_v8  ;;  %v10551_v20 = vadd.f32 %v10448_v33, %v947_v38  ;;  %v2966_v30 = vshll.u32 %v10114_v35, 16  ;;  %v1599_v24 = vadd.f32 1.4214138, %v1545_v26 }
 0x1e8   : > { %v10554_v61 = vmul.f32 %v2675_v43, %v2460_v57  ;;  %v2191_v2 = vsub.f32 1.0, %v2137_v44  ;;  %v1978_v42 = vmul.f32 %v1924_v56, %v10482_v31  ;;  %v1925_v52 = vsub.f32 0.0, %v10502_v0 }
 0x1e9   : > { %v2138_v17 = vmul.f32 %v8765_v62, %v1868_v37  ;;  %v10559_v47 = vmul.f32 0.70710677, %v10551_v20  ;;  %v2968_v3 = vrot.slane %v2966_v30, 1  ;;  %v2964_v8 = vshrl.u32 %v10114_v35, 16 }
 0x1ea   : > { %v10561_v15 = vpop.eup %8766  ;;  %v5656_v25 = vrot.slane %v10554_v61, 1  ;;  %v2299_v6 = vsub.f32 0.0, %v2191_v2  ;;  %v2971_v38 = vshll.u32 %v10497_v14, 16  ;;  %vm2246_vm3 = vcmp.ge.f32.partialorder %v10363_v29, 0.0 }
 0x1eb   : > { %v2192_v57 = vsub.f32 1.0, %v2138_v17  ;;  %v1438_v31 = vmul.f32 1.0614054, %v10561_v15  ;;  %v10569_v26 = vand.u32 2147483647, %v10559_v47  ;;  %v1653_v62 = vmul.f32 %v10478_v16, %v1599_v24 }
 0x1ec   : > { %v10574_v56 = vsel %vm3143_vm8, %v5654_v9, %v5656_v25  ;;  %v2353_v44 = vsel %vm2245_vm1, %v2191_v2, %v2299_v6  ;;  %v2969_v43 = vor.u32 %v2968_v3, %v2964_v8  ;;  %v2062_v7 = vmul.f32 1.442695, %v1978_v42  ;;  %v2680_v3 = vpop.permute.xlu1 %2679 }
 0x1ed   : > { %13719 = vst [vmem:[#allocation42_spill] sm:$0xff] %v10574_v56  ;;  %v2407_v14 = vadd.f32 1.0, %v2353_v44  ;;  %v2300_v37 = vsub.f32 0.0, %v2192_v57  ;;  %v1492_v30 = vadd.f32 -1.4531521, %v1438_v31  ;;  %v1979_v13 = vmul.f32 %v1925_v52, %v10502_v0 }
 0x1ee   : > { %v1224_v17 = vmul.f32 0.3275911, %v10569_v26  ;;  %v2973_v49 = vrot.slane %v2971_v38, 1  ;;  %v948_v46 = vmul.f32 %v10433_v34, %v10001_v58  ;;  %v10583_v9 = vpop.eup %8768  ;;  %v1058_v6 = vmul.f32 0.5, %v10352_v4  ;;  %v2685_v4 = vpop.permute.xlu0 %2684 }
 0x1ef   : > { %v2461_v25 = vmul.f32 %v2407_v14, %v1057_v48  ;;  %v2354_v22 = vsel %vm2246_vm3, %v2192_v57, %v2300_v37  ;;  %v1546_v2 = vmul.f32 %v10561_v15, %v1492_v30  ;;  %v1707_v42 = vadd.f32 -0.28449672, %v1653_v62 }
 0x1f0   : > { %v1278_v24 = vadd.f32 1.0, %v1224_v17  ;;  %v2408_v8 = vadd.f32 1.0, %v2354_v22  ;;  %v1439_v0 = vmul.f32 1.0614054, %v10583_v9  ;;  %v10591_v58 = vsel %vm2902_vm2, %v2969_v43, %v2973_v49 }
 0x1f1   : > { %v2839_v52 = vmul.f32 %v2680_v3, %v2461_v25  ;;  %v1600_v38 = vadd.f32 1.4214138, %v1546_v2  ;;  %13720 = vst [vmem:[#allocation43_spill] sm:$0xff] %v10591_v58  ;;  %v2400_v48 = vadd.f32 1.0, %v10398_v54  ;;  %3894 = vmatprep.mubr.bf16.mxu1 %v10591_v58  ;;  %4209 = vmatmul.mubr.bf16.gmra.mrb[124].mxu0 %v10591_v58  ;;  %v2064_v44 = vmul.f32 1.442695, %v1979_v13 }
 0x1f2   : > { %8770 = vrcp.f32 %v1278_v24  ;;  %v2462_v29 = vmul.f32 %v2408_v8, %v1058_v6  ;;  %v1493_v57 = vadd.f32 -1.4531521, %v1439_v0  ;;  %3895 = vmatmul.mubr.bf16.gmra.mrb[20].mxu1 %v10114_v35  ;;  %v10599_v62 = vadd.f32 %v10448_v33, %v948_v46  ;;  %v13723_v2 = vld [vmem:[#allocation23_spill] sm:$0xff] }
 0x1f3   : > { %8772 = vpow2.f32 %v2062_v7  ;;  %v1654_v31 = vmul.f32 %v10561_v15, %v1600_v38  ;;  %v949_v49 = vmul.f32 %v10433_v34, %v10036_v39  ;;  %v2403_v54 = vadd.f32 1.0, %v10523_v50 }
 0x1f4   : > { %v10604_v7 = vmul.f32 %v2685_v4, %v2462_v29  ;;  %8774 = vpow2.f32 %v2060_v5  ;;  %v1547_v43 = vmul.f32 %v10583_v9, %v1493_v57  ;;  %v5658_v14 = vrot.slane %v2839_v52, 1 }
 0x1f5   : > { %v1761_v37 = vmul.f32 %v10478_v16, %v1707_v42  ;;  %v1708_v30 = vadd.f32 -0.28449672, %v1654_v31  ;;  %v10609_v13 = vmul.f32 0.70710677, %v10599_v62  ;;  %v10616_v50 = vadd.f32 %v10448_v33, %v949_v49 }
 0x1f6   : > { %13721 = vst [vmem:[#allocation44_spill] sm:$0xff] %v10604_v7  ;;  %v10612_v17 = vpack.c.bf16 %v10604_v7, %v2839_v52  ;;  %v13613_v46 = vrot.slane %v10604_v7, 1  ;;  %v1601_v39 = vadd.f32 1.4214138, %v1547_v43  ;;  %v2454_v5 = vmul.f32 %v2400_v48, %v10369_v36 }
 0x1f7   : > { %v1762_v25 = vmul.f32 %v10561_v15, %v1708_v30  ;;  %8776 = vpow2.f32 %v2064_v44  ;;  %v1171_v22 = vand.u32 2147483647, %v10609_v13  ;;  %v1053_v24 = vmul.f32 0.5, %v13723_v2  ;;  %v13726_v44 = vld [vmem:[#allocation19_spill] sm:$0xff] }
 0x1f8   : > { %13722 = vst [vmem:[#allocation45_spill] sm:$0xff] %v10612_v17  ;;  %v10625_v3 = vsel %vm3143_vm8, %v5658_v14, %v13613_v46  ;;  %v1655_v6 = vmul.f32 %v10583_v9, %v1601_v39  ;;  %v10629_v8 = vmul.f32 0.70710677, %v10616_v50  ;;  %v1815_v42 = vadd.f32 0.2548296, %v1761_v37  ;;  %v10646_v39 = vpop.f32.mrb[96].mxu0 }
 0x1f9   : > { %13724 = vst [vmem:[#allocation23_spill] sm:$0xff] %v10625_v3  ;;  %v1816_v0 = vadd.f32 0.2548296, %v1762_v25  ;;  %v1225_v36 = vmul.f32 0.3275911, %v1171_v22  ;;  %v2457_v52 = vmul.f32 %v2403_v54, %v1053_v24  ;;  %v10637_v57 = vmul.f32 %v10284_v53, %v2454_v5  ;;  %v8457_v25 = vpop.f32.mrb[97].mxu0 }
 0x1fa   : > { %v1709_v38 = vadd.f32 -0.28449672, %v1655_v6  ;;  %v10632_v48 = vand.u32 2147483647, %v10629_v8  ;;  %v950_v49 = vmul.f32 %v10433_v34, %v13726_v44  ;;  %v1060_v14 = vmul.f32 0.5, %v10451_v27 }
 0x1fb   : > { %13725 = vst [vmem:[#allocation46_spill] sm:$0xff] %v10637_v57  ;;  %v1870_v4 = vmul.f32 %v10561_v15, %v1816_v0  ;;  %v1279_v31 = vadd.f32 1.0, %v1225_v36  ;;  %v1869_v53 = vmul.f32 %v10478_v16, %v1815_v42  ;;  %v10650_v15 = vmul.f32 0.5, %v10474_v55  ;;  %v10655_v36 = vpop.f32.mrb[98].mxu0 }
 0x1fc   : > { %v10634_v29 = vpop.eup %8770  ;;  %v1763_v54 = vmul.f32 %v10583_v9, %v1709_v38  ;;  %v1226_v30 = vmul.f32 0.3275911, %v10632_v48  ;;  %v10653_v24 = vmul.f32 %v10455_v45, %v2457_v52  ;;  %v1927_v44 = vsub.f32 0.0, %v1171_v22  ;;  %v8458_v16 = vpop.f32.mrb[99].mxu0 }
 0x1fd   : > { %v8773_v43 = vpop.eup %8772  ;;  %v1440_v37 = vmul.f32 1.0614054, %v10634_v29  ;;  %8778 = vrcp.f32 %v1279_v31  ;;  %v10658_v46 = vadd.f32 %v10448_v33, %v950_v49  ;;  %v2879_v55 = vpack.c.bf16 %v10637_v57, %v10637_v57  ;;  %v10686_v16 = vpop.f32.mrb[100].mxu0 }
 0x1fe   : > { %v2140_v5 = vmul.f32 %v8773_v43, %v1870_v4  ;;  %v8775_v2 = vpop.eup %8774  ;;  %13727 = vst [vmem:[#allocation19_spill] sm:$0xff] %v10653_v24  ;;  %v1817_v27 = vadd.f32 0.2548296, %v1763_v54  ;;  %v1280_v0 = vadd.f32 1.0, %v1226_v30  ;;  %vm2248_vm4 = vcmp.ge.f32.partialorder %v10471_v1, 0.0 }
 0x1ff   : > { %v1494_v6 = vadd.f32 -1.4531521, %v1440_v37  ;;  %v10665_v4 = vmul.f32 %v8775_v2, %v1869_v53  ;;  %vm2249_vm5 = vcmp.ge.f32.partialorder %v10493_v12, 0.0  ;;  %v10669_v49 = vmul.f32 0.70710677, %v10658_v46 }
 0x200   : > { %v2194_v38 = vsub.f32 1.0, %v2140_v5  ;;  %v1871_v42 = vmul.f32 %v10583_v9, %v1817_v27  ;;  %8780 = vrcp.f32 %v1280_v0  ;;  %v1926_v54 = vsub.f32 0.0, %v10569_v26  ;;  %v8614_v0 = vld [vmem:[%s13574_s5 + $0xd8] sm:$0xff]  }
 0x201   : > { %v1548_v45 = vmul.f32 %v10634_v29, %v1494_v6  ;;  %v8777_v52 = vpop.eup %8776  ;;  %v3162_v37 = vrot.slane %v10253_v28, 1  ;;  %v3163_v1 = vrot.slane %v2879_v55, 1  ;;  %v1981_v5 = vmul.f32 %v1927_v44, %v1171_v22  ;;  %7999 = vmatprep.subr.bf16.mxu1 %v8614_v0 }
 0x202   : > { %v2302_v31 = vsub.f32 0.0, %v2194_v38  ;;  %v2141_v43 = vmul.f32 %v8777_v52, %v1871_v42  ;;  %v10674_v25 = vand.u32 2147483647, %v10669_v49  ;;  %v1928_v27 = vsub.f32 0.0, %v10632_v48  ;;  %v8461_v52 = vpop.f32.mrb[101].mxu0 }
 0x203   : > { %v1602_v9 = vadd.f32 1.4214138, %v1548_v45  ;;  %v10678_v6 = vsel %vm3143_vm8, %v3162_v37, %v3163_v1  ;;  %v2978_v42 = vshll.u32 %v10253_v28, 16  ;;  %v2983_v45 = vshll.u32 %v2879_v55, 16 }
 0x204   : > { %v2356_v30 = vsel %vm2248_vm4, %v2194_v38, %v2302_v31  ;;  %v2195_v2 = vsub.f32 1.0, %v2141_v43  ;;  %13728 = vst [vmem:[#allocation47_spill] sm:$0xff] %v10678_v6  ;;  %v8615_v38 = vld [vmem:[%s13574_s5 + $0x98] sm:$0xff]   ;;  %v1227_v44 = vmul.f32 0.3275911, %v10674_v25  ;;  %4216 = vmatprep.mubr.bf16.mxu0 %v10678_v6  ;;  %v10692_v31 = vpop.permute.xlu1 %2689  ;;  %v1980_v1 = vmul.f32 %v1926_v54, %v10569_v26  ;;  %v2695_v54 = vpop.permute.xlu0 %2694 }
 0x205   : > { %v2410_v53 = vadd.f32 1.0, %v2356_v30  ;;  %v13729_v30 = vld [vmem:[#allocation24_spill] sm:$0xff]  ;;  %v2976_v7 = vshrl.u32 %v10253_v28, 16  ;;  %v2980_v57 = vrot.slane %v2978_v42, 1  ;;  %v2985_v58 = vrot.slane %v2983_v45, 1  ;;  %8000 = vmatpush3.bf16.msra.mxu1 %v8615_v38 }
 0x206   : > { %v2303_v37 = vsub.f32 0.0, %v2195_v2  ;;  %v951_v3 = vmul.f32 %v10433_v34, %v13729_v30  ;;  %v1281_v22 = vadd.f32 1.0, %v1227_v44  ;;  %v1982_v26 = vmul.f32 %v1928_v27, %v10632_v48 }
 0x207   : > { %v2464_v43 = vmul.f32 %v2410_v53, %v1060_v14  ;;  %v10697_v56 = vpop.eup %8778  ;;  %v2068_v53 = vmul.f32 1.442695, %v1981_v5  ;;  %v1656_v0 = vmul.f32 %v10634_v29, %v1602_v9  ;;  %v2981_v30 = vor.u32 %v2980_v57, %v2976_v7 }
 0x208   : > { %v2357_v55 = vsel %vm2249_vm5, %v2195_v2, %v2303_v37  ;;  %v1441_v14 = vmul.f32 1.0614054, %v10697_v56  ;;  %8782 = vrcp.f32 %v1281_v22  ;;  %v13730_v42 = vsub.f32 1.0, %v10665_v4  ;;  %v2700_v9 = vpop.permute.xlu1 %2699 }
 0x209   : > { %v2411_v52 = vadd.f32 1.0, %v2357_v55  ;;  %v2842_v38 = vmul.f32 %v2695_v54, %v2464_v43  ;;  %v10710_v12 = vadd.f32 %v10448_v33, %v951_v3  ;;  %v2066_v2 = vmul.f32 1.442695, %v1980_v1 }
 0x20a   : > { %v10705_v44 = vpop.eup %8780  ;;  %v2301_v45 = vsub.f32 0.0, %v13730_v42  ;;  %v1495_v35 = vadd.f32 -1.4531521, %v1441_v14  ;;  %v10715_v27 = vsel %vm2902_vm2, %v2981_v30, %v2985_v58  ;;  %8784 = vpow2.f32 %v2068_v53  ;;  %v13733_v58 = vld [vmem:[#allocation25_spill] sm:$0xff] }
 0x20b   : > { %v2465_v5 = vmul.f32 %v2411_v52, %v10650_v15  ;;  %v1442_v48 = vmul.f32 1.0614054, %v10705_v44  ;;  %13731 = vst [vmem:[#allocation24_spill] sm:$0xff] %v10715_v27  ;;  %v2070_v57 = vmul.f32 1.442695, %v1982_v26  ;;  %3902 = vmatprep.mubr.bf16.mxu1 %v10715_v27  ;;  %4217 = vmatmul.mubr.bf16.gmra.mrb[128].mxu0 %v10715_v27  ;;  %v952_v37 = vmul.f32 %v10433_v34, %v13733_v58 }
 0x20c   : > { %v1549_v7 = vmul.f32 %v10697_v56, %v1495_v35  ;;  %v10721_v3 = vmul.f32 0.70710677, %v10710_v12  ;;  %v1710_v15 = vadd.f32 -0.28449672, %v1656_v0  ;;  %3903 = vmatmul.mubr.bf16.gmra.mrb[24].mxu1 %v10253_v28  ;;  %v5663_v1 = vrot.slane %v2842_v38, 1  ;;  %v10740_v0 = vpop.f32.mrb[102].mxu0 }
 0x20d   : > { %v10723_v22 = vmul.f32 %v2700_v9, %v2465_v5  ;;  %v1496_v43 = vadd.f32 -1.4531521, %v1442_v48  ;;  %v1929_v55 = vsub.f32 0.0, %v10674_v25  ;;  %v10738_v52 = vadd.f32 %v10448_v33, %v952_v37  ;;  %v8462_v5 = vpop.f32.mrb[103].mxu0 }
 0x20e   : > { %v1603_v35 = vadd.f32 1.4214138, %v1549_v7  ;;  %v10730_v14 = vand.u32 2147483647, %v10721_v3  ;;  %vm2247_vm6 = vcmp.ge.f32.partialorder %v10386_v59, 0.0  ;;  %8786 = vpow2.f32 %v2066_v2 }
 0x20f   : > { %13732 = vst [vmem:[#allocation48_spill] sm:$0xff] %v10723_v22  ;;  %v10733_v53 = vpack.c.bf16 %v10723_v22, %v2842_v38  ;;  %v13619_v26 = vrot.slane %v10723_v22, 1  ;;  %v1550_v54 = vmul.f32 %v10705_v44, %v1496_v43  ;;  %v1764_v48 = vmul.f32 %v10634_v29, %v1710_v15  ;;  %v10777_v22 = vpop.f32.mrb[104].mxu0 }
 0x210   : > { %v1657_v30 = vmul.f32 %v10697_v56, %v1603_v35  ;;  %v1228_v42 = vmul.f32 0.3275911, %v10730_v14  ;;  %v10752_v7 = vmul.f32 0.70710677, %v10738_v52  ;;  %v13736_v43 = vsub.f32 1.0, %v10665_v4 }
 0x211   : > { %13734 = vst [vmem:[#allocation25_spill] sm:$0xff] %v10733_v53  ;;  %v10748_v38 = vsel %vm3143_vm8, %v5663_v1, %v13619_v26  ;;  %v1604_v9 = vadd.f32 1.4214138, %v1550_v54  ;;  %8788 = vpow2.f32 %v2070_v57  ;;  %v1059_v35 = vmul.f32 0.5, %v10366_v23 }
 0x212   : > { %13735 = vst [vmem:[#allocation49_spill] sm:$0xff] %v10748_v38  ;;  %v2355_v59 = vsel %vm2247_vm6, %v13736_v43, %v2301_v45  ;;  %v1711_v2 = vadd.f32 -0.28449672, %v1657_v30  ;;  %v1282_v58 = vadd.f32 1.0, %v1228_v42  ;;  %v10756_v37 = vpop.eup %8782  ;;  %v1983_v1 = vmul.f32 %v1929_v55, %v10674_v25 }
 0x213   : > { %v1658_v5 = vmul.f32 %v10705_v44, %v1604_v9  ;;  %v10762_v15 = vand.u32 2147483647, %v10752_v7  ;;  %v1443_v26 = vmul.f32 1.0614054, %v10756_v37  ;;  %v2881_v4 = vpack.c.bf16 %v10653_v24, %v10653_v24 }
 0x214   : > { %v1765_v54 = vmul.f32 %v10697_v56, %v1711_v2  ;;  %8790 = vrcp.f32 %v1282_v58  ;;  %v2409_v45 = vadd.f32 1.0, %v2355_v59  ;;  %v10769_v57 = vmul.f32 0.5, %v10551_v20  ;;  %v8785_v42 = vpop.eup %8784 }
 0x215   : > { %v1818_v23 = vadd.f32 0.2548296, %v1764_v48  ;;  %v1712_v30 = vadd.f32 -0.28449672, %v1658_v5  ;;  %v1497_v25 = vadd.f32 -1.4531521, %v1443_v26  ;;  %v953_v43 = vmul.f32 %v10433_v34, %v10197_v51 }
 0x216   : > { %v1819_v9 = vadd.f32 0.2548296, %v1765_v54  ;;  %v1229_v55 = vmul.f32 0.3275911, %v10762_v15  ;;  %v1063_v2 = vmul.f32 0.5, %v10599_v62  ;;  %v3165_v59 = vrot.slane %v10314_v19, 1 }
 0x217   : > { %v1766_v58 = vmul.f32 %v10705_v44, %v1712_v30  ;;  %v2072_v38 = vmul.f32 1.442695, %v1983_v1  ;;  %v1551_v48 = vmul.f32 %v10756_v37, %v1497_v25  ;;  %v3166_v26 = vrot.slane %v2881_v4, 1  ;;  %v8465_v54 = vpop.f32.mrb[105].mxu0 }
 0x218   : > { %v1873_v20 = vmul.f32 %v10697_v56, %v1819_v9  ;;  %v1283_v5 = vadd.f32 1.0, %v1229_v55  ;;  %v1872_v24 = vmul.f32 %v10634_v29, %v1818_v23  ;;  %v1930_v51 = vsub.f32 0.0, %v10730_v14  ;;  %v10786_v1 = vpop.f32.mrb[106].mxu0  ;;  %v8787_v30 = vpop.eup %8786 }
 0x219   : > { %v1820_v27 = vadd.f32 0.2548296, %v1766_v58  ;;  %v10784_v62 = vadd.f32 %v10448_v33, %v953_v43  ;;  %v1605_v6 = vadd.f32 1.4214138, %v1551_v48  ;;  %v10789_v56 = vsel %vm3143_vm8, %v3165_v59, %v3166_v26  ;;  %v8466_v9 = vpop.f32.mrb[107].mxu0 }
 0x21a   : > { %v2143_v28 = vmul.f32 %v8785_v42, %v1873_v20  ;;  %8792 = vrcp.f32 %v1283_v5  ;;  %13737 = vst [vmem:[#allocation50_spill] sm:$0xff] %v10789_v56  ;;  %v10791_v25 = vmul.f32 %v2409_v45, %v1059_v35  ;;  %vm2251_vm7 = vcmp.ge.f32.partialorder %v10609_v13, 0.0  ;;  %4224 = vmatprep.mubr.bf16.mxu0 %v10789_v56  ;;  %v10816_v9 = vpop.permute.xlu0 %2704 }
 0x21b   : > { %v1874_v29 = vmul.f32 %v10705_v44, %v1820_v27  ;;  %vm2252_vm9 = vcmp.ge.f32.partialorder %v10629_v8, 0.0  ;;  %v8789_v23 = vpop.eup %8788  ;;  %v1659_v42 = vmul.f32 %v10756_v37, %v1605_v6  ;;  %8794 = vpow2.f32 %v2072_v38 }
 0x21c   : > { %v2197_v55 = vsub.f32 1.0, %v2143_v28  ;;  %v10799_v43 = vmul.f32 0.70710677, %v10784_v62  ;;  %v10801_v58 = vmul.f32 %v8787_v30, %v1872_v24  ;;  %v2990_v45 = vshll.u32 %v10314_v19, 16 }
 0x21d   : > { %v2144_v35 = vmul.f32 %v8789_v23, %v1874_v29  ;;  %v2995_v59 = vshll.u32 %v2881_v4, 16  ;;  %v1984_v27 = vmul.f32 %v1930_v51, %v10730_v14  ;;  %v2988_v28 = vshrl.u32 %v10314_v19, 16 }
 0x21e   : > { %v10804_v20 = vpop.eup %8790  ;;  %v2305_v44 = vsub.f32 0.0, %v2197_v55  ;;  %v10808_v48 = vand.u32 2147483647, %v10799_v43  ;;  %v2992_v5 = vrot.slane %v2990_v45, 1  ;;  %v1713_v54 = vadd.f32 -0.28449672, %v1659_v42 }
 0x21f   : > { %v2198_v6 = vsub.f32 1.0, %v2144_v35  ;;  %v1444_v38 = vmul.f32 1.0614054, %v10804_v20  ;;  %v2997_v24 = vrot.slane %v2995_v59, 1  ;;  %v1931_v4 = vsub.f32 0.0, %v10762_v15 }
 0x220   : > { %v2359_v26 = vsel %vm2251_vm7, %v2197_v55, %v2305_v44  ;;  %v1230_v30 = vmul.f32 0.3275911, %v10808_v48  ;;  %v2993_v23 = vor.u32 %v2992_v5, %v2988_v28  ;;  %v2196_v35 = vsub.f32 1.0, %v10801_v58 }
 0x221   : > { %v2413_v14 = vadd.f32 1.0, %v2359_v26  ;;  %v2306_v51 = vsub.f32 0.0, %v2198_v6  ;;  %v1498_v29 = vadd.f32 -1.4531521, %v1444_v38  ;;  %vm2250_vm10 = vcmp.ge.f32.partialorder %v10559_v47, 0.0 }
 0x222   : > { %v2074_v45 = vmul.f32 1.442695, %v1984_v27  ;;  %v1284_v59 = vadd.f32 1.0, %v1230_v30  ;;  %v954_v13 = vmul.f32 %v10433_v34, %v10226_v40  ;;  %v10826_v26 = vsel %vm2902_vm2, %v2993_v23, %v2997_v24  ;;  %v2710_v40 = vpop.permute.xlu1 %2709 }
 0x223   : > { %v2467_v55 = vmul.f32 %v2413_v14, %v1063_v2  ;;  %v2360_v42 = vsel %vm2252_vm9, %v2198_v6, %v2306_v51  ;;  %v1552_v44 = vmul.f32 %v10804_v20, %v1498_v29  ;;  %13738 = vst [vmem:[#allocation51_spill] sm:$0xff] %v10826_v26  ;;  %v1064_v58 = vmul.f32 0.5, %v10616_v50  ;;  %3910 = vmatprep.mubr.bf16.mxu1 %v10826_v26  ;;  %v2715_v14 = vpop.permute.xlu0 %2714 }
 0x224   : > { %v10828_v38 = vpop.eup %8792  ;;  %v2414_v28 = vadd.f32 1.0, %v2360_v42  ;;  %v1985_v27 = vmul.f32 %v1931_v4, %v10762_v15  ;;  %8796 = vrcp.f32 %v1284_v59  ;;  %4225 = vmatmul.mubr.bf16.gmra.mrb[132].mxu0 %v10826_v26  ;;  %v1767_v8 = vmul.f32 %v10756_v37, %v1713_v54  ;;  %3911 = vmatmul.mubr.bf16.gmra.mrb[28].mxu1 %v10314_v19  ;;  %v8616_v4 = vld [vmem:[%s13574_s5 + $0xe0] sm:$0xff]  }
 0x225   : > { %v1606_v2 = vadd.f32 1.4214138, %v1552_v44  ;;  %v1445_v6 = vmul.f32 1.0614054, %v10828_v38  ;;  %v10838_v5 = vadd.f32 %v10448_v33, %v954_v13  ;;  %v8795_v50 = vpop.eup %8794  ;;  %v2845_v24 = vmul.f32 %v2710_v40, %v2467_v55  ;;  %v8617_v54 = vld [vmem:[%s13574_s5 + $0xa0] sm:$0xff]   ;;  %8001 = vmatprep.subr.bf16.mxu1 %v8616_v4 }
 0x226   : > { %v2468_v30 = vmul.f32 %v2414_v28, %v1064_v58  ;;  %8798 = vpow2.f32 %v2074_v45  ;;  %v955_v15 = vmul.f32 %v10433_v34, %v10256_v11  ;;  %v2304_v51 = vsub.f32 0.0, %v2196_v35  ;;  %8002 = vmatpush3.bf16.msra.mxu1 %v8617_v54 }
 0x227   : > { %v1660_v29 = vmul.f32 %v10804_v20, %v1606_v2  ;;  %v1499_v23 = vadd.f32 -1.4531521, %v1445_v6  ;;  %v1932_v59 = vsub.f32 0.0, %v10808_v48  ;;  %v10852_v45 = vmul.f32 %v10692_v31, %v10791_v25 }
 0x228   : > { %v10854_v11 = vmul.f32 %v2715_v14, %v2468_v30  ;;  %v2076_v13 = vmul.f32 1.442695, %v1985_v27  ;;  %v10857_v55 = vmul.f32 0.70710677, %v10838_v5  ;;  %v1821_v42 = vadd.f32 0.2548296, %v1767_v8 }
 0x229   : > { %13739 = vst [vmem:[#allocation52_spill] sm:$0xff] %v10852_v45  ;;  %v1714_v44 = vadd.f32 -0.28449672, %v1660_v29  ;;  %v1553_v58 = vmul.f32 %v10828_v38, %v1499_v23  ;;  %v10861_v28 = vadd.f32 %v10448_v33, %v955_v15  ;;  %v5668_v40 = vrot.slane %v2845_v24, 1 }
 0x22a   : > { %13740 = vst [vmem:[#allocation53_spill] sm:$0xff] %v10854_v11  ;;  %v10864_v2 = vpack.c.bf16 %v10854_v11, %v2845_v24  ;;  %v13628_v31 = vrot.slane %v10854_v11, 1  ;;  %v1177_v25 = vand.u32 2147483647, %v10857_v55  ;;  %v2358_v27 = vsel %vm2250_vm10, %v2196_v35, %v2304_v51 }
 0x22b   : > { %v1768_v8 = vmul.f32 %v10804_v20, %v1714_v44  ;;  %v1607_v6 = vadd.f32 1.4214138, %v1553_v58  ;;  %v1986_v30 = vmul.f32 %v1932_v59, %v10808_v48  ;;  %8800 = vpow2.f32 %v2076_v13 }
 0x22c   : > { %13741 = vst [vmem:[#allocation54_spill] sm:$0xff] %v10864_v2  ;;  %v10875_v15 = vsel %vm3143_vm8, %v5668_v40, %v13628_v31  ;;  %v1231_v24 = vmul.f32 0.3275911, %v1177_v25  ;;  %v956_v4 = vmul.f32 %v10433_v34, %v10269_v32  ;;  %v10880_v54 = vmul.f32 0.5, %v10658_v46 }
 0x22d   : > { %13742 = vst [vmem:[#allocation55_spill] sm:$0xff] %v10875_v15  ;;  %v1822_v47 = vadd.f32 0.2548296, %v1768_v8  ;;  %v1661_v35 = vmul.f32 %v10828_v38, %v1607_v6  ;;  %v10884_v14 = vmul.f32 0.70710677, %v10861_v28  ;;  %v2412_v51 = vadd.f32 1.0, %v2358_v27 }
 0x22e   : > { %v10886_v48 = vpop.eup %8796  ;;  %v1875_v29 = vmul.f32 %v10756_v37, %v1821_v42  ;;  %v1066_v23 = vmul.f32 0.5, %v10710_v12  ;;  %v1285_v59 = vadd.f32 1.0, %v1231_v24  ;;  %v2078_v46 = vmul.f32 1.442695, %v1986_v30 }
 0x22f   : > { %v1876_v13 = vmul.f32 %v10804_v20, %v1822_v47  ;;  %v1715_v32 = vadd.f32 -0.28449672, %v1661_v35  ;;  %v1446_v34 = vmul.f32 1.0614054, %v10886_v48  ;;  %v10893_v58 = vand.u32 2147483647, %v10884_v14 }
 0x230   : > { %v8799_v44 = vpop.eup %8798  ;;  %8802 = vrcp.f32 %v1285_v59  ;;  %v10896_v40 = vadd.f32 %v10448_v33, %v956_v4  ;;  %v2883_v37 = vpack.c.bf16 %v10554_v61, %v10554_v61  ;;  %vm2254_vm11 = vcmp.ge.f32.partialorder %v10721_v3, 0.0 }
 0x231   : > { %v2146_v42 = vmul.f32 %v8799_v44, %v1876_v13  ;;  %v1769_v12 = vmul.f32 %v10828_v38, %v1715_v32  ;;  %v1500_v20 = vadd.f32 -1.4531521, %v1446_v34  ;;  %v2466_v27 = vmul.f32 %v2412_v51, %v10769_v57 }
 0x232   : > { %v10903_v8 = vmul.f32 %v8795_v50, %v1875_v29  ;;  %v10906_v6 = vmul.f32 0.5, %v10738_v52  ;;  %v1232_v30 = vmul.f32 0.3275911, %v10893_v58  ;;  %8804 = vpow2.f32 %v2078_v46 }
 0x233   : > { %v2200_v33 = vsub.f32 1.0, %v2146_v42  ;;  %v1823_v24 = vadd.f32 0.2548296, %v1769_v12  ;;  %v1554_v4 = vmul.f32 %v10886_v48, %v1500_v20  ;;  %v1933_v61 = vsub.f32 0.0, %v1177_v25 }
 0x234   : > { %v1286_v47 = vadd.f32 1.0, %v1232_v30  ;;  %v10911_v35 = vmul.f32 0.70710677, %v10896_v40  ;;  %v3169_v59 = vrot.slane %v2883_v37, 1  ;;  %v3168_v52 = vrot.slane %v10505_v60, 1 }
 0x235   : > { %v2308_v13 = vsub.f32 0.0, %v2200_v33  ;;  %v1877_v57 = vmul.f32 %v10828_v38, %v1823_v24  ;;  %v1608_v50 = vadd.f32 1.4214138, %v1554_v4  ;;  %v8801_v51 = vpop.eup %8800  ;;  %v10916_v29 = vmul.f32 %v10816_v9, %v2466_v27  ;;  %v8618_v27 = vld [vmem:[%s13574_s5 + $0xe8] sm:$0xff]  }
 0x236   : > { %vm2255_vm12 = vcmp.ge.f32.partialorder %v10752_v7, 0.0  ;;  %8806 = vrcp.f32 %v1286_v47  ;;  %v10920_v32 = vand.u32 2147483647, %v10911_v35  ;;  %v10926_v38 = vsel %vm3143_vm8, %v3168_v52, %v3169_v59  ;;  %v8619_v4 = vld [vmem:[%s13574_s5 + $0xa8] sm:$0xff]   ;;  %8003 = vmatprep.subr.bf16.mxu1 %v8618_v27 }
 0x237   : > { %13743 = vst [vmem:[#allocation56_spill] sm:$0xff] %v10916_v29  ;;  %v2362_v34 = vsel %vm2254_vm11, %v2200_v33, %v2308_v13  ;;  %v2147_v46 = vmul.f32 %v8801_v51, %v1877_v57  ;;  %v1662_v44 = vmul.f32 %v10886_v48, %v1608_v50  ;;  %13744 = vst [vmem:[#allocation57_spill] sm:$0xff] %v10926_v38  ;;  %v2199_v42 = vsub.f32 1.0, %v10903_v8  ;;  %v10942_v57 = vpop.permute.xlu1 %2719 }
 0x238   : > { %v2416_v12 = vadd.f32 1.0, %v2362_v34  ;;  %v1987_v9 = vmul.f32 %v1933_v61, %v1177_v25  ;;  %v1233_v20 = vmul.f32 0.3275911, %v10920_v32  ;;  %4232 = vmatprep.mubr.bf16.mxu0 %v10926_v38  ;;  %v1934_v33 = vsub.f32 0.0, %v10893_v58  ;;  %8004 = vmatpush3.bf16.msra.mxu1 %v8619_v4 }
 0x239   : > { %v2201_v3 = vsub.f32 1.0, %v2147_v46  ;;  %v1716_v30 = vadd.f32 -0.28449672, %v1662_v44  ;;  %v3002_v24 = vshll.u32 %v10505_v60, 16  ;;  %v3000_v59 = vshrl.u32 %v10505_v60, 16 }
 0x23a   : > { %v10939_v47 = vpop.eup %8802  ;;  %v2470_v25 = vmul.f32 %v2416_v12, %v1066_v23  ;;  %v1287_v61 = vadd.f32 1.0, %v1233_v20  ;;  %v3007_v13 = vshll.u32 %v2883_v37, 16  ;;  %v2307_v46 = vsub.f32 0.0, %v2199_v42  ;;  %v2725_v20 = vpop.permute.xlu0 %2724 }
 0x23b   : > { %v2309_v50 = vsub.f32 0.0, %v2201_v3  ;;  %v1770_v52 = vmul.f32 %v10886_v48, %v1716_v30  ;;  %v1447_v51 = vmul.f32 1.0614054, %v10939_v47  ;;  %v3004_v34 = vrot.slane %v3002_v24, 1 }
 0x23c   : > { %v2080_v44 = vmul.f32 1.442695, %v1987_v9  ;;  %8808 = vrcp.f32 %v1287_v61  ;;  %v3009_v23 = vrot.slane %v3007_v13, 1  ;;  %v8805_v12 = vpop.eup %8804  ;;  %vm2253_vm13 = vcmp.ge.f32.partialorder %v10669_v49, 0.0  ;;  %v10956_v9 = vld [vmem:[%s13572_s3] ss:$0 sm:$0xff] }
 0x23d   : > { %v2363_v37 = vsel %vm2255_vm12, %v2201_v3, %v2309_v50  ;;  %v1501_v27 = vadd.f32 -1.4531521, %v1447_v51  ;;  %v1988_v30 = vmul.f32 %v1934_v33, %v10893_v58  ;;  %v3005_v31 = vor.u32 %v3004_v34, %v3000_v59  ;;  %v2730_v59 = vpop.permute.xlu1 %2729 }
 0x23e   : > { %v2848_v11 = vmul.f32 %v2725_v20, %v2470_v25  ;;  %v2417_v24 = vadd.f32 1.0, %v2363_v37  ;;  %v1935_v4 = vsub.f32 0.0, %v10920_v32  ;;  %v957_v61 = vmul.f32 %v10956_v9, %v10380_v63  ;;  %v10974_v63 = vld [vmem:[%s13573_s4] ss:$0 sm:$0xff] }
 0x23f   : > { %v1824_v13 = vadd.f32 0.2548296, %v1770_v52  ;;  %v1555_v7 = vmul.f32 %v10939_v47, %v1501_v27  ;;  %v10962_v3 = vsel %vm2902_vm2, %v3005_v31, %v3009_v23  ;;  %v958_v58 = vmul.f32 %v10956_v9, %v10389_v41  ;;  %v8622_v37 = vld [vmem:[%s13574_s5 + $0x200] sm:$0xff]  }
 0x240   : > { %13745 = vst [vmem:[#allocation58_spill] sm:$0xff] %v10962_v3  ;;  %v10966_v33 = vpop.eup %8806  ;;  %v2471_v25 = vmul.f32 %v2417_v24, %v10906_v6  ;;  %8810 = vpow2.f32 %v2080_v44  ;;  %3918 = vmatprep.mubr.bf16.mxu1 %v10962_v3  ;;  %4233 = vmatmul.mubr.bf16.gmra.mrb[136].mxu0 %v10962_v3  ;;  %v10977_v31 = vadd.f32 %v10974_v63, %v957_v61  ;;  %v2082_v52 = vmul.f32 1.442695, %v1988_v30  ;;  %v8631_v3 = vld [vmem:[%s13574_s5 + $0x228] sm:$0xff]  }
 0x241   : > { %v10981_v41 = vpack.c.bf16 %v10852_v45, %v10852_v45  ;;  %v1609_v50 = vadd.f32 1.4214138, %v1555_v7  ;;  %v1448_v6 = vmul.f32 1.0614054, %v10966_v33  ;;  %3919 = vmatmul.mubr.bf16.gmra.mrb[32].mxu1 %v10505_v60  ;;  %v10986_v51 = vadd.f32 %v10974_v63, %v958_v58  ;;  %8467 = vmatprep.subr.bf16.mxu0 %v8622_v37 }
 0x242   : > { %v10988_v34 = vmul.f32 %v2730_v59, %v2471_v25  ;;  %v1989_v44 = vmul.f32 %v1935_v4, %v10920_v32  ;;  %v10992_v23 = vmul.f32 0.70710677, %v10977_v31  ;;  %v5673_v27 = vrot.slane %v2848_v11, 1  ;;  %8468 = vmatpush3.bf16.msra.mxu0 %v8622_v37  ;;  %v8625_v37 = vld [vmem:[%s13574_s5 + $0x208] sm:$0xff]  }
 0x243   : > { %v3172_v20 = vrot.slane %v10981_v41, 1  ;;  %v1878_v30 = vmul.f32 %v10886_v48, %v1824_v13  ;;  %v1663_v24 = vmul.f32 %v10939_v47, %v1609_v50  ;;  %v1502_v61 = vadd.f32 -1.4531521, %v1448_v6  ;;  %8469 = vmatprep.subr.bf16.mxu0 %v8625_v37 }
 0x244   : > { %13746 = vst [vmem:[#allocation59_spill] sm:$0xff] %v10988_v34  ;;  %v11001_v7 = vpack.c.bf16 %v10988_v34, %v2848_v11  ;;  %v13630_v32 = vrot.slane %v10988_v34, 1  ;;  %v11005_v4 = vand.u32 2147483647, %v10992_v23  ;;  %v3171_v58 = vrot.slane %v10612_v17, 1 }
 0x245   : > { %v11009_v25 = vmul.f32 0.5, %v10784_v62  ;;  %v1717_v59 = vadd.f32 -0.28449672, %v1663_v24  ;;  %v1556_v48 = vmul.f32 %v10966_v33, %v1502_v61  ;;  %v11013_v13 = vmul.f32 0.70710677, %v10986_v51 }
 0x246   : > { %13747 = vst [vmem:[#allocation60_spill] sm:$0xff] %v11001_v7  ;;  %v11015_v11 = vpop.eup %8808  ;;  %v2361_v50 = vsel %vm2253_vm13, %v2199_v42, %v2307_v46  ;;  %v11024_v6 = vsel %vm3143_vm8, %v5673_v27, %v13630_v32  ;;  %v1234_v62 = vmul.f32 0.3275911, %v11005_v4  ;;  %v11028_v24 = vsel %vm3143_vm8, %v3171_v58, %v3172_v20  ;;  %8470 = vmatpush3.bf16.msra.mxu0 %v8625_v37 }
 0x247   : > { %13748 = vst [vmem:[#allocation61_spill] sm:$0xff] %v11024_v6  ;;  %13749 = vst [vmem:[#allocation62_spill] sm:$0xff] %v11028_v24  ;;  %v1771_v61 = vmul.f32 %v10939_v47, %v1717_v59  ;;  %v1610_v8 = vadd.f32 1.4214138, %v1556_v48  ;;  %8812 = vpow2.f32 %v2082_v52  ;;  %v1449_v49 = vmul.f32 1.0614054, %v11015_v11  ;;  %4240 = vmatprep.mubr.bf16.mxu0 %v11028_v24 }
 0x248   : > { %v11036_v42 = vmul.f32 %v8805_v12, %v1878_v30  ;;  %v2084_v46 = vmul.f32 1.442695, %v1989_v44  ;;  %v1288_v27 = vadd.f32 1.0, %v1234_v62  ;;  %v11039_v32 = vand.u32 2147483647, %v11013_v13  ;;  %v8626_v44 = vld [vmem:[%s13574_s5 + $0x210] sm:$0xff]  }
 0x249   : > { %v11042_v20 = vmul.f32 0.5, %v10838_v5  ;;  %v1825_v58 = vadd.f32 0.2548296, %v1771_v61  ;;  %v1664_v59 = vmul.f32 %v10966_v33, %v1610_v8  ;;  %v1503_v48 = vadd.f32 -1.4531521, %v1449_v49  ;;  %v8620_v49 = vld [vmem:[%s13574_s5 + $0xf0] sm:$0xff]   ;;  %8471 = vmatprep.subr.bf16.mxu0 %v8626_v44 }
 0x24a   : > { %v8811_v52 = vpop.eup %8810  ;;  %v2415_v6 = vadd.f32 1.0, %v2361_v50  ;;  %vm2257_vm14 = vcmp.ge.f32.partialorder %v10857_v55, 0.0  ;;  %8814 = vrcp.f32 %v1288_v27  ;;  %v1235_v12 = vmul.f32 0.3275911, %v11039_v32  ;;  %8472 = vmatpush3.bf16.msra.mxu0 %v8626_v44  ;;  %8005 = vmatprep.subr.bf16.mxu1 %v8620_v49 }
 0x24b   : > { %v1879_v30 = vmul.f32 %v10939_v47, %v1825_v58  ;;  %v11052_v5 = vmul.f32 0.5, %v10861_v28  ;;  %v1718_v62 = vadd.f32 -0.28449672, %v1664_v59  ;;  %v1557_v61 = vmul.f32 %v11015_v11, %v1503_v48  ;;  %v8621_v47 = vld [vmem:[%s13574_s5 + $0xb0] sm:$0xff]   ;;  %v8623_v28 = vld [vmem:[%s13574_s5 + $0xf8] sm:$0xff]  }
 0x24c   : > { %8816 = vpow2.f32 %v2084_v46  ;;  %v1289_v50 = vadd.f32 1.0, %v1235_v12  ;;  %v959_v8 = vmul.f32 %v10956_v9, %v10412_v10  ;;  %v1936_v59 = vsub.f32 0.0, %v11005_v4  ;;  %v8627_v10 = vld [vmem:[%s13574_s5 + $0x218] sm:$0xff]   ;;  %8006 = vmatpush3.bf16.msra.mxu1 %v8621_v47 }
 0x24d   : > { %v2149_v27 = vmul.f32 %v8811_v52, %v1879_v30  ;;  %v1772_v46 = vmul.f32 %v10966_v33, %v1718_v62  ;;  %v1611_v58 = vadd.f32 1.4214138, %v1557_v61  ;;  %v11073_v48 = vmul.f32 %v2415_v6, %v10880_v54  ;;  %v8628_v52 = vld [vmem:[%s13574_s5 + $0x220] sm:$0xff]   ;;  %8473 = vmatprep.subr.bf16.mxu0 %v8627_v10  ;;  %8007 = vmatprep.subr.bf16.mxu1 %v8623_v28 }
 0x24e   : > { %v11076_v12 = vmul.f32 0.5, %v10896_v40  ;;  %8818 = vrcp.f32 %v1289_v50  ;;  %v11079_v37 = vadd.f32 %v10974_v63, %v959_v8  ;;  %vm2256_vm15 = vcmp.ge.f32.partialorder %v10799_v43, 0.0  ;;  %v8624_v40 = vld [vmem:[%s13574_s5 + $0xb8] sm:$0xff]   ;;  %8474 = vmatpush3.bf16.msra.mxu0 %v8627_v10 }
 0x24f   : > { %v2203_v44 = vsub.f32 1.0, %v2149_v27  ;;  %v1826_v30 = vadd.f32 0.2548296, %v1772_v46  ;;  %v1665_v62 = vmul.f32 %v11015_v11, %v1611_v58  ;;  %v11087_v54 = vmul.f32 0.5, %v10977_v31  ;;  %v8629_v31 = vld [vmem:[%s13574_s5 + $0x1c0] sm:$0xff]   ;;  %8475 = vmatprep.subr.bf16.mxu0 %v8628_v52 }
 0x250   : > { %v13750_v6 = vsub.f32 1.0, %v11036_v42  ;;  %vm2258_vm0 = vcmp.ge.f32.partialorder %v10884_v14, 0.0  ;;  %v1937_v50 = vsub.f32 0.0, %v11039_v32  ;;  %v11097_v8 = vmul.f32 0.70710677, %v11079_v37  ;;  %8008 = vmatpush3.bf16.msra.mxu1 %v8624_v40 }
 0x251   : > { %v3014_v49 = vshll.u32 %v10612_v17, 16  ;;  %v8813_v47 = vpop.eup %8812  ;;  %v2311_v27 = vsub.f32 0.0, %v2203_v44  ;;  %v1880_v46 = vmul.f32 %v10966_v33, %v1826_v30  ;;  %v1719_v58 = vadd.f32 -0.28449672, %v1665_v62  ;;  %8217 = vmatprep.subr.bf16.mxu1 %v8629_v31 }
 0x252   : > { %v2310_v61 = vsub.f32 0.0, %v13750_v6  ;;  %v1990_v6 = vmul.f32 %v1936_v59, %v11005_v4  ;;  %v11106_v34 = vand.u32 2147483647, %v11097_v8  ;;  %v3012_v15 = vshrl.u32 %v10612_v17, 16  ;;  %8476 = vmatpush3.bf16.msra.mxu0 %v8628_v52 }
 0x253   : > { %v3016_v45 = vrot.slane %v3014_v49, 1  ;;  %v3019_v28 = vshll.u32 %v10981_v41, 16  ;;  %v2365_v33 = vsel %vm2257_vm14, %v2203_v44, %v2311_v27  ;;  %v2150_v30 = vmul.f32 %v8813_v47, %v1880_v46  ;;  %8477 = vmatprep.subr.bf16.mxu0 %v8631_v3 }
 0x254   : > { %v1773_v4 = vmul.f32 %v11015_v11, %v1719_v58  ;;  %v960_v59 = vmul.f32 %v10956_v9, %v10488_v21  ;;  %v11118_v10 = vpop.eup %8814  ;;  %v2419_v62 = vadd.f32 1.0, %v2365_v33  ;;  %v1991_v41 = vmul.f32 %v1937_v50, %v11039_v32 }
 0x255   : > { %v1236_v49 = vmul.f32 0.3275911, %v11106_v34  ;;  %v3017_v26 = vor.u32 %v3016_v45, %v3012_v15  ;;  %v2204_v60 = vsub.f32 1.0, %v2150_v30  ;;  %v1450_v55 = vmul.f32 1.0614054, %v11118_v10  ;;  %v8632_v45 = vld [vmem:[%s13574_s5 + $0x230] sm:$0xff]   ;;  %v11134_v15 = vpop.permute.xlu0 %2734  ;;  %v2740_v30 = vpop.permute.xlu1 %2739 }
 0x256   : > { %v1827_v19 = vadd.f32 0.2548296, %v1773_v4  ;;  %v3021_v44 = vrot.slane %v3019_v28, 1  ;;  %v8817_v47 = vpop.eup %8816  ;;  %v2473_v27 = vmul.f32 %v2419_v62, %v11042_v20  ;;  %vm2259_vm1 = vcmp.ge.f32.partialorder %v10911_v35, 0.0  ;;  %8478 = vmatpush3.bf16.msra.mxu0 %v8631_v3  ;;  %v11184_v35 = vpop.f32.mrb[0].mxu1 }
 0x257   : > { %v11126_v21 = vmul.f32 0.5, %v10986_v51  ;;  %v1290_v40 = vadd.f32 1.0, %v1236_v49  ;;  %v11129_v32 = vadd.f32 %v10974_v63, %v960_v59  ;;  %v2312_v52 = vsub.f32 0.0, %v2204_v60  ;;  %8479 = vmatprep.subr.bf16.mxu0 %v8632_v45 }
 0x258   : > { %v1881_v50 = vmul.f32 %v11015_v11, %v1827_v19  ;;  %v1504_v20 = vadd.f32 -1.4531521, %v1450_v55  ;;  %v11138_v31 = vsel %vm2902_vm2, %v3017_v26, %v3021_v44  ;;  %v11140_v51 = vpop.eup %8818  ;;  %v13752_v46 = vsub.f32 1.0, %v11036_v42  ;;  %v13753_v55 = vld [vmem:[#allocation40_spill] sm:$0xff] }
 0x259   : > { %13751 = vst [vmem:[#allocation63_spill] sm:$0xff] %v11138_v31  ;;  %v2086_v28 = vmul.f32 1.442695, %v1990_v6  ;;  %v2088_v33 = vmul.f32 1.442695, %v1991_v41  ;;  %8820 = vrcp.f32 %v1290_v40  ;;  %3926 = vmatprep.mubr.bf16.mxu1 %v11138_v31  ;;  %4241 = vmatmul.mubr.bf16.gmra.mrb[140].mxu0 %v11138_v31  ;;  %v2366_v19 = vsel %vm2258_vm0, %v2204_v60, %v2312_v52  ;;  %v8633_v60 = vld [vmem:[%s13574_s5 + $0x238] sm:$0xff]  }
 0x25a   : > { %v2364_v58 = vsel %vm2256_vm15, %v13752_v46, %v2310_v61  ;;  %v2151_v26 = vmul.f32 %v8817_v47, %v1881_v50  ;;  %v1558_v11 = vmul.f32 %v11118_v10, %v1504_v20  ;;  %v1451_v4 = vmul.f32 1.0614054, %v11140_v51  ;;  %3927 = vmatmul.mubr.bf16.gmra.mrb[36].mxu1 %v10612_v17  ;;  %v2745_v47 = vpop.permute.xlu0 %2744  ;;  %8480 = vmatpush3.bf16.msra.mxu0 %v8632_v45 }
 0x25b   : > { %v2851_v43 = vmul.f32 %v2740_v30, %v2473_v27  ;;  %v2420_v42 = vadd.f32 1.0, %v2366_v19  ;;  %v1938_v61 = vsub.f32 0.0, %v11106_v34  ;;  %v11155_v6 = vmul.f32 0.70710677, %v11129_v32  ;;  %8481 = vmatprep.subr.bf16.mxu0 %v8633_v60 }
 0x25c   : > { %v2205_v14 = vsub.f32 1.0, %v2151_v26  ;;  %v1612_v59 = vadd.f32 1.4214138, %v1558_v11  ;;  %v1505_v62 = vadd.f32 -1.4531521, %v1451_v4  ;;  %v961_v41 = vmul.f32 %v10956_v9, %v10511_v18 }
 0x25d   : > { %v2474_v3 = vmul.f32 %v2420_v42, %v11052_v5  ;;  %8822 = vpow2.f32 %v2086_v28  ;;  %v1183_v49 = vand.u32 2147483647, %v11155_v6  ;;  %v962_v44 = vmul.f32 %v10956_v9, %v13753_v55 }
 0x25e   : > { %v2313_v27 = vsub.f32 0.0, %v2205_v14  ;;  %v1666_v40 = vmul.f32 %v11118_v10, %v1612_v59  ;;  %v1559_v52 = vmul.f32 %v11140_v51, %v1505_v62  ;;  %v11169_v50 = vadd.f32 %v10974_v63, %v961_v41  ;;  %8482 = vmatpush3.bf16.msra.mxu0 %v8633_v60  ;;  %v11192_v41 = vpop.f32.mrb[1].mxu1 }
 0x25f   : > { %v2852_v20 = vmul.f32 %v2745_v47, %v2474_v3  ;;  %8824 = vpow2.f32 %v2088_v33  ;;  %v1992_v18 = vmul.f32 %v1938_v61, %v11106_v34  ;;  %v1237_v5 = vmul.f32 0.3275911, %v1183_v49  ;;  %v2750_v3 = vpop.permute.xlu1 %2749 }
 0x260   : > { %v5678_v46 = vrot.slane %v2851_v43, 1  ;;  %v2367_v28 = vsel %vm2259_vm1, %v2205_v14, %v2313_v27  ;;  %v1720_v30 = vadd.f32 -0.28449672, %v1666_v40  ;;  %v1613_v19 = vadd.f32 1.4214138, %v1559_v52 }
 0x261   : > { %v11174_v26 = vpack.c.bf16 %v2852_v20, %v2851_v43  ;;  %v5679_v11 = vrot.slane %v2852_v20, 1  ;;  %v2421_v4 = vadd.f32 1.0, %v2367_v28  ;;  %v1291_v42 = vadd.f32 1.0, %v1237_v5  ;;  %v11203_v20 = vpop.f32.mrb[2].mxu1 }
 0x262   : > { %v1774_v59 = vmul.f32 %v11118_v10, %v1720_v30  ;;  %v1667_v45 = vmul.f32 %v11140_v51, %v1613_v19  ;;  %v11179_v33 = vmul.f32 0.70710677, %v11169_v50  ;;  %v11182_v34 = vadd.f32 %v10974_v63, %v962_v44 }
 0x263   : > { %13754 = vst [vmem:[#allocation40_spill] sm:$0xff] %v11174_v26  ;;  %v11186_v61 = vpop.eup %8820  ;;  %v11189_v43 = vsel %vm3143_vm8, %v5678_v46, %v5679_v11  ;;  %v2475_v14 = vmul.f32 %v2421_v4, %v11076_v12  ;;  %v2090_v62 = vmul.f32 1.442695, %v1992_v18  ;;  %8826 = vrcp.f32 %v1291_v42  ;;  %v11210_v46 = vpop.f32.mrb[3].mxu1 }
 0x264   : > { %13755 = vst [vmem:[#allocation64_spill] sm:$0xff] %v11189_v43  ;;  %v11196_v55 = vmul.f32 %v10942_v57, %v11073_v48  ;;  %v1828_v44 = vadd.f32 0.2548296, %v1774_v59  ;;  %v1721_v60 = vadd.f32 -0.28449672, %v1667_v45  ;;  %v2418_v27 = vadd.f32 1.0, %v2364_v58 }
 0x265   : > { %v1452_v47 = vmul.f32 1.0614054, %v11186_v61  ;;  %v11199_v40 = vmul.f32 %v2750_v3, %v2475_v14  ;;  %vm2260_vm3 = vcmp.ge.f32.partialorder %v10992_v23, 0.0  ;;  %v1939_v52 = vsub.f32 0.0, %v1183_v49 }
 0x266   : > { %13756 = vst [vmem:[#allocation65_spill] sm:$0xff] %v11196_v55  ;;  %v1184_v12 = vand.u32 2147483647, %v11179_v33  ;;  %v1882_v18 = vmul.f32 %v11118_v10, %v1828_v44  ;;  %v1775_v5 = vmul.f32 %v11140_v51, %v1721_v60  ;;  %v11208_v48 = vmul.f32 0.70710677, %v11182_v34 }
 0x267   : > { %v1506_v57 = vadd.f32 -1.4531521, %v1452_v47  ;;  %v8823_v58 = vpop.eup %8822  ;;  %v5681_v28 = vrot.slane %v11199_v40, 1  ;;  %8828 = vpow2.f32 %v2090_v62  ;;  %vm2261_vm4 = vcmp.ge.f32.partialorder %v11013_v13, 0.0 }
 0x268   : > { %v1238_v30 = vmul.f32 0.3275911, %v1184_v12  ;;  %v1940_v19 = vsub.f32 0.0, %v1184_v12  ;;  %v2152_v4 = vmul.f32 %v8823_v58, %v1882_v18  ;;  %v1829_v42 = vadd.f32 0.2548296, %v1775_v5 }
 0x269   : > { %v1560_v59 = vmul.f32 %v11186_v61, %v1506_v57  ;;  %v11215_v10 = vand.u32 2147483647, %v11208_v48  ;;  %v8825_v45 = vpop.eup %8824  ;;  %v11218_v14 = vsel %vm3143_vm8, %v5679_v11, %v5681_v28  ;;  %v1993_v3 = vmul.f32 %v1939_v52, %v1183_v49  ;;  %v11231_v28 = vpop.f32.mrb[108].mxu0 }
 0x26a   : > { %13757 = vst [vmem:[#allocation66_spill] sm:$0xff] %v11218_v14  ;;  %v1292_v44 = vadd.f32 1.0, %v1238_v30  ;;  %v2887_v62 = vpack.c.bf16 %v10916_v29, %v10916_v29  ;;  %v2206_v60 = vsub.f32 1.0, %v2152_v4  ;;  %v1883_v47 = vmul.f32 %v11140_v51, %v1829_v42  ;;  %v11233_v49 = vpop.f32.mrb[4].mxu1  ;;  %v11236_v42 = vpop.f32.mrb[109].mxu0 }
 0x26b   : > { %v1614_v18 = vadd.f32 1.4214138, %v1560_v59  ;;  %v1239_v5 = vmul.f32 0.3275911, %v11215_v10  ;;  %v11226_v57 = vmul.f32 0.5, %v11079_v37  ;;  %v11229_v58 = vmul.f32 0.5, %v11129_v32 }
 0x26c   : > { %8830 = vrcp.f32 %v1292_v44  ;;  %v1994_v11 = vmul.f32 %v1940_v19, %v1184_v12  ;;  %v2314_v52 = vsub.f32 0.0, %v2206_v60  ;;  %v2153_v30 = vmul.f32 %v8825_v45, %v1883_v47  ;;  %v11238_v59 = vpop.f32.mrb[5].mxu1  ;;  %v11246_v14 = vpop.f32.mrb[110].mxu0 }
 0x26d   : > { %v1668_v4 = vmul.f32 %v11186_v61, %v1614_v18  ;;  %v1293_v51 = vadd.f32 1.0, %v1239_v5  ;;  %v11240_v37 = vpop.eup %8826  ;;  %v11243_v32 = vmul.f32 %v2418_v27, %v11009_v25  ;;  %v2092_v44 = vmul.f32 1.442695, %v1993_v3  ;;  %v11248_v43 = vpop.f32.mrb[6].mxu1 }
 0x26e   : > { %v3174_v12 = vrot.slane %v10733_v53, 1  ;;  %v3175_v19 = vrot.slane %v2887_v62, 1  ;;  %v2368_v45 = vsel %vm2260_vm3, %v2206_v60, %v2314_v52  ;;  %v2207_v47 = vsub.f32 1.0, %v2153_v30  ;;  %v11253_v29 = vpop.f32.mrb[111].mxu0  ;;  %v11258_v3 = vpop.f32.mrb[7].mxu1 }
 0x26f   : > { %v1722_v18 = vadd.f32 -0.28449672, %v1668_v4  ;;  %v1453_v5 = vmul.f32 1.0614054, %v11240_v37  ;;  %v2422_v31 = vadd.f32 1.0, %v2368_v45  ;;  %8832 = vrcp.f32 %v1293_v51 }
 0x270   : > { %v2094_v25 = vmul.f32 1.442695, %v1994_v11  ;;  %v11256_v27 = vsel %vm3143_vm8, %v3174_v12, %v3175_v19  ;;  %v2315_v17 = vsub.f32 0.0, %v2207_v47  ;;  %v3026_v23 = vshll.u32 %v10733_v53, 16 }
 0x271   : > { %13758 = vst [vmem:[#allocation67_spill] sm:$0xff] %v11256_v27  ;;  %v1776_v24 = vmul.f32 %v11186_v61, %v1722_v18  ;;  %v1507_v38 = vadd.f32 -1.4531521, %v1453_v5  ;;  %4248 = vmatprep.mubr.bf16.mxu0 %v11256_v27  ;;  %v8829_v60 = vpop.eup %8828  ;;  %v2476_v52 = vmul.f32 %v2422_v31, %v11087_v54  ;;  %v3024_v30 = vshrl.u32 %v10733_v53, 16  ;;  %v2755_v18 = vpop.permute.xlu0 %2754 }
 0x272   : > { %v3031_v11 = vshll.u32 %v2887_v62, 16  ;;  %v963_v4 = vmul.f32 %v10956_v9, %v10646_v39  ;;  %v2369_v51 = vsel %vm2261_vm4, %v2207_v47, %v2315_v17  ;;  %v3028_v45 = vrot.slane %v3026_v23, 1  ;;  %v2760_v23 = vpop.permute.xlu1 %2759 }
 0x273   : > { %v1830_v12 = vadd.f32 0.2548296, %v1776_v24  ;;  %v1561_v19 = vmul.f32 %v11240_v37, %v1507_v38  ;;  %v2423_v5 = vadd.f32 1.0, %v2369_v51  ;;  %vm2262_vm5 = vcmp.ge.f32.partialorder %v11097_v8, 0.0 }
 0x274   : > { %v1941_v27 = vsub.f32 0.0, %v11215_v10  ;;  %v3033_v54 = vrot.slane %v3031_v11, 1  ;;  %v11273_v31 = vadd.f32 %v10974_v63, %v963_v4  ;;  %v2854_v62 = vmul.f32 %v2755_v18, %v2476_v52 }
 0x275   : > { %v1884_v39 = vmul.f32 %v11186_v61, %v1830_v12  ;;  %v1615_v56 = vadd.f32 1.4214138, %v1561_v19  ;;  %v3029_v13 = vor.u32 %v3028_v45, %v3024_v30  ;;  %v2477_v38 = vmul.f32 %v2423_v5, %v11126_v21 }
 0x276   : > { %v11276_v17 = vpop.eup %8830  ;;  %8834 = vpow2.f32 %v2092_v44  ;;  %v11280_v24 = vmul.f32 0.70710677, %v11273_v31  ;;  %v964_v47 = vmul.f32 %v10956_v9, %v10655_v36  ;;  %v1995_v21 = vmul.f32 %v1941_v27, %v11215_v10 }
 0x277   : > { %v2154_v11 = vmul.f32 %v8829_v60, %v1884_v39  ;;  %v1669_v4 = vmul.f32 %v11240_v37, %v1615_v56  ;;  %v1454_v52 = vmul.f32 1.0614054, %v11276_v17  ;;  %v11287_v61 = vsel %vm2902_vm2, %v3029_v13, %v3033_v54  ;;  %v11308_v39 = vpop.f32.mrb[112].mxu0  ;;  %v11310_v13 = vpop.f32.mrb[8].mxu1 }
 0x278   : > { %13759 = vst [vmem:[#allocation68_spill] sm:$0xff] %v11287_v61  ;;  %v11289_v30 = vmul.f32 %v2760_v23, %v2477_v38  ;;  %8836 = vpow2.f32 %v2094_v25  ;;  %3934 = vmatprep.mubr.bf16.mxu1 %v11287_v61  ;;  %4249 = vmatmul.mubr.bf16.gmra.mrb[144].mxu0 %v11287_v61  ;;  %v1186_v36 = vand.u32 2147483647, %v11280_v24  ;;  %v5683_v44 = vrot.slane %v2854_v62, 1  ;;  %13760 = vst [vmem:[#allocation69_spill] sm:$0xff] %v11310_v13 }
 0x279   : > { %v2208_v60 = vsub.f32 1.0, %v2154_v11  ;;  %v1723_v51 = vadd.f32 -0.28449672, %v1669_v4  ;;  %v1508_v56 = vadd.f32 -1.4531521, %v1454_v52  ;;  %3935 = vmatmul.mubr.bf16.gmra.mrb[40].mxu1 %v10733_v53  ;;  %v11296_v12 = vpop.eup %8832  ;;  %v11303_v27 = vadd.f32 %v10974_v63, %v964_v47  ;;  %v11319_v11 = vpop.f32.mrb[113].mxu0 }
 0x27a   : > { %v11299_v19 = vpack.c.bf16 %v11289_v30, %v2854_v62  ;;  %v5684_v25 = vrot.slane %v11289_v30, 1  ;;  %v1240_v10 = vmul.f32 0.3275911, %v1186_v36  ;;  %v1455_v54 = vmul.f32 1.0614054, %v11296_v12  ;;  %v11321_v4 = vpop.f32.mrb[9].mxu1 }
 0x27b   : > { %v2316_v45 = vsub.f32 0.0, %v2208_v60  ;;  %v1777_v18 = vmul.f32 %v11240_v37, %v1723_v51  ;;  %v1562_v5 = vmul.f32 %v11276_v17, %v1508_v56  ;;  %v2096_v38 = vmul.f32 1.442695, %v1995_v21  ;;  %13762 = vst [vmem:[#allocation71_spill] sm:$0xff] %v11321_v4 }
 0x27c   : > { %v11313_v62 = vsel %vm3143_vm8, %v5683_v44, %v5684_v25  ;;  %v1294_v23 = vadd.f32 1.0, %v1240_v10  ;;  %v11317_v47 = vpack.c.bf16 %v11196_v55, %v11196_v55  ;;  %v1509_v56 = vadd.f32 -1.4531521, %v1455_v54  ;;  %v11328_v10 = vpop.f32.mrb[114].mxu0 }
 0x27d   : > { %13761 = vst [vmem:[#allocation70_spill] sm:$0xff] %v11313_v62  ;;  %v2370_v52 = vsel %vm2262_vm5, %v2208_v60, %v2316_v45  ;;  %v1831_v30 = vadd.f32 0.2548296, %v1777_v18  ;;  %v1616_v51 = vadd.f32 1.4214138, %v1562_v5  ;;  %v1942_v44 = vsub.f32 0.0, %v1186_v36 }
 0x27e   : > { %v2424_v61 = vadd.f32 1.0, %v2370_v52  ;;  %8838 = vrcp.f32 %v1294_v23  ;;  %v11326_v21 = vmul.f32 0.70710677, %v11303_v27  ;;  %13763 = vst [vmem:[#allocation72_spill] sm:$0xff] %v11328_v10  ;;  %vm2263_vm6 = vcmp.ge.f32.partialorder %v11155_v6, 0.0  ;;  %v11334_v60 = vpop.f32.mrb[10].mxu1 }
 0x27f   : > { %v1885_v62 = vmul.f32 %v11240_v37, %v1831_v30  ;;  %v1670_v55 = vmul.f32 %v11276_v17, %v1616_v51  ;;  %v1563_v8 = vmul.f32 %v11296_v12, %v1509_v56  ;;  %13764 = vst [vmem:[#allocation73_spill] sm:$0xff] %v11334_v60  ;;  %v11336_v45 = vpop.f32.mrb[115].mxu0  ;;  %8840 = vpow2.f32 %v2096_v38  ;;  %v11341_v52 = vpop.f32.mrb[11].mxu1 }
 0x280   : > { %13765 = vst [vmem:[#allocation74_spill] sm:$0xff] %v11336_v45  ;;  %v8835_v18 = vpop.eup %8834  ;;  %v2478_v5 = vmul.f32 %v2424_v61, %v11226_v57  ;;  %v1187_v54 = vand.u32 2147483647, %v11326_v21  ;;  %v3177_v23 = vrot.slane %v10864_v2, 1  ;;  %13766 = vst [vmem:[#allocation75_spill] sm:$0xff] %v11341_v52  ;;  %v2765_v37 = vpop.permute.xlu0 %2764  ;;  %v3178_v56 = vrot.slane %v11317_v47, 1 }
 0x281   : > { %v2155_v30 = vmul.f32 %v8835_v18, %v1885_v62  ;;  %v1724_v53 = vadd.f32 -0.28449672, %v1670_v55  ;;  %v1617_v51 = vadd.f32 1.4214138, %v1563_v8  ;;  %v1996_v45 = vmul.f32 %v1942_v44, %v1186_v36 }
 0x282   : > { %v8837_v10 = vpop.eup %8836  ;;  %v11344_v60 = vmul.f32 %v2765_v37, %v2478_v5  ;;  %v1241_v4 = vmul.f32 0.3275911, %v1187_v54  ;;  %v965_v57 = vmul.f32 %v10956_v9, %v10686_v16  ;;  %v11351_v52 = vsel %vm3143_vm8, %v3177_v23, %v3178_v56 }
 0x283   : > { %v2209_v61 = vsub.f32 1.0, %v2155_v30  ;;  %v1778_v38 = vmul.f32 %v11276_v17, %v1724_v53  ;;  %v1671_v13 = vmul.f32 %v11296_v12, %v1617_v51  ;;  %13767 = vst [vmem:[#allocation76_spill] sm:$0xff] %v11351_v52  ;;  %v1943_v8 = vsub.f32 0.0, %v1187_v54  ;;  %4256 = vmatprep.mubr.bf16.mxu0 %v11351_v52 }
 0x284   : > { %v5686_v55 = vrot.slane %v11344_v60, 1  ;;  %v1295_v62 = vadd.f32 1.0, %v1241_v4  ;;  %v11356_v36 = vadd.f32 %v10974_v63, %v965_v57  ;;  %v1076_v16 = vmul.f32 0.5, %v11169_v50 }
 0x285   : > { %v2317_v44 = vsub.f32 0.0, %v2209_v61  ;;  %v1832_v18 = vadd.f32 0.2548296, %v1778_v38  ;;  %v1725_v5 = vadd.f32 -0.28449672, %v1671_v13  ;;  %v11363_v23 = vmul.f32 0.5, %v11182_v34 }
 0x286   : > { %v11360_v53 = vsel %vm3143_vm8, %v5684_v25, %v5686_v55  ;;  %v2098_v37 = vmul.f32 1.442695, %v1996_v45  ;;  %8842 = vrcp.f32 %v1295_v62  ;;  %v11370_v56 = vmul.f32 0.70710677, %v11356_v36 }
 0x287   : > { %13768 = vst [vmem:[#allocation77_spill] sm:$0xff] %v11360_v53  ;;  %v2371_v4 = vsel %vm2263_vm6, %v2209_v61, %v2317_v44  ;;  %v1886_v30 = vmul.f32 %v11276_v17, %v1832_v18  ;;  %v1779_v51 = vmul.f32 %v11296_v12, %v1725_v5  ;;  %v1997_v25 = vmul.f32 %v1943_v8, %v1187_v54 }
 0x288   : > { %v11372_v50 = vpop.eup %8838  ;;  %v2425_v13 = vadd.f32 1.0, %v2371_v4  ;;  %v3038_v57 = vshll.u32 %v10864_v2, 16  ;;  %v3043_v34 = vshll.u32 %v11317_v47, 16  ;;  %v1188_v61 = vand.u32 2147483647, %v11370_v56 }
 0x289   : > { %v2156_v45 = vmul.f32 %v8837_v10, %v1886_v30  ;;  %v1833_v38 = vadd.f32 0.2548296, %v1779_v51  ;;  %v1456_v6 = vmul.f32 1.0614054, %v11372_v50  ;;  %v8841_v17 = vpop.eup %8840  ;;  %v3036_v62 = vshrl.u32 %v10864_v2, 16  ;;  %v2770_v30 = vpop.permute.xlu1 %2769 }
 0x28a   : > { %v2479_v55 = vmul.f32 %v2425_v13, %v11229_v58  ;;  %v3040_v44 = vrot.slane %v3038_v57, 1  ;;  %v3045_v18 = vrot.slane %v3043_v34, 1  ;;  %v1242_v4 = vmul.f32 0.3275911, %v1188_v61 }
 0x28b   : > { %v2210_v5 = vsub.f32 1.0, %v2156_v45  ;;  %v1887_v54 = vmul.f32 %v11296_v12, %v1833_v38  ;;  %v1510_v8 = vadd.f32 -1.4531521, %v1456_v6  ;;  %vm2264_vm7 = vcmp.ge.f32.partialorder %v11179_v33, 0.0 }
 0x28c   : > { %8844 = vpow2.f32 %v2098_v37  ;;  %v3041_v47 = vor.u32 %v3040_v44, %v3036_v62  ;;  %v966_v10 = vmul.f32 %v10956_v9, %v10740_v0  ;;  %v1296_v13 = vadd.f32 1.0, %v1242_v4 }
 0x28d   : > { %v2318_v51 = vsub.f32 0.0, %v2210_v5  ;;  %v2157_v53 = vmul.f32 %v8841_v17, %v1887_v54  ;;  %v1564_v58 = vmul.f32 %v11372_v50, %v1510_v8  ;;  %v2857_v57 = vmul.f32 %v2770_v30, %v2479_v55 }
 0x28e   : > { %v2100_v34 = vmul.f32 1.442695, %v1997_v25  ;;  %v11386_v45 = vsel %vm2902_vm2, %v3041_v47, %v3045_v18  ;;  %v11389_v12 = vadd.f32 %v10974_v63, %v966_v10  ;;  %8846 = vrcp.f32 %v1296_v13 }
 0x28f   : > { %13769 = vst [vmem:[#allocation78_spill] sm:$0xff] %v11386_v45  ;;  %v2372_v33 = vsel %vm2264_vm7, %v2210_v5, %v2318_v51  ;;  %v2211_v37 = vsub.f32 1.0, %v2157_v53  ;;  %v1618_v38 = vadd.f32 1.4214138, %v1564_v58  ;;  %3942 = vmatprep.mubr.bf16.mxu1 %v11386_v45  ;;  %4257 = vmatmul.mubr.bf16.gmra.mrb[148].mxu0 %v11386_v45  ;;  %vm2265_vm9 = vcmp.ge.f32.partialorder %v11208_v48, 0.0  ;;  %v2775_v48 = vpop.permute.xlu0 %2774 }
 0x290   : > { %v11393_v0 = vpop.eup %8842  ;;  %v2426_v6 = vadd.f32 1.0, %v2372_v33  ;;  %v1944_v25 = vsub.f32 0.0, %v1188_v61  ;;  %3943 = vmatmul.mubr.bf16.gmra.mrb[44].mxu1 %v10864_v2  ;;  %v11398_v17 = vmul.f32 0.70710677, %v11389_v12  ;;  %v967_v44 = vmul.f32 %v10956_v9, %v10777_v22 }
 0x291   : > { %v2319_v55 = vsub.f32 0.0, %v2211_v37  ;;  %v1672_v53 = vmul.f32 %v11372_v50, %v1618_v38  ;;  %v1457_v62 = vmul.f32 1.0614054, %v11393_v0  ;;  %v5688_v18 = vrot.slane %v2857_v57, 1 }
 0x292   : > { %v2480_v5 = vmul.f32 %v2426_v6, %v1076_v16  ;;  %8848 = vpow2.f32 %v2100_v34  ;;  %v1189_v54 = vand.u32 2147483647, %v11398_v17  ;;  %v11406_v10 = vadd.f32 %v10974_v63, %v967_v44 }
 0x293   : > { %v2373_v8 = vsel %vm2265_vm9, %v2211_v37, %v2319_v55  ;;  %v1726_v4 = vadd.f32 -0.28449672, %v1672_v53  ;;  %v1511_v47 = vadd.f32 -1.4531521, %v1457_v62  ;;  %v1998_v58 = vmul.f32 %v1944_v25, %v1188_v61  ;;  %v11413_v34 = vpop.f32.mrb[116].mxu0  ;;  %v2780_v25 = vpop.permute.xlu1 %2779 }
 0x294   : > { %v2858_v30 = vmul.f32 %v2775_v48, %v2480_v5  ;;  %v2427_v51 = vadd.f32 1.0, %v2373_v8  ;;  %v1243_v13 = vmul.f32 0.3275911, %v1189_v54  ;;  %v1945_v38 = vsub.f32 0.0, %v1189_v54  ;;  %v11418_v44 = vpop.f32.mrb[12].mxu1  ;;  %v11420_v61 = vpop.f32.mrb[117].mxu0 }
 0x295   : > { %v1780_v33 = vmul.f32 %v11372_v50, %v1726_v4  ;;  %v1565_v22 = vmul.f32 %v11393_v0, %v1511_v47  ;;  %v11411_v16 = vmul.f32 0.70710677, %v11406_v10  ;;  %v11424_v5 = vmul.f32 %v11134_v15, %v11243_v32 }
 0x296   : > { %v8845_v37 = vpop.eup %8844  ;;  %v11415_v6 = vpack.c.bf16 %v2858_v30, %v2857_v57  ;;  %v5689_v55 = vrot.slane %v2858_v30, 1  ;;  %v2481_v53 = vmul.f32 %v2427_v51, %v11363_v23  ;;  %v1297_v62 = vadd.f32 1.0, %v1243_v13  ;;  %v11432_v30 = vpop.f32.mrb[13].mxu1 }
 0x297   : > { %13770 = vst [vmem:[#allocation79_spill] sm:$0xff] %v11424_v5  ;;  %v1834_v48 = vadd.f32 0.2548296, %v1780_v33  ;;  %v1619_v8 = vadd.f32 1.4214138, %v1565_v22  ;;  %v11434_v51 = vpop.f32.mrb[118].mxu0  ;;  %v1999_v33 = vmul.f32 %v1945_v38, %v1189_v54 }
 0x298   : > { %v1190_v4 = vand.u32 2147483647, %v11411_v16  ;;  %v11428_v57 = vsel %vm3143_vm8, %v5688_v18, %v5689_v55  ;;  %v11430_v47 = vmul.f32 %v2780_v25, %v2481_v53  ;;  %v2102_v23 = vmul.f32 1.442695, %v1998_v58  ;;  %v11436_v13 = vpop.eup %8846  ;;  %v11440_v45 = vpop.f32.mrb[14].mxu1 }
 0x299   : > { %13771 = vst [vmem:[#allocation80_spill] sm:$0xff] %v11428_v57  ;;  %8850 = vrcp.f32 %v1297_v62  ;;  %v1888_v15 = vmul.f32 %v11372_v50, %v1834_v48  ;;  %v1673_v32 = vmul.f32 %v11393_v0, %v1619_v8  ;;  %13772 = vst [vmem:[#allocation81_spill] sm:$0xff] %v11440_v45  ;;  %v11442_v18 = vpop.f32.mrb[119].mxu0  ;;  %v1458_v58 = vmul.f32 1.0614054, %v11436_v13  ;;  %v11448_v57 = vpop.f32.mrb[15].mxu1 }
 0x29a   : > { %v1244_v22 = vmul.f32 0.3275911, %v1190_v4  ;;  %13773 = vst [vmem:[#allocation82_spill] sm:$0xff] %v11442_v18  ;;  %v5691_v53 = vrot.slane %v11430_v47, 1  ;;  %v1946_v62 = vsub.f32 0.0, %v1190_v4  ;;  %v968_v25 = vmul.f32 %v10956_v9, %v10786_v1 }
 0x29b   : > { %v2158_v2 = vmul.f32 %v8845_v37, %v1888_v15  ;;  %vm2266_vm10 = vcmp.ge.f32.partialorder %v11280_v24, 0.0  ;;  %v1727_v50 = vadd.f32 -0.28449672, %v1673_v32  ;;  %v1512_v8 = vadd.f32 -1.4531521, %v1458_v58 }
 0x29c   : > { %v1298_v54 = vadd.f32 1.0, %v1244_v22  ;;  %v8849_v38 = vpop.eup %8848  ;;  %v11452_v48 = vsel %vm3143_vm8, %v5689_v55, %v5691_v53  ;;  %8852 = vpow2.f32 %v2102_v23  ;;  %v11455_v52 = vadd.f32 %v10974_v63, %v968_v25 }
 0x29d   : > { %13774 = vst [vmem:[#allocation83_spill] sm:$0xff] %v11452_v48  ;;  %v2212_v45 = vsub.f32 1.0, %v2158_v2  ;;  %v1781_v18 = vmul.f32 %v11393_v0, %v1727_v50  ;;  %v2891_v1 = vpack.c.bf16 %v11424_v5, %v11424_v5  ;;  %v1566_v9 = vmul.f32 %v11436_v13, %v1512_v8 }
 0x29e   : > { %13775 = vst [vmem:[#allocation84_spill] sm:$0xff] %v11455_v52  ;;  %8854 = vrcp.f32 %v1298_v54  ;;  %v2104_v37 = vmul.f32 1.442695, %v1999_v33  ;;  %v2000_v15 = vmul.f32 %v1946_v62, %v1190_v4  ;;  %v11462_v32 = vmul.f32 0.70710677, %v11455_v52 }
 0x29f   : > { %v2320_v55 = vsub.f32 0.0, %v2212_v45  ;;  %v1835_v22 = vadd.f32 0.2548296, %v1781_v18  ;;  %v3180_v23 = vrot.slane %v11001_v7, 1  ;;  %v3181_v63 = vrot.slane %v2891_v1, 1 }
 0x2a0   : > { %v1078_v2 = vmul.f32 0.5, %v11273_v31  ;;  %v1620_v53 = vadd.f32 1.4214138, %v1566_v9  ;;  %v11467_v58 = vand.u32 2147483647, %v11462_v32  ;;  %v1079_v33 = vmul.f32 0.5, %v11303_v27 }
 0x2a1   : > { %v2374_v25 = vsel %vm2266_vm10, %v2212_v45, %v2320_v55  ;;  %v1889_v4 = vmul.f32 %v11393_v0, %v1835_v22  ;;  %v11474_v62 = vsel %vm3143_vm8, %v3180_v23, %v3181_v63  ;;  %8856 = vpow2.f32 %v2104_v37 }
 0x2a2   : > { %v2428_v50 = vadd.f32 1.0, %v2374_v25  ;;  %v1674_v54 = vmul.f32 %v11436_v13, %v1620_v53  ;;  %v2106_v31 = vmul.f32 1.442695, %v2000_v15  ;;  %4264 = vmatprep.mubr.bf16.mxu0 %v11474_v62  ;;  %v3050_v45 = vshll.u32 %v11001_v7, 16 }
 0x2a3   : > { %v11476_v18 = vpop.eup %8850  ;;  %v2159_v8 = vmul.f32 %v8849_v38, %v1889_v4  ;;  %v3055_v27 = vshll.u32 %v2891_v1, 16  ;;  %v1245_v55 = vmul.f32 0.3275911, %v11467_v58  ;;  %v3048_v22 = vshrl.u32 %v11001_v7, 16 }
 0x2a4   : > { %v1459_v24 = vmul.f32 1.0614054, %v11476_v18  ;;  %v2482_v9 = vmul.f32 %v2428_v50, %v1078_v2  ;;  %v1728_v0 = vadd.f32 -0.28449672, %v1674_v54  ;;  %v3052_v25 = vrot.slane %v3050_v45, 1  ;;  %v2785_v2 = vpop.permute.xlu0 %2784 }
 0x2a5   : > { %v2213_v23 = vsub.f32 1.0, %v2159_v8  ;;  %v3057_v53 = vrot.slane %v3055_v27, 1  ;;  %vm2267_vm11 = vcmp.ge.f32.partialorder %v11326_v21, 0.0  ;;  %v11486_v38 = vmul.f32 0.5, %v11356_v36 }
 0x2a6   : > { %v1513_v63 = vadd.f32 -1.4531521, %v1459_v24  ;;  %v8853_v37 = vpop.eup %8852  ;;  %v1782_v15 = vmul.f32 %v11436_v13, %v1728_v0  ;;  %8858 = vpow2.f32 %v2106_v31  ;;  %vm2268_vm12 = vcmp.ge.f32.partialorder %v11370_v56, 0.0 }
 0x2a7   : > { %v2321_v4 = vsub.f32 0.0, %v2213_v23  ;;  %v3053_v54 = vor.u32 %v3052_v25, %v3048_v22  ;;  %v2893_v8 = vpack.c.bf16 %v11199_v40, %v11199_v40  ;;  %v2860_v24 = vmul.f32 %v2785_v2, %v2482_v9 }
 0x2a8   : > { %v11489_v1 = vpop.eup %8854  ;;  %v1567_v50 = vmul.f32 %v11476_v18, %v1513_v63  ;;  %v1836_v21 = vadd.f32 0.2548296, %v1782_v15  ;;  %v1299_v45 = vadd.f32 1.0, %v1245_v55  ;;  %v3183_v48 = vrot.slane %v11174_v26, 1 }
 0x2a9   : > { %v1460_v36 = vmul.f32 1.0614054, %v11489_v1  ;;  %v2375_v27 = vsel %vm2267_vm11, %v2213_v23, %v2321_v4  ;;  %v11497_v31 = vsel %vm2902_vm2, %v3053_v54, %v3057_v53  ;;  %v3184_v40 = vrot.slane %v2893_v8, 1  ;;  %v2790_v4 = vpop.permute.xlu1 %2789 }
 0x2aa   : > { %v1621_v0 = vadd.f32 1.4214138, %v1567_v50  ;;  %13776 = vst [vmem:[#allocation85_spill] sm:$0xff] %v11497_v31  ;;  %v2429_v5 = vadd.f32 1.0, %v2375_v27  ;;  %v1890_v52 = vmul.f32 %v11436_v13, %v1836_v21  ;;  %3950 = vmatprep.mubr.bf16.mxu1 %v11497_v31  ;;  %4265 = vmatmul.mubr.bf16.gmra.mrb[152].mxu0 %v11497_v31  ;;  %v3060_v55 = vshrl.u32 %v11174_v26, 16  ;;  %v11514_v27 = vpop.f32.mrb[120].mxu0 }
 0x2ab   : > { %v1514_v63 = vadd.f32 -1.4531521, %v1460_v36  ;;  %3951 = vmatmul.mubr.bf16.gmra.mrb[48].mxu1 %v11001_v7  ;;  %v3062_v22 = vshll.u32 %v11174_v26, 16  ;;  %v3067_v23 = vshll.u32 %v2893_v8, 16  ;;  %v8857_v25 = vpop.eup %8856  ;;  %v11509_v2 = vsel %vm3143_vm8, %v3183_v48, %v3184_v40  ;;  %v11520_v48 = vpop.f32.mrb[121].mxu0 }
 0x2ac   : > { %v1675_v9 = vmul.f32 %v11476_v18, %v1621_v0  ;;  %v2483_v53 = vmul.f32 %v2429_v5, %v1079_v33  ;;  %v2160_v15 = vmul.f32 %v8853_v37, %v1890_v52  ;;  %13777 = vst [vmem:[#allocation86_spill] sm:$0xff] %v11509_v2  ;;  %4272 = vmatprep.mubr.bf16.mxu0 %v11509_v2  ;;  %v5693_v8 = vrot.slane %v2860_v24, 1  ;;  %v11518_v33 = vpop.f32.mrb[16].mxu1 }
 0x2ad   : > { %v1568_v13 = vmul.f32 %v11489_v1, %v1514_v63  ;;  %v3064_v54 = vrot.slane %v3062_v22, 1  ;;  %v3069_v21 = vrot.slane %v3067_v23, 1  ;;  %v2895_v36 = vpack.c.bf16 %v11344_v60, %v11344_v60  ;;  %v11524_v22 = vpop.f32.mrb[17].mxu1  ;;  %v11526_v60 = vpop.f32.mrb[122].mxu0 }
 0x2ae   : > { %v1729_v50 = vadd.f32 -0.28449672, %v1675_v9  ;;  %v11516_v0 = vmul.f32 %v2790_v4, %v2483_v53  ;;  %v2214_v52 = vsub.f32 1.0, %v2160_v15  ;;  %v3186_v40 = vrot.slane %v11299_v19, 1  ;;  %v11533_v31 = vpop.f32.mrb[18].mxu1 }
 0x2af   : > { %v1622_v5 = vadd.f32 1.4214138, %v1568_v13  ;;  %v3065_v63 = vor.u32 %v3064_v54, %v3060_v55  ;;  %v3187_v9 = vrot.slane %v2895_v36, 1  ;;  %8860 = vrcp.f32 %v1299_v45  ;;  %v11543_v2 = vpop.f32.mrb[19].mxu1 }
 0x2b0   : > { %v1783_v37 = vmul.f32 %v11476_v18, %v1729_v50  ;;  %v8859_v23 = vpop.eup %8858  ;;  %v11529_v53 = vpack.c.bf16 %v11516_v0, %v2860_v24  ;;  %v5694_v15 = vrot.slane %v11516_v0, 1  ;;  %v2322_v13 = vsub.f32 0.0, %v2214_v52  ;;  %v11535_v50 = vpop.f32.mrb[123].mxu0 }
 0x2b1   : > { %v1676_v4 = vmul.f32 %v11489_v1, %v1622_v5  ;;  %v11538_v54 = vsel %vm2902_vm2, %v3065_v63, %v3069_v21  ;;  %v11541_v7 = vsel %vm3143_vm8, %v3186_v40, %v3187_v9  ;;  %v3074_v45 = vshll.u32 %v11299_v19, 16 }
 0x2b2   : > { %v1837_v55 = vadd.f32 0.2548296, %v1783_v37  ;;  %13778 = vst [vmem:[#allocation87_spill] sm:$0xff] %v11538_v54  ;;  %v11546_v24 = vsel %vm3143_vm8, %v5693_v8, %v5694_v15  ;;  %v2376_v0 = vsel %vm2268_vm12, %v2214_v52, %v2322_v13  ;;  %3958 = vmatprep.mubr.bf16.mxu1 %v11538_v54  ;;  %4273 = vmatmul.mubr.bf16.gmra.mrb[156].mxu0 %v11538_v54  ;;  %v3079_v63 = vshll.u32 %v2895_v36, 16 }
 0x2b3   : > { %13779 = vst [vmem:[#allocation88_spill] sm:$0xff] %v11546_v24  ;;  %v1730_v5 = vadd.f32 -0.28449672, %v1676_v4  ;;  %v2430_v21 = vadd.f32 1.0, %v2376_v0  ;;  %3959 = vmatmul.mubr.bf16.gmra.mrb[52].mxu1 %v11174_v26  ;;  %4280 = vmatprep.mubr.bf16.mxu0 %v11541_v7  ;;  %v3072_v56 = vshrl.u32 %v11299_v19, 16  ;;  %v3076_v52 = vrot.slane %v3074_v45, 1  ;;  %v2795_v0 = vpop.permute.xlu0 %2794 }
 0x2b4   : > { %v1891_v37 = vmul.f32 %v11476_v18, %v1837_v55  ;;  %v2897_v40 = vpack.c.bf16 %v11430_v47, %v11430_v47  ;;  %v3081_v4 = vrot.slane %v3079_v63, 1  ;;  %v3189_v55 = vrot.slane %v11415_v6, 1 }
 0x2b5   : > { %v1784_v8 = vmul.f32 %v11489_v1, %v1730_v5  ;;  %v2484_v9 = vmul.f32 %v2430_v21, %v11486_v38  ;;  %v3077_v18 = vor.u32 %v3076_v52, %v3072_v56  ;;  %vm2269_vm13 = vcmp.ge.f32.partialorder %v11398_v17, 0.0 }
 0x2b6   : > { %v2161_v13 = vmul.f32 %v8857_v25, %v1891_v37  ;;  %v3190_v54 = vrot.slane %v2897_v40, 1  ;;  %v3086_v5 = vshll.u32 %v11415_v6, 16  ;;  %v3091_v25 = vshll.u32 %v2897_v40, 16 }
 0x2b7   : > { %v1838_v24 = vadd.f32 0.2548296, %v1784_v8  ;;  %v2862_v26 = vmul.f32 %v2795_v0, %v2484_v9  ;;  %v11566_v47 = vsel %vm2902_vm2, %v3077_v18, %v3081_v4  ;;  %v3084_v63 = vshrl.u32 %v11415_v6, 16 }
 0x2b8   : > { %v2215_v36 = vsub.f32 1.0, %v2161_v13  ;;  %v11569_v38 = vsel %vm3143_vm8, %v3189_v55, %v3190_v54  ;;  %3966 = vmatprep.mubr.bf16.mxu1 %v11566_v47  ;;  %v3088_v8 = vrot.slane %v3086_v5, 1  ;;  %v3093_v52 = vrot.slane %v3091_v25, 1 }
 0x2b9   : > { %v1892_v45 = vmul.f32 %v11489_v1, %v1838_v24  ;;  %v5696_v21 = vrot.slane %v2862_v26, 1  ;;  %v2899_v9 = vpack.c.bf16 %v2862_v26, %v2862_v26  ;;  %v11574_v1 = vpop.eup %8860  ;;  %v1081_v13 = vmul.f32 0.5, %v11389_v12 }
 0x2ba   : > { %v2323_v37 = vsub.f32 0.0, %v2215_v36  ;;  %4281 = vmatmul.mubr.bf16.gmra.mrb[160].mxu0 %v11566_v47  ;;  %v3089_v40 = vor.u32 %v3088_v8, %v3084_v63  ;;  %vm2270_vm14 = vcmp.ge.f32.partialorder %v11411_v16, 0.0  ;;  %v1461_v18 = vmul.f32 1.0614054, %v11574_v1 }
 0x2bb   : > { %v2162_v56 = vmul.f32 %v8859_v23, %v1892_v45  ;;  %v11577_v24 = vsel %vm3143_vm8, %v5694_v15, %v5696_v21  ;;  %3967 = vmatmul.mubr.bf16.gmra.mrb[56].mxu1 %v11299_v19  ;;  %4288 = vmatprep.mubr.bf16.mxu0 %v11569_v38  ;;  %v3224_v0 = vrot.slane %v2899_v9, 1  ;;  %v3223_v17 = vrot.slane %v11529_v53, 1  ;;  %v13781_v45 = vld [vmem:[#allocation9_spill] sm:$0xff] }
 0x2bc   : > { %13780 = vst [vmem:[#allocation89_spill] sm:$0xff] %v11577_v24  ;;  %v2377_v54 = vsel %vm2269_vm13, %v2215_v36, %v2323_v37  ;;  %v11586_v26 = vsel %vm2902_vm2, %v3089_v40, %v3093_v52  ;;  %v3211_v55 = vshll.u32 %v11529_v53, 16  ;;  %v1082_v36 = vmul.f32 0.5, %v11406_v10  ;;  %v13785_v40 = vld [vmem:[#allocation72_spill] sm:$0xff] }
 0x2bd   : > { %v2431_v23 = vadd.f32 1.0, %v2377_v54  ;;  %v2216_v4 = vsub.f32 1.0, %v2162_v56  ;;  %3974 = vmatprep.mubr.bf16.mxu1 %v11586_v26  ;;  %v3216_v12 = vshll.u32 %v2899_v9, 16  ;;  %v11595_v5 = vadd.f32 %v11192_v41, %v11184_v35  ;;  %v13782_v9 = vld [vmem:[#allocation69_spill] sm:$0xff]  ;;  %v2805_v54 = vpop.permute.xlu0 %2804 }
 0x2be   : > { %v11599_v16 = vadd.f32 %v11210_v46, %v11203_v20  ;;  %v3145_v25 = vrot.slane %v13781_v45, 1  ;;  %v11603_v63 = vsel %vm3143_vm8, %v3223_v17, %v3224_v0  ;;  %v3213_v56 = vrot.slane %v3211_v55, 1  ;;  %v13789_v55 = vld [vmem:[#allocation82_spill] sm:$0xff] }
 0x2bf   : > { %v2324_v15 = vsub.f32 0.0, %v2216_v4  ;;  %v2485_v21 = vmul.f32 %v2431_v23, %v1081_v13  ;;  %v11607_v10 = vadd.f32 %v11236_v42, %v11231_v28  ;;  %v11611_v35 = vadd.f32 %v11238_v59, %v11233_v49  ;;  %v2800_v28 = vpop.permute.xlu1 %2799  ;;  %v13787_v13 = vld [vmem:[#allocation73_spill] sm:$0xff]  ;;  %v13788_v23 = vld [vmem:[#allocation75_spill] sm:$0xff] }
 0x2c0   : > { %v1515_v41 = vadd.f32 -1.4531521, %v1461_v18  ;;  %v11616_v20 = vadd.f32 %v11253_v29, %v11246_v14  ;;  %v11620_v46 = vadd.f32 %v11258_v3, %v11248_v43  ;;  %v11624_v52 = vadd.f32 %v11319_v11, %v11308_v39  ;;  %v13783_v29 = vld [vmem:[#allocation71_spill] sm:$0xff]  ;;  %v13786_v39 = vld [vmem:[#allocation74_spill] sm:$0xff] }
 0x2c1   : > { %v2378_v37 = vsel %vm2270_vm14, %v2216_v4, %v2324_v15  ;;  %v3209_v49 = vshrl.u32 %v11529_v53, 16  ;;  %v3218_v59 = vrot.slane %v3216_v12, 1  ;;  %v11631_v14 = vadd.f32 %v13783_v29, %v13782_v9  ;;  %v13784_v3 = vld [vmem:[#allocation3_spill] sm:$0xff]  ;;  %v13790_v12 = vld [vmem:[#allocation81_spill] sm:$0xff] }
 0x2c2   : > { %v2432_v8 = vadd.f32 1.0, %v2378_v37  ;;  %4289 = vmatmul.mubr.bf16.gmra.mrb[164].mxu0 %v11586_v26  ;;  %v2863_v43 = vmul.f32 %v2800_v28, %v2485_v21  ;;  %v11636_v11 = vadd.f32 %v13786_v39, %v13785_v40  ;;  %v11640_v4 = vadd.f32 %v13788_v23, %v13787_v13  ;;  %v8637_v39 = vld [vmem:[%s13574_s5 + $0x190] sm:$0xff]   ;;  %v8638_v23 = vld [vmem:[%s13574_s5 + $0x1d8] sm:$0xff]  }
 0x2c3   : > { %3975 = vmatmul.mubr.bf16.gmra.mrb[60].mxu1 %v11415_v6  ;;  %4296 = vmatprep.mubr.bf16.mxu0 %v11603_v63  ;;  %v11644_v0 = vadd.f32 %v11420_v61, %v11413_v34  ;;  %v3214_v18 = vor.u32 %v3213_v56, %v3209_v49  ;;  %v11648_v17 = vadd.f32 %v11432_v30, %v11418_v44  ;;  %vm2271_vm15 = vcmp.ge.f32.partialorder %v11462_v32, 0.0 }
 0x2c4   : > { %v2486_v42 = vmul.f32 %v2432_v8, %v1082_v36  ;;  %4015 = vmatprep.mubr.bf16.mxu1 %v13784_v3  ;;  %v11652_v36 = vadd.f32 %v13789_v55, %v11434_v51  ;;  %v11656_v45 = vadd.f32 %v11448_v57, %v13790_v12  ;;  %v11660_v21 = vadd.f32 %v11520_v48, %v11514_v27  ;;  %v8145_v51 = vpop.f32.mrb[124].mxu0  ;;  %v13791_v27 = vld [vmem:[#allocation2_spill] sm:$0xff]  ;;  %v8636_v3 = vld [vmem:[%s13574_s5 + $0x1d0] sm:$0xff]  }
 0x2c5   : > { %v11664_v34 = vadd.f32 %v11524_v22, %v11518_v33  ;;  %v11668_v44 = vadd.f32 %v11535_v50, %v11526_v60  ;;  %v11673_v30 = vsel %vm2902_vm2, %v3214_v18, %v3218_v59  ;;  %v11677_v57 = vadd.f32 %v11543_v2, %v11533_v31  ;;  %v8630_v33 = vld [vmem:[%s13574_s5 + $0x180] sm:$0xff]   ;;  %v7927_v22 = vpop.f32.mrb[20].mxu1  ;;  %v8146_v37 = vpop.f32.mrb[125].mxu0  ;;  %v8634_v60 = vld [vmem:[%s13574_s5 + $0x1c8] sm:$0xff]   ;;  %v13795_v18 = vld [vmem:[#allocation32_spill] sm:$0xff] }
 0x2c6   : > { %v2864_v15 = vmul.f32 %v2805_v54, %v2486_v42  ;;  %v3144_v48 = vrot.slane %v13791_v27, 1  ;;  %v11686_v50 = vadd.f32 %v8146_v37, %v8145_v51  ;;  %v7928_v8 = vpop.f32.mrb[21].mxu1  ;;  %v8148_v56 = vpop.f32.mrb[126].mxu0  ;;  %v1569_v31 = vmul.f32 %v11574_v1, %v1515_v41  ;;  %v13792_v59 = vld [vmem:[#allocation26_spill] sm:$0xff]  ;;  %v13794_v54 = vld [vmem:[#allocation7_spill] sm:$0xff]  ;;  %v13798_v51 = vld [vmem:[#allocation12_spill] sm:$0xff] }
 0x2c7   : > { %v11691_v28 = vadd.f32 %v7928_v8, %v7927_v22  ;;  %v7930_v42 = vpop.f32.mrb[22].mxu1  ;;  %v8149_v49 = vpop.f32.mrb[127].mxu0  ;;  %v8635_v41 = vld [vmem:[%s13574_s5 + $0x188] sm:$0xff]   ;;  %v13796_v55 = vld [vmem:[#allocation18_spill] sm:$0xff]  ;;  %v13799_v8 = vld [vmem:[#allocation41_spill] sm:$0xff]  ;;  %vm7394_vm5 = vcmask 1041409  }
 0x2c8   : > { %v11670_v61 = vpack.c.bf16 %v2864_v15, %v2863_v43  ;;  %v3146_v2 = vsel %vm3143_vm8, %v3144_v48, %v3145_v25  ;;  %v11694_v9 = vadd.f32 %v8149_v49, %v8148_v56  ;;  %v7931_v29 = vpop.f32.mrb[23].mxu1  ;;  %v1947_v43 = vsub.f32 0.0, %v11467_v58  ;;  %v13797_v12 = vld [vmem:[#allocation38_spill] sm:$0xff]  ;;  %v8642_v37 = vld [vmem:[%s13574_s5 + $0x1e8] sm:$0xff]  }
 0x2c9   : > { %v11700_v25 = vadd.f32 %v7931_v29, %v7930_v42  ;;  %v1623_v40 = vadd.f32 1.4214138, %v1569_v31  ;;  %v8640_v48 = vld [vmem:[%s13574_s5 + $0x1e0] sm:$0xff]   ;;  %v13800_v56 = vld [vmem:[#allocation47_spill] sm:$0xff]  ;;  %v13801_v31 = vld [vmem:[#allocation16_spill] sm:$0xff]  ;;  %vm7396_vm6 = vcmask 1042434  }
 0x2ca   : > { %4297 = vmatmul.mubr.bf16.gmra.mrb[168].mxu0 %v11673_v30  ;;  %13793 = vst [vmem:[#allocation9_spill] sm:$0xff] %v11694_v9  ;;  %v2001_v13 = vmul.f32 %v1947_v43, %v11467_v58  ;;  %v8639_v58 = vld [vmem:[%s13574_s5 + $0x198] sm:$0xff]   ;;  %v8641_v22 = vld [vmem:[%s13574_s5 + $0x1a0] sm:$0xff]   ;;  %v8644_v42 = vld [vmem:[%s13574_s5 + $0x1f0] sm:$0xff]   ;;  %vm7398_vm7 = vcmask 1043459   ;;  %vm7400_vm10 = vcmask 1044484  }
 0x2cb   : > { %4016 = vmatmul.mubr.bf16.vlgmr.msra.gmra.mrb[64].mxu1 %v3146_v2  ;;  %8483 = vmatprep.mubr.bf16.mxu0 %v13792_v59  ;;  %v1677_v15 = vmul.f32 %v11574_v1, %v1623_v40  ;;  %v8643_v2 = vld [vmem:[%s13574_s5 + $0x1a8] sm:$0xff]   ;;  %vm7402_vm11 = vcmask 1045509   ;;  %vm7404_vm12 = vcmask 1046534   ;;  %vm7406_vm13 = vcmask 1047559  }
 0x2cc   : > { %8218 = vmatpush3.bf16.msra.mxu1 %v8630_v33  ;;  %4023 = vmatprep.mubr.bf16.mxu1 %v13794_v54  ;;  %v2108_v27 = vmul.f32 1.442695, %v2001_v13 }
 0x2cd   : > { %8219 = vmatprep.subr.bf16.mxu1 %v8634_v60  ;;  %v1731_v33 = vadd.f32 -0.28449672, %v1677_v15 }
 0x2ce   : > { %8862 = vpow2.f32 %v2108_v27  ;;  %v13805_v27 = vld [vmem:[#allocation21_spill] sm:$0xff] }
 0x2cf   : > { %v1785_v60 = vmul.f32 %v11574_v1, %v1731_v33 }
 0x2d0   : > { %8220 = vmatpush3.bf16.msra.mxu1 %v8635_v41  ;;  %v8646_v41 = vld [vmem:[%s13574_s5 + $0x1f8] sm:$0xff]  }
 0x2d1   : > { %8221 = vmatprep.subr.bf16.mxu1 %v8636_v3  ;;  %v1839_v49 = vadd.f32 0.2548296, %v1785_v60  ;;  %v13802_v3 = vld [vmem:[#allocation50_spill] sm:$0xff] }
 0x2d2   : > { %8484 = vmatmul.mubr.bf16.vlgmr.msra.gmra.mrb[172].mxu0 %v13795_v18 }
 0x2d3   : > { %4024 = vmatmul.mubr.bf16.gmra.mrb[68].mxu1 %v13796_v55  ;;  %8487 = vmatprep.mubr.bf16.mxu0 %v13797_v12  ;;  %v1893_v43 = vmul.f32 %v11574_v1, %v1839_v49  ;;  %v13807_v49 = vld [vmem:[#allocation62_spill] sm:$0xff] }
 0x2d4   : > { %4031 = vmatprep.mubr.bf16.mxu1 %v13798_v51  ;;  %8222 = vmatpush3.bf16.msra.mxu1 %v8637_v39 }
 0x2d5   : > { %8223 = vmatprep.subr.bf16.mxu1 %v8638_v23  ;;  %v13803_v23 = vld [vmem:[#allocation57_spill] sm:$0xff] }
 0x2d8   : > { %8224 = vmatpush3.bf16.msra.mxu1 %v8639_v58  ;;  %v8863_v13 = vpop.eup %8862 }
 0x2d9   : > { %8225 = vmatprep.subr.bf16.mxu1 %v8640_v48  ;;  %v2163_v60 = vmul.f32 %v8863_v13, %v1893_v43  ;;  %v13812_v43 = vld [vmem:[#allocation84_spill] sm:$0xff] }
 0x2da   : > { %8488 = vmatmul.mubr.bf16.gmra.mrb[176].mxu0 %v13799_v8  ;;  %v1083_v13 = vmul.f32 0.5, %v13812_v43 }
 0x2db   : > { %4032 = vmatmul.mubr.bf16.gmra.mrb[72].mxu1 %v13792_v59  ;;  %8491 = vmatprep.mubr.bf16.mxu0 %v13800_v56  ;;  %v8645_v59 = vld [vmem:[%s13574_s5 + $0x1b0] sm:$0xff]  }
 0x2dc   : > { %4039 = vmatprep.mubr.bf16.mxu1 %v13801_v31  ;;  %8226 = vmatpush3.bf16.msra.mxu1 %v8641_v22  ;;  %v8647_v22 = vld [vmem:[%s13574_s5 + $0x1b8] sm:$0xff]  }
 0x2dd   : > { %8227 = vmatprep.subr.bf16.mxu1 %v8642_v37 }
 0x2de   : > { %v8151_v29 = vpop.f32.mrb[128].mxu0 }
 0x2df   : > { %v7933_v40 = vpop.f32.mrb[24].mxu1  ;;  %v8152_v39 = vpop.f32.mrb[129].mxu0 }
 0x2e0   : > { %8228 = vmatpush3.bf16.msra.mxu1 %v8643_v2  ;;  %v11751_v15 = vadd.f32 %v8152_v39, %v8151_v29  ;;  %v7934_v55 = vpop.f32.mrb[25].mxu1  ;;  %v8154_v58 = vpop.f32.mrb[130].mxu0  ;;  %v13809_v29 = vld [vmem:[#allocation30_spill] sm:$0xff] }
 0x2e1   : > { %8229 = vmatprep.subr.bf16.mxu1 %v8644_v42  ;;  %v11754_v48 = vadd.f32 %v7934_v55, %v7933_v40  ;;  %v7936_v33 = vpop.f32.mrb[26].mxu1  ;;  %v8155_v1 = vpop.f32.mrb[131].mxu0  ;;  %v2217_v42 = vsub.f32 1.0, %v2163_v60  ;;  %v13810_v55 = vld [vmem:[#allocation76_spill] sm:$0xff] }
 0x2e2   : > { %8492 = vmatmul.mubr.bf16.gmra.mrb[180].mxu0 %v13802_v3  ;;  %13804 = vst [vmem:[#allocation69_spill] sm:$0xff] %v11751_v15  ;;  %v11759_v37 = vadd.f32 %v8155_v1, %v8154_v58 }
 0x2e3   : > { %4040 = vmatmul.mubr.bf16.gmra.mrb[76].mxu1 %v13795_v18  ;;  %8495 = vmatprep.mubr.bf16.mxu0 %v13803_v23  ;;  %v7937_v18 = vpop.f32.mrb[27].mxu1  ;;  %v2325_v40 = vsub.f32 0.0, %v2217_v42 }
 0x2e4   : > { %4047 = vmatprep.mubr.bf16.mxu1 %v13805_v27  ;;  %8230 = vmatpush3.bf16.msra.mxu1 %v8645_v59  ;;  %13806 = vst [vmem:[#allocation71_spill] sm:$0xff] %v11759_v37  ;;  %v11761_v2 = vadd.f32 %v7937_v18, %v7936_v33  ;;  %v13808_v59 = vld [vmem:[#allocation67_spill] sm:$0xff] }
 0x2e5   : > { %8231 = vmatprep.subr.bf16.mxu1 %v8646_v41  ;;  %v2379_v39 = vsel %vm2271_vm15, %v2217_v42, %v2325_v40  ;;  %v13811_v41 = vld [vmem:[#allocation34_spill] sm:$0xff]  ;;  %v13814_v40 = vld [vmem:[#allocation11_spill] sm:$0xff] }
 0x2e6   : > { %v2433_v58 = vadd.f32 1.0, %v2379_v39 }
 0x2e8   : > { %8232 = vmatpush3.bf16.msra.mxu1 %v8647_v22  ;;  %v2487_v33 = vmul.f32 %v2433_v58, %v1083_v13  ;;  %v13813_v22 = vld [vmem:[#allocation86_spill] sm:$0xff] }
 0x2ea   : > { %8496 = vmatmul.mubr.bf16.gmra.mrb[184].mxu0 %v13807_v49 }
 0x2eb   : > { %4048 = vmatmul.mubr.bf16.gmra.mrb[80].mxu1 %v13797_v12  ;;  %8499 = vmatprep.mubr.bf16.mxu0 %v13808_v59  ;;  %v2810_v12 = vpop.permute.xlu1 %2809 }
 0x2ec   : > { %4055 = vmatprep.mubr.bf16.mxu1 %v13809_v29  ;;  %v2865_v13 = vmul.f32 %v2810_v12, %v2487_v33  ;;  %v13818_v33 = vld [vmem:[#allocation54_spill] sm:$0xff] }
 0x2ee   : > { %v11785_v9 = vpack.c.bf16 %v2865_v13, %v2865_v13 }
 0x2f2   : > { %8500 = vmatmul.mubr.bf16.gmra.mrb[188].mxu0 %v13810_v55 }
 0x2f3   : > { %4056 = vmatmul.mubr.bf16.gmra.mrb[84].mxu1 %v13799_v8  ;;  %8503 = vmatprep.mubr.bf16.mxu0 %v11474_v62 }
 0x2f4   : > { %4063 = vmatprep.mubr.bf16.mxu1 %v13811_v41 }
 0x2f7   : > { %v8157_v1 = vpop.f32.mrb[132].mxu0  ;;  %v7939_v18 = vpop.f32.mrb[28].mxu1 }
 0x2f8   : > { %v8158_v60 = vpop.f32.mrb[133].mxu0  ;;  %v7940_v8 = vpop.f32.mrb[29].mxu1 }
 0x2f9   : > { %v11776_v32 = vadd.f32 %v8158_v60, %v8157_v1  ;;  %v8160_v42 = vpop.f32.mrb[134].mxu0  ;;  %v11779_v24 = vadd.f32 %v7940_v8, %v7939_v18  ;;  %v7942_v39 = vpop.f32.mrb[30].mxu1  ;;  %v3243_v1 = vrot.slane %v11785_v9, 1  ;;  %v3242_v18 = vrot.slane %v11670_v61, 1 }
 0x2fa   : > { %8504 = vmatmul.mubr.bf16.gmra.mrb[192].mxu0 %v13813_v22  ;;  %v8161_v43 = vpop.f32.mrb[135].mxu0  ;;  %v7943_v37 = vpop.f32.mrb[31].mxu1 }
 0x2fb   : > { %4064 = vmatmul.mubr.bf16.gmra.mrb[88].mxu1 %v13800_v56  ;;  %8507 = vmatprep.mubr.bf16.mxu0 %v11541_v7  ;;  %v11781_v58 = vadd.f32 %v8161_v43, %v8160_v42  ;;  %v11783_v15 = vadd.f32 %v7943_v37, %v7942_v39  ;;  %v13816_v56 = vld [vmem:[#allocation45_spill] sm:$0xff]  ;;  %v3244_v12 = vsel %vm3143_vm8, %v3242_v18, %v3243_v1 }
 0x2fc   : > { %4071 = vmatprep.mubr.bf16.mxu1 %v13814_v40  ;;  %v13817_v37 = vld [vmem:[#allocation25_spill] sm:$0xff] }
 0x2fd   : > { %13815 = vst [vmem:[#allocation3_spill] sm:$0xff] %v11781_v58  ;;  %v13822_v58 = vld [vmem:[#allocation40_spill] sm:$0xff] }
 0x302   : > { %8508 = vmatmul.mubr.bf16.gmra.mrb[196].mxu0 %v11569_v38 }
 0x303   : > { %4072 = vmatmul.mubr.bf16.gmra.mrb[92].mxu1 %v13802_v3  ;;  %8511 = vmatprep.mubr.bf16.mxu0 %v11603_v63 }
 0x304   : > { %4079 = vmatprep.mubr.bf16.mxu1 %v13816_v56 }
 0x30a   : > { %8512 = vmatmul.mubr.bf16.gmra.mrb[200].mxu0 %v3244_v12 }
 0x30b   : > { %4080 = vmatmul.mubr.bf16.gmra.mrb[96].mxu1 %v13803_v23 }
 0x30c   : > { %4087 = vmatprep.mubr.bf16.mxu1 %v13817_v37 }
 0x313   : > { %4088 = vmatmul.mubr.bf16.gmra.mrb[100].mxu1 %v13807_v49  ;;  %v8163_v3 = vpop.f32.mrb[136].mxu0  ;;  %v13821_v49 = vld [vmem:[#allocation60_spill] sm:$0xff] }
 0x314   : > { %4095 = vmatprep.mubr.bf16.mxu1 %v13818_v33  ;;  %v7945_v60 = vpop.f32.mrb[32].mxu1  ;;  %v8164_v63 = vpop.f32.mrb[137].mxu0 }
 0x315   : > { %v11798_v8 = vadd.f32 %v8164_v63, %v8163_v3  ;;  %v7946_v42 = vpop.f32.mrb[33].mxu1  ;;  %v8166_v39 = vpop.f32.mrb[138].mxu0 }
 0x316   : > { %v11800_v43 = vadd.f32 %v7946_v42, %v7945_v60  ;;  %v7948_v13 = vpop.f32.mrb[34].mxu1  ;;  %v8167_v1 = vpop.f32.mrb[139].mxu0 }
 0x317   : > { %13819 = vst [vmem:[#allocation72_spill] sm:$0xff] %v11798_v8  ;;  %v11802_v18 = vadd.f32 %v8167_v1, %v8166_v39  ;;  %v7949_v23 = vpop.f32.mrb[35].mxu1 }
 0x318   : > { %v11804_v12 = vadd.f32 %v7949_v23, %v7948_v13 }
 0x319   : > { %13820 = vst [vmem:[#allocation74_spill] sm:$0xff] %v11802_v18 }
 0x31b   : > { %4096 = vmatmul.mubr.bf16.gmra.mrb[104].mxu1 %v13808_v59 }
 0x31c   : > { %4103 = vmatprep.mubr.bf16.mxu1 %v13821_v49 }
 0x323   : > { %4104 = vmatmul.mubr.bf16.gmra.mrb[108].mxu1 %v13810_v55 }
 0x324   : > { %4111 = vmatprep.mubr.bf16.mxu1 %v13822_v58 }
 0x32b   : > { %4112 = vmatmul.mubr.bf16.gmra.mrb[112].mxu1 %v11474_v62  ;;  %v13825_v62 = vld [vmem:[#allocation28_spill] sm:$0xff] }
 0x32c   : > { %4119 = vmatprep.mubr.bf16.mxu1 %v11299_v19  ;;  %v8169_v3 = vpop.f32.mrb[140].mxu0 }
 0x32d   : > { %v7951_v60 = vpop.f32.mrb[36].mxu1  ;;  %v8170_v63 = vpop.f32.mrb[141].mxu0 }
 0x32e   : > { %v11812_v42 = vadd.f32 %v8170_v63, %v8169_v3  ;;  %v7952_v39 = vpop.f32.mrb[37].mxu1  ;;  %v8172_v13 = vpop.f32.mrb[142].mxu0 }
 0x32f   : > { %v11814_v1 = vadd.f32 %v7952_v39, %v7951_v60  ;;  %v7954_v59 = vpop.f32.mrb[38].mxu1  ;;  %v8173_v23 = vpop.f32.mrb[143].mxu0  ;;  %v13826_v60 = vld [vmem:[#allocation36_spill] sm:$0xff] }
 0x330   : > { %13823 = vst [vmem:[#allocation73_spill] sm:$0xff] %v11812_v42  ;;  %v11816_v18 = vadd.f32 %v8173_v23, %v8172_v13  ;;  %v7955_v55 = vpop.f32.mrb[39].mxu1 }
 0x331   : > { %v11818_v8 = vadd.f32 %v7955_v55, %v7954_v59 }
 0x332   : > { %13824 = vst [vmem:[#allocation75_spill] sm:$0xff] %v11816_v18 }
 0x333   : > { %4120 = vmatmul.mubr.bf16.gmra.mrb[116].mxu1 %v13813_v22 }
 0x334   : > { %4127 = vmatprep.mubr.bf16.mxu1 %v11415_v6 }
 0x33b   : > { %4128 = vmatmul.mubr.bf16.gmra.mrb[120].mxu1 %v11541_v7 }
 0x33c   : > { %4135 = vmatprep.mubr.bf16.mxu1 %v11529_v53 }
 0x343   : > { %4136 = vmatmul.mubr.bf16.gmra.mrb[124].mxu1 %v11569_v38 }
 0x344   : > { %4337 = vmatprep.mubr.bf16.mxu1 %v13825_v62  ;;  %v13830_v62 = vld [vmem:[#allocation43_spill] sm:$0xff] }
 0x34b   : > { %4338 = vmatmul.mubr.bf16.vlgmr.msra.gmra.mrb[128].mxu1 %v13794_v54  ;;  %v8175_v3 = vpop.f32.mrb[144].mxu0  ;;  %v13829_v54 = vld [vmem:[#allocation10_spill] sm:$0xff] }
 0x34c   : > { %4345 = vmatprep.mubr.bf16.mxu1 %v13826_v60  ;;  %v7957_v63 = vpop.f32.mrb[40].mxu1  ;;  %v8176_v39 = vpop.f32.mrb[145].mxu0 }
 0x34d   : > { %v11828_v13 = vadd.f32 %v8176_v39, %v8175_v3  ;;  %v7958_v22 = vpop.f32.mrb[41].mxu1  ;;  %v8178_v59 = vpop.f32.mrb[146].mxu0  ;;  %v13831_v39 = vld [vmem:[#allocation24_spill] sm:$0xff] }
 0x34e   : > { %v11830_v23 = vadd.f32 %v7958_v22, %v7957_v63  ;;  %v7960_v7 = vpop.f32.mrb[42].mxu1  ;;  %v8179_v55 = vpop.f32.mrb[147].mxu0 }
 0x34f   : > { %13827 = vst [vmem:[#allocation82_spill] sm:$0xff] %v11828_v13  ;;  %v11832_v18 = vadd.f32 %v8179_v55, %v8178_v59  ;;  %v7961_v38 = vpop.f32.mrb[43].mxu1 }
 0x350   : > { %v11834_v42 = vadd.f32 %v7961_v38, %v7960_v7 }
 0x351   : > { %13828 = vst [vmem:[#allocation81_spill] sm:$0xff] %v11832_v18 }
 0x353   : > { %4346 = vmatmul.mubr.bf16.gmra.mrb[132].mxu1 %v13798_v51 }
 0x354   : > { %4353 = vmatprep.mubr.bf16.mxu1 %v13829_v54 }
 0x35b   : > { %4354 = vmatmul.mubr.bf16.gmra.mrb[136].mxu1 %v13801_v31 }
 0x35c   : > { %4361 = vmatprep.mubr.bf16.mxu1 %v13830_v62  ;;  %v13835_v62 = vld [vmem:[#allocation58_spill] sm:$0xff] }
 0x362   : > { %v8181_v3 = vpop.f32.mrb[148].mxu0 }
 0x363   : > { %4362 = vmatmul.mubr.bf16.gmra.mrb[140].mxu1 %v13805_v27  ;;  %v7963_v60 = vpop.f32.mrb[44].mxu1  ;;  %v8182_v63 = vpop.f32.mrb[149].mxu0  ;;  %v13834_v27 = vld [vmem:[#allocation51_spill] sm:$0xff] }
 0x364   : > { %4369 = vmatprep.mubr.bf16.mxu1 %v13831_v39  ;;  %v11842_v22 = vadd.f32 %v8182_v63, %v8181_v3  ;;  %v7964_v59 = vpop.f32.mrb[45].mxu1  ;;  %v8184_v7 = vpop.f32.mrb[150].mxu0  ;;  %v13836_v3 = vld [vmem:[#allocation63_spill] sm:$0xff] }
 0x365   : > { %v11844_v55 = vadd.f32 %v7964_v59, %v7963_v60  ;;  %v7966_v51 = vpop.f32.mrb[46].mxu1  ;;  %v8185_v38 = vpop.f32.mrb[151].mxu0 }
 0x366   : > { %13832 = vst [vmem:[#allocation2_spill] sm:$0xff] %v11842_v22  ;;  %v11846_v54 = vadd.f32 %v8185_v38, %v8184_v7  ;;  %v7967_v31 = vpop.f32.mrb[47].mxu1 }
 0x367   : > { %v11848_v18 = vadd.f32 %v7967_v31, %v7966_v51 }
 0x368   : > { %13833 = vst [vmem:[#allocation26_spill] sm:$0xff] %v11846_v54 }
 0x36b   : > { %4370 = vmatmul.mubr.bf16.gmra.mrb[144].mxu1 %v13809_v29 }
 0x36c   : > { %4377 = vmatprep.mubr.bf16.mxu1 %v13834_v27 }
 0x373   : > { %4378 = vmatmul.mubr.bf16.gmra.mrb[148].mxu1 %v13811_v41 }
 0x374   : > { %4385 = vmatprep.mubr.bf16.mxu1 %v13835_v62 }
 0x37b   : > { %4386 = vmatmul.mubr.bf16.gmra.mrb[152].mxu1 %v13814_v40  ;;  %v13839_v40 = vld [vmem:[#allocation68_spill] sm:$0xff] }
 0x37c   : > { %4393 = vmatprep.mubr.bf16.mxu1 %v13836_v3 }
 0x37d   : > { %v8187_v60 = vpop.f32.mrb[152].mxu0 }
 0x37e   : > { %v7969_v63 = vpop.f32.mrb[48].mxu1  ;;  %v8188_v39 = vpop.f32.mrb[153].mxu0 }
 0x37f   : > { %v11856_v59 = vadd.f32 %v8188_v39, %v8187_v60  ;;  %v7970_v7 = vpop.f32.mrb[49].mxu1  ;;  %v8190_v51 = vpop.f32.mrb[154].mxu0 }
 0x380   : > { %v11858_v38 = vadd.f32 %v7970_v7, %v7969_v63  ;;  %v7972_v29 = vpop.f32.mrb[50].mxu1  ;;  %v8191_v31 = vpop.f32.mrb[155].mxu0 }
 0x381   : > { %13837 = vst [vmem:[#allocation7_spill] sm:$0xff] %v11856_v59  ;;  %v11860_v27 = vadd.f32 %v8191_v31, %v8190_v51  ;;  %v7973_v41 = vpop.f32.mrb[51].mxu1 }
 0x382   : > { %v11862_v54 = vadd.f32 %v7973_v41, %v7972_v29 }
 0x383   : > { %13838 = vst [vmem:[#allocation32_spill] sm:$0xff] %v11860_v27  ;;  %4394 = vmatmul.mubr.bf16.gmra.mrb[156].mxu1 %v13816_v56  ;;  %v13843_v56 = vld [vmem:[#allocation78_spill] sm:$0xff] }
 0x384   : > { %4401 = vmatprep.mubr.bf16.mxu1 %v13839_v40 }
 0x385   : > { %v8193_v62 = vpop.f32.mrb[156].mxu0 }
 0x386   : > { %v7975_v3 = vpop.f32.mrb[52].mxu1  ;;  %v8194_v22 = vpop.f32.mrb[157].mxu0 }
 0x387   : > { %v11866_v60 = vadd.f32 %v8194_v22, %v8193_v62  ;;  %v7976_v39 = vpop.f32.mrb[53].mxu1  ;;  %v8196_v59 = vpop.f32.mrb[158].mxu0 }
 0x388   : > { %v11868_v63 = vadd.f32 %v7976_v39, %v7975_v3  ;;  %v7978_v7 = vpop.f32.mrb[54].mxu1  ;;  %v8197_v13 = vpop.f32.mrb[159].mxu0 }
 0x389   : > { %13840 = vst [vmem:[#allocation18_spill] sm:$0xff] %v11866_v60  ;;  %v11870_v51 = vadd.f32 %v8197_v13, %v8196_v59  ;;  %v7979_v31 = vpop.f32.mrb[55].mxu1 }
 0x38a   : > { %13841 = vst [vmem:[#allocation38_spill] sm:$0xff] %v11868_v63  ;;  %v11872_v29 = vadd.f32 %v7979_v31, %v7978_v7 }
 0x38b   : > { %13842 = vst [vmem:[#allocation12_spill] sm:$0xff] %v11870_v51  ;;  %4402 = vmatmul.mubr.bf16.gmra.mrb[160].mxu1 %v13817_v37  ;;  %v13848_v37 = vld [vmem:[#allocation85_spill] sm:$0xff] }
 0x38c   : > { %4409 = vmatprep.mubr.bf16.mxu1 %v13843_v56 }
 0x38d   : > { %v8199_v41 = vpop.f32.mrb[160].mxu0 }
 0x38e   : > { %v7981_v40 = vpop.f32.mrb[56].mxu1  ;;  %v8200_v27 = vpop.f32.mrb[161].mxu0 }
 0x38f   : > { %v11876_v22 = vadd.f32 %v8200_v27, %v8199_v41  ;;  %v7982_v62 = vpop.f32.mrb[57].mxu1  ;;  %v8202_v60 = vpop.f32.mrb[162].mxu0 }
 0x390   : > { %v11878_v3 = vadd.f32 %v7982_v62, %v7981_v40  ;;  %v7984_v39 = vpop.f32.mrb[58].mxu1  ;;  %v8203_v63 = vpop.f32.mrb[163].mxu0 }
 0x391   : > { %13844 = vst [vmem:[#allocation41_spill] sm:$0xff] %v11876_v22  ;;  %v11880_v13 = vadd.f32 %v8203_v63, %v8202_v60  ;;  %v7985_v59 = vpop.f32.mrb[59].mxu1 }
 0x392   : > { %13845 = vst [vmem:[#allocation47_spill] sm:$0xff] %v11878_v3  ;;  %v11882_v7 = vadd.f32 %v7985_v59, %v7984_v39 }
 0x393   : > { %13846 = vst [vmem:[#allocation16_spill] sm:$0xff] %v11880_v13  ;;  %4410 = vmatmul.mubr.bf16.gmra.mrb[164].mxu1 %v13818_v33  ;;  %v13852_v33 = vld [vmem:[#allocation87_spill] sm:$0xff] }
 0x394   : > { %13847 = vst [vmem:[#allocation50_spill] sm:$0xff] %v11882_v7  ;;  %4417 = vmatprep.mubr.bf16.mxu1 %v13848_v37 }
 0x395   : > { %v8205_v31 = vpop.f32.mrb[164].mxu0 }
 0x396   : > { %v7987_v56 = vpop.f32.mrb[60].mxu1  ;;  %v8206_v51 = vpop.f32.mrb[165].mxu0 }
 0x397   : > { %v11886_v27 = vadd.f32 %v8206_v51, %v8205_v31  ;;  %v7988_v41 = vpop.f32.mrb[61].mxu1  ;;  %v8208_v22 = vpop.f32.mrb[166].mxu0 }
 0x398   : > { %v11888_v40 = vadd.f32 %v7988_v41, %v7987_v56  ;;  %v7990_v62 = vpop.f32.mrb[62].mxu1  ;;  %v8209_v3 = vpop.f32.mrb[167].mxu0 }
 0x399   : > { %13849 = vst [vmem:[#allocation57_spill] sm:$0xff] %v11886_v27  ;;  %v11890_v60 = vadd.f32 %v8209_v3, %v8208_v22  ;;  %v7991_v63 = vpop.f32.mrb[63].mxu1 }
 0x39a   : > { %13850 = vst [vmem:[#allocation21_spill] sm:$0xff] %v11888_v40  ;;  %v11892_v39 = vadd.f32 %v7991_v63, %v7990_v62 }
 0x39b   : > { %13851 = vst [vmem:[#allocation62_spill] sm:$0xff] %v11890_v60  ;;  %4418 = vmatmul.mubr.bf16.gmra.mrb[168].mxu1 %v13821_v49 }
 0x39c   : > { %4425 = vmatprep.mubr.bf16.mxu1 %v13852_v33 }
 0x39d   : > { %v8211_v59 = vpop.f32.mrb[168].mxu0 }
 0x39e   : > { %v8009_v37 = vpop.f32.mrb[64].mxu1  ;;  %v8212_v13 = vpop.f32.mrb[169].mxu0 }
 0x39f   : > { %v8010_v51 = vpop.f32.mrb[65].mxu1  ;;  %v11896_v31 = vadd.f32 %v8212_v13, %v8211_v59  ;;  %v8214_v27 = vpop.f32.mrb[170].mxu0 }
 0x3a0   : > { %v8011_v56 = vadd.f32 %v8010_v51, %v8009_v37  ;;  %v8012_v41 = vpop.f32.mrb[66].mxu1  ;;  %v8215_v40 = vpop.f32.mrb[171].mxu0 }
 0x3a1   : > { %13853 = vst [vmem:[#allocation67_spill] sm:$0xff] %v11896_v31  ;;  %v8013_v7 = vpop.f32.mrb[67].mxu1  ;;  %v11898_v22 = vadd.f32 %v8215_v40, %v8214_v27 }
 0x3a2   : > { %v4018_v3 = vadd.f32 %v8011_v56, %v11595_v5  ;;  %v8014_v62 = vadd.f32 %v8013_v7, %v8012_v41 }
 0x3a3   : > { %13854 = vst [vmem:[#allocation30_spill] sm:$0xff] %v11898_v22  ;;  %4426 = vmatmul.mubr.bf16.gmra.mrb[172].mxu1 %v13822_v58 }
 0x3a4   : > { %v11903_v49 = vadd.f32 %v8014_v62, %v11599_v16  ;;  %4433 = vmatprep.mubr.bf16.mxu1 %v11566_v47  ;;  %v11907_v13 = vadd.f32 %v11607_v10, %v4018_v3 }
 0x3a5   : > { %v11909_v63 = vpop.f32.mrb[172].mxu0 }
 0x3a6   : > { %v8015_v33 = vpop.f32.mrb[68].mxu1  ;;  %v11911_v59 = vpop.f32.mrb[173].mxu0 }
 0x3a7   : > { %v8016_v27 = vpop.f32.mrb[69].mxu1  ;;  %v11913_v40 = vpop.f32.mrb[174].mxu0 }
 0x3a8   : > { %v8017_v5 = vadd.f32 %v8016_v27, %v8015_v33  ;;  %v8018_v7 = vpop.f32.mrb[70].mxu1  ;;  %v11915_v37 = vpop.f32.mrb[175].mxu0  ;;  %v3230_v33 = vshll.u32 %v11670_v61, 16 }
 0x3a9   : > { %v8019_v58 = vpop.f32.mrb[71].mxu1 }
 0x3aa   : > { %v11918_v16 = vadd.f32 %v8017_v5, %v11611_v35  ;;  %v8020_v47 = vadd.f32 %v8019_v58, %v8018_v7  ;;  %v3235_v58 = vshll.u32 %v11785_v9, 16 }
 0x3ab   : > { %4434 = vmatmul.mubr.bf16.gmra.mrb[176].mxu1 %v11299_v19 }
 0x3ac   : > { %v11922_v10 = vadd.f32 %v8020_v47, %v11620_v46  ;;  %4441 = vmatprep.mubr.bf16.mxu1 %v11586_v26  ;;  %v3232_v26 = vrot.slane %v3230_v33, 1 }
 0x3ad   : > { %v11925_v51 = vpop.f32.mrb[176].mxu0 }
 0x3ae   : > { %v8021_v56 = vpop.f32.mrb[72].mxu1  ;;  %v11927_v41 = vpop.f32.mrb[177].mxu0 }
 0x3af   : > { %v8022_v3 = vpop.f32.mrb[73].mxu1  ;;  %v11929_v62 = vpop.f32.mrb[178].mxu0 }
 0x3b0   : > { %v8023_v35 = vadd.f32 %v8022_v3, %v8021_v56  ;;  %v8024_v27 = vpop.f32.mrb[74].mxu1  ;;  %v11932_v5 = vpop.f32.mrb[179].mxu0  ;;  %v3228_v56 = vshrl.u32 %v11670_v61, 16 }
 0x3b1   : > { %v8025_v19 = vpop.f32.mrb[75].mxu1 }
 0x3b2   : > { %v11935_v46 = vadd.f32 %v8023_v35, %v11631_v14  ;;  %v8026_v7 = vadd.f32 %v8025_v19, %v8024_v27  ;;  %v3233_v35 = vor.u32 %v3232_v26, %v3228_v56  ;;  %v3237_v27 = vrot.slane %v3235_v58, 1 }
 0x3b3   : > { %4442 = vmatmul.mubr.bf16.gmra.mrb[180].mxu1 %v11415_v6 }
 0x3b4   : > { %v11940_v47 = vadd.f32 %v8026_v7, %v11640_v4  ;;  %4449 = vmatprep.mubr.bf16.mxu1 %v11673_v30  ;;  %v3238_v60 = vsel %vm2902_vm2, %v3233_v35, %v3237_v27 }
 0x3b5   : > { %v11943_v22 = vpop.f32.mrb[180].mxu0 }
 0x3b6   : > { %13855 = vst [vmem:[#allocation76_spill] sm:$0xff] %v11943_v22  ;;  %v8027_v3 = vpop.f32.mrb[76].mxu1  ;;  %v11946_v31 = vpop.f32.mrb[181].mxu0 }
 0x3b7   : > { %v8028_v14 = vpop.f32.mrb[77].mxu1  ;;  %v11948_v19 = vpop.f32.mrb[182].mxu0 }
 0x3b8   : > { %13856 = vst [vmem:[#allocation34_spill] sm:$0xff] %v11948_v19  ;;  %v8029_v6 = vadd.f32 %v8028_v14, %v8027_v3  ;;  %v8030_v33 = vpop.f32.mrb[78].mxu1  ;;  %v11950_v9 = vpop.f32.mrb[183].mxu0 }
 0x3b9   : > { %v8031_v4 = vpop.f32.mrb[79].mxu1 }
 0x3ba   : > { %v11953_v7 = vadd.f32 %v8029_v6, %v11648_v17  ;;  %v8032_v30 = vadd.f32 %v8031_v4, %v8030_v33 }
 0x3bb   : > { %4450 = vmatmul.mubr.bf16.gmra.mrb[184].mxu1 %v11529_v53 }
 0x3bc   : > { %v11958_v22 = vadd.f32 %v8032_v30, %v11656_v45  ;;  %4457 = vmatprep.mubr.bf16.mxu1 %v3238_v60 }
 0x3bd   : > { %v11960_v26 = vpop.f32.mrb[184].mxu0 }
 0x3be   : > { %13857 = vst [vmem:[#allocation84_spill] sm:$0xff] %v11960_v26  ;;  %v8033_v58 = vpop.f32.mrb[80].mxu1  ;;  %v11962_v56 = vpop.f32.mrb[185].mxu0 }
 0x3bf   : > { %13858 = vst [vmem:[#allocation86_spill] sm:$0xff] %v11962_v56  ;;  %v8034_v3 = vpop.f32.mrb[81].mxu1  ;;  %v11964_v14 = vpop.f32.mrb[186].mxu0 }
 0x3c0   : > { %13859 = vst [vmem:[#allocation11_spill] sm:$0xff] %v11964_v14  ;;  %v8035_v19 = vadd.f32 %v8034_v3, %v8033_v58  ;;  %v8036_v17 = vpop.f32.mrb[82].mxu1  ;;  %v11966_v6 = vpop.f32.mrb[187].mxu0 }
 0x3c1   : > { %13860 = vst [vmem:[#allocation45_spill] sm:$0xff] %v11966_v6  ;;  %v8037_v33 = vpop.f32.mrb[83].mxu1 }
 0x3c2   : > { %v11969_v53 = vadd.f32 %v8035_v19, %v11664_v34  ;;  %v8038_v35 = vadd.f32 %v8037_v33, %v8036_v17 }
 0x3c3   : > { %4458 = vmatmul.mubr.bf16.gmra.mrb[188].mxu1 %v11670_v61 }
 0x3c4   : > { %v11973_v45 = vadd.f32 %v8038_v35, %v11677_v57 }
 0x3c5   : > { %v11975_v60 = vpop.f32.mrb[188].mxu0 }
 0x3c6   : > { %13861 = vst [vmem:[#allocation25_spill] sm:$0xff] %v11975_v60  ;;  %v8039_v27 = vpop.f32.mrb[84].mxu1  ;;  %v11977_v4 = vpop.f32.mrb[189].mxu0 }
 0x3c7   : > { %13862 = vst [vmem:[#allocation54_spill] sm:$0xff] %v11977_v4  ;;  %v8040_v30 = vpop.f32.mrb[85].mxu1  ;;  %v11979_v58 = vpop.f32.mrb[190].mxu0 }
 0x3c8   : > { %13863 = vst [vmem:[#allocation60_spill] sm:$0xff] %v11979_v58  ;;  %v8041_v3 = vadd.f32 %v8040_v30, %v8039_v27  ;;  %v8042_v14 = vpop.f32.mrb[86].mxu1  ;;  %v11981_v26 = vpop.f32.mrb[191].mxu0 }
 0x3c9   : > { %13864 = vst [vmem:[#allocation40_spill] sm:$0xff] %v11981_v26  ;;  %v8043_v34 = vpop.f32.mrb[87].mxu1 }
 0x3ca   : > { %v11984_v19 = vadd.f32 %v8041_v3, %v11691_v28  ;;  %v8044_v61 = vadd.f32 %v8043_v34, %v8042_v14 }
 0x3cc   : > { %v11987_v57 = vadd.f32 %v8044_v61, %v11700_v25 }
 0x3cd   : > { %v11989_v17 = vpop.f32.mrb[192].mxu0 }
 0x3ce   : > { %13865 = vst [vmem:[#allocation28_spill] sm:$0xff] %v11989_v17  ;;  %v8045_v33 = vpop.f32.mrb[88].mxu1  ;;  %v11991_v35 = vpop.f32.mrb[193].mxu0 }
 0x3cf   : > { %13866 = vst [vmem:[#allocation36_spill] sm:$0xff] %v11991_v35  ;;  %v8046_v60 = vpop.f32.mrb[89].mxu1  ;;  %v11993_v4 = vpop.f32.mrb[194].mxu0 }
 0x3d0   : > { %13867 = vst [vmem:[#allocation10_spill] sm:$0xff] %v11993_v4  ;;  %v8047_v27 = vadd.f32 %v8046_v60, %v8045_v33  ;;  %v8048_v30 = vpop.f32.mrb[90].mxu1  ;;  %v11995_v58 = vpop.f32.mrb[195].mxu0 }
 0x3d1   : > { %13868 = vst [vmem:[#allocation43_spill] sm:$0xff] %v11995_v58  ;;  %v8049_v26 = vpop.f32.mrb[91].mxu1 }
 0x3d2   : > { %v11998_v28 = vadd.f32 %v8047_v27, %v11754_v48  ;;  %v8050_v14 = vadd.f32 %v8049_v26, %v8048_v30 }
 0x3d4   : > { %v12001_v25 = vadd.f32 %v8050_v14, %v11761_v2  ;;  %v12016_v2 = vadd.f32 %v11616_v20, %v11903_v49  ;;  %v12031_v20 = vadd.f32 %v11624_v52, %v11918_v16  ;;  %v12045_v52 = vadd.f32 %v11644_v0, %v11935_v46 }
 0x3d5   : > { %v12003_v3 = vpop.f32.mrb[196].mxu0  ;;  %v12059_v0 = vadd.f32 %v11660_v21, %v11953_v7  ;;  %v13877_v7 = vld [vmem:[#allocation9_spill] sm:$0xff] }
 0x3d6   : > { %13869 = vst [vmem:[#allocation24_spill] sm:$0xff] %v12003_v3  ;;  %v8051_v34 = vpop.f32.mrb[92].mxu1  ;;  %v12005_v61 = vpop.f32.mrb[197].mxu0 }
 0x3d7   : > { %13870 = vst [vmem:[#allocation51_spill] sm:$0xff] %v12005_v61  ;;  %v8052_v17 = vpop.f32.mrb[93].mxu1  ;;  %v12007_v35 = vpop.f32.mrb[198].mxu0 }
 0x3d8   : > { %13871 = vst [vmem:[#allocation58_spill] sm:$0xff] %v12007_v35  ;;  %v8053_v60 = vadd.f32 %v8052_v17, %v8051_v34  ;;  %v8054_v33 = vpop.f32.mrb[94].mxu1  ;;  %v12009_v4 = vpop.f32.mrb[199].mxu0 }
 0x3d9   : > { %13872 = vst [vmem:[#allocation63_spill] sm:$0xff] %v12009_v4  ;;  %v8055_v58 = vpop.f32.mrb[95].mxu1 }
 0x3da   : > { %v12012_v48 = vadd.f32 %v8053_v60, %v11779_v24  ;;  %v8056_v26 = vadd.f32 %v8055_v58, %v8054_v33  ;;  %v12038_v60 = vadd.f32 %v11636_v11, %v11922_v10  ;;  %v12052_v11 = vadd.f32 %v11652_v36, %v11940_v47 }
 0x3db   : > { %v12066_v36 = vadd.f32 %v11668_v44, %v11958_v22  ;;  %v12080_v44 = vadd.f32 %v13877_v7, %v11973_v45  ;;  %v13885_v7 = vld [vmem:[#allocation3_spill] sm:$0xff] }
 0x3dc   : > { %v12019_v27 = vadd.f32 %v8056_v26, %v11783_v15 }
 0x3dd   : > { %v12021_v30 = vpop.f32.mrb[200].mxu0 }
 0x3de   : > { %13873 = vst [vmem:[#allocation68_spill] sm:$0xff] %v12021_v30  ;;  %v8057_v14 = vpop.f32.mrb[96].mxu1  ;;  %v12023_v35 = vpop.f32.mrb[201].mxu0 }
 0x3df   : > { %13874 = vst [vmem:[#allocation78_spill] sm:$0xff] %v12023_v35  ;;  %v8058_v17 = vpop.f32.mrb[97].mxu1  ;;  %v12025_v34 = vpop.f32.mrb[202].mxu0  ;;  %v13914_v35 = vld [vmem:[#allocation32_spill] sm:$0xff] }
 0x3e0   : > { %13875 = vst [vmem:[#allocation85_spill] sm:$0xff] %v12025_v34  ;;  %v8059_v3 = vadd.f32 %v8058_v17, %v8057_v14  ;;  %v8060_v4 = vpop.f32.mrb[98].mxu1  ;;  %v12027_v24 = vpop.f32.mrb[203].mxu0 }
 0x3e1   : > { %13876 = vst [vmem:[#allocation87_spill] sm:$0xff] %v12027_v24  ;;  %v8061_v58 = vpop.f32.mrb[99].mxu1 }
 0x3e2   : > { %v12034_v15 = vadd.f32 %v8059_v3, %v11800_v43  ;;  %v8062_v49 = vadd.f32 %v8061_v58, %v8060_v4 }
 0x3e4   : > { %v12041_v33 = vadd.f32 %v8062_v49, %v11804_v12 }
 0x3e6   : > { %v8063_v26 = vpop.f32.mrb[100].mxu1 }
 0x3e7   : > { %v8064_v14 = vpop.f32.mrb[101].mxu1 }
 0x3e8   : > { %v8065_v17 = vadd.f32 %v8064_v14, %v8063_v26  ;;  %v8066_v34 = vpop.f32.mrb[102].mxu1 }
 0x3e9   : > { %v8067_v30 = vpop.f32.mrb[103].mxu1 }
 0x3ea   : > { %v12048_v43 = vadd.f32 %v8065_v17, %v11814_v1  ;;  %v8068_v16 = vadd.f32 %v8067_v30, %v8066_v34 }
 0x3ec   : > { %v12055_v12 = vadd.f32 %v8068_v16, %v11818_v8 }
 0x3ee   : > { %v8069_v10 = vpop.f32.mrb[104].mxu1 }
 0x3ef   : > { %v8070_v4 = vpop.f32.mrb[105].mxu1 }
 0x3f0   : > { %v8071_v3 = vadd.f32 %v8070_v4, %v8069_v10  ;;  %v8072_v58 = vpop.f32.mrb[106].mxu1 }
 0x3f1   : > { %v8073_v49 = vpop.f32.mrb[107].mxu1 }
 0x3f2   : > { %v12062_v1 = vadd.f32 %v8071_v3, %v11830_v23  ;;  %v8074_v46 = vadd.f32 %v8073_v49, %v8072_v58  ;;  %v12076_v23 = vadd.f32 %v11686_v50, %v11969_v53  ;;  %v13880_v53 = vld [vmem:[#allocation71_spill] sm:$0xff] }
 0x3f3   : > { %v12094_v45 = vadd.f32 %v13880_v53, %v11987_v57  ;;  %v12108_v57 = vadd.f32 %v13885_v7, %v12001_v25  ;;  %v13896_v7 = vld [vmem:[#allocation73_spill] sm:$0xff] }
 0x3f4   : > { %v12069_v8 = vadd.f32 %v8074_v46, %v11834_v42 }
 0x3f5   : > { %13886 = vst [vmem:[#allocation3_spill] sm:$0xff] %v12108_v57 }
 0x3f6   : > { %v8075_v47 = vpop.f32.mrb[108].mxu1 }
 0x3f7   : > { %v8076_v30 = vpop.f32.mrb[109].mxu1 }
 0x3f8   : > { %v8077_v34 = vadd.f32 %v8076_v30, %v8075_v47  ;;  %v8078_v26 = vpop.f32.mrb[110].mxu1 }
 0x3f9   : > { %v8079_v14 = vpop.f32.mrb[111].mxu1 }
 0x3fa   : > { %v12072_v17 = vadd.f32 %v8077_v34, %v11844_v55  ;;  %v8080_v21 = vadd.f32 %v8079_v14, %v8078_v26  ;;  %v13878_v55 = vld [vmem:[#allocation69_spill] sm:$0xff]  ;;  %v13883_v14 = vld [vmem:[#allocation38_spill] sm:$0xff] }
 0x3fb   : > { %v12087_v58 = vadd.f32 %v13878_v55, %v11984_v19  ;;  %v12101_v19 = vadd.f32 %v11776_v32, %v11998_v28  ;;  %v13888_v55 = vld [vmem:[#allocation72_spill] sm:$0xff]  ;;  %v13890_v28 = vld [vmem:[#allocation47_spill] sm:$0xff] }
 0x3fc   : > { %v12083_v42 = vadd.f32 %v8080_v21, %v11848_v18  ;;  %v12115_v32 = vadd.f32 %v13888_v55, %v12012_v48  ;;  %v12129_v48 = vadd.f32 %v13896_v7, %v12034_v15 }
 0x3fd   : > { %13882 = vst [vmem:[#allocation71_spill] sm:$0xff] %v12101_v19 }
 0x3fe   : > { %v8081_v22 = vpop.f32.mrb[112].mxu1  ;;  %13889 = vst [vmem:[#allocation72_spill] sm:$0xff] %v12115_v32  ;;  %13897 = vst [vmem:[#allocation73_spill] sm:$0xff] %v12129_v48 }
 0x3ff   : > { %v8082_v16 = vpop.f32.mrb[113].mxu1 }
 0x400   : > { %v8083_v10 = vadd.f32 %v8082_v16, %v8081_v22  ;;  %v8084_v4 = vpop.f32.mrb[114].mxu1 }
 0x401   : > { %v8085_v3 = vpop.f32.mrb[115].mxu1 }
 0x402   : > { %v12090_v49 = vadd.f32 %v8083_v10, %v11858_v38  ;;  %v8086_v50 = vadd.f32 %v8085_v3, %v8084_v4 }
 0x404   : > { %13879 = vst [vmem:[#allocation9_spill] sm:$0xff] %v12090_v49  ;;  %v12097_v18 = vadd.f32 %v8086_v50, %v11862_v54 }
 0x406   : > { %13881 = vst [vmem:[#allocation69_spill] sm:$0xff] %v12097_v18  ;;  %v8087_v46 = vpop.f32.mrb[116].mxu1 }
 0x407   : > { %v8088_v47 = vpop.f32.mrb[117].mxu1 }
 0x408   : > { %v8089_v30 = vadd.f32 %v8088_v47, %v8087_v46  ;;  %v8090_v34 = vpop.f32.mrb[118].mxu1  ;;  %v13892_v46 = vld [vmem:[#allocation74_spill] sm:$0xff] }
 0x409   : > { %v8091_v26 = vpop.f32.mrb[119].mxu1  ;;  %v12122_v25 = vadd.f32 %v13892_v46, %v12019_v27  ;;  %v13894_v47 = vld [vmem:[#allocation50_spill] sm:$0xff] }
 0x40a   : > { %v12104_v38 = vadd.f32 %v8089_v30, %v13883_v14  ;;  %v8092_v21 = vadd.f32 %v8091_v26, %v8090_v34 }
 0x40b   : > { %13893 = vst [vmem:[#allocation74_spill] sm:$0xff] %v12122_v25 }
 0x40c   : > { %13884 = vst [vmem:[#allocation38_spill] sm:$0xff] %v12104_v38  ;;  %v12111_v54 = vadd.f32 %v8092_v21, %v11872_v29 }
 0x40e   : > { %13887 = vst [vmem:[#allocation90_spill] sm:$0xff] %v12111_v54  ;;  %v8093_v22 = vpop.f32.mrb[120].mxu1 }
 0x40f   : > { %v8094_v16 = vpop.f32.mrb[121].mxu1 }
 0x410   : > { %v8095_v10 = vadd.f32 %v8094_v16, %v8093_v22  ;;  %v8096_v4 = vpop.f32.mrb[122].mxu1  ;;  %v13898_v22 = vld [vmem:[#allocation21_spill] sm:$0xff] }
 0x411   : > { %v8097_v3 = vpop.f32.mrb[123].mxu1 }
 0x412   : > { %v12118_v50 = vadd.f32 %v8095_v10, %v13890_v28  ;;  %v8098_v53 = vadd.f32 %v8097_v3, %v8096_v4  ;;  %v13900_v4 = vld [vmem:[#allocation75_spill] sm:$0xff] }
 0x413   : > { %v12136_v27 = vadd.f32 %v13900_v4, %v12041_v33  ;;  %v12149_v33 = vld [vmem:[%s13575_s6] ss:$0 sm:$0xff] }
 0x414   : > { %13891 = vst [vmem:[#allocation47_spill] sm:$0xff] %v12118_v50  ;;  %v12125_v29 = vadd.f32 %v8098_v53, %v13894_v47 }
 0x415   : > { %13901 = vst [vmem:[#allocation75_spill] sm:$0xff] %v12136_v27 }
 0x416   : > { %13895 = vst [vmem:[#allocation50_spill] sm:$0xff] %v12125_v29  ;;  %v8099_v30 = vpop.f32.mrb[124].mxu1 }
 0x417   : > { %v8100_v34 = vpop.f32.mrb[125].mxu1 }
 0x418   : > { %v8101_v26 = vadd.f32 %v8100_v34, %v8099_v30  ;;  %v8102_v14 = vpop.f32.mrb[126].mxu1  ;;  %v13903_v30 = vld [vmem:[#allocation82_spill] sm:$0xff] }
 0x419   : > { %v8103_v21 = vpop.f32.mrb[127].mxu1  ;;  %v12143_v15 = vadd.f32 %v13903_v30, %v12048_v43  ;;  %v12160_v43 = vld [vmem:[%s13576_s7] ss:$0 sm:$0xff] }
 0x41a   : > { %v12132_v16 = vadd.f32 %v8101_v26, %v13898_v22  ;;  %v8104_v10 = vadd.f32 %v8103_v21, %v8102_v14 }
 0x41b   : > { %13904 = vst [vmem:[#allocation82_spill] sm:$0xff] %v12143_v15 }
 0x41c   : > { %13899 = vst [vmem:[#allocation21_spill] sm:$0xff] %v12132_v16  ;;  %v12139_v3 = vadd.f32 %v8104_v10, %v11892_v39  ;;  %v13905_v39 = vld [vmem:[#allocation81_spill] sm:$0xff] }
 0x41d   : > { %v12153_v14 = vadd.f32 %v13905_v39, %v12055_v12 }
 0x41e   : > { %13902 = vst [vmem:[#allocation91_spill] sm:$0xff] %v12139_v3  ;;  %v8233_v55 = vpop.f32.mrb[128].mxu1 }
 0x41f   : > { %v8234_v28 = vpop.f32.mrb[129].mxu1  ;;  %13906 = vst [vmem:[#allocation81_spill] sm:$0xff] %v12153_v14 }
 0x420   : > { %v8235_v53 = vadd.f32 %v8234_v28, %v8233_v55  ;;  %v8236_v46 = vpop.f32.mrb[130].mxu1 }
 0x421   : > { %v8237_v47 = vpop.f32.mrb[131].mxu1 }
 0x422   : > { %v4340_v34 = vadd.f32 %v8235_v53, %v11907_v13  ;;  %v8238_v26 = vadd.f32 %v8237_v47, %v8236_v46 }
 0x424   : > { %v4501_v21 = vadd.f32 %v11911_v59, %v4340_v34  ;;  %v4343_v7 = vadd.f32 %v8238_v26, %v12016_v2  ;;  %v13907_v2 = vld [vmem:[#allocation2_spill] sm:$0xff] }
 0x425   : > { %v12168_v46 = vadd.f32 %v13907_v2, %v12062_v1  ;;  %v13909_v26 = vld [vmem:[#allocation26_spill] sm:$0xff] }
 0x426   : > { %v4634_v13 = vmul.f32 %v12149_v33, %v4501_v21  ;;  %v4504_v22 = vadd.f32 %v11915_v37, %v4343_v7  ;;  %v8239_v10 = vpop.f32.mrb[132].mxu1  ;;  %v12178_v39 = vadd.f32 %v13909_v26, %v12069_v8 }
 0x427   : > { %v8240_v4 = vpop.f32.mrb[133].mxu1  ;;  %13908 = vst [vmem:[#allocation2_spill] sm:$0xff] %v12168_v46 }
 0x428   : > { %v4673_v55 = vadd.f32 %v12160_v43, %v4634_v13  ;;  %v4635_v12 = vmul.f32 %v12149_v33, %v4504_v22  ;;  %v8241_v28 = vadd.f32 %v8240_v4, %v8239_v10  ;;  %v8242_v53 = vpop.f32.mrb[134].mxu1  ;;  %13910 = vst [vmem:[#allocation26_spill] sm:$0xff] %v12178_v39  ;;  %v9031_v10 = vmov 1983009808  }
 0x429   : > { %v8243_v59 = vpop.f32.mrb[135].mxu1  ;;  %v5828_v4 = vunpack.c.l.s4 %v9031_v10  ;;  %v13912_v10 = vld [vmem:[#allocation7_spill] sm:$0xff] }
 0x42a   : > { %v12170_v47 = vmul.f32 0.70710677, %v4673_v55  ;;  %v12173_v30 = vadd.f32 %v12160_v43, %v4635_v12  ;;  %v4348_v37 = vadd.f32 %v8241_v28, %v12031_v20  ;;  %v8244_v34 = vadd.f32 %v8243_v59, %v8242_v53  ;;  %v13911_v59 = vld [vmem:[#allocation20_spill] sm:$0xff] }
 0x42b   : > { %v5830_v12 = vlaneseq  ;;  %v5626_v2 = vrot.slane %v13911_v59, 1  ;;  %v12196_v16 = vadd.f32 %v13912_v10, %v12072_v17  ;;  %v12207_v17 = vadd.f32 %v13914_v35, %v12083_v42 }
 0x42c   : > { %v4769_v21 = vand.u32 2147483647, %v12170_v47  ;;  %v12182_v7 = vmul.f32 0.70710677, %v12173_v30  ;;  %v4509_v1 = vadd.f32 %v11909_v63, %v4348_v37  ;;  %v4351_v13 = vadd.f32 %v8244_v34, %v12038_v60 }
 0x42d   : > { %13913 = vst [vmem:[#allocation20_spill] sm:$0xff] %v12196_v16  ;;  %13915 = vst [vmem:[#allocation7_spill] sm:$0xff] %v12207_v17  ;;  %v12228_v38 = vmul.f32 0.5, %v4673_v55  ;;  %vm5409_vm2 = vcmp.ge.f32.partialorder %v12170_v47, 0.0 }
 0x42e   : > { %v4801_v22 = vmul.f32 0.3275911, %v4769_v21  ;;  %v4770_v20 = vand.u32 2147483647, %v12182_v7  ;;  %v4636_v28 = vmul.f32 %v12149_v33, %v4509_v1  ;;  %v4512_v8 = vadd.f32 %v11913_v40, %v4351_v13  ;;  %v8245_v53 = vpop.f32.mrb[136].mxu1 }
 0x42f   : > { %v8246_v24 = vpop.f32.mrb[137].mxu1  ;;  %v5829_v1 = vunpack.c.0.s8 %v5828_v4  ;;  %v5831_v40 = vshrl.u32 %v5830_v12, 7  ;;  %v5217_v59 = vsub.f32 0.0, %v4769_v21  ;;  %v13918_v12 = vld [vmem:[#allocation37_spill] sm:$0xff]  ;;  %vm5410_vm0 = vcmp.ge.f32.partialorder %v12182_v7, 0.0 }
 0x430   : > { %v4833_v26 = vadd.f32 1.0, %v4801_v22  ;;  %v4802_v3 = vmul.f32 0.3275911, %v4770_v20  ;;  %v12191_v63 = vadd.f32 %v12160_v43, %v4636_v28  ;;  %v4637_v60 = vmul.f32 %v12149_v33, %v4512_v8  ;;  %v8248_v34 = vpop.f32.mrb[138].mxu1 }
 0x431   : > { %v8247_v37 = vadd.f32 %v8246_v24, %v8245_v53  ;;  %v8249_v29 = vpop.f32.mrb[139].mxu1  ;;  %v5218_v24 = vsub.f32 0.0, %v4770_v20 }
 0x432   : > { %8864 = vrcp.f32 %v4833_v26  ;;  %v4834_v13 = vadd.f32 1.0, %v4802_v3  ;;  %v12199_v22 = vmul.f32 0.70710677, %v12191_v63  ;;  %v12202_v28 = vadd.f32 %v12160_v43, %v4637_v60  ;;  %v13916_v26 = vld [vmem:[#allocation6_spill] sm:$0xff] }
 0x433   : > { %v4356_v8 = vadd.f32 %v8247_v37, %v12045_v52  ;;  %v8250_v53 = vadd.f32 %v8249_v29, %v8248_v34  ;;  %v13917_v4 = vrot.slane %v13916_v26, 1  ;;  %v12216_v60 = vsub.s32 %v5829_v1, %v5831_v40 }
 0x434   : > { %8866 = vrcp.f32 %v4834_v13  ;;  %v4771_v50 = vand.u32 2147483647, %v12199_v22  ;;  %v12219_v52 = vmul.f32 0.70710677, %v12202_v28  ;;  %v5249_v37 = vmul.f32 %v5217_v59, %v4769_v21 }
 0x435   : > { %v12212_v3 = vsel %vm3143_vm8, %v13917_v4, %v5626_v2  ;;  %v4517_v29 = vadd.f32 %v11927_v41, %v4356_v8  ;;  %v4359_v35 = vadd.f32 %v8250_v53, %v12052_v11  ;;  %v12223_v2 = vsub.s32 0, %v5831_v40 }
 0x436   : > { %v8251_v42 = vpop.f32.mrb[140].mxu1  ;;  %v4803_v34 = vmul.f32 0.3275911, %v4771_v50  ;;  %v5219_v26 = vsub.f32 0.0, %v4771_v50  ;;  %v5250_v10 = vmul.f32 %v5218_v24, %v4770_v20  ;;  %v4772_v13 = vand.u32 2147483647, %v12219_v52 }
 0x437   : > { %v8252_v4 = vpop.f32.mrb[141].mxu1  ;;  %v4638_v1 = vmul.f32 %v12149_v33, %v4517_v29  ;;  %v4520_v61 = vadd.f32 %v11932_v5, %v4359_v35  ;;  %v5281_v20 = vmul.f32 1.442695, %v5249_v37  ;;  %vm5411_vm1 = vcmp.ge.f32.partialorder %v12199_v22, 0.0 }
 0x438   : > { %v8254_v54 = vpop.f32.mrb[142].mxu1  ;;  %v4835_v41 = vadd.f32 1.0, %v4803_v34  ;;  %v5251_v8 = vmul.f32 %v5219_v26, %v4771_v50  ;;  %v8253_v11 = vadd.f32 %v8252_v4, %v8251_v42  ;;  %v4804_v21 = vmul.f32 0.3275911, %v4772_v13 }
 0x439   : > { %v8255_v53 = vpop.f32.mrb[143].mxu1  ;;  %v5220_v59 = vsub.f32 0.0, %v4772_v13  ;;  %v4677_v40 = vadd.f32 %v12160_v43, %v4638_v1  ;;  %v4639_v18 = vmul.f32 %v12149_v33, %v4520_v61  ;;  %v5283_v5 = vmul.f32 1.442695, %v5250_v10 }
 0x43a   : > { %8868 = vrcp.f32 %v4835_v41  ;;  %v4364_v24 = vadd.f32 %v8253_v11, %v12059_v0  ;;  %v8256_v29 = vadd.f32 %v8255_v53, %v8254_v54  ;;  %v4836_v55 = vadd.f32 1.0, %v4804_v21 }
 0x43b   : > { %v5252_v35 = vmul.f32 %v5220_v59, %v4772_v13  ;;  %v12235_v34 = vmul.f32 0.70710677, %v4677_v40  ;;  %v5285_v42 = vmul.f32 1.442695, %v5251_v8  ;;  %v4678_v26 = vadd.f32 %v12160_v43, %v4639_v18 }
 0x43c   : > { %v12233_v49 = vpop.eup %8864  ;;  %v4525_v4 = vadd.f32 %v11925_v51, %v4364_v24  ;;  %v12241_v61 = vmul.f32 0.5, %v12173_v30  ;;  %8870 = vrcp.f32 %v4836_v55  ;;  %v12251_v51 = vmul.f32 0.5, %v12191_v63 }
 0x43d   : > { %v4929_v50 = vmul.f32 1.0614054, %v12233_v49  ;;  %v5287_v0 = vmul.f32 1.442695, %v5252_v35  ;;  %v4773_v54 = vand.u32 2147483647, %v12235_v34  ;;  %8872 = vpow2.f32 %v5281_v20 }
 0x43e   : > { %v8257_v37 = vpop.f32.mrb[144].mxu1  ;;  %v12244_v10 = vpop.eup %8866  ;;  %v12246_v1 = vmul.f32 0.70710677, %v4678_v26  ;;  %v4640_v41 = vmul.f32 %v12149_v33, %v4525_v4  ;;  %8874 = vpow2.f32 %v5283_v5  ;;  %v4367_v5 = vadd.f32 %v8256_v29, %v12066_v36 }
 0x43f   : > { %v4961_v13 = vadd.f32 -1.4531521, %v4929_v50  ;;  %v8258_v8 = vpop.f32.mrb[145].mxu1  ;;  %v4930_v18 = vmul.f32 1.0614054, %v12244_v10  ;;  %v5221_v21 = vsub.f32 0.0, %v4773_v54  ;;  %8876 = vpow2.f32 %v5285_v42 }
 0x440   : > { %v4805_v30 = vmul.f32 0.3275911, %v4773_v54  ;;  %v12253_v11 = vpop.f32.mrb[146].mxu1  ;;  %v4774_v59 = vand.u32 2147483647, %v12246_v1  ;;  %v12258_v20 = vadd.f32 %v12160_v43, %v4640_v41  ;;  %8878 = vpow2.f32 %v5287_v0 }
 0x441   : > { %v4993_v53 = vmul.f32 %v12233_v49, %v4961_v13  ;;  %v12260_v24 = vpop.f32.mrb[147].mxu1  ;;  %v4962_v55 = vadd.f32 -1.4531521, %v4930_v18  ;;  %v12265_v13 = vmul.f32 0.5, %v12202_v28  ;;  %v5253_v18 = vmul.f32 %v5221_v21, %v4773_v54 }
 0x442   : > { %v4837_v35 = vadd.f32 1.0, %v4805_v30  ;;  %v4806_v50 = vmul.f32 0.3275911, %v4774_v59  ;;  %v5222_v4 = vsub.f32 0.0, %v4774_v59  ;;  %v12268_v41 = vmul.f32 0.70710677, %v12258_v20 }
 0x443   : > { %v5025_v63 = vadd.f32 1.4214138, %v4993_v53  ;;  %v4994_v17 = vmul.f32 %v12244_v10, %v4962_v55  ;;  %v4528_v36 = vadd.f32 %v11929_v62, %v4367_v5  ;;  %v12276_v39 = vmul.f32 0.5, %v4677_v40 }
 0x444   : > { %8880 = vrcp.f32 %v4837_v35  ;;  %v12270_v16 = vpop.eup %8868  ;;  %v4838_v30 = vadd.f32 1.0, %v4806_v50  ;;  %v5254_v53 = vmul.f32 %v5222_v4, %v4774_v59  ;;  %v4775_v55 = vand.u32 2147483647, %v12268_v41 }
 0x445   : > { %v5057_v42 = vmul.f32 %v12233_v49, %v5025_v63  ;;  %v5026_v29 = vadd.f32 1.4214138, %v4994_v17  ;;  %v4931_v0 = vmul.f32 1.0614054, %v12270_v16  ;;  %v12278_v35 = vmul.f32 0.5, %v4678_v26 }
 0x446   : > { %8882 = vrcp.f32 %v4838_v30  ;;  %v12280_v46 = vpop.f32.mrb[148].mxu1  ;;  %v12282_v14 = vpop.eup %8870  ;;  %v4807_v62 = vmul.f32 0.3275911, %v4775_v55  ;;  %v5223_v17 = vsub.f32 0.0, %v4775_v55  ;;  %v5289_v50 = vmul.f32 1.442695, %v5253_v18 }
 0x447   : > { %v5089_v28 = vadd.f32 -0.28449672, %v5057_v42  ;;  %v5058_v54 = vmul.f32 %v12244_v10, %v5026_v29  ;;  %v4963_v21 = vadd.f32 -1.4531521, %v4931_v0  ;;  %v12285_v5 = vpop.f32.mrb[149].mxu1  ;;  %v8873_v59 = vpop.eup %8872  ;;  %v4641_v26 = vmul.f32 %v12149_v33, %v4528_v36 }
 0x448   : > { %v4932_v40 = vmul.f32 1.0614054, %v12282_v14  ;;  %v8875_v4 = vpop.eup %8874  ;;  %v5291_v15 = vmul.f32 1.442695, %v5254_v53  ;;  %v4839_v27 = vadd.f32 1.0, %v4807_v62  ;;  %v8259_v25 = vadd.f32 %v8258_v8, %v8257_v37 }
 0x449   : > { %v5121_v63 = vmul.f32 %v12233_v49, %v5089_v28  ;;  %v5090_v42 = vadd.f32 -0.28449672, %v5058_v54  ;;  %v4995_v30 = vmul.f32 %v12270_v16, %v4963_v21  ;;  %v12292_v48 = vadd.f32 %v12160_v43, %v4641_v26  ;;  %v8877_v32 = vpop.eup %8876 }
 0x44a   : > { %v4964_v0 = vadd.f32 -1.4531521, %v4932_v40  ;;  %8884 = vrcp.f32 %v4839_v27  ;;  %v5255_v36 = vmul.f32 %v5223_v17, %v4775_v55  ;;  %v12296_v6 = vpop.eup %8878  ;;  %vm5412_vm3 = vcmp.ge.f32.partialorder %v12219_v52, 0.0 }
 0x44b   : > { %v5153_v29 = vadd.f32 0.2548296, %v5121_v63  ;;  %v5122_v28 = vmul.f32 %v12244_v10, %v5090_v42  ;;  %v5027_v18 = vadd.f32 1.4214138, %v4995_v30  ;;  %8886 = vpow2.f32 %v5289_v50 }
 0x44c   : > { %v4996_v53 = vmul.f32 %v12282_v14, %v4964_v0  ;;  %v12301_v21 = vmul.f32 0.70710677, %v12292_v48  ;;  %8888 = vpow2.f32 %v5291_v15  ;;  %v4372_v63 = vadd.f32 %v8259_v25, %v12076_v23 }
 0x44d   : > { %v5185_v54 = vmul.f32 %v12233_v49, %v5153_v29  ;;  %v5154_v37 = vadd.f32 0.2548296, %v5122_v28  ;;  %v5059_v8 = vmul.f32 %v12270_v16, %v5027_v18  ;;  %v5293_v26 = vmul.f32 1.442695, %v5255_v36 }
 0x44e   : > { %v12303_v62 = vpop.eup %8880  ;;  %v5028_v55 = vadd.f32 1.4214138, %v4996_v53  ;;  %v4776_v17 = vand.u32 2147483647, %v12301_v21  ;;  %v4533_v42 = vadd.f32 %v11946_v31, %v4372_v63  ;;  %vm5413_vm4 = vcmp.ge.f32.partialorder %v12235_v34, 0.0 }
 0x44f   : > { %v5345_v27 = vmul.f32 %v8873_v59, %v5185_v54  ;;  %v4933_v49 = vmul.f32 1.0614054, %v12303_v62  ;;  %v5186_v40 = vmul.f32 %v12244_v10, %v5154_v37  ;;  %v5091_v50 = vadd.f32 -0.28449672, %v5059_v8 }
 0x450   : > { %v12312_v30 = vpop.eup %8882  ;;  %v5060_v15 = vmul.f32 %v12282_v14, %v5028_v55  ;;  %v4808_v25 = vmul.f32 0.3275911, %v4776_v17  ;;  %v5224_v18 = vsub.f32 0.0, %v4776_v17  ;;  %8890 = vpow2.f32 %v5293_v26 }
 0x451   : > { %v5377_v29 = vsub.f32 1.0, %v5345_v27  ;;  %v4965_v23 = vadd.f32 -1.4531521, %v4933_v49  ;;  %v5346_v59 = vmul.f32 %v8875_v4, %v5186_v40  ;;  %v5123_v0 = vmul.f32 %v12270_v16, %v5091_v50 }
 0x452   : > { %v4934_v28 = vmul.f32 1.0614054, %v12312_v30  ;;  %v5092_v53 = vadd.f32 -0.28449672, %v5060_v15  ;;  %v4840_v36 = vadd.f32 1.0, %v4808_v25  ;;  %v5256_v55 = vmul.f32 %v5224_v18, %v4776_v17  ;;  %v12336_v18 = vpop.f32.mrb[150].mxu1 }
 0x453   : > { %v5441_v54 = vsub.f32 0.0, %v5377_v29  ;;  %v4997_v10 = vmul.f32 %v12303_v62, %v4965_v23  ;;  %v5378_v37 = vsub.f32 1.0, %v5346_v59  ;;  %v5155_v31 = vadd.f32 0.2548296, %v5123_v0 }
 0x454   : > { %v4966_v8 = vadd.f32 -1.4531521, %v4934_v28  ;;  %v5124_v4 = vmul.f32 %v12282_v14, %v5092_v53  ;;  %v12322_v49 = vpop.eup %8884  ;;  %8892 = vrcp.f32 %v4840_v36  ;;  %v13919_v36 = vld [vmem:[#allocation4_spill] sm:$0xff]  ;;  %v12343_v7 = vmul.f32 1.442695, %v5256_v55 }
 0x455   : > { %v5473_v63 = vsel %vm5409_vm2, %v5377_v29, %v5441_v54  ;;  %v5029_v27 = vadd.f32 1.4214138, %v4997_v10  ;;  %v5442_v50 = vsub.f32 0.0, %v5378_v37  ;;  %v5187_v15 = vmul.f32 %v12270_v16, %v5155_v31  ;;  %v12326_v25 = vpop.eup %8886 }
 0x456   : > { %v5505_v40 = vadd.f32 1.0, %v5473_v63  ;;  %v4998_v23 = vmul.f32 %v12312_v30, %v4966_v8  ;;  %v5156_v26 = vadd.f32 0.2548296, %v5124_v4  ;;  %v4935_v29 = vmul.f32 1.0614054, %v12322_v49  ;;  %v12330_v59 = vpop.eup %8888  ;;  %v12339_v8 = vpop.f32.mrb[151].mxu1 }
 0x457   : > { %v5061_v47 = vmul.f32 %v12303_v62, %v5029_v27  ;;  %v5474_v0 = vsel %vm5410_vm0, %v5378_v37, %v5442_v50  ;;  %v5347_v28 = vmul.f32 %v8877_v32, %v5187_v15  ;;  %v12376_v52 = vpop.f32.mrb[152].mxu1  ;;  %vm5414_vm9 = vcmp.ge.f32.partialorder %v12246_v1, 0.0 }
 0x458   : > { %v5537_v17 = vmul.f32 %v5505_v40, %v12228_v38  ;;  %v5030_v16 = vadd.f32 1.4214138, %v4998_v23  ;;  %v5506_v54 = vadd.f32 1.0, %v5474_v0  ;;  %v5188_v53 = vmul.f32 %v12282_v14, %v5156_v26  ;;  %v13920_v26 = vld [vmem:[#allocation5_spill] sm:$0xff] }
 0x459   : > { %v5093_v10 = vadd.f32 -0.28449672, %v5061_v47  ;;  %v4967_v31 = vadd.f32 -1.4531521, %v4935_v29  ;;  %v5379_v4 = vsub.f32 1.0, %v5347_v28  ;;  %v12350_v23 = vmul.f32 %v12149_v33, %v4533_v42 }
 0x45a   : > { %v5730_v63 = vadd.f32 %v13919_v36, %v5537_v17  ;;  %v5062_v38 = vmul.f32 %v12312_v30, %v5030_v16  ;;  %v5538_v32 = vmul.f32 %v5506_v54, %v12241_v61  ;;  %v5348_v37 = vmul.f32 %v12296_v6, %v5188_v53  ;;  %v12353_v0 = vpop.eup %8890 }
 0x45b   : > { %v5125_v27 = vmul.f32 %v12303_v62, %v5093_v10  ;;  %v4999_v40 = vmul.f32 %v12322_v49, %v4967_v31  ;;  %v5443_v50 = vsub.f32 0.0, %v5379_v4  ;;  %8894 = vpow2.f32 %v12343_v7 }
 0x45c   : > { %v5762_v14 = vmul.f32 0.70710677, %v5730_v63  ;;  %v5094_v15 = vadd.f32 -0.28449672, %v5062_v38  ;;  %v5731_v47 = vadd.f32 %v13920_v26, %v5538_v32  ;;  %v5380_v29 = vsub.f32 1.0, %v5348_v37 }
 0x45d   : > { %v5157_v17 = vadd.f32 0.2548296, %v5125_v27  ;;  %v5031_v55 = vadd.f32 1.4214138, %v4999_v40  ;;  %v5475_v28 = vsel %vm5411_vm1, %v5379_v4, %v5443_v50  ;;  %vm5415_vm14 = vcmp.ge.f32.partialorder %v12268_v41, 0.0 }
 0x45e   : > { %v5826_v61 = vcombine.high %v5762_v14, %v5762_v14  ;;  %v5833_v6 = vrot.slane %v5762_v14, %v12216_v60  ;;  %v5126_v16 = vmul.f32 %v12312_v30, %v5094_v15  ;;  %v5763_v54 = vmul.f32 0.70710677, %v5731_v47  ;;  %v12361_v32 = vpop.eup %8892 }
 0x45f   : > { %v5507_v53 = vadd.f32 1.0, %v5475_v28  ;;  %v5444_v10 = vsub.f32 0.0, %v5380_v29  ;;  %v5189_v42 = vmul.f32 %v12303_v62, %v5157_v17  ;;  %v13921_v17 = vld [vmem:[#allocation8_spill] sm:$0xff]  ;;  %vm5416_vm15 = vcmp.ge.f32.partialorder %v12301_v21, 0.0 }
 0x460   : > { %v5840_v31 = vrot.slane %v5826_v61, %v12216_v60  ;;  %v5841_v36 = vcombine.high %v5833_v6, %v5833_v6  ;;  %v7720_v63 = vrot.slane %v5833_v6, 9  ;;  %v5158_v38 = vadd.f32 0.2548296, %v5126_v16 }
 0x461   : > { %v5843_v37 = vcombine.high %v5763_v54, %v5763_v54  ;;  %v5850_v27 = vrot.slane %v5763_v54, %v12216_v60  ;;  %v5539_v22 = vmul.f32 %v5507_v53, %v12251_v51  ;;  %v5476_v4 = vsel %vm5412_vm3, %v5380_v29, %v5444_v10 }
 0x462   : > { %v5842_v40 = vcombine.high %v5840_v31, %v5840_v31  ;;  %v7721_v14 = vrot.slane %v5841_v36, 9  ;;  %v7722_v50 = vrot.slane %v5840_v31, 9  ;;  %v12367_v15 = vmax.f32 %v5833_v6, %v7720_v63  ;;  %v12380_v63 = vpop.f32.mrb[153].mxu1 }
 0x463   : > { %v5857_v62 = vrot.slane %v5843_v37, %v12216_v60  ;;  %v5858_v26 = vcombine.high %v5850_v27, %v5850_v27  ;;  %v7724_v47 = vrot.slane %v5850_v27, 9  ;;  %v5732_v61 = vadd.f32 %v13921_v17, %v5539_v22 }
 0x464   : > { %v7723_v28 = vrot.slane %v5842_v40, 9  ;;  %v12371_v16 = vmax.f32 %v5841_v36, %v7721_v14  ;;  %v12373_v54 = vmax.f32 %v5840_v31, %v7722_v50  ;;  %v5508_v51 = vadd.f32 1.0, %v5476_v4  ;;  %v12386_v14 = vpop.f32.mrb[154].mxu1 }
 0x465   : > { %v5859_v29 = vcombine.high %v5857_v62, %v5857_v62  ;;  %v7725_v53 = vrot.slane %v5858_v26, 9  ;;  %v7726_v6 = vrot.slane %v5857_v62, 9  ;;  %v12378_v10 = vmax.f32 %v5850_v27, %v7724_v47  ;;  %13922 = vst [vmem:[#allocation32_spill] sm:$0xff] %v12386_v14  ;;  %v12393_v27 = vpop.f32.mrb[155].mxu1 }
 0x466   : > { %v12382_v37 = vmax.f32 %v5842_v40, %v7723_v28  ;;  %v5764_v22 = vmul.f32 0.70710677, %v5732_v61  ;;  %v5540_v36 = vmul.f32 %v5508_v51, %v12265_v13  ;;  %v5349_v31 = vmul.f32 %v12326_v25, %v5189_v42  ;;  %13923 = vst [vmem:[#allocation6_spill] sm:$0xff] %v12393_v27 }
 0x467   : > { %v7727_v4 = vrot.slane %v5859_v29, 9  ;;  %v12388_v50 = vmax.f32 %v5858_v26, %v7725_v53  ;;  %v12390_v17 = vmax.f32 %v5857_v62, %v7726_v6  ;;  %v5190_v57 = vmul.f32 %v12312_v30, %v5158_v38 }
 0x468   : > { %v5860_v47 = vcombine.high %v5764_v22, %v5764_v22  ;;  %v5867_v40 = vrot.slane %v5764_v22, %v12216_v60  ;;  %v5733_v61 = vadd.f32 %v12212_v3, %v5540_v36  ;;  %v5381_v28 = vsub.f32 1.0, %v5349_v31 }
 0x469   : > { %v12397_v13 = vmax.f32 %v5859_v29, %v7727_v4  ;;  %v5350_v25 = vmul.f32 %v12330_v59, %v5190_v57  ;;  %v5063_v42 = vmul.f32 %v12322_v49, %v5031_v55  ;;  %v4936_v62 = vmul.f32 1.0614054, %v12361_v32 }
 0x46a   : > { %v5874_v26 = vrot.slane %v5860_v47, %v12216_v60  ;;  %v5875_v30 = vcombine.high %v5867_v40, %v5867_v40  ;;  %v7784_v38 = vrot.slane %v5867_v40, 9  ;;  %v5765_v51 = vmul.f32 0.70710677, %v5733_v61  ;;  %v12409_v61 = vpop.f32.mrb[156].mxu1 }
 0x46b   : > { %v5445_v53 = vsub.f32 0.0, %v5381_v28  ;;  %v5382_v6 = vsub.f32 1.0, %v5350_v25  ;;  %v5095_v3 = vadd.f32 -0.28449672, %v5063_v42  ;;  %v12404_v29 = vadd.f32 -1.4531521, %v4936_v62 }
 0x46c   : > { %v5876_v22 = vcombine.high %v5874_v26, %v5874_v26  ;;  %v7785_v57 = vrot.slane %v5875_v30, 9  ;;  %v7786_v59 = vrot.slane %v5874_v26, 9  ;;  %v6946_v55 = vmax.f32 %v5867_v40, %v7784_v38  ;;  %v12412_v62 = vpop.f32.mrb[157].mxu1 }
 0x46d   : > { %v5877_v36 = vcombine.high %v5765_v51, %v5765_v51  ;;  %v5884_v31 = vrot.slane %v5765_v51, %v12216_v60  ;;  %v5477_v4 = vsel %vm5413_vm4, %v5381_v28, %v5445_v53  ;;  %v5446_v47 = vsub.f32 0.0, %v5382_v6 }
 0x46e   : > { %v7787_v25 = vrot.slane %v5876_v22, 9  ;;  %v6947_v56 = vmax.f32 %v5875_v30, %v7785_v57  ;;  %v6948_v27 = vmax.f32 %v5874_v26, %v7786_v59  ;;  %v7010_v42 = vmax.f32 %v12367_v15, %v6946_v55 }
 0x46f   : > { %v5891_v40 = vrot.slane %v5877_v36, %v12216_v60  ;;  %v5892_v38 = vcombine.high %v5884_v31, %v5884_v31  ;;  %v7788_v14 = vrot.slane %v5884_v31, 9  ;;  %v5509_v51 = vadd.f32 1.0, %v5477_v4 }
 0x470   : > { %v6949_v19 = vmax.f32 %v5876_v22, %v7787_v25  ;;  %v7011_v34 = vmax.f32 %v12371_v16, %v6947_v56  ;;  %v7012_v28 = vmax.f32 %v12373_v54, %v6948_v27  ;;  %v7141_v53 = vrot.slane %v7010_v42, %v12223_v2  ;;  %v13924_v42 = vld [vmem:[#allocation13_spill] sm:$0xff] }
 0x471   : > { %v5893_v26 = vcombine.high %v5891_v40, %v5891_v40  ;;  %v7789_v30 = vrot.slane %v5892_v38, 9  ;;  %v7790_v15 = vrot.slane %v5891_v40, 9  ;;  %v6950_v57 = vmax.f32 %v5884_v31, %v7788_v14 }
 0x472   : > { %v7013_v59 = vmax.f32 %v12382_v37, %v6949_v19  ;;  %v7145_v55 = vrot.slane %v7011_v34, %v12223_v2  ;;  %v7149_v36 = vrot.slane %v7012_v28, %v12223_v2  ;;  %v5541_v22 = vmul.f32 %v5509_v51, %v12276_v39 }
 0x473   : > { %v7791_v4 = vrot.slane %v5893_v26, 9  ;;  %v6951_v56 = vmax.f32 %v5892_v38, %v7789_v30  ;;  %v6952_v16 = vmax.f32 %v5891_v40, %v7790_v15  ;;  %v7014_v54 = vmax.f32 %v12378_v10, %v6950_v57  ;;  %v13925_v57 = vld [vmem:[#allocation46_spill] sm:$0xff] }
 0x474   : > { %v7153_v27 = vrot.slane %v7013_v59, %v12223_v2  ;;  %v7395_v25 = vsel %vm7394_vm5, %v7145_v55, %v7141_v53  ;;  %v5734_v14 = vadd.f32 %v13924_v42, %v5541_v22  ;;  %v5478_v19 = vsel %vm5414_vm9, %v5382_v6, %v5446_v47 }
 0x475   : > { %v7397_v37 = vsel %vm7396_vm6, %v7149_v36, %v7395_v25  ;;  %v6953_v31 = vmax.f32 %v5893_v26, %v7791_v4  ;;  %v7015_v34 = vmax.f32 %v12388_v50, %v6951_v56  ;;  %v7016_v39 = vmax.f32 %v12390_v17, %v6952_v16  ;;  %v13926_v4 = vld [vmem:[#allocation14_spill] sm:$0xff] }
 0x476   : > { %v7157_v40 = vrot.slane %v7014_v54, %v12223_v2  ;;  %v7399_v10 = vsel %vm7398_vm7, %v7153_v27, %v7397_v37  ;;  %v5766_v38 = vmul.f32 0.70710677, %v5734_v14  ;;  %v5510_v51 = vadd.f32 1.0, %v5478_v19  ;;  %v12462_v19 = vpop.f32.mrb[158].mxu1 }
 0x477   : > { %v7017_v28 = vmax.f32 %v12397_v13, %v6953_v31  ;;  %v7161_v53 = vrot.slane %v7015_v34, %v12223_v2  ;;  %v7165_v1 = vrot.slane %v7016_v39, %v12223_v2  ;;  %v5127_v6 = vmul.f32 %v12322_v49, %v5095_v3  ;;  %v13928_v31 = vld [vmem:[#allocation15_spill] sm:$0xff]  ;;  %v13930_v39 = vld [vmem:[#allocation29_spill] sm:$0xff] }
 0x478   : > { %v7401_v47 = vsel %vm7400_vm10, %v7157_v40, %v7399_v10  ;;  %v5894_v50 = vcombine.high %v5766_v38, %v5766_v38  ;;  %v5901_v17 = vrot.slane %v5766_v38, %v12216_v60  ;;  %v5542_v26 = vmul.f32 %v5510_v51, %v12278_v35  ;;  %v12478_v38 = vpop.f32.mrb[159].mxu1 }
 0x479   : > { %v7169_v13 = vrot.slane %v7017_v28, %v12223_v2  ;;  %v7403_v30 = vsel %vm7402_vm11, %v7161_v53, %v7401_v47  ;;  %v5159_v15 = vadd.f32 0.2548296, %v5127_v6  ;;  %v5000_v3 = vmul.f32 %v12361_v32, %v12404_v29  ;;  %v13932_v53 = vld [vmem:[#allocation19_spill] sm:$0xff] }
 0x47a   : > { %v5646_v59 = vrot.slane %v13925_v57, 1  ;;  %v7405_v55 = vsel %vm7404_vm12, %v7165_v1, %v7403_v30  ;;  %v5908_v35 = vrot.slane %v5894_v50, %v12216_v60  ;;  %v5909_v36 = vcombine.high %v5901_v17, %v5901_v17 }
 0x47b   : > { %v7407_v22 = vsel %vm7406_vm13, %v7169_v13, %v7405_v55  ;;  %v5735_v56 = vadd.f32 %v13926_v4, %v5542_v26  ;;  %v5191_v16 = vmul.f32 %v12322_v49, %v5159_v15  ;;  %v5032_v54 = vadd.f32 1.4214138, %v5000_v3 }
 0x47c   : > { %7465 = vst [vmem:[%s12444_s13] sm:$0xff] %v7407_v22  ;;  %v5910_v27 = vcombine.high %v5908_v35, %v5908_v35  ;;  %v4681_v14 = vadd.f32 %v12160_v43, %v12350_v23  ;;  %v13927_v37 = vrot.slane %v13918_v12, 1  ;;  %v13929_v34 = vrot.slane %v13928_v31, 1 }
 0x47d   : > { %v5767_v25 = vmul.f32 0.70710677, %v5735_v56  ;;  %v5351_v29 = vmul.f32 %v12353_v0, %v5191_v16  ;;  %v5064_v42 = vmul.f32 %v12361_v32, %v5032_v54  ;;  %v13931_v40 = vrot.slane %v13930_v39, 1  ;;  %v13933_v39 = vld [vmem:[#allocation17_spill] sm:$0xff] }
 0x47e   : > { %v12469_v49 = vsel %vm3143_vm8, %v13929_v34, %v13927_v37  ;;  %v7728_v0 = vrot.slane %v5901_v17, 9  ;;  %v8262_v10 = vadd.f32 %v12260_v24, %v12253_v11  ;;  %v7729_v23 = vrot.slane %v5909_v36, 9 }
 0x47f   : > { %v12474_v7 = vsel %vm3143_vm8, %v13931_v40, %v5646_v59  ;;  %v5911_v51 = vcombine.high %v5767_v25, %v5767_v25  ;;  %v5383_v28 = vsub.f32 1.0, %v5351_v29  ;;  %v5096_v12 = vadd.f32 -0.28449672, %v5064_v42 }
 0x480   : > { %v5918_v6 = vrot.slane %v5767_v25, %v12216_v60  ;;  %v12482_v47 = vmul.f32 0.70710677, %v4681_v14  ;;  %v4375_v50 = vadd.f32 %v8262_v10, %v12080_v44  ;;  %v7730_v26 = vrot.slane %v5908_v35, 9 }
 0x481   : > { %v7731_v13 = vrot.slane %v5910_v27, 9  ;;  %v4711_v30 = vmul.f32 0.5, %v12258_v20  ;;  %v5447_v15 = vsub.f32 0.0, %v5383_v28  ;;  %v5128_v11 = vmul.f32 %v12361_v32, %v5096_v12  ;;  %v13935_v12 = vld [vmem:[#allocation34_spill] sm:$0xff] }
 0x482   : > { %v4777_v24 = vand.u32 2147483647, %v12482_v47  ;;  %v4536_v3 = vadd.f32 %v11950_v9, %v4375_v50  ;;  %v12490_v57 = vmax.f32 %v5901_v17, %v7728_v0  ;;  %v12492_v59 = vmax.f32 %v5909_v36, %v7729_v23  ;;  %v8895_v17 = vpop.eup %8894 }
 0x483   : > { %v5925_v55 = vrot.slane %v5911_v51, %v12216_v60  ;;  %v4712_v44 = vmul.f32 0.5, %v12292_v48  ;;  %v5926_v22 = vcombine.high %v5918_v6, %v5918_v6  ;;  %v5479_v4 = vsel %vm5415_vm14, %v5383_v28, %v5447_v15  ;;  %v13934_v51 = vld [vmem:[#allocation76_spill] sm:$0xff] }
 0x484   : > { %v5160_v20 = vadd.f32 0.2548296, %v5128_v11  ;;  %v4809_v56 = vmul.f32 0.3275911, %v4777_v24  ;;  %v12496_v16 = vmax.f32 %v5908_v35, %v7730_v26  ;;  %v12498_v41 = vmax.f32 %v5910_v27, %v7731_v13  ;;  %v13936_v26 = vld [vmem:[#allocation71_spill] sm:$0xff]  ;;  %v13937_v15 = vld [vmem:[#allocation32_spill] sm:$0xff] }
 0x485   : > { %v5511_v54 = vadd.f32 1.0, %v5479_v4  ;;  %v12501_v9 = vmul.f32 0.5, %v4681_v14  ;;  %v7732_v36 = vrot.slane %v5918_v6, 9  ;;  %v4643_v48 = vmul.f32 %v12149_v33, %v4536_v3 }
 0x486   : > { %v5192_v25 = vmul.f32 %v12361_v32, %v5160_v20  ;;  %v4841_v29 = vadd.f32 1.0, %v4809_v56  ;;  %v5927_v42 = vcombine.high %v5925_v55, %v5925_v55  ;;  %v8265_v35 = vadd.f32 %v12285_v5, %v12280_v46 }
 0x487   : > { %v5543_v37 = vmul.f32 %v5511_v54, %v4711_v30  ;;  %v8268_v27 = vadd.f32 %v12339_v8, %v12336_v18  ;;  %v7733_v31 = vrot.slane %v5926_v22, 9  ;;  %v12510_v14 = vadd.f32 %v12160_v43, %v4643_v48 }
 0x488   : > { %v5352_v34 = vmul.f32 %v8895_v17, %v5192_v25  ;;  %8896 = vrcp.f32 %v4841_v29  ;;  %v4380_v32 = vadd.f32 %v8265_v35, %v12087_v58  ;;  %v8271_v10 = vadd.f32 %v12380_v63, %v12376_v52  ;;  %v13938_v52 = vld [vmem:[#allocation6_spill] sm:$0xff] }
 0x489   : > { %v5736_v40 = vadd.f32 %v13933_v39, %v5543_v37  ;;  %v4383_v0 = vadd.f32 %v8268_v27, %v12094_v45  ;;  %v7734_v23 = vrot.slane %v5925_v55, 9  ;;  %v5225_v5 = vsub.f32 0.0, %v4777_v24 }
 0x48a   : > { %v5384_v46 = vsub.f32 1.0, %v5352_v34  ;;  %v12518_v18 = vmul.f32 0.70710677, %v12510_v14  ;;  %v4541_v28 = vadd.f32 %v13934_v51, %v4380_v32  ;;  %v4388_v13 = vadd.f32 %v8271_v10, %v13936_v26 }
 0x48b   : > { %v5768_v8 = vmul.f32 0.70710677, %v5736_v40  ;;  %v4544_v50 = vadd.f32 %v13935_v12, %v4383_v0  ;;  %v12523_v30 = vmax.f32 %v5918_v6, %v7732_v36  ;;  %v12528_v63 = vadd.f32 %v13938_v52, %v13937_v15  ;;  %v13939_v6 = vld [vmem:[#allocation86_spill] sm:$0xff] }
 0x48c   : > { %v5448_v58 = vsub.f32 0.0, %v5384_v46  ;;  %v4778_v45 = vand.u32 2147483647, %v12518_v18  ;;  %v7735_v11 = vrot.slane %v5927_v42, 9  ;;  %v4644_v20 = vmul.f32 %v12149_v33, %v4541_v28 }
 0x48d   : > { %v5928_v3 = vcombine.high %v5768_v8, %v5768_v8  ;;  %v5935_v4 = vrot.slane %v5768_v8, %v12216_v60  ;;  %v5257_v54 = vmul.f32 %v5225_v5, %v4777_v24  ;;  %v12535_v36 = vadd.f32 %v13939_v6, %v4388_v13 }
 0x48e   : > { %v5480_v56 = vsel %vm5416_vm15, %v5384_v46, %v5448_v58  ;;  %v4810_v17 = vmul.f32 0.3275911, %v4778_v45  ;;  %v12538_v35 = vmax.f32 %v5926_v22, %v7733_v31  ;;  %v12540_v27 = vmax.f32 %v5925_v55, %v7734_v23  ;;  %v12548_v31 = vpop.f32.mrb[160].mxu1 }
 0x48f   : > { %v5942_v25 = vrot.slane %v5928_v3, %v12216_v60  ;;  %v5943_v29 = vcombine.high %v5935_v4, %v5935_v4  ;;  %v7792_v48 = vrot.slane %v5935_v4, 9  ;;  %v5512_v37 = vadd.f32 1.0, %v5480_v56 }
 0x490   : > { %v4842_v34 = vadd.f32 1.0, %v4810_v17  ;;  %v12543_v39 = vadd.f32 %v12160_v43, %v4644_v20  ;;  %v5297_v46 = vmul.f32 1.442695, %v5257_v54  ;;  %v5226_v5 = vsub.f32 0.0, %v4778_v45 }
 0x491   : > { %v5944_v21 = vcombine.high %v5942_v25, %v5942_v25  ;;  %v7793_v40 = vrot.slane %v5943_v29, 9  ;;  %v7794_v24 = vrot.slane %v5942_v25, 9  ;;  %v6954_v32 = vmax.f32 %v5935_v4, %v7792_v48 }
 0x492   : > { %v12545_v0 = vpop.eup %8896  ;;  %v5544_v10 = vmul.f32 %v5512_v37, %v4712_v44  ;;  %8898 = vrcp.f32 %v4842_v34  ;;  %v12550_v23 = vmax.f32 %v5927_v42, %v7735_v11  ;;  %v12555_v26 = vmul.f32 0.70710677, %v12543_v39  ;;  %v12557_v44 = vpop.f32.mrb[161].mxu1 }
 0x493   : > { %v7795_v8 = vrot.slane %v5944_v21, 9  ;;  %v6955_v51 = vmax.f32 %v5943_v29, %v7793_v40  ;;  %v6956_v22 = vmax.f32 %v5942_v25, %v7794_v24  ;;  %v7018_v55 = vmax.f32 %v12490_v57, %v6954_v32  ;;  %v12562_v52 = vpop.f32.mrb[162].mxu1 }
 0x494   : > { %v5737_v28 = vadd.f32 %v12469_v49, %v5544_v10  ;;  %v4937_v12 = vmul.f32 1.0614054, %v12545_v0  ;;  %v4645_v57 = vmul.f32 %v12149_v33, %v4544_v50  ;;  %v5258_v3 = vmul.f32 %v5226_v5, %v4778_v45  ;;  %v12571_v54 = vpop.f32.mrb[163].mxu1 }
 0x495   : > { %v6957_v13 = vmax.f32 %v5944_v21, %v7795_v8  ;;  %v7019_v58 = vmax.f32 %v12492_v59, %v6955_v51  ;;  %v7020_v15 = vmax.f32 %v12496_v16, %v6956_v22  ;;  %v12565_v49 = vand.u32 2147483647, %v12555_v26  ;;  %v12584_v32 = vpop.f32.mrb[164].mxu1 }
 0x496   : > { %v5769_v42 = vmul.f32 0.70710677, %v5737_v28  ;;  %v4969_v11 = vadd.f32 -1.4531521, %v4937_v12  ;;  %v7173_v20 = vrot.slane %v7018_v55, %v12223_v2  ;;  %8900 = vpow2.f32 %v5297_v46  ;;  %v12588_v51 = vpop.f32.mrb[165].mxu1 }
 0x497   : > { %v7021_v4 = vmax.f32 %v12498_v41, %v6957_v13  ;;  %v7177_v56 = vrot.slane %v7019_v58, %v12223_v2  ;;  %v7181_v59 = vrot.slane %v7020_v15, %v12223_v2  ;;  %v4811_v45 = vmul.f32 0.3275911, %v12565_v49  ;;  %v12593_v12 = vpop.f32.mrb[166].mxu1 }
 0x498   : > { %v5945_v16 = vcombine.high %v5769_v42, %v5769_v42  ;;  %v5952_v33 = vrot.slane %v5769_v42, %v12216_v60  ;;  %v5001_v50 = vmul.f32 %v12545_v0, %v4969_v11  ;;  %v12579_v41 = vadd.f32 %v12160_v43, %v4645_v57  ;;  %v12596_v42 = vpop.f32.mrb[167].mxu1 }
 0x499   : > { %v7185_v17 = vrot.slane %v7021_v4, %v12223_v2  ;;  %v7408_v6 = vsel %vm7394_vm5, %v7177_v56, %v7173_v20  ;;  %v5299_v40 = vmul.f32 1.442695, %v5258_v3  ;;  %v4843_v24 = vadd.f32 1.0, %v4811_v45  ;;  %v12604_v20 = vld [vmem:[%s13575_s6] ss:$0 sm:$0xff] }
 0x49a   : > { %v7409_v25 = vsel %vm7396_vm6, %v7181_v59, %v7408_v6  ;;  %v5959_v29 = vrot.slane %v5945_v16, %v12216_v60  ;;  %v5960_v48 = vcombine.high %v5952_v33, %v5952_v33  ;;  %v7796_v37 = vrot.slane %v5952_v33, 9 }
 0x49b   : > { %v7410_v34 = vsel %vm7398_vm7, %v7185_v17, %v7409_v25  ;;  %v5033_v21 = vadd.f32 1.4214138, %v5001_v50  ;;  %8902 = vrcp.f32 %v4843_v24  ;;  %v5227_v28 = vsub.f32 0.0, %v12565_v49 }
 0x49c   : > { %v12586_v10 = vpop.eup %8898  ;;  %v5961_v5 = vcombine.high %v5959_v29, %v5959_v29  ;;  %v7797_v46 = vrot.slane %v5960_v48, 9  ;;  %v7798_v8 = vrot.slane %v5959_v29, 9  ;;  %v6958_v43 = vmax.f32 %v5952_v33, %v7796_v37 }
 0x49d   : > { %v5065_v22 = vmul.f32 %v12545_v0, %v5033_v21  ;;  %v4938_v55 = vmul.f32 1.0614054, %v12586_v10  ;;  %v12599_v4 = vmul.f32 0.70710677, %v12579_v41  ;;  %v4646_v56 = vmul.f32 %v12604_v20, %v12535_v36  ;;  %v12621_v21 = vld [vmem:[%s13576_s7] ss:$0 sm:$0xff] }
 0x49e   : > { %v7799_v13 = vrot.slane %v5961_v5, 9  ;;  %v6959_v58 = vmax.f32 %v5960_v48, %v7797_v46  ;;  %v6960_v15 = vmax.f32 %v5959_v29, %v7798_v8  ;;  %v7022_v57 = vmax.f32 %v12523_v30, %v6958_v43  ;;  %v12632_v8 = vpop.f32.mrb[168].mxu1 }
 0x49f   : > { %v5097_v11 = vadd.f32 -0.28449672, %v5065_v22  ;;  %v4970_v3 = vadd.f32 -1.4531521, %v4938_v55  ;;  %8904 = vpow2.f32 %v5299_v40  ;;  %v4780_v17 = vand.u32 2147483647, %v12599_v4 }
 0x4a0   : > { %v6961_v59 = vmax.f32 %v5961_v5, %v7799_v13  ;;  %v7023_v16 = vmax.f32 %v12538_v35, %v6959_v58  ;;  %v7024_v30 = vmax.f32 %v12540_v27, %v6960_v15  ;;  %v7189_v33 = vrot.slane %v7022_v57, %v12223_v2  ;;  %v8901_v35 = vpop.eup %8900  ;;  %v13940_v5 = vld [vmem:[#allocation3_spill] sm:$0xff]  ;;  %v12637_v58 = vpop.f32.mrb[169].mxu1 }
 0x4a1   : > { %v5129_v50 = vmul.f32 %v12545_v0, %v5097_v11  ;;  %v5002_v45 = vmul.f32 %v12586_v10, %v4970_v3  ;;  %v4812_v37 = vmul.f32 0.3275911, %v4780_v17  ;;  %v12624_v40 = vadd.f32 %v12621_v21, %v4646_v56  ;;  %v13941_v56 = vld [vmem:[#allocation45_spill] sm:$0xff] }
 0x4a2   : > { %v7025_v6 = vmax.f32 %v12550_v23, %v6961_v59  ;;  %v7193_v25 = vrot.slane %v7023_v16, %v12223_v2  ;;  %v7197_v36 = vrot.slane %v7024_v30, %v12223_v2  ;;  %v7411_v29 = vsel %vm7400_vm10, %v7189_v33, %v7410_v34 }
 0x4a3   : > { %v5161_v48 = vadd.f32 0.2548296, %v5129_v50  ;;  %v5034_v27 = vadd.f32 1.4214138, %v5002_v45  ;;  %vm5417_vm2 = vcmp.ge.f32.partialorder %v12482_v47, 0.0  ;;  %v5259_v34 = vmul.f32 %v5227_v28, %v12565_v49 }
 0x4a4   : > { %v7201_v23 = vrot.slane %v7025_v6, %v12223_v2  ;;  %v7412_v24 = vsel %vm7402_vm11, %v7193_v25, %v7411_v29  ;;  %v4391_v46 = vadd.f32 %v12528_v63, %v13940_v5  ;;  %v4844_v13 = vadd.f32 1.0, %v4812_v37  ;;  %v12646_v63 = vpop.f32.mrb[170].mxu1  ;;  %v13943_v5 = vld [vmem:[#allocation72_spill] sm:$0xff] }
 0x4a5   : > { %v7413_v43 = vsel %vm7404_vm12, %v7197_v36, %v7412_v24  ;;  %v5193_v22 = vmul.f32 %v12545_v0, %v5161_v48  ;;  %v5066_v55 = vmul.f32 %v12586_v10, %v5034_v27  ;;  %v12641_v57 = vmul.f32 0.5, %v12510_v14  ;;  %v12648_v11 = vpop.eup %8902  ;;  %v12652_v16 = vpop.f32.mrb[171].mxu1 }
 0x4a6   : > { %v7414_v15 = vsel %vm7406_vm13, %v7201_v23, %v7413_v43  ;;  %v5228_v49 = vsub.f32 0.0, %v4780_v17  ;;  %v12644_v28 = vmul.f32 0.70710677, %v12624_v40  ;;  %8906 = vrcp.f32 %v4844_v13  ;;  %13942 = vst [vmem:[#allocation37_spill] sm:$0xff] %v12652_v16  ;;  %v12667_v43 = vpop.f32.mrb[172].mxu1 }
 0x4a7   : > { %7466 = vst [vmem:[%s12444_s13 + $0x8] sm:$0xff] %v7414_v15  ;;  %v5353_v0 = vmul.f32 %v8901_v35, %v5193_v22  ;;  %v5098_v3 = vadd.f32 -0.28449672, %v5066_v55  ;;  %v4552_v59 = vadd.f32 %v13941_v56, %v4391_v46  ;;  %v12655_v30 = vmul.f32 0.5, %v12543_v39  ;;  %13944 = vst [vmem:[#allocation4_spill] sm:$0xff] %v12667_v43  ;;  %v12673_v22 = vpop.f32.mrb[173].mxu1 }
 0x4a8   : > { %v4939_v14 = vmul.f32 1.0614054, %v12648_v11  ;;  %v4781_v33 = vand.u32 2147483647, %v12644_v28  ;;  %v8277_v50 = vadd.f32 %v12412_v62, %v12409_v61  ;;  %v5301_v25 = vmul.f32 1.442695, %v5259_v34 }
 0x4a9   : > { %v5385_v45 = vsub.f32 1.0, %v5353_v0  ;;  %v5130_v6 = vmul.f32 %v12586_v10, %v5098_v3  ;;  %v4647_v36 = vmul.f32 %v12604_v20, %v4552_v59  ;;  %v5260_v35 = vmul.f32 %v5228_v49, %v4780_v17  ;;  %v8905_v37 = vpop.eup %8904  ;;  %13945 = vst [vmem:[#allocation5_spill] sm:$0xff] %v12673_v22  ;;  %v12681_v49 = vpop.f32.mrb[174].mxu1 }
 0x4aa   : > { %v4971_v29 = vadd.f32 -1.4531521, %v4939_v14  ;;  %v4813_v48 = vmul.f32 0.3275911, %v4781_v33  ;;  %v5229_v27 = vsub.f32 0.0, %v4781_v33  ;;  %v4396_v46 = vadd.f32 %v8277_v50, %v13943_v5  ;;  %13946 = vst [vmem:[#allocation8_spill] sm:$0xff] %v12681_v49 }
 0x4ab   : > { %v5449_v39 = vsub.f32 0.0, %v5385_v45  ;;  %v5162_v23 = vadd.f32 0.2548296, %v5130_v6  ;;  %v12664_v24 = vadd.f32 %v12621_v21, %v4647_v36  ;;  %vm5418_vm0 = vcmp.ge.f32.partialorder %v12518_v18, 0.0  ;;  %v13948_v14 = vld [vmem:[#allocation84_spill] sm:$0xff]  ;;  %v13949_v6 = vld [vmem:[#allocation74_spill] sm:$0xff] }
 0x4ac   : > { %v5003_v61 = vmul.f32 %v12648_v11, %v4971_v29  ;;  %v4845_v62 = vadd.f32 1.0, %v4813_v48  ;;  %v5261_v34 = vmul.f32 %v5229_v27, %v4781_v33  ;;  %v8280_v17 = vadd.f32 %v12478_v38, %v12462_v19  ;;  %v12686_v19 = vpop.f32.mrb[175].mxu1  ;;  %v13951_v5 = vld [vmem:[#allocation11_spill] sm:$0xff] }
 0x4ad   : > { %v5481_v55 = vsel %vm5417_vm2, %v5385_v45, %v5449_v39  ;;  %v5194_v13 = vmul.f32 %v12586_v10, %v5162_v23  ;;  %8908 = vpow2.f32 %v5301_v25  ;;  %v12679_v15 = vmul.f32 0.70710677, %v12664_v24  ;;  %13947 = vst [vmem:[#allocation13_spill] sm:$0xff] %v12686_v19 }
 0x4ae   : > { %v5513_v0 = vadd.f32 1.0, %v5481_v55  ;;  %v5035_v3 = vadd.f32 1.4214138, %v5003_v61  ;;  %v12684_v56 = vmul.f32 0.5, %v12579_v41  ;;  %8910 = vrcp.f32 %v4845_v62 }
 0x4af   : > { %v5354_v38 = vmul.f32 %v8905_v37, %v5194_v13  ;;  %v5303_v59 = vmul.f32 1.442695, %v5260_v35  ;;  %v4782_v47 = vand.u32 2147483647, %v12679_v15  ;;  %v4557_v10 = vadd.f32 %v13948_v14, %v4396_v46  ;;  %v13950_v37 = vld [vmem:[#allocation22_spill] sm:$0xff] }
 0x4b0   : > { %v5545_v33 = vmul.f32 %v5513_v0, %v12501_v9  ;;  %v5067_v50 = vmul.f32 %v12648_v11, %v5035_v3  ;;  %v5305_v45 = vmul.f32 1.442695, %v5261_v34  ;;  %v4399_v25 = vadd.f32 %v8280_v17, %v13949_v6  ;;  %v12693_v36 = vpop.eup %8906 }
 0x4b1   : > { %v5386_v41 = vsub.f32 1.0, %v5354_v38  ;;  %v4814_v29 = vmul.f32 0.3275911, %v4782_v47  ;;  %v5230_v48 = vsub.f32 0.0, %v4782_v47  ;;  %v4648_v27 = vmul.f32 %v12604_v20, %v4557_v10 }
 0x4b2   : > { %v5738_v35 = vadd.f32 %v13950_v37, %v5545_v33  ;;  %v5099_v39 = vadd.f32 -0.28449672, %v5067_v50  ;;  %v4940_v23 = vmul.f32 1.0614054, %v12693_v36  ;;  %v4560_v46 = vadd.f32 %v13951_v5, %v4399_v25 }
 0x4b3   : > { %v5450_v9 = vsub.f32 0.0, %v5386_v41  ;;  %v4846_v61 = vadd.f32 1.0, %v4814_v29  ;;  %v5262_v62 = vmul.f32 %v5230_v48, %v4782_v47  ;;  %v12700_v34 = vadd.f32 %v12621_v21, %v4648_v27 }
 0x4b4   : > { %v5770_v17 = vmul.f32 0.70710677, %v5738_v35  ;;  %v5131_v55 = vmul.f32 %v12648_v11, %v5099_v39  ;;  %v4972_v13 = vadd.f32 -1.4531521, %v4940_v23  ;;  %8912 = vpow2.f32 %v5303_v59 }
 0x4b5   : > { %v5482_v0 = vsel %vm5418_vm0, %v5386_v41, %v5450_v9  ;;  %v12706_v3 = vmul.f32 0.5, %v12624_v40  ;;  %8914 = vrcp.f32 %v4846_v61  ;;  %v5307_v38 = vmul.f32 1.442695, %v5262_v62 }
 0x4b6   : > { %v5962_v14 = vcombine.high %v5770_v17, %v5770_v17  ;;  %v5969_v10 = vrot.slane %v5770_v17, %v12216_v60  ;;  %v5514_v47 = vadd.f32 1.0, %v5482_v0  ;;  %v5163_v33 = vadd.f32 0.2548296, %v5131_v55 }
 0x4b7   : > { %v8909_v50 = vpop.eup %8908  ;;  %v5004_v6 = vmul.f32 %v12693_v36, %v4972_v13  ;;  %8916 = vpow2.f32 %v5305_v45  ;;  %v12711_v25 = vmul.f32 0.70710677, %v12700_v34  ;;  %v4649_v18 = vmul.f32 %v12604_v20, %v4560_v46  ;;  %v13952_v46 = vld [vmem:[#allocation27_spill] sm:$0xff] }
 0x4b8   : > { %v12714_v59 = vpop.eup %8910  ;;  %v5976_v40 = vrot.slane %v5962_v14, %v12216_v60  ;;  %v5977_v41 = vcombine.high %v5969_v10, %v5969_v10  ;;  %v7736_v29 = vrot.slane %v5969_v10, 9  ;;  %v5546_v48 = vmul.f32 %v5514_v47, %v12641_v57 }
 0x4b9   : > { %vm5419_vm1 = vcmp.ge.f32.partialorder %v12555_v26, 0.0  ;;  %v5195_v27 = vmul.f32 %v12648_v11, %v5163_v33  ;;  %v5036_v37 = vadd.f32 1.4214138, %v5004_v6  ;;  %v4941_v45 = vmul.f32 1.0614054, %v12714_v59 }
 0x4ba   : > { %v4783_v35 = vand.u32 2147483647, %v12711_v25  ;;  %v5978_v39 = vcombine.high %v5976_v40, %v5976_v40  ;;  %v7737_v23 = vrot.slane %v5977_v41, 9  ;;  %v12723_v5 = vmul.f32 0.5, %v12664_v24 }
 0x4bb   : > { %8918 = vpow2.f32 %v5307_v38  ;;  %v5739_v9 = vadd.f32 %v13952_v46, %v5546_v48  ;;  %v5355_v61 = vmul.f32 %v8909_v50, %v5195_v27  ;;  %v5068_v57 = vmul.f32 %v12693_v36, %v5036_v37 }
 0x4bc   : > { %v4973_v62 = vadd.f32 -1.4531521, %v4941_v45  ;;  %v7738_v17 = vrot.slane %v5976_v40, 9  ;;  %v12727_v55 = vmax.f32 %v5969_v10, %v7736_v29  ;;  %v4815_v11 = vmul.f32 0.3275911, %v4783_v35 }
 0x4bd   : > { %v12730_v13 = vadd.f32 %v12621_v21, %v4649_v18  ;;  %v5771_v0 = vmul.f32 0.70710677, %v5739_v9  ;;  %v5387_v14 = vsub.f32 1.0, %v5355_v61  ;;  %v5100_v47 = vadd.f32 -0.28449672, %v5068_v57 }
 0x4be   : > { %v5005_v24 = vmul.f32 %v12714_v59, %v4973_v62  ;;  %v8913_v33 = vpop.eup %8912  ;;  %v7739_v38 = vrot.slane %v5978_v39, 9  ;;  %v12733_v6 = vmax.f32 %v5977_v41, %v7737_v23  ;;  %v4847_v50 = vadd.f32 1.0, %v4815_v11 }
 0x4bf   : > { %v5231_v48 = vsub.f32 0.0, %v4783_v35  ;;  %v12735_v27 = vpop.eup %8914  ;;  %v5979_v37 = vcombine.high %v5771_v0, %v5771_v0  ;;  %v5986_v10 = vrot.slane %v5771_v0, %v12216_v60  ;;  %v5451_v29 = vsub.f32 0.0, %v5387_v14 }
 0x4c0   : > { %v5132_v18 = vmul.f32 %v12693_v36, %v5100_v47  ;;  %v5037_v45 = vadd.f32 1.4214138, %v5005_v24  ;;  %v4942_v46 = vmul.f32 1.0614054, %v12735_v27  ;;  %8920 = vrcp.f32 %v4847_v50 }
 0x4c1   : > { %v5263_v9 = vmul.f32 %v5231_v48, %v4783_v35  ;;  %v8917_v61 = vpop.eup %8916  ;;  %v5993_v57 = vrot.slane %v5979_v37, %v12216_v60  ;;  %v5994_v41 = vcombine.high %v5986_v10, %v5986_v10  ;;  %v7740_v23 = vrot.slane %v5986_v10, 9 }
 0x4c2   : > { %v5483_v62 = vsel %vm5419_vm1, %v5387_v14, %v5451_v29  ;;  %v5164_v1 = vadd.f32 0.2548296, %v5132_v18  ;;  %v5069_v0 = vmul.f32 %v12714_v59, %v5037_v45  ;;  %v4974_v19 = vadd.f32 -1.4531521, %v4942_v46  ;;  %v13954_v45 = vld [vmem:[#allocation31_spill] sm:$0xff] }
 0x4c3   : > { %v5515_v11 = vadd.f32 1.0, %v5483_v62  ;;  %v12744_v49 = vmax.f32 %v5976_v40, %v7738_v17  ;;  %v5995_v47 = vcombine.high %v5993_v57, %v5993_v57  ;;  %v7741_v24 = vrot.slane %v5994_v41, 9  ;;  %v12756_v17 = vpop.f32.mrb[176].mxu1 }
 0x4c4   : > { %v7742_v22 = vrot.slane %v5993_v57, 9  ;;  %vm5420_vm3 = vcmp.ge.f32.partialorder %v12599_v4, 0.0  ;;  %v5196_v48 = vmul.f32 %v12693_v36, %v5164_v1  ;;  %v5101_v26 = vadd.f32 -0.28449672, %v5069_v0  ;;  %13953 = vst [vmem:[#allocation46_spill] sm:$0xff] %v12756_v17 }
 0x4c5   : > { %v12747_v35 = vpop.eup %8918  ;;  %v5547_v50 = vmul.f32 %v5515_v11, %v12655_v30  ;;  %v5006_v14 = vmul.f32 %v12735_v27, %v4974_v19  ;;  %v12752_v37 = vmax.f32 %v5978_v39, %v7739_v38  ;;  %v7743_v29 = vrot.slane %v5995_v47, 9 }
 0x4c6   : > { %v12754_v18 = vmax.f32 %v5986_v10, %v7740_v23  ;;  %v5309_v40 = vmul.f32 1.442695, %v5263_v9  ;;  %v5356_v62 = vmul.f32 %v8913_v33, %v5196_v48  ;;  %v5133_v43 = vmul.f32 %v12714_v59, %v5101_v26 }
 0x4c7   : > { %v5740_v46 = vadd.f32 %v13954_v45, %v5547_v50  ;;  %v5038_v16 = vadd.f32 1.4214138, %v5006_v14  ;;  %v12760_v30 = vmax.f32 %v5994_v41, %v7741_v24  ;;  %v12762_v1 = vmax.f32 %v5993_v57, %v7742_v22 }
 0x4c8   : > { %v12764_v36 = vmax.f32 %v5995_v47, %v7743_v29  ;;  %v12767_v19 = vmul.f32 0.70710677, %v12730_v13  ;;  %v5388_v38 = vsub.f32 1.0, %v5356_v62  ;;  %v5165_v10 = vadd.f32 0.2548296, %v5133_v43 }
 0x4c9   : > { %v5772_v39 = vmul.f32 0.70710677, %v5740_v46  ;;  %v5070_v9 = vmul.f32 %v12735_v27, %v5038_v16  ;;  %8922 = vpow2.f32 %v5309_v40  ;;  %v8283_v41 = vadd.f32 %v12557_v44, %v12548_v31  ;;  %v13955_v31 = vld [vmem:[#allocation73_spill] sm:$0xff] }
 0x4ca   : > { %v12771_v33 = vand.u32 2147483647, %v12767_v19  ;;  %v12777_v22 = vadd.f32 %v12571_v54, %v12562_v52  ;;  %v12779_v57 = vpop.eup %8920  ;;  %v5452_v0 = vsub.f32 0.0, %v5388_v38  ;;  %v5197_v43 = vmul.f32 %v12714_v59, %v5165_v10 }
 0x4cb   : > { %v5996_v23 = vcombine.high %v5772_v39, %v5772_v39  ;;  %v6003_v11 = vrot.slane %v5772_v39, %v12216_v60  ;;  %vm5421_vm4 = vcmp.ge.f32.partialorder %v12644_v28, 0.0  ;;  %v5102_v16 = vadd.f32 -0.28449672, %v5070_v9 }
 0x4cc   : > { %v4943_v47 = vmul.f32 1.0614054, %v12779_v57  ;;  %v4816_v24 = vmul.f32 0.3275911, %v12771_v33  ;;  %v12787_v44 = vadd.f32 %v8283_v41, %v13955_v31  ;;  %v5484_v48 = vsel %vm5420_vm3, %v5388_v38, %v5452_v0 }
 0x4cd   : > { %v6010_v52 = vrot.slane %v5996_v23, %v12216_v60  ;;  %v6011_v54 = vcombine.high %v6003_v11, %v6003_v11  ;;  %v7800_v50 = vrot.slane %v6003_v11, 9  ;;  %v5516_v26 = vadd.f32 1.0, %v5484_v48 }
 0x4ce   : > { %v5357_v14 = vmul.f32 %v8917_v61, %v5197_v43  ;;  %v5134_v59 = vmul.f32 %v12735_v27, %v5102_v16  ;;  %v4975_v29 = vadd.f32 -1.4531521, %v4943_v47  ;;  %vm5422_vm9 = vcmp.ge.f32.partialorder %v12679_v15, 0.0 }
 0x4cf   : > { %v6012_v40 = vcombine.high %v6010_v52, %v6010_v52  ;;  %v7801_v45 = vrot.slane %v6011_v54, 9  ;;  %v7802_v46 = vrot.slane %v6010_v52, 9  ;;  %v6962_v62 = vmax.f32 %v6003_v11, %v7800_v50 }
 0x4d0   : > { %v5548_v39 = vmul.f32 %v5516_v26, %v12684_v56  ;;  %v5389_v10 = vsub.f32 1.0, %v5357_v14  ;;  %v5166_v9 = vadd.f32 0.2548296, %v5134_v59  ;;  %v5007_v41 = vmul.f32 %v12779_v57, %v4975_v29 }
 0x4d1   : > { %v7803_v23 = vrot.slane %v6012_v40, 9  ;;  %v6963_v31 = vmax.f32 %v6011_v54, %v7801_v45  ;;  %v6964_v17 = vmax.f32 %v6010_v52, %v7802_v46  ;;  %v7026_v4 = vmax.f32 %v12727_v55, %v6962_v62 }
 0x4d2   : > { %v5741_v61 = vadd.f32 %v12474_v7, %v5548_v39  ;;  %v5453_v38 = vsub.f32 0.0, %v5389_v10  ;;  %v5198_v0 = vmul.f32 %v12735_v27, %v5166_v9  ;;  %v5039_v43 = vadd.f32 1.4214138, %v5007_v41 }
 0x4d3   : > { %v6965_v11 = vmax.f32 %v6012_v40, %v7803_v23  ;;  %v7027_v56 = vmax.f32 %v12733_v6, %v6963_v31  ;;  %v7028_v16 = vmax.f32 %v12744_v49, %v6964_v17  ;;  %v7205_v47 = vrot.slane %v7026_v4, %v12223_v2  ;;  %v8923_v50 = vpop.eup %8922 }
 0x4d4   : > { %v5773_v54 = vmul.f32 0.70710677, %v5741_v61  ;;  %v5485_v55 = vsel %vm5421_vm4, %v5389_v10, %v5453_v38  ;;  %v5358_v7 = vmul.f32 %v12747_v35, %v5198_v0  ;;  %v5071_v52 = vmul.f32 %v12779_v57, %v5039_v43  ;;  %v13956_v10 = vld [vmem:[#allocation35_spill] sm:$0xff] }
 0x4d5   : > { %v7029_v27 = vmax.f32 %v12752_v37, %v6965_v11  ;;  %v7209_v48 = vrot.slane %v7027_v56, %v12223_v2  ;;  %v7213_v26 = vrot.slane %v7028_v16, %v12223_v2  ;;  %v5517_v6 = vadd.f32 1.0, %v5485_v55 }
 0x4d6   : > { %v6013_v14 = vcombine.high %v5773_v54, %v5773_v54  ;;  %v6020_v49 = vrot.slane %v5773_v54, %v12216_v60  ;;  %v5390_v17 = vsub.f32 1.0, %v5358_v7  ;;  %v5103_v59 = vadd.f32 -0.28449672, %v5071_v52 }
 0x4d7   : > { %v7217_v29 = vrot.slane %v7029_v27, %v12223_v2  ;;  %v7415_v28 = vsel %vm7394_vm5, %v7209_v48, %v7205_v47  ;;  %v5549_v35 = vmul.f32 %v5517_v6, %v12706_v3  ;;  %v4848_v40 = vadd.f32 1.0, %v4816_v24 }
 0x4d8   : > { %v7416_v45 = vsel %vm7396_vm6, %v7213_v26, %v7415_v28  ;;  %v6027_v37 = vrot.slane %v6013_v14, %v12216_v60  ;;  %v6028_v46 = vcombine.high %v6020_v49, %v6020_v49  ;;  %v7804_v62 = vrot.slane %v6020_v49, 9  ;;  %v13957_v26 = vld [vmem:[#allocation52_spill] sm:$0xff]  ;;  %v13960_v28 = vld [vmem:[#allocation33_spill] sm:$0xff] }
 0x4d9   : > { %v7417_v39 = vsel %vm7398_vm7, %v7217_v29, %v7416_v45  ;;  %v5742_v9 = vadd.f32 %v13956_v10, %v5549_v35  ;;  %v5454_v41 = vsub.f32 0.0, %v5390_v17  ;;  %v5135_v23 = vmul.f32 %v12779_v57, %v5103_v59  ;;  %v13958_v14 = vld [vmem:[#allocation56_spill] sm:$0xff] }
 0x4da   : > { %v6029_v31 = vcombine.high %v6027_v37, %v6027_v37  ;;  %v7805_v4 = vrot.slane %v6028_v46, 9  ;;  %v7806_v61 = vrot.slane %v6027_v37, 9  ;;  %v6966_v38 = vmax.f32 %v6020_v49, %v7804_v62  ;;  %v13962_v62 = vld [vmem:[#allocation44_spill] sm:$0xff] }
 0x4db   : > { %v5774_v0 = vmul.f32 0.70710677, %v5742_v9  ;;  %v5486_v3 = vsel %vm5422_vm9, %v5390_v17, %v5454_v41  ;;  %v5167_v24 = vadd.f32 0.2548296, %v5135_v23  ;;  %8924 = vrcp.f32 %v4848_v40  ;;  %v13964_v10 = vld [vmem:[#allocation48_spill] sm:$0xff] }
 0x4dc   : > { %v7807_v43 = vrot.slane %v6029_v31, 9  ;;  %v6967_v11 = vmax.f32 %v6028_v46, %v7805_v4  ;;  %v6968_v56 = vmax.f32 %v6027_v37, %v7806_v61  ;;  %v7030_v16 = vmax.f32 %v12754_v18, %v6966_v38 }
 0x4dd   : > { %v6030_v47 = vcombine.high %v5774_v0, %v5774_v0  ;;  %v6037_v54 = vrot.slane %v5774_v0, %v12216_v60  ;;  %v5518_v55 = vadd.f32 1.0, %v5486_v3  ;;  %v5199_v7 = vmul.f32 %v12779_v57, %v5167_v24  ;;  %v13966_v3 = vld [vmem:[#allocation54_spill] sm:$0xff] }
 0x4de   : > { %v6969_v52 = vmax.f32 %v6029_v31, %v7807_v43  ;;  %v7031_v27 = vmax.f32 %v12760_v30, %v6967_v11  ;;  %v7032_v48 = vmax.f32 %v12762_v1, %v6968_v56  ;;  %v7221_v15 = vrot.slane %v7030_v16, %v12223_v2  ;;  %v13967_v43 = vld [vmem:[#allocation75_spill] sm:$0xff] }
 0x4df   : > { %v5661_v6 = vrot.slane %v13957_v26, 1  ;;  %v5666_v49 = vrot.slane %v13958_v14, 1  ;;  %v5550_v17 = vmul.f32 %v5518_v55, %v12723_v5  ;;  %v13959_v57 = vrot.slane %v13932_v53, 1  ;;  %v13969_v26 = vld [vmem:[#allocation82_spill] sm:$0xff] }
 0x4e0   : > { %v7033_v18 = vmax.f32 %v12764_v36, %v6969_v52  ;;  %v7225_v59 = vrot.slane %v7031_v27, %v12223_v2  ;;  %v7418_v29 = vsel %vm7400_vm10, %v7221_v15, %v7417_v39  ;;  %v13961_v30 = vrot.slane %v13960_v28, 1 }
 0x4e1   : > { %v7229_v35 = vrot.slane %v7032_v48, %v12223_v2  ;;  %v6044_v40 = vrot.slane %v6030_v47, %v12216_v60  ;;  %v6045_v45 = vcombine.high %v6037_v54, %v6037_v54  ;;  %v5359_v46 = vmul.f32 %v8923_v50, %v5199_v7  ;;  %v13968_v48 = vld [vmem:[#allocation40_spill] sm:$0xff] }
 0x4e2   : > { %v5652_v1 = vsel %vm3143_vm8, %v13961_v30, %v13959_v57  ;;  %v7233_v5 = vrot.slane %v7033_v18, %v12223_v2  ;;  %v7419_v36 = vsel %vm7402_vm11, %v7225_v59, %v7418_v29  ;;  %v13963_v39 = vrot.slane %v13962_v62, 1 }
 0x4e3   : > { %v5743_v37 = vadd.f32 %v5652_v1, %v5550_v17  ;;  %v13965_v9 = vrot.slane %v13964_v10, 1  ;;  %v7420_v23 = vsel %vm7404_vm12, %v7229_v35, %v7419_v36  ;;  %vm5423_vm14 = vcmp.ge.f32.partialorder %v12711_v25, 0.0 }
 0x4e4   : > { %v12844_v53 = vsel %vm3143_vm8, %v13963_v39, %v5661_v6  ;;  %v7421_v31 = vsel %vm7406_vm13, %v7233_v5, %v7420_v23  ;;  %v5391_v61 = vsub.f32 1.0, %v5359_v46  ;;  %v5232_v50 = vsub.f32 0.0, %v12771_v33 }
 0x4e5   : > { %v12849_v41 = vsel %vm3143_vm8, %v13965_v9, %v5666_v49  ;;  %v5775_v4 = vmul.f32 0.70710677, %v5743_v37  ;;  %v12855_v38 = vpop.eup %8924  ;;  %7467 = vst [vmem:[%s12444_s13 + $0x10] sm:$0xff] %v7421_v31  ;;  %v7744_v0 = vrot.slane %v6037_v54, 9  ;;  %v4565_v24 = vadd.f32 %v13966_v3, %v12787_v44  ;;  %v13973_v3 = vld [vmem:[#allocation81_spill] sm:$0xff] }
 0x4e6   : > { %v4407_v11 = vadd.f32 %v12777_v22, %v13967_v43  ;;  %v8289_v56 = vadd.f32 %v12588_v51, %v12584_v32  ;;  %v6046_v16 = vcombine.high %v6044_v40, %v6044_v40  ;;  %v7745_v47 = vrot.slane %v6045_v45, 9 }
 0x4e7   : > { %v5455_v55 = vsub.f32 0.0, %v5391_v61  ;;  %v4944_v7 = vmul.f32 1.0614054, %v12855_v38  ;;  %v5264_v52 = vmul.f32 %v5232_v50, %v12771_v33  ;;  %v4650_v27 = vmul.f32 %v12604_v20, %v4565_v24  ;;  %v13970_v33 = vld [vmem:[#allocation65_spill] sm:$0xff] }
 0x4e8   : > { %v4568_v15 = vadd.f32 %v13968_v48, %v4407_v11  ;;  %v4412_v6 = vadd.f32 %v8289_v56, %v13969_v26  ;;  %v7746_v44 = vrot.slane %v6044_v40, 9  ;;  %v6047_v14 = vcombine.high %v5775_v4, %v5775_v4 }
 0x4e9   : > { %v6054_v22 = vrot.slane %v5775_v4, %v12216_v60  ;;  %v5487_v32 = vsel %vm5423_vm14, %v5391_v61, %v5455_v55  ;;  %v4719_v51 = vmul.f32 0.5, %v12700_v34  ;;  %v4976_v17 = vadd.f32 -1.4531521, %v4944_v7 }
 0x4ea   : > { %v5519_v49 = vadd.f32 1.0, %v5487_v32  ;;  %v4689_v18 = vadd.f32 %v12621_v21, %v4650_v27  ;;  %v5671_v59 = vrot.slane %v13970_v33, 1  ;;  %v7747_v29 = vrot.slane %v6046_v16, 9 }
 0x4eb   : > { %v12875_v57 = vmax.f32 %v6037_v54, %v7744_v0  ;;  %v12878_v28 = vmul.f32 0.5, %v12730_v13  ;;  %v12880_v30 = vmax.f32 %v6045_v45, %v7745_v47  ;;  %v5008_v25 = vmul.f32 %v12855_v38, %v4976_v17  ;;  %v13971_v54 = vld [vmem:[#allocation39_spill] sm:$0xff]  ;;  %v13972_v45 = vld [vmem:[#allocation25_spill] sm:$0xff] }
 0x4ec   : > { %v5551_v1 = vmul.f32 %v5519_v49, %v4719_v51  ;;  %v5311_v35 = vmul.f32 1.442695, %v5264_v52  ;;  %v12883_v5 = vmax.f32 %v6044_v40, %v7746_v44  ;;  %v12886_v34 = vrot.slane %v6047_v14, %v12216_v60 }
 0x4ed   : > { %v12888_v36 = vcombine.high %v6054_v22, %v6054_v22  ;;  %v12890_v37 = vmul.f32 0.70710677, %v4689_v18  ;;  %v5040_v62 = vadd.f32 1.4214138, %v5008_v25  ;;  %v4651_v13 = vmul.f32 %v12604_v20, %v4568_v15 }
 0x4ee   : > { %v5744_v46 = vadd.f32 %v13971_v54, %v5551_v1  ;;  %v4573_v39 = vadd.f32 %v13972_v45, %v4412_v6  ;;  %v12895_v10 = vmax.f32 %v6046_v16, %v7747_v29  ;;  %v7748_v9 = vrot.slane %v6054_v22, 9 }
 0x4ef   : > { %v4785_v40 = vand.u32 2147483647, %v12890_v37  ;;  %v8292_v23 = vadd.f32 %v12596_v42, %v12593_v12  ;;  %v5072_v4 = vmul.f32 %v12855_v38, %v5040_v62  ;;  %8926 = vpow2.f32 %v5311_v35 }
 0x4f0   : > { %v5776_v31 = vmul.f32 0.70710677, %v5744_v46  ;;  %v12902_v61 = vadd.f32 %v12621_v21, %v4651_v13  ;;  %v12906_v50 = vcombine.high %v12886_v34, %v12886_v34  ;;  %v8295_v43 = vadd.f32 %v12637_v58, %v12632_v8 }
 0x4f1   : > { %v4817_v0 = vmul.f32 0.3275911, %v4785_v40  ;;  %v4415_v24 = vadd.f32 %v8292_v23, %v13973_v3  ;;  %v7749_v11 = vrot.slane %v12888_v36, 9  ;;  %v5104_v56 = vadd.f32 -0.28449672, %v5072_v4  ;;  %v13974_v3 = vld [vmem:[#allocation60_spill] sm:$0xff] }
 0x4f2   : > { %v6064_v12 = vcombine.high %v5776_v31, %v5776_v31  ;;  %v6071_v42 = vrot.slane %v5776_v31, %v12216_v60  ;;  %v7750_v16 = vrot.slane %v12886_v34, 9  ;;  %v12915_v55 = vmul.f32 0.70710677, %v12902_v61 }
 0x4f3   : > { %v4849_v47 = vadd.f32 1.0, %v4817_v0  ;;  %v4652_v7 = vmul.f32 %v12604_v20, %v4573_v39  ;;  %v5136_v8 = vmul.f32 %v12855_v38, %v5104_v56  ;;  %v12920_v58 = vmax.f32 %v6054_v22, %v7748_v9 }
 0x4f4   : > { %v6078_v52 = vrot.slane %v6064_v12, %v12216_v60  ;;  %v6079_v27 = vcombine.high %v6071_v42, %v6071_v42  ;;  %v7808_v48 = vrot.slane %v6071_v42, 9  ;;  %v5233_v15 = vsub.f32 0.0, %v4785_v40 }
 0x4f5   : > { %8928 = vrcp.f32 %v4849_v47  ;;  %v4786_v26 = vand.u32 2147483647, %v12915_v55  ;;  %v5168_v51 = vadd.f32 0.2548296, %v5136_v8  ;;  %v12923_v49 = vmul.f32 0.5, %v4689_v18 }
 0x4f6   : > { %v6080_v6 = vcombine.high %v6078_v52, %v6078_v52  ;;  %v7809_v44 = vrot.slane %v6079_v27, 9  ;;  %v7810_v14 = vrot.slane %v6078_v52, 9  ;;  %v6970_v32 = vmax.f32 %v6071_v42, %v7808_v48 }
 0x4f7   : > { %v4818_v17 = vmul.f32 0.3275911, %v4786_v26  ;;  %v12926_v29 = vadd.f32 %v12621_v21, %v4652_v7  ;;  %vm5424_vm15 = vcmp.ge.f32.partialorder %v12767_v19, 0.0  ;;  %v5200_v54 = vmul.f32 %v12855_v38, %v5168_v51 }
 0x4f8   : > { %v7811_v1 = vrot.slane %v6080_v6, 9  ;;  %v6971_v25 = vmax.f32 %v6079_v27, %v7809_v44  ;;  %v6972_v35 = vmax.f32 %v6078_v52, %v7810_v14  ;;  %v7034_v22 = vmax.f32 %v12875_v57, %v6970_v32  ;;  %v13975_v27 = vld [vmem:[#allocation2_spill] sm:$0xff]  ;;  %v13976_v32 = vld [vmem:[#allocation36_spill] sm:$0xff] }
 0x4f9   : > { %v5265_v46 = vmul.f32 %v5233_v15, %v4785_v40  ;;  %v4850_v62 = vadd.f32 1.0, %v4818_v17  ;;  %v5234_v13 = vsub.f32 0.0, %v4786_v26  ;;  %v8927_v45 = vpop.eup %8926  ;;  %v7751_v18 = vrot.slane %v12906_v50, 9 }
 0x4fa   : > { %v6973_v39 = vmax.f32 %v6080_v6, %v7811_v1  ;;  %v7035_v9 = vmax.f32 %v12880_v30, %v6971_v25  ;;  %v7036_v23 = vmax.f32 %v12883_v5, %v6972_v35  ;;  %v7237_v31 = vrot.slane %v7034_v22, %v12223_v2  ;;  %v13977_v25 = vld [vmem:[#allocation37_spill] sm:$0xff] }
 0x4fb   : > { %v5360_v4 = vmul.f32 %v8927_v45, %v5200_v54  ;;  %8930 = vrcp.f32 %v4850_v62  ;;  %v12936_v57 = vmul.f32 0.70710677, %v12926_v29  ;;  %v4576_v12 = vadd.f32 %v13974_v3, %v4415_v24  ;;  %v13978_v45 = vld [vmem:[#allocation26_spill] sm:$0xff] }
 0x4fc   : > { %v7037_v38 = vmax.f32 %v12895_v10, %v6973_v39  ;;  %v7241_v40 = vrot.slane %v7035_v9, %v12223_v2  ;;  %v7245_v0 = vrot.slane %v7036_v23, %v12223_v2  ;;  %v5313_v56 = vmul.f32 1.442695, %v5265_v46 }
 0x4fd   : > { %v5392_v42 = vsub.f32 1.0, %v5360_v4  ;;  %v5266_v30 = vmul.f32 %v5234_v13, %v4786_v26  ;;  %v4787_v5 = vand.u32 2147483647, %v12936_v57  ;;  %v4653_v52 = vmul.f32 %v12604_v20, %v4576_v12  ;;  %v13979_v4 = vld [vmem:[#allocation43_spill] sm:$0xff]  ;;  %v13982_v12 = vld [vmem:[#allocation42_spill] sm:$0xff] }
 0x4fe   : > { %v7249_v47 = vrot.slane %v7037_v38, %v12223_v2  ;;  %v7422_v7 = vsel %vm7394_vm5, %v7241_v40, %v7237_v31  ;;  %v4420_v48 = vadd.f32 %v8295_v43, %v13975_v27  ;;  %v8298_v35 = vadd.f32 %v13977_v25, %v12646_v63  ;;  %v13980_v40 = vld [vmem:[#allocation4_spill] sm:$0xff] }
 0x4ff   : > { %v12947_v10 = vpop.eup %8928  ;;  %v7423_v8 = vsel %vm7396_vm6, %v7245_v0, %v7422_v7  ;;  %v5456_v15 = vsub.f32 0.0, %v5392_v42  ;;  %v4819_v6 = vmul.f32 0.3275911, %v4787_v5  ;;  %v5235_v24 = vsub.f32 0.0, %v4787_v5  ;;  %v13981_v0 = vld [vmem:[#allocation5_spill] sm:$0xff] }
 0x500   : > { %v12951_v44 = vsel %vm7398_vm7, %v7249_v47, %v7423_v8  ;;  %v4945_v26 = vmul.f32 1.0614054, %v12947_v10  ;;  %v12955_v14 = vadd.f32 %v12621_v21, %v4653_v52  ;;  %v4581_v51 = vadd.f32 %v13976_v32, %v4420_v48 }
 0x501   : > { %v5488_v43 = vsel %vm5424_vm15, %v5392_v42, %v5456_v15  ;;  %v4851_v17 = vadd.f32 1.0, %v4819_v6  ;;  %v5267_v1 = vmul.f32 %v5235_v24, %v4787_v5  ;;  %v12965_v22 = vmax.f32 %v12888_v36, %v7749_v11 }
 0x502   : > { %v5520_v54 = vadd.f32 1.0, %v5488_v43  ;;  %v4977_v46 = vadd.f32 -1.4531521, %v4945_v26  ;;  %v12968_v62 = vmul.f32 0.70710677, %v12955_v14  ;;  %v4654_v19 = vmul.f32 %v12604_v20, %v4581_v51 }
 0x503   : > { %v5315_v13 = vmul.f32 1.442695, %v5266_v30  ;;  %8932 = vrcp.f32 %v4851_v17  ;;  %v4423_v39 = vadd.f32 %v8298_v35, %v13978_v45  ;;  %v5317_v11 = vmul.f32 1.442695, %v5267_v1 }
 0x504   : > { %v5552_v9 = vmul.f32 %v5520_v54, %v12878_v28  ;;  %v5009_v63 = vmul.f32 %v12947_v10, %v4977_v46  ;;  %8934 = vpow2.f32 %v5313_v56  ;;  %v4788_v23 = vand.u32 2147483647, %v12968_v62 }
 0x505   : > { %v12975_v36 = vpop.eup %8930  ;;  %v12978_v31 = vadd.f32 %v12621_v21, %v4654_v19  ;;  %v4584_v38 = vadd.f32 %v13979_v4, %v4423_v39  ;;  %v12983_v3 = vadd.f32 %v13981_v0, %v13980_v40  ;;  %v12990_v5 = vmax.f32 %v12886_v34, %v7750_v16 }
 0x506   : > { %v5745_v42 = vadd.f32 %v13982_v12, %v5552_v9  ;;  %v5041_v28 = vadd.f32 1.4214138, %v5009_v63  ;;  %v4946_v30 = vmul.f32 1.0614054, %v12975_v36  ;;  %v4820_v56 = vmul.f32 0.3275911, %v4788_v23 }
 0x507   : > { %8936 = vpow2.f32 %v5315_v13  ;;  %v5236_v47 = vsub.f32 0.0, %v4788_v23  ;;  %v12993_v7 = vmul.f32 0.70710677, %v12978_v31  ;;  %v6721_v15 = vmax.f32 %v12906_v50, %v7751_v18 }
 0x508   : > { %v5777_v52 = vmul.f32 0.70710677, %v5745_v42  ;;  %v5073_v27 = vmul.f32 %v12947_v10, %v5041_v28  ;;  %v4978_v48 = vadd.f32 -1.4531521, %v4946_v30  ;;  %v4852_v8 = vadd.f32 1.0, %v4820_v56  ;;  %v13018_v42 = vpop.f32.mrb[177].mxu1 }
 0x509   : > { %8938 = vpow2.f32 %v5317_v11  ;;  %v5268_v6 = vmul.f32 %v5236_v47, %v4788_v23  ;;  %v12998_v24 = vand.u32 2147483647, %v12993_v7  ;;  %v13003_v51 = vmul.f32 0.5, %v12902_v61 }
 0x50a   : > { %v6081_v26 = vcombine.high %v5777_v52, %v5777_v52  ;;  %v6088_v34 = vrot.slane %v5777_v52, %v12216_v60  ;;  %v5105_v16 = vadd.f32 -0.28449672, %v5073_v27  ;;  %v5010_v32 = vmul.f32 %v12975_v36, %v4978_v48 }
 0x50b   : > { %v13006_v43 = vmul.f32 0.5, %v12926_v29  ;;  %8940 = vrcp.f32 %v4852_v8  ;;  %v4821_v50 = vmul.f32 0.3275911, %v12998_v24  ;;  %v5319_v46 = vmul.f32 1.442695, %v5268_v6 }
 0x50c   : > { %v6095_v18 = vrot.slane %v6081_v26, %v12216_v60  ;;  %v6096_v17 = vcombine.high %v6088_v34, %v6088_v34  ;;  %v7812_v1 = vrot.slane %v6088_v34, 9  ;;  %v5137_v25 = vmul.f32 %v12947_v10, %v5105_v16 }
 0x50d   : > { %v13011_v35 = vpop.eup %8932  ;;  %v5042_v54 = vadd.f32 1.4214138, %v5010_v32  ;;  %v4853_v13 = vadd.f32 1.0, %v4821_v50  ;;  %v4655_v61 = vmul.f32 %v12604_v20, %v4584_v38  ;;  %vm5425_vm2 = vcmp.ge.f32.partialorder %v12890_v37, 0.0 }
 0x50e   : > { %v8935_v19 = vpop.eup %8934  ;;  %v6097_v45 = vcombine.high %v6095_v18, %v6095_v18  ;;  %v7813_v29 = vrot.slane %v6096_v17, 9  ;;  %v7814_v39 = vrot.slane %v6095_v18, 9  ;;  %v6974_v9 = vmax.f32 %v6088_v34, %v7812_v1 }
 0x50f   : > { %v5169_v63 = vadd.f32 0.2548296, %v5137_v25  ;;  %v5074_v23 = vmul.f32 %v12975_v36, %v5042_v54  ;;  %v4947_v11 = vmul.f32 1.0614054, %v13011_v35  ;;  %8942 = vrcp.f32 %v4853_v13 }
 0x510   : > { %v7815_v4 = vrot.slane %v6097_v45, 9  ;;  %v6975_v40 = vmax.f32 %v6096_v17, %v7813_v29  ;;  %v6976_v0 = vmax.f32 %v6095_v18, %v7814_v39  ;;  %v7038_v12 = vmax.f32 %v12920_v58, %v6974_v9  ;;  %v13027_v58 = vpop.f32.mrb[178].mxu1 }
 0x511   : > { %v8937_v20 = vpop.eup %8936  ;;  %v5201_v38 = vmul.f32 %v12947_v10, %v5169_v63  ;;  %v5106_v28 = vadd.f32 -0.28449672, %v5074_v23  ;;  %v4979_v30 = vadd.f32 -1.4531521, %v4947_v11  ;;  %v13022_v56 = vadd.f32 %v12621_v21, %v4655_v61  ;;  %v13034_v21 = vpop.f32.mrb[179].mxu1 }
 0x512   : > { %v6977_v47 = vmax.f32 %v6097_v45, %v7815_v4  ;;  %v7039_v52 = vmax.f32 %v12965_v22, %v6975_v40  ;;  %v7040_v27 = vmax.f32 %v12990_v5, %v6976_v0  ;;  %v7253_v48 = vrot.slane %v7038_v12, %v12223_v2  ;;  %v13052_v45 = vpop.f32.mrb[180].mxu1  ;;  %v13983_v0 = vld [vmem:[#allocation20_spill] sm:$0xff] }
 0x513   : > { %v13029_v8 = vpop.eup %8938  ;;  %v5361_v6 = vmul.f32 %v8935_v19, %v5201_v38  ;;  %v5138_v26 = vmul.f32 %v12975_v36, %v5106_v28  ;;  %v5011_v10 = vmul.f32 %v13011_v35, %v4979_v30  ;;  %v5237_v34 = vsub.f32 0.0, %v12998_v24  ;;  %v13057_v23 = vpop.f32.mrb[181].mxu1 }
 0x514   : > { %v7041_v16 = vmax.f32 %v6721_v15, %v6977_v47  ;;  %v7257_v22 = vrot.slane %v7039_v52, %v12223_v2  ;;  %v7425_v5 = vsel %vm7400_vm10, %v7253_v48, %v12951_v44  ;;  %8944 = vpow2.f32 %v5319_v46  ;;  %v13984_v48 = vld [vmem:[#allocation28_spill] sm:$0xff] }
 0x515   : > { %v13039_v32 = vpop.eup %8940  ;;  %v7261_v50 = vrot.slane %v7040_v27, %v12223_v2  ;;  %v5393_v18 = vsub.f32 1.0, %v5361_v6  ;;  %v5170_v17 = vadd.f32 0.2548296, %v5138_v26  ;;  %v5043_v1 = vadd.f32 1.4214138, %v5011_v10 }
 0x516   : > { %v7265_v25 = vrot.slane %v7041_v16, %v12223_v2  ;;  %v7426_v54 = vsel %vm7402_vm11, %v7257_v22, %v7425_v5  ;;  %vm5426_vm0 = vcmp.ge.f32.partialorder %v12915_v55, 0.0  ;;  %v4948_v15 = vmul.f32 1.0614054, %v13039_v32  ;;  %v13074_v22 = vld [vmem:[%s13575_s6] ss:$0 sm:$0xff] }
 0x517   : > { %v13047_v13 = vmul.f32 0.70710677, %v13022_v56  ;;  %v7427_v44 = vsel %vm7404_vm12, %v7261_v50, %v7426_v54  ;;  %v5457_v46 = vsub.f32 0.0, %v5393_v18  ;;  %v5202_v61 = vmul.f32 %v12975_v36, %v5170_v17  ;;  %v13090_v55 = vld [vmem:[%s13576_s7] ss:$0 sm:$0xff] }
 0x518   : > { %v5075_v19 = vmul.f32 %v13011_v35, %v5043_v1  ;;  %v7428_v29 = vsel %vm7406_vm13, %v7265_v25, %v7427_v44  ;;  %v4980_v39 = vadd.f32 -1.4531521, %v4948_v15  ;;  %v5269_v9 = vmul.f32 %v5237_v34, %v12998_v24 }
 0x519   : > { %v4790_v63 = vand.u32 2147483647, %v13047_v13  ;;  %v13059_v11 = vpop.eup %8942  ;;  %7468 = vst [vmem:[%s12444_s13 + $0x18] sm:$0xff] %v7428_v29  ;;  %v5489_v4 = vsel %vm5425_vm2, %v5393_v18, %v5457_v46  ;;  %v5362_v36 = vmul.f32 %v8937_v20, %v5202_v61  ;;  %v4428_v12 = vadd.f32 %v12983_v3, %v13983_v0  ;;  %v13985_v18 = vld [vmem:[#allocation23_spill] sm:$0xff]  ;;  %v13987_v29 = vld [vmem:[#allocation13_spill] sm:$0xff] }
 0x51a   : > { %v5107_v40 = vadd.f32 -0.28449672, %v5075_v19  ;;  %v5521_v38 = vadd.f32 1.0, %v5489_v4  ;;  %v5012_v28 = vmul.f32 %v13039_v32, %v4980_v39  ;;  %v4949_v24 = vmul.f32 1.0614054, %v13059_v11  ;;  %v13986_v19 = vld [vmem:[#allocation8_spill] sm:$0xff] }
 0x51b   : > { %v4822_v30 = vmul.f32 0.3275911, %v4790_v63  ;;  %v5394_v47 = vsub.f32 1.0, %v5362_v36  ;;  %v5238_v27 = vsub.f32 0.0, %v4790_v63  ;;  %v4589_v6 = vadd.f32 %v13984_v48, %v4428_v12 }
 0x51c   : > { %v5139_v52 = vmul.f32 %v13011_v35, %v5107_v40  ;;  %v5553_v37 = vmul.f32 %v5521_v38, %v12923_v49  ;;  %v5044_v26 = vadd.f32 1.4214138, %v5012_v28  ;;  %v4981_v20 = vadd.f32 -1.4531521, %v4949_v24  ;;  %v13095_v40 = vpop.f32.mrb[182].mxu1 }
 0x51d   : > { %v4854_v10 = vadd.f32 1.0, %v4822_v30  ;;  %v5458_v34 = vsub.f32 0.0, %v5394_v47  ;;  %v5270_v3 = vmul.f32 %v5238_v27, %v4790_v63  ;;  %v4656_v5 = vmul.f32 %v13074_v22, %v4589_v6  ;;  %v13988_v30 = vld [vmem:[#allocation7_spill] sm:$0xff] }
 0x51e   : > { %v5171_v16 = vadd.f32 0.2548296, %v5139_v52  ;;  %v8945_v50 = vpop.eup %8944  ;;  %v5746_v17 = vadd.f32 %v13985_v18, %v5553_v37  ;;  %v5076_v1 = vmul.f32 %v13039_v32, %v5044_v26  ;;  %v5013_v49 = vmul.f32 %v13059_v11, %v4981_v20 }
 0x51f   : > { %8946 = vrcp.f32 %v4854_v10  ;;  %v5490_v25 = vsel %vm5426_vm0, %v5394_v47, %v5458_v34  ;;  %vm5427_vm1 = vcmp.ge.f32.partialorder %v12936_v57, 0.0  ;;  %v5321_v15 = vmul.f32 1.442695, %v5269_v9 }
 0x520   : > { %v5203_v54 = vmul.f32 %v13011_v35, %v5171_v16  ;;  %v5778_v44 = vmul.f32 0.70710677, %v5746_v17  ;;  %v5522_v46 = vadd.f32 1.0, %v5490_v25  ;;  %v5108_v61 = vadd.f32 -0.28449672, %v5076_v1 }
 0x521   : > { %v8304_v39 = vadd.f32 %v13987_v29, %v13986_v19  ;;  %v5045_v4 = vadd.f32 1.4214138, %v5013_v49  ;;  %v5323_v36 = vmul.f32 1.442695, %v5270_v3  ;;  %v13093_v35 = vadd.f32 %v13090_v55, %v4656_v5 }
 0x522   : > { %v5363_v63 = vmul.f32 %v13029_v8, %v5203_v54  ;;  %v6098_v9 = vcombine.high %v5778_v44, %v5778_v44  ;;  %v6105_v0 = vrot.slane %v5778_v44, %v12216_v60  ;;  %v5554_v12 = vmul.f32 %v5522_v46, %v13003_v51  ;;  %v13100_v8 = vpop.f32.mrb[183].mxu1 }
 0x523   : > { %v5140_v38 = vmul.f32 %v13039_v32, %v5108_v61  ;;  %v5077_v24 = vmul.f32 %v13059_v11, %v5045_v4  ;;  %8948 = vpow2.f32 %v5321_v15  ;;  %v13104_v47 = vadd.f32 %v8304_v39, %v13988_v30  ;;  %v13989_v4 = vld [vmem:[#allocation49_spill] sm:$0xff] }
 0x524   : > { %v5395_v28 = vsub.f32 1.0, %v5363_v63  ;;  %v6112_v52 = vrot.slane %v6098_v9, %v12216_v60  ;;  %v6113_v27 = vcombine.high %v6105_v0, %v6105_v0  ;;  %v5747_v48 = vadd.f32 %v12844_v53, %v5554_v12 }
 0x525   : > { %v13109_v6 = vmul.f32 0.5, %v12955_v14  ;;  %v5172_v37 = vadd.f32 0.2548296, %v5140_v38  ;;  %v13112_v26 = vmul.f32 0.5, %v12978_v31  ;;  %v5109_v20 = vadd.f32 -0.28449672, %v5077_v24 }
 0x526   : > { %v5459_v51 = vsub.f32 0.0, %v5395_v28  ;;  %v6114_v10 = vcombine.high %v6112_v52, %v6112_v52  ;;  %v7752_v34 = vrot.slane %v6105_v0, 9  ;;  %8950 = vpow2.f32 %v5323_v36 }
 0x527   : > { %v13115_v16 = vmul.f32 0.70710677, %v13093_v35  ;;  %v5779_v3 = vmul.f32 0.70710677, %v5747_v48  ;;  %v5204_v53 = vmul.f32 %v13039_v32, %v5172_v37  ;;  %vm5428_vm3 = vcmp.ge.f32.partialorder %v12968_v62, 0.0  ;;  %v13990_v62 = vld [vmem:[#allocation10_spill] sm:$0xff] }
 0x528   : > { %v5491_v5 = vsel %vm5427_vm1, %v5395_v28, %v5459_v51  ;;  %v5141_v14 = vmul.f32 %v13059_v11, %v5109_v20  ;;  %v7753_v31 = vrot.slane %v6113_v27, 9  ;;  %v7754_v17 = vrot.slane %v6112_v52, 9 }
 0x529   : > { %v13122_v18 = vpop.eup %8946  ;;  %v7755_v1 = vrot.slane %v6114_v10, 9  ;;  %v5523_v49 = vadd.f32 1.0, %v5491_v5  ;;  %v6115_v25 = vcombine.high %v5779_v3, %v5779_v3  ;;  %v6122_v54 = vrot.slane %v5779_v3, %v12216_v60 }
 0x52a   : > { %v5364_v15 = vmul.f32 %v8945_v50, %v5204_v53  ;;  %v5173_v44 = vadd.f32 0.2548296, %v5141_v14  ;;  %v13125_v46 = vmax.f32 %v6105_v0, %v7752_v34  ;;  %v4950_v32 = vmul.f32 1.0614054, %v13122_v18 }
 0x52b   : > { %v5555_v57 = vmul.f32 %v5523_v49, %v13006_v43  ;;  %v13130_v61 = vand.u32 2147483647, %v13115_v16  ;;  %v6129_v19 = vrot.slane %v6115_v25, %v12216_v60  ;;  %v6130_v29 = vcombine.high %v6122_v54, %v6122_v54  ;;  %v13137_v43 = vpop.f32.mrb[184].mxu1 }
 0x52c   : > { %v7756_v39 = vrot.slane %v6122_v54, 9  ;;  %v5396_v63 = vsub.f32 1.0, %v5364_v15  ;;  %v5205_v9 = vmul.f32 %v13059_v11, %v5173_v44  ;;  %vm5429_vm4 = vcmp.ge.f32.partialorder %v12993_v7, 0.0  ;;  %v13143_v48 = vpop.f32.mrb[185].mxu1 }
 0x52d   : > { %v5748_v36 = vadd.f32 %v13989_v4, %v5555_v57  ;;  %v4982_v50 = vadd.f32 -1.4531521, %v4950_v32  ;;  %v4823_v0 = vmul.f32 0.3275911, %v13130_v61  ;;  %v8949_v12 = vpop.eup %8948  ;;  %v6723_v38 = vmax.f32 %v6113_v27, %v7753_v31  ;;  %v13162_v4 = vpop.f32.mrb[186].mxu1 }
 0x52e   : > { %v6724_v28 = vmax.f32 %v6112_v52, %v7754_v17  ;;  %v13139_v24 = vmax.f32 %v6114_v10, %v7755_v1  ;;  %v13141_v30 = vcombine.high %v6129_v19, %v6129_v19  ;;  %v5460_v37 = vsub.f32 0.0, %v5396_v63 }
 0x52f   : > { %v5780_v51 = vmul.f32 0.70710677, %v5748_v36  ;;  %v5365_v20 = vmul.f32 %v8949_v12, %v5205_v9  ;;  %v5014_v11 = vmul.f32 %v13122_v18, %v4982_v50  ;;  %v7757_v34 = vrot.slane %v6130_v29, 9  ;;  %v13164_v12 = vpop.f32.mrb[187].mxu1 }
 0x530   : > { %v7758_v3 = vrot.slane %v6129_v19, 9  ;;  %v13146_v5 = vmax.f32 %v6122_v54, %v7756_v39  ;;  %v4855_v53 = vadd.f32 1.0, %v4823_v0  ;;  %v13148_v14 = vpop.eup %8950  ;;  %v5492_v10 = vsel %vm5428_vm3, %v5396_v63, %v5460_v37 }
 0x531   : > { %v6132_v27 = vcombine.high %v5780_v51, %v5780_v51  ;;  %v6139_v52 = vrot.slane %v5780_v51, %v12216_v60  ;;  %v5397_v31 = vsub.f32 1.0, %v5365_v20  ;;  %v5524_v1 = vadd.f32 1.0, %v5492_v10 }
 0x532   : > { %v5046_v49 = vadd.f32 1.4214138, %v5014_v11  ;;  %8952 = vrcp.f32 %v4855_v53  ;;  %v5239_v39 = vsub.f32 0.0, %v13130_v61  ;;  %v13160_v63 = vadd.f32 %v13990_v62, %v13104_v47 }
 0x533   : > { %v6146_v25 = vrot.slane %v6132_v27, %v12216_v60  ;;  %v6147_v15 = vcombine.high %v6139_v52, %v6139_v52  ;;  %v7816_v54 = vrot.slane %v6139_v52, 9  ;;  %v5461_v44 = vsub.f32 0.0, %v5397_v31 }
 0x534   : > { %v5556_v57 = vmul.f32 %v5524_v1, %v13109_v6  ;;  %v5078_v32 = vmul.f32 %v13122_v18, %v5046_v49  ;;  %v6727_v51 = vmax.f32 %v6130_v29, %v7757_v34  ;;  %v6728_v10 = vmax.f32 %v6129_v19, %v7758_v3 }
 0x535   : > { %v6148_v36 = vcombine.high %v6146_v25, %v6146_v25  ;;  %v7817_v9 = vrot.slane %v6147_v15, 9  ;;  %v7818_v50 = vrot.slane %v6146_v25, 9  ;;  %v6978_v0 = vmax.f32 %v6139_v52, %v7816_v54 }
 0x536   : > { %v5749_v37 = vadd.f32 %v12849_v41, %v5556_v57  ;;  %v5493_v6 = vsel %vm5429_vm4, %v5397_v31, %v5461_v44  ;;  %v5110_v20 = vadd.f32 -0.28449672, %v5078_v32  ;;  %v5271_v29 = vmul.f32 %v5239_v39, %v13130_v61  ;;  %v13991_v44 = vld [vmem:[#allocation55_spill] sm:$0xff] }
 0x537   : > { %v7819_v11 = vrot.slane %v6148_v36, 9  ;;  %v6979_v53 = vmax.f32 %v6147_v15, %v7817_v9  ;;  %v6980_v27 = vmax.f32 %v6146_v25, %v7818_v50  ;;  %v7042_v47 = vmax.f32 %v13125_v46, %v6978_v0 }
 0x538   : > { %v5781_v1 = vmul.f32 0.70710677, %v5749_v37  ;;  %v5525_v49 = vadd.f32 1.0, %v5493_v6  ;;  %v5142_v62 = vmul.f32 %v13122_v18, %v5110_v20  ;;  %vm5430_vm9 = vcmp.ge.f32.partialorder %v13047_v13, 0.0 }
 0x539   : > { %v6981_v52 = vmax.f32 %v6148_v36, %v7819_v11  ;;  %v7043_v54 = vmax.f32 %v6723_v38, %v6979_v53  ;;  %v7044_v17 = vmax.f32 %v6724_v28, %v6980_v27  ;;  %v7269_v46 = vrot.slane %v7042_v47, %v12223_v2 }
 0x53a   : > { %v6149_v41 = vcombine.high %v5781_v1, %v5781_v1  ;;  %v6156_v7 = vrot.slane %v5781_v1, %v12216_v60  ;;  %v5557_v34 = vmul.f32 %v5525_v49, %v13112_v26  ;;  %v5174_v31 = vadd.f32 0.2548296, %v5142_v62 }
 0x53b   : > { %v7045_v25 = vmax.f32 %v13139_v24, %v6981_v52  ;;  %v7273_v19 = vrot.slane %v7043_v54, %v12223_v2  ;;  %v7277_v3 = vrot.slane %v7044_v17, %v12223_v2  ;;  %vm5431_vm14 = vcmp.ge.f32.partialorder %v13115_v16, 0.0 }
 0x53c   : > { %v13178_v15 = vpop.eup %8952  ;;  %v6163_v38 = vrot.slane %v6149_v41, %v12216_v60  ;;  %v6164_v28 = vcombine.high %v6156_v7, %v6156_v7  ;;  %v7820_v61 = vrot.slane %v6156_v7, 9  ;;  %v5750_v57 = vadd.f32 %v13991_v44, %v5557_v34 }
 0x53d   : > { %v7281_v32 = vrot.slane %v7045_v25, %v12223_v2  ;;  %v7429_v26 = vsel %vm7394_vm5, %v7273_v19, %v7269_v46  ;;  %v5206_v24 = vmul.f32 %v13122_v18, %v5174_v31  ;;  %v4951_v39 = vmul.f32 1.0614054, %v13178_v15  ;;  %v13992_v18 = vld [vmem:[#allocation53_spill] sm:$0xff]  ;;  %v13995_v25 = vld [vmem:[#allocation79_spill] sm:$0xff] }
 0x53e   : > { %v7430_v36 = vsel %vm7396_vm6, %v7277_v3, %v7429_v26  ;;  %v6165_v9 = vcombine.high %v6163_v38, %v6163_v38  ;;  %v7821_v17 = vrot.slane %v6164_v28, 9  ;;  %v7822_v50 = vrot.slane %v6163_v38, 9 }
 0x53f   : > { %v6982_v0 = vmax.f32 %v6156_v7, %v7820_v61  ;;  %v7431_v37 = vsel %vm7398_vm7, %v7281_v32, %v7430_v36  ;;  %v5782_v6 = vmul.f32 0.70710677, %v5750_v57  ;;  %v5366_v20 = vmul.f32 %v13148_v14, %v5206_v24 }
 0x540   : > { %v7823_v11 = vrot.slane %v6165_v9, 9  ;;  %v6983_v53 = vmax.f32 %v6164_v28, %v7821_v17  ;;  %v6984_v27 = vmax.f32 %v6163_v38, %v7822_v50  ;;  %v4983_v47 = vadd.f32 -1.4531521, %v4951_v39  ;;  %v13996_v50 = vld [vmem:[#allocation9_spill] sm:$0xff] }
 0x541   : > { %v13993_v1 = vrot.slane %v13992_v18, 1  ;;  %v7046_v62 = vmax.f32 %v13146_v5, %v6982_v0  ;;  %v6166_v52 = vcombine.high %v5782_v6, %v5782_v6  ;;  %v5398_v54 = vsub.f32 1.0, %v5366_v20  ;;  %v13997_v0 = vld [vmem:[#allocation18_spill] sm:$0xff]  ;;  %v13999_v20 = vld [vmem:[#allocation69_spill] sm:$0xff] }
 0x542   : > { %v13994_v41 = vrot.slane %v13141_v30, 9  ;;  %v6985_v34 = vmax.f32 %v6165_v9, %v7823_v11  ;;  %v7047_v14 = vmax.f32 %v6727_v51, %v6983_v53  ;;  %v7048_v31 = vmax.f32 %v6728_v10, %v6984_v27  ;;  %v14000_v11 = vld [vmem:[#allocation12_spill] sm:$0xff] }
 0x543   : > { %v5672_v49 = vsel %vm3143_vm8, %v13993_v1, %v5671_v59  ;;  %v5676_v46 = vrot.slane %v13995_v25, 1  ;;  %v7285_v19 = vrot.slane %v7046_v62, %v12223_v2  ;;  %v6173_v33 = vrot.slane %v5782_v6, %v12216_v60  ;;  %v13998_v6 = vld [vmem:[#allocation46_spill] sm:$0xff] }
 0x544   : > { %v6729_v7 = vmax.f32 %v13141_v30, %v13994_v41  ;;  %v5325_v3 = vmul.f32 1.442695, %v5271_v29  ;;  %v7289_v59 = vrot.slane %v7047_v14, %v12223_v2  ;;  %v5462_v5 = vsub.f32 0.0, %v5398_v54 }
 0x545   : > { %v5015_v28 = vmul.f32 %v13178_v15, %v4983_v47  ;;  %v7293_v61 = vrot.slane %v7048_v31, %v12223_v2  ;;  %v7432_v30 = vsel %vm7400_vm10, %v7285_v19, %v7431_v37  ;;  %v6180_v51 = vrot.slane %v6166_v52, %v12216_v60  ;;  %v14001_v52 = vld [vmem:[#allocation38_spill] sm:$0xff] }
 0x546   : > { %v7049_v38 = vmax.f32 %v6729_v7, %v6985_v34  ;;  %v7433_v44 = vsel %vm7402_vm11, %v7289_v59, %v7432_v30  ;;  %v4726_v29 = vmul.f32 0.5, %v13022_v56  ;;  %v5494_v57 = vsel %vm5430_vm9, %v5398_v54, %v5462_v5  ;;  %v14002_v54 = vld [vmem:[#allocation41_spill] sm:$0xff]  ;;  %v14003_v7 = vld [vmem:[#allocation90_spill] sm:$0xff]  ;;  %v14004_v34 = vld [vmem:[#allocation16_spill] sm:$0xff] }
 0x547   : > { %v7434_v32 = vsel %vm7404_vm12, %v7293_v61, %v7433_v44  ;;  %v6181_v26 = vcombine.high %v6173_v33, %v6173_v33  ;;  %v7760_v24 = vrot.slane %v6173_v33, 9  ;;  %8954 = vpow2.f32 %v5325_v3  ;;  %v14006_v44 = vld [vmem:[#allocation63_spill] sm:$0xff] }
 0x548   : > { %v7297_v10 = vrot.slane %v7049_v38, %v12223_v2  ;;  %v5526_v36 = vadd.f32 1.0, %v5494_v57  ;;  %v5047_v9 = vadd.f32 1.4214138, %v5015_v28  ;;  %v4657_v17 = vmul.f32 %v13074_v22, %v13160_v63  ;;  %v13225_v63 = vpop.f32.mrb[188].mxu1 }
 0x549   : > { %v6182_v13 = vcombine.high %v6180_v51, %v6180_v51  ;;  %v4275_v37 = vadd.f32 %v13997_v0, %v13996_v50  ;;  %v8307_v56 = vadd.f32 %v13018_v42, %v13998_v6  ;;  %v4278_v53 = vadd.f32 %v14000_v11, %v13999_v20  ;;  %v13233_v31 = vpop.f32.mrb[189].mxu1 }
 0x54a   : > { %v7435_v39 = vsel %vm7406_vm13, %v7297_v10, %v7434_v32  ;;  %v5558_v27 = vmul.f32 %v5526_v36, %v4726_v29  ;;  %v5079_v47 = vmul.f32 %v13178_v15, %v5047_v9  ;;  %v4696_v18 = vadd.f32 %v13090_v55, %v4657_v17  ;;  %v14007_v29 = vld [vmem:[#allocation24_spill] sm:$0xff] }
 0x54b   : > { %7469 = vst [vmem:[%s12444_s13 + $0x20] sm:$0xff] %v7435_v39  ;;  %v8310_v1 = vadd.f32 %v13034_v21, %v13027_v58  ;;  %v4436_v62 = vadd.f32 %v8307_v56, %v4275_v37  ;;  %v4283_v41 = vadd.f32 %v14002_v54, %v14001_v52  ;;  %v8313_v42 = vadd.f32 %v13057_v23, %v13052_v45  ;;  %v14005_v58 = vld [vmem:[#allocation51_spill] sm:$0xff] }
 0x54c   : > { %v4286_v14 = vadd.f32 %v14004_v34, %v14003_v7  ;;  %v7761_v25 = vrot.slane %v6181_v26, 9  ;;  %v5751_v19 = vadd.f32 %v5672_v49, %v5558_v27  ;;  %v5111_v3 = vadd.f32 -0.28449672, %v5079_v47 }
 0x54d   : > { %v13235_v38 = vmul.f32 0.70710677, %v4696_v18  ;;  %v4597_v21 = vadd.f32 %v14005_v58, %v4436_v62  ;;  %v4439_v59 = vadd.f32 %v8310_v1, %v4278_v53  ;;  %v4444_v5 = vadd.f32 %v8313_v42, %v4283_v41  ;;  %v14010_v58 = vld [vmem:[#allocation58_spill] sm:$0xff] }
 0x54e   : > { %v8316_v28 = vadd.f32 %v13100_v8, %v13095_v40  ;;  %v7762_v61 = vrot.slane %v6180_v51, 9  ;;  %v5783_v30 = vmul.f32 0.70710677, %v5751_v19  ;;  %v5143_v45 = vmul.f32 %v13178_v15, %v5111_v3  ;;  %v14008_v40 = vld [vmem:[#allocation59_spill] sm:$0xff] }
 0x54f   : > { %v4792_v23 = vand.u32 2147483647, %v13235_v38  ;;  %v4658_v10 = vmul.f32 %v13074_v22, %v4597_v21  ;;  %v4600_v49 = vadd.f32 %v14006_v44, %v4439_v59  ;;  %v4605_v57 = vadd.f32 %v14007_v29, %v4444_v5 }
 0x550   : > { %v4447_v32 = vadd.f32 %v8316_v28, %v4286_v14  ;;  %v6183_v39 = vcombine.high %v5783_v30, %v5783_v30  ;;  %v6190_v36 = vrot.slane %v5783_v30, %v12216_v60  ;;  %v5175_v9 = vadd.f32 0.2548296, %v5143_v45 }
 0x551   : > { %v4824_v17 = vmul.f32 0.3275911, %v4792_v23  ;;  %v8955_v50 = vpop.eup %8954  ;;  %v14009_v8 = vrot.slane %v14008_v40, 1  ;;  %v7763_v37 = vrot.slane %v6182_v13, 9  ;;  %v4727_v6 = vmul.f32 0.5, %v13093_v35 }
 0x552   : > { %v4697_v56 = vadd.f32 %v13090_v55, %v4658_v10  ;;  %v13253_v20 = vmax.f32 %v6173_v33, %v7760_v24  ;;  %v5207_v11 = vmul.f32 %v13178_v15, %v5175_v9  ;;  %v5240_v53 = vsub.f32 0.0, %v4792_v23 }
 0x553   : > { %v13249_v0 = vsel %vm3143_vm8, %v14009_v8, %v5676_v46  ;;  %v13257_v27 = vmax.f32 %v6181_v26, %v7761_v25  ;;  %v6197_v47 = vrot.slane %v6183_v39, %v12216_v60  ;;  %v4856_v1 = vadd.f32 1.0, %v4824_v17 }
 0x554   : > { %v13260_v62 = vmul.f32 0.70710677, %v4697_v56  ;;  %v13262_v46 = vmax.f32 %v6180_v51, %v7762_v61  ;;  %v6198_v52 = vcombine.high %v6190_v36, %v6190_v36  ;;  %v4659_v35 = vmul.f32 %v13074_v22, %v4600_v49  ;;  %v14012_v61 = vld [vmem:[#allocation57_spill] sm:$0xff] }
 0x555   : > { %v4660_v33 = vmul.f32 %v13074_v22, %v4605_v57  ;;  %v13266_v24 = vmax.f32 %v6182_v13, %v7763_v37  ;;  %v5367_v15 = vmul.f32 %v8955_v50, %v5207_v11  ;;  %8956 = vrcp.f32 %v4856_v1 }
 0x556   : > { %v4793_v54 = vand.u32 2147483647, %v13260_v62  ;;  %v7764_v26 = vrot.slane %v6190_v36, 9  ;;  %v13269_v41 = vmul.f32 0.5, %v4696_v18  ;;  %v5272_v42 = vmul.f32 %v5240_v53, %v4792_v23  ;;  %v14011_v18 = vld [vmem:[#allocation47_spill] sm:$0xff] }
 0x557   : > { %v13271_v7 = vmul.f32 0.5, %v4697_v56  ;;  %v6199_v34 = vcombine.high %v6197_v47, %v6197_v47  ;;  %v5399_v51 = vsub.f32 1.0, %v5367_v15  ;;  %v7765_v19 = vrot.slane %v6198_v52, 9 }
 0x558   : > { %v4825_v14 = vmul.f32 0.3275911, %v4793_v54  ;;  %v5241_v25 = vsub.f32 0.0, %v4793_v54  ;;  %v4698_v3 = vadd.f32 %v13090_v55, %v4659_v35  ;;  %v13275_v13 = vadd.f32 %v13090_v55, %v4660_v33 }
 0x559   : > { %v4608_v21 = vadd.f32 %v14010_v58, %v4447_v32  ;;  %v7766_v59 = vrot.slane %v6197_v47, 9  ;;  %v5463_v5 = vsub.f32 0.0, %v5399_v51  ;;  %v4291_v30 = vadd.f32 %v14012_v61, %v14011_v18 }
 0x55a   : > { %v4857_v28 = vadd.f32 1.0, %v4825_v14  ;;  %v13280_v45 = vmax.f32 %v6190_v36, %v7764_v26  ;;  %v5327_v23 = vmul.f32 1.442695, %v5272_v42  ;;  %v13282_v10 = vmul.f32 0.70710677, %v4698_v3 }
 0x55b   : > { %v13285_v44 = vmul.f32 0.70710677, %v13275_v13  ;;  %v5495_v49 = vsel %vm5431_vm14, %v5399_v51, %v5463_v5  ;;  %v5273_v29 = vmul.f32 %v5241_v25, %v4793_v54  ;;  %v4661_v57 = vmul.f32 %v13074_v22, %v4608_v21 }
 0x55c   : > { %8958 = vrcp.f32 %v4857_v28  ;;  %v7767_v32 = vrot.slane %v6199_v34, 9  ;;  %v5527_v39 = vadd.f32 1.0, %v5495_v49  ;;  %v4794_v9 = vand.u32 2147483647, %v13282_v10  ;;  %v14014_v49 = vld [vmem:[#allocation78_spill] sm:$0xff] }
 0x55d   : > { %v4795_v36 = vand.u32 2147483647, %v13285_v44  ;;  %v13292_v17 = vmax.f32 %v6198_v52, %v7765_v19  ;;  %v13294_v50 = vmax.f32 %v6197_v47, %v7766_v59  ;;  %v13297_v40 = vadd.f32 %v13090_v55, %v4661_v57  ;;  %v14013_v47 = vld [vmem:[#allocation61_spill] sm:$0xff]  ;;  %v13313_v59 = vpop.f32.mrb[190].mxu1 }
 0x55e   : > { %v8319_v16 = vadd.f32 %v13143_v48, %v13137_v43  ;;  %v5559_v8 = vmul.f32 %v5527_v39, %v4727_v6  ;;  %v4826_v37 = vmul.f32 0.3275911, %v4794_v9  ;;  %v5242_v56 = vsub.f32 0.0, %v4794_v9  ;;  %v13317_v61 = vpop.f32.mrb[191].mxu1 }
 0x55f   : > { %v4827_v11 = vmul.f32 0.3275911, %v4795_v36  ;;  %v13301_v53 = vpop.eup %8956  ;;  %v5329_v1 = vmul.f32 1.442695, %v5273_v29  ;;  %v5243_v35 = vsub.f32 0.0, %v4795_v36  ;;  %8960 = vpow2.f32 %v5327_v23 }
 0x560   : > { %v13304_v33 = vmul.f32 0.70710677, %v13297_v40  ;;  %v4452_v52 = vadd.f32 %v8319_v16, %v4291_v30  ;;  %v5752_v15 = vadd.f32 %v14013_v47, %v5559_v8  ;;  %v4952_v54 = vmul.f32 1.0614054, %v13301_v53 }
 0x561   : > { %v4858_v26 = vadd.f32 1.0, %v4826_v37  ;;  %v5274_v42 = vmul.f32 %v5242_v56, %v4794_v9  ;;  %v4859_v43 = vadd.f32 1.0, %v4827_v11  ;;  %v5275_v48 = vmul.f32 %v5243_v35, %v4795_v36 }
 0x562   : > { %v4796_v6 = vand.u32 2147483647, %v13304_v33  ;;  %v5784_v51 = vmul.f32 0.70710677, %v5752_v15  ;;  %v4984_v14 = vadd.f32 -1.4531521, %v4952_v54  ;;  %v13309_v19 = vmax.f32 %v6199_v34, %v7767_v32 }
 0x563   : > { %8962 = vrcp.f32 %v4858_v26  ;;  %v5331_v25 = vmul.f32 1.442695, %v5274_v42  ;;  %v13311_v58 = vmul.f32 0.5, %v4698_v3  ;;  %v5333_v23 = vmul.f32 1.442695, %v5275_v48 }
 0x564   : > { %8964 = vrcp.f32 %v4859_v43  ;;  %v4828_v21 = vmul.f32 0.3275911, %v4796_v6  ;;  %v6200_v5 = vcombine.high %v5784_v51, %v5784_v51  ;;  %v6207_v28 = vrot.slane %v5784_v51, %v12216_v60 }
 0x565   : > { %v5016_v18 = vmul.f32 %v13301_v53, %v4984_v14  ;;  %8966 = vpow2.f32 %v5329_v1  ;;  %v4613_v3 = vadd.f32 %v14014_v49, %v4452_v52  ;;  %v5244_v36 = vsub.f32 0.0, %v4796_v6 }
 0x566   : > { %v13319_v30 = vpop.eup %8958  ;;  %8968 = vpow2.f32 %v5331_v25  ;;  %v4860_v34 = vadd.f32 1.0, %v4828_v21  ;;  %v6214_v29 = vrot.slane %v6200_v5, %v12216_v60  ;;  %v6215_v57 = vcombine.high %v6207_v28, %v6207_v28 }
 0x567   : > { %v7824_v32 = vrot.slane %v6207_v28, 9  ;;  %v5048_v39 = vadd.f32 1.4214138, %v5016_v18  ;;  %v4953_v9 = vmul.f32 1.0614054, %v13319_v30  ;;  %v4662_v16 = vmul.f32 %v13074_v22, %v4613_v3 }
 0x568   : > { %8970 = vrcp.f32 %v4860_v34  ;;  %v6216_v8 = vcombine.high %v6214_v29, %v6214_v29  ;;  %v7825_v37 = vrot.slane %v6215_v57, 9  ;;  %v7826_v56 = vrot.slane %v6214_v29, 9 }
 0x569   : > { %v6986_v11 = vmax.f32 %v6207_v28, %v7824_v32  ;;  %v5080_v1 = vmul.f32 %v13301_v53, %v5048_v39  ;;  %v4985_v35 = vadd.f32 -1.4531521, %v4953_v9  ;;  %8972 = vpow2.f32 %v5333_v23  ;;  %v8961_v42 = vpop.eup %8960 }
 0x56a   : > { %v13327_v52 = vadd.f32 %v13090_v55, %v4662_v16  ;;  %v7827_v47 = vrot.slane %v6216_v8, 9  ;;  %v6987_v15 = vmax.f32 %v6215_v57, %v7825_v37  ;;  %v6988_v54 = vmax.f32 %v6214_v29, %v7826_v56 }
 0x56b   : > { %v7050_v26 = vmax.f32 %v13253_v20, %v6986_v11  ;;  %v5112_v43 = vadd.f32 -0.28449672, %v5080_v1  ;;  %v5017_v48 = vmul.f32 %v13319_v30, %v4985_v35  ;;  %v5276_v51 = vmul.f32 %v5244_v36, %v4796_v6 }
 0x56c   : > { %v13332_v14 = vmul.f32 0.70710677, %v13327_v52  ;;  %v6989_v21 = vmax.f32 %v6216_v8, %v7827_v47  ;;  %v7051_v5 = vmax.f32 %v13257_v27, %v6987_v15  ;;  %v7052_v28 = vmax.f32 %v13262_v46, %v6988_v54 }
 0x56d   : > { %v13334_v25 = vpop.eup %8962  ;;  %v7301_v18 = vrot.slane %v7050_v26, %v12223_v2  ;;  %v5144_v20 = vmul.f32 %v13301_v53, %v5112_v43  ;;  %v5049_v34 = vadd.f32 1.4214138, %v5017_v48  ;;  %vm5432_vm8 = vcmp.ge.f32.partialorder %v13235_v38, 0.0 }
 0x56e   : > { %v13339_v23 = vpop.eup %8964  ;;  %v4954_v49 = vmul.f32 1.0614054, %v13334_v25  ;;  %v4797_v6 = vand.u32 2147483647, %v13332_v14  ;;  %v7053_v29 = vmax.f32 %v13266_v24, %v6989_v21  ;;  %v7305_v57 = vrot.slane %v7051_v5, %v12223_v2 }
 0x56f   : > { %v8967_v3 = vpop.eup %8966  ;;  %v7309_v27 = vrot.slane %v7052_v28, %v12223_v2  ;;  %v4955_v46 = vmul.f32 1.0614054, %v13339_v23  ;;  %v5176_v39 = vadd.f32 0.2548296, %v5144_v20  ;;  %v5081_v9 = vmul.f32 %v13319_v30, %v5049_v34 }
 0x570   : > { %v13348_v32 = vpop.eup %8968  ;;  %v4986_v36 = vadd.f32 -1.4531521, %v4954_v49  ;;  %v4829_v16 = vmul.f32 0.3275911, %v4797_v6  ;;  %v7313_v8 = vrot.slane %v7053_v29, %v12223_v2  ;;  %v7436_v37 = vsel %vm7394_vm5, %v7305_v57, %v7301_v18 }
 0x571   : > { %v4987_v24 = vadd.f32 -1.4531521, %v4955_v46  ;;  %v5335_v56 = vmul.f32 1.442695, %v5276_v51  ;;  %v7437_v1 = vsel %vm7396_vm6, %v7309_v27, %v7436_v37  ;;  %v5208_v35 = vmul.f32 %v13301_v53, %v5176_v39  ;;  %v14015_v46 = vld [vmem:[#allocation50_spill] sm:$0xff] }
 0x572   : > { %v13354_v11 = vpop.eup %8970  ;;  %v5113_v47 = vadd.f32 -0.28449672, %v5081_v9  ;;  %v5018_v15 = vmul.f32 %v13334_v25, %v4986_v36  ;;  %v13360_v54 = vsel %vm7398_vm7, %v7313_v8, %v7437_v1  ;;  %v4861_v48 = vadd.f32 1.0, %v4829_v16  ;;  %v14016_v39 = vld [vmem:[#allocation62_spill] sm:$0xff] }
 0x573   : > { %v5019_v26 = vmul.f32 %v13339_v23, %v4987_v24  ;;  %v4956_v43 = vmul.f32 1.0614054, %v13354_v11  ;;  %v8973_v21 = vpop.eup %8972  ;;  %v5368_v5 = vmul.f32 %v8961_v42, %v5208_v35  ;;  %v5245_v18 = vsub.f32 0.0, %v4797_v6  ;;  %v14017_v35 = vld [vmem:[#allocation21_spill] sm:$0xff] }
 0x574   : > { %v5145_v51 = vmul.f32 %v13319_v30, %v5113_v47  ;;  %v5050_v28 = vadd.f32 1.4214138, %v5018_v15  ;;  %v13366_v20 = vmul.f32 0.5, %v13275_v13  ;;  %8974 = vrcp.f32 %v4861_v48  ;;  %v14018_v47 = vld [vmem:[#allocation67_spill] sm:$0xff] }
 0x575   : > { %v5051_v53 = vadd.f32 1.4214138, %v5019_v26  ;;  %v4988_v34 = vadd.f32 -1.4531521, %v4956_v43  ;;  %v5400_v49 = vsub.f32 1.0, %v5368_v5  ;;  %8976 = vpow2.f32 %v5335_v56  ;;  %v14019_v5 = vld [vmem:[#allocation87_spill] sm:$0xff] }
 0x576   : > { %v5177_v29 = vadd.f32 0.2548296, %v5145_v51  ;;  %v5082_v57 = vmul.f32 %v13334_v25, %v5050_v28  ;;  %vm5433_vm15 = vcmp.ge.f32.partialorder %v13260_v62, 0.0  ;;  %v4294_v9 = vadd.f32 %v14016_v39, %v14015_v46 }
 0x577   : > { %v5083_v27 = vmul.f32 %v13339_v23, %v5051_v53  ;;  %v5020_v42 = vmul.f32 %v13354_v11, %v4988_v34  ;;  %v8322_v13 = vadd.f32 %v13164_v12, %v13162_v4  ;;  %v5464_v36 = vsub.f32 0.0, %v5400_v49  ;;  %v14020_v34 = vld [vmem:[#allocation91_spill] sm:$0xff] }
 0x578   : > { %v5209_v16 = vmul.f32 %v13319_v30, %v5177_v29  ;;  %v5114_v8 = vadd.f32 -0.28449672, %v5082_v57  ;;  %v5277_v37 = vmul.f32 %v5245_v18, %v4797_v6  ;;  %v4299_v15 = vadd.f32 %v14018_v47, %v14017_v35  ;;  %v14021_v29 = vld [vmem:[#allocation30_spill] sm:$0xff] }
 0x579   : > { %v5115_v24 = vadd.f32 -0.28449672, %v5083_v27  ;;  %v5052_v1 = vadd.f32 1.4214138, %v5020_v42  ;;  %v4455_v56 = vadd.f32 %v8322_v13, %v4294_v9  ;;  %v5496_v26 = vsel %vm5432_vm8, %v5400_v49, %v5464_v36  ;;  %v14022_v42 = vld [vmem:[#allocation68_spill] sm:$0xff] }
 0x57a   : > { %v5369_v43 = vmul.f32 %v8967_v3, %v5209_v16  ;;  %v5146_v48 = vmul.f32 %v13334_v25, %v5114_v8  ;;  %v8325_v4 = vadd.f32 %v13233_v31, %v13225_v63  ;;  %v5528_v12 = vadd.f32 1.0, %v5496_v26 }
 0x57b   : > { %v5147_v30 = vmul.f32 %v13339_v23, %v5115_v24  ;;  %v5084_v6 = vmul.f32 %v13354_v11, %v5052_v1  ;;  %v4616_v51 = vadd.f32 %v14019_v5, %v4455_v56  ;;  %v13389_v38 = vadd.f32 %v14021_v29, %v14020_v34 }
 0x57c   : > { %v5401_v28 = vsub.f32 1.0, %v5369_v43  ;;  %v5178_v18 = vadd.f32 0.2548296, %v5146_v48  ;;  %v4460_v53 = vadd.f32 %v8325_v4, %v4299_v15  ;;  %v5560_v3 = vmul.f32 %v5528_v12, %v13269_v41 }
 0x57d   : > { %vm5434_vm2 = vcmp.ge.f32.partialorder %v13282_v10, 0.0  ;;  %v5179_v49 = vadd.f32 0.2548296, %v5147_v30  ;;  %v5116_v63 = vadd.f32 -0.28449672, %v5084_v6  ;;  %v4663_v31 = vmul.f32 %v13074_v22, %v4616_v51  ;;  %v14023_v30 = vld [vmem:[#allocation64_spill] sm:$0xff] }
 0x57e   : > { %v5465_v57 = vsub.f32 0.0, %v5401_v28  ;;  %v5210_v27 = vmul.f32 %v13334_v25, %v5178_v18  ;;  %v13396_v46 = vadd.f32 %v14022_v42, %v4460_v53  ;;  %v13400_v39 = vadd.f32 %v13317_v61, %v13313_v59  ;;  %v13402_v9 = vpop.eup %8974 }
 0x57f   : > { %v5753_v41 = vadd.f32 %v13249_v0, %v5560_v3  ;;  %v5211_v13 = vmul.f32 %v13339_v23, %v5179_v49  ;;  %vm5435_vm0 = vcmp.ge.f32.partialorder %v13285_v44, 0.0  ;;  %v5148_v36 = vmul.f32 %v13354_v11, %v5116_v63  ;;  %v8977_v16 = vpop.eup %8976 }
 0x580   : > { %v5497_v25 = vsel %vm5433_vm15, %v5401_v28, %v5465_v57  ;;  %v5370_v8 = vmul.f32 %v13348_v32, %v5210_v27  ;;  %v4957_v24 = vmul.f32 1.0614054, %v13402_v9  ;;  %v5337_v59 = vmul.f32 1.442695, %v5277_v37 }
 0x581   : > { %v5785_v61 = vmul.f32 0.70710677, %v5753_v41  ;;  %v5529_v1 = vadd.f32 1.0, %v5497_v25  ;;  %v5371_v56 = vmul.f32 %v8973_v21, %v5211_v13  ;;  %v5180_v35 = vadd.f32 0.2548296, %v5148_v36 }
 0x582   : > { %v5402_v0 = vsub.f32 1.0, %v5370_v8  ;;  %v13413_v23 = vmul.f32 0.5, %v13297_v40  ;;  %v4989_v47 = vadd.f32 -1.4531521, %v4957_v24  ;;  %v13416_v15 = vadd.f32 %v13090_v55, %v4663_v31  ;;  %v14024_v24 = vld [vmem:[#allocation66_spill] sm:$0xff] }
 0x583   : > { %v6217_v26 = vcombine.high %v5785_v61, %v5785_v61  ;;  %v6224_v62 = vrot.slane %v5785_v61, %v12216_v60  ;;  %v5561_v32 = vmul.f32 %v5529_v1, %v13271_v7  ;;  %v5403_v43 = vsub.f32 1.0, %v5371_v56 }
 0x584   : > { %v5466_v48 = vsub.f32 0.0, %v5402_v0  ;;  %v5212_v37 = vmul.f32 %v13354_v11, %v5180_v35  ;;  %v13422_v21 = vmul.f32 0.5, %v13327_v52  ;;  %8978 = vpow2.f32 %v5337_v59 }
 0x585   : > { %v6231_v40 = vrot.slane %v6217_v26, %v12216_v60  ;;  %v6232_v4 = vcombine.high %v6224_v62, %v6224_v62  ;;  %v7828_v12 = vrot.slane %v6224_v62, 9  ;;  %v5754_v55 = vadd.f32 %v14023_v30, %v5561_v32  ;;  %v14025_v30 = vld [vmem:[#allocation70_spill] sm:$0xff] }
 0x586   : > { %v5498_v6 = vsel %vm5434_vm2, %v5402_v0, %v5466_v48  ;;  %v5467_v5 = vsub.f32 0.0, %v5403_v43  ;;  %v5021_v7 = vmul.f32 %v13402_v9, %v4989_v47  ;;  %v13430_v51 = vmul.f32 0.70710677, %v13416_v15 }
 0x587   : > { %v6233_v11 = vcombine.high %v6231_v40, %v6231_v40  ;;  %v7829_v28 = vrot.slane %v6232_v4, 9  ;;  %v7830_v52 = vrot.slane %v6231_v40, 9  ;;  %v6990_v18 = vmax.f32 %v6224_v62, %v7828_v12 }
 0x588   : > { %v5786_v53 = vmul.f32 0.70710677, %v5754_v55  ;;  %v5530_v34 = vadd.f32 1.0, %v5498_v6  ;;  %v5499_v29 = vsel %vm5435_vm0, %v5403_v43, %v5467_v5  ;;  %v5372_v3 = vmul.f32 %v8977_v16, %v5212_v37 }
 0x589   : > { %v7831_v49 = vrot.slane %v6233_v11, 9  ;;  %v6991_v63 = vmax.f32 %v6232_v4, %v7829_v28  ;;  %v6992_v10 = vmax.f32 %v6231_v40, %v7830_v52  ;;  %v7054_v31 = vmax.f32 %v13280_v45, %v6990_v18 }
 0x58a   : > { %v6234_v57 = vcombine.high %v5786_v53, %v5786_v53  ;;  %v6241_v27 = vrot.slane %v5786_v53, %v12216_v60  ;;  %v5562_v42 = vmul.f32 %v5530_v34, %v13311_v58  ;;  %v5531_v41 = vadd.f32 1.0, %v5499_v29 }
 0x58b   : > { %v6993_v13 = vmax.f32 %v6233_v11, %v7831_v49  ;;  %v7055_v36 = vmax.f32 %v13292_v17, %v6991_v63  ;;  %v7056_v25 = vmax.f32 %v13294_v50, %v6992_v10  ;;  %v7317_v44 = vrot.slane %v7054_v31, %v12223_v2 }
 0x58c   : > { %vm5436_vm1 = vcmp.ge.f32.partialorder %v13304_v33, 0.0  ;;  %v6248_v16 = vrot.slane %v6234_v57, %v12216_v60  ;;  %v6249_v8 = vcombine.high %v6241_v27, %v6241_v27  ;;  %v5755_v45 = vadd.f32 %v14024_v24, %v5562_v42 }
 0x58d   : > { %v4798_v59 = vand.u32 2147483647, %v13430_v51  ;;  %v7057_v61 = vmax.f32 %v13309_v19, %v6993_v13  ;;  %v7321_v58 = vrot.slane %v7055_v36, %v12223_v2  ;;  %v7439_v17 = vsel %vm7400_vm10, %v7317_v44, %v13360_v54 }
 0x58e   : > { %v5053_v1 = vadd.f32 1.4214138, %v5021_v7  ;;  %v13448_v50 = vpop.eup %8978  ;;  %v7325_v56 = vrot.slane %v7056_v25, %v12223_v2  ;;  %v6250_v35 = vcombine.high %v6248_v16, %v6248_v16  ;;  %v7768_v0 = vrot.slane %v6241_v27, 9 }
 0x58f   : > { %v5404_v47 = vsub.f32 1.0, %v5372_v3  ;;  %v7329_v26 = vrot.slane %v7057_v61, %v12223_v2  ;;  %v7440_v62 = vsel %vm7402_vm11, %v7321_v58, %v7439_v17  ;;  %v5787_v32 = vmul.f32 0.70710677, %v5755_v45 }
 0x590   : > { %v5563_v19 = vmul.f32 %v5531_v41, %v13366_v20  ;;  %v7441_v43 = vsel %vm7404_vm12, %v7325_v56, %v7440_v62  ;;  %v7769_v48 = vrot.slane %v6249_v8, 9  ;;  %v7770_v54 = vrot.slane %v6248_v16, 9 }
 0x591   : > { %v4664_v37 = vmul.f32 %v13074_v22, %v13396_v46  ;;  %v7442_v40 = vsel %vm7406_vm13, %v7329_v26, %v7441_v43  ;;  %v6251_v4 = vcombine.high %v5787_v32, %v5787_v32  ;;  %v6258_v12 = vrot.slane %v5787_v32, %v12216_v60 }
 0x592   : > { %v5756_v55 = vadd.f32 %v14025_v30, %v5563_v19  ;;  %7470 = vst [vmem:[%s12444_s13 + $0x28] sm:$0xff] %v7442_v40  ;;  %v6738_v6 = vmax.f32 %v6241_v27, %v7768_v0  ;;  %v5468_v5 = vsub.f32 0.0, %v5404_v47  ;;  %v5085_v7 = vmul.f32 %v13402_v9, %v5053_v1 }
 0x593   : > { %v4830_v20 = vmul.f32 0.3275911, %v4798_v59  ;;  %v7771_v11 = vrot.slane %v6250_v35, 9  ;;  %v6265_v28 = vrot.slane %v6251_v4, %v12216_v60  ;;  %v6266_v52 = vcombine.high %v6258_v12, %v6258_v12 }
 0x594   : > { %v5788_v18 = vmul.f32 0.70710677, %v5756_v55  ;;  %v6739_v53 = vmax.f32 %v6249_v8, %v7769_v48  ;;  %v5500_v22 = vsel %vm5436_vm1, %v5404_v47, %v5468_v5  ;;  %v5117_v46 = vadd.f32 -0.28449672, %v5085_v7 }
 0x595   : > { %v4862_v34 = vadd.f32 1.0, %v4830_v20  ;;  %v6740_v29 = vmax.f32 %v6248_v16, %v7770_v54  ;;  %v13465_v3 = vcombine.high %v6265_v28, %v6265_v28  ;;  %v7772_v49 = vrot.slane %v6258_v12, 9 }
 0x596   : > { %v5246_v63 = vsub.f32 0.0, %v4798_v59  ;;  %v6268_v10 = vcombine.high %v5788_v18, %v5788_v18  ;;  %v6275_v31 = vrot.slane %v5788_v18, %v12216_v60  ;;  %v5532_v57 = vadd.f32 1.0, %v5500_v22 }
 0x597   : > { %v5149_v27 = vmul.f32 %v13402_v9, %v5117_v46  ;;  %v6741_v42 = vmax.f32 %v6250_v35, %v7771_v11  ;;  %v7773_v41 = vrot.slane %v6266_v52, 9  ;;  %v7774_v13 = vrot.slane %v6265_v28, 9  ;;  %v14026_v35 = vld [vmem:[#allocation77_spill] sm:$0xff] }
 0x598   : > { %8980 = vrcp.f32 %v4862_v34  ;;  %v6282_v33 = vrot.slane %v6268_v10, %v12216_v60  ;;  %v6283_v36 = vcombine.high %v6275_v31, %v6275_v31  ;;  %v7832_v25 = vrot.slane %v6275_v31, 9 }
 0x599   : > { %v5564_v44 = vmul.f32 %v5532_v57, %v13413_v23  ;;  %v7775_v16 = vrot.slane %v13465_v3, 9  ;;  %v13472_v8 = vmax.f32 %v6258_v12, %v7772_v49  ;;  %v5181_v24 = vadd.f32 0.2548296, %v5149_v27  ;;  %v13480_v23 = vld [vmem:[%s13576_s7] ss:$0 sm:$0xff] }
 0x59a   : > { %v5278_v45 = vmul.f32 %v5246_v63, %v4798_v59  ;;  %v6284_v61 = vcombine.high %v6282_v33, %v6282_v33  ;;  %v7833_v58 = vrot.slane %v6283_v36, 9  ;;  %v7834_v17 = vrot.slane %v6282_v33, 9 }
 0x59b   : > { %v6994_v1 = vmax.f32 %v6275_v31, %v7832_v25  ;;  %v6743_v56 = vmax.f32 %v6266_v52, %v7773_v41  ;;  %v5757_v0 = vadd.f32 %v14026_v35, %v5564_v44  ;;  %v5213_v47 = vmul.f32 %v13402_v9, %v5181_v24 }
 0x59c   : > { %vm5437_vm3 = vcmp.ge.f32.partialorder %v13332_v14, 0.0  ;;  %v13483_v26 = vadd.f32 %v13480_v23, %v4664_v37  ;;  %v7835_v59 = vrot.slane %v6284_v61, 9  ;;  %v6995_v62 = vmax.f32 %v6283_v36, %v7833_v58 }
 0x59d   : > { %v6996_v32 = vmax.f32 %v6282_v33, %v7834_v17  ;;  %v7058_v19 = vmax.f32 %v6738_v6, %v6994_v1  ;;  %v6744_v43 = vmax.f32 %v6265_v28, %v7774_v13  ;;  %v5789_v48 = vmul.f32 0.70710677, %v5757_v0 }
 0x59e   : > { %v5373_v54 = vmul.f32 %v13448_v50, %v5213_v47  ;;  %v5339_v40 = vmul.f32 1.442695, %v5278_v45  ;;  %v6997_v9 = vmax.f32 %v6284_v61, %v7835_v59  ;;  %v7059_v4 = vmax.f32 %v6739_v53, %v6995_v62  ;;  %v14027_v62 = vld [vmem:[#allocation80_spill] sm:$0xff] }
 0x59f   : > { %v7060_v12 = vmax.f32 %v6740_v29, %v6996_v32  ;;  %v7333_v30 = vrot.slane %v7058_v19, %v12223_v2  ;;  %v6285_v55 = vcombine.high %v5789_v48, %v5789_v48  ;;  %v6292_v5 = vrot.slane %v5789_v48, %v12216_v60  ;;  %v14028_v48 = vld [vmem:[#allocation85_spill] sm:$0xff] }
 0x5a0   : > { %v5405_v7 = vsub.f32 1.0, %v5373_v54  ;;  %v13489_v37 = vmul.f32 0.70710677, %v13483_v26  ;;  %v7061_v20 = vmax.f32 %v6741_v42, %v6997_v9  ;;  %v7337_v6 = vrot.slane %v7059_v4, %v12223_v2 }
 0x5a1   : > { %v7341_v11 = vrot.slane %v7060_v12, %v12223_v2  ;;  %v4463_v50 = vadd.f32 %v13400_v39, %v13389_v38  ;;  %v6299_v52 = vrot.slane %v6285_v55, %v12216_v60  ;;  %v6300_v18 = vcombine.high %v6292_v5, %v6292_v5 }
 0x5a2   : > { %v8981_v28 = vpop.eup %8980  ;;  %v7836_v53 = vrot.slane %v6292_v5, 9  ;;  %v5469_v22 = vsub.f32 0.0, %v5405_v7  ;;  %v7345_v46 = vrot.slane %v7061_v20, %v12223_v2  ;;  %v7443_v34 = vsel %vm7394_vm5, %v7337_v6, %v7333_v30 }
 0x5a3   : > { %v4958_v29 = vmul.f32 1.0614054, %v8981_v28  ;;  %v4799_v49 = vand.u32 2147483647, %v13489_v37  ;;  %v7444_v63 = vsel %vm7396_vm6, %v7341_v11, %v7443_v34  ;;  %v6301_v10 = vcombine.high %v6299_v52, %v6299_v52 }
 0x5a4   : > { %v7837_v31 = vrot.slane %v6300_v18, 9  ;;  %v7838_v57 = vrot.slane %v6299_v52, 9  ;;  %v6998_v27 = vmax.f32 %v6292_v5, %v7836_v53  ;;  %v7445_v38 = vsel %vm7398_vm7, %v7345_v46, %v7444_v63 }
 0x5a5   : > { %v5501_v39 = vsel %vm5437_vm3, %v5405_v7, %v5469_v22  ;;  %v4990_v42 = vadd.f32 -1.4531521, %v4958_v29  ;;  %v7839_v41 = vrot.slane %v6301_v10, 9  ;;  %v6745_v25 = vmax.f32 %v13465_v3, %v7775_v16 }
 0x5a6   : > { %v6999_v13 = vmax.f32 %v6300_v18, %v7837_v31  ;;  %v7000_v33 = vmax.f32 %v6299_v52, %v7838_v57  ;;  %v5533_v36 = vadd.f32 1.0, %v5501_v39  ;;  %v7062_v44 = vmax.f32 %v13472_v8, %v6998_v27 }
 0x5a7   : > { %v5022_v24 = vmul.f32 %v8981_v28, %v4990_v42  ;;  %v4831_v45 = vmul.f32 0.3275911, %v4799_v49  ;;  %v7001_v61 = vmax.f32 %v6301_v10, %v7839_v41  ;;  %8982 = vpow2.f32 %v5339_v40  ;;  %v9003_v40 = vld [vmem:[%s13575_s6] ss:$0 sm:$0xff]  ;;  %v14029_v42 = vld [vmem:[#allocation83_spill] sm:$0xff] }
 0x5a8   : > { %v7063_v58 = vmax.f32 %v6743_v56, %v6999_v13  ;;  %v7064_v17 = vmax.f32 %v6744_v43, %v7000_v33  ;;  %v5565_v1 = vmul.f32 %v5533_v36, %v13422_v21  ;;  %v7349_v35 = vrot.slane %v7062_v44, %v12223_v2 }
 0x5a9   : > { %v5054_v14 = vadd.f32 1.4214138, %v5022_v24  ;;  %v4863_v0 = vadd.f32 1.0, %v4831_v45  ;;  %v7065_v47 = vmax.f32 %v6745_v25, %v7001_v61  ;;  %v4624_v54 = vadd.f32 %v14028_v48, %v4463_v50 }
 0x5aa   : > { %v7353_v59 = vrot.slane %v7063_v58, %v12223_v2  ;;  %v5758_v32 = vadd.f32 %v14027_v62, %v5565_v1  ;;  %v7357_v3 = vrot.slane %v7064_v17, %v12223_v2  ;;  %v7446_v16 = vsel %vm7400_vm10, %v7349_v35, %v7445_v38 }
 0x5ab   : > { %v5086_v8 = vmul.f32 %v8981_v28, %v5054_v14  ;;  %8984 = vrcp.f32 %v4863_v0  ;;  %v7361_v56 = vrot.slane %v7065_v47, %v12223_v2  ;;  %v4665_v12 = vmul.f32 %v9003_v40, %v4624_v54 }
 0x5ac   : > { %v7447_v21 = vsel %vm7402_vm11, %v7353_v59, %v7446_v16  ;;  %v5247_v5 = vsub.f32 0.0, %v4799_v49  ;;  %vm5438_vm4 = vcmp.ge.f32.partialorder %v13430_v51, 0.0  ;;  %v4734_v31 = vmul.f32 0.5, %v13416_v15 }
 0x5ad   : > { %v7448_v19 = vsel %vm7404_vm12, %v7357_v3, %v7447_v21  ;;  %v5118_v43 = vadd.f32 -0.28449672, %v5086_v8  ;;  %v13521_v55 = vadd.f32 %v13480_v23, %v4665_v12  ;;  %v5790_v15 = vmul.f32 0.70710677, %v5758_v32 }
 0x5ae   : > { %v7449_v9 = vsel %vm7406_vm13, %v7361_v56, %v7448_v19  ;;  %v5279_v53 = vmul.f32 %v5247_v5, %v4799_v49  ;;  %vm5439_vm9 = vcmp.ge.f32.partialorder %v13489_v37, 0.0  ;;  %v4735_v3 = vmul.f32 0.5, %v13483_v26 }
 0x5af   : > { %7471 = vst [vmem:[%s12444_s13 + $0x30] sm:$0xff] %v7449_v9  ;;  %v5150_v4 = vmul.f32 %v8981_v28, %v5118_v43  ;;  %v13524_v20 = vmul.f32 0.70710677, %v13521_v55  ;;  %v6302_v47 = vcombine.high %v5790_v15, %v5790_v15  ;;  %v6309_v8 = vrot.slane %v5790_v15, %v12216_v60  ;;  %v14030_v43 = vld [vmem:[#allocation88_spill] sm:$0xff] }
 0x5b0   : > { %v5341_v10 = vmul.f32 1.442695, %v5279_v53 }
 0x5b1   : > { %v5182_v30 = vadd.f32 0.2548296, %v5150_v4  ;;  %v8983_v6 = vpop.eup %8982  ;;  %v4800_v52 = vand.u32 2147483647, %v13524_v20  ;;  %v6316_v19 = vrot.slane %v6302_v47, %v12216_v60  ;;  %v6317_v54 = vcombine.high %v6309_v8, %v6309_v8 }
 0x5b2   : > { %v7776_v40 = vrot.slane %v6309_v8, 9  ;;  %vm5440_vm14 = vcmp.ge.f32.partialorder %v13524_v20, 0.0 }
 0x5b3   : > { %v5214_v7 = vmul.f32 %v8981_v28, %v5182_v30  ;;  %v4832_v46 = vmul.f32 0.3275911, %v4800_v52  ;;  %v5248_v33 = vsub.f32 0.0, %v4800_v52  ;;  %v6318_v37 = vcombine.high %v6316_v19, %v6316_v19 }
 0x5b5   : > { %v8985_v11 = vpop.eup %8984  ;;  %v5374_v50 = vmul.f32 %v8983_v6, %v5214_v7  ;;  %v4864_v63 = vadd.f32 1.0, %v4832_v46  ;;  %v5280_v51 = vmul.f32 %v5248_v33, %v4800_v52  ;;  %v7777_v7 = vrot.slane %v6317_v54, 9 }
 0x5b6   : > { %v4959_v18 = vmul.f32 1.0614054, %v8985_v11  ;;  %v7778_v6 = vrot.slane %v6316_v19, 9  ;;  %v7779_v53 = vrot.slane %v6318_v37, 9 }
 0x5b7   : > { %v5406_v22 = vsub.f32 1.0, %v5374_v50  ;;  %8986 = vrcp.f32 %v4864_v63  ;;  %v5343_v17 = vmul.f32 1.442695, %v5280_v51  ;;  %v4736_v51 = vmul.f32 0.5, %v13521_v55 }
 0x5b8   : > { %v4991_v34 = vadd.f32 -1.4531521, %v4959_v18  ;;  %8988 = vpow2.f32 %v5341_v10 }
 0x5b9   : > { %v5470_v29 = vsub.f32 0.0, %v5406_v22  ;;  %8990 = vpow2.f32 %v5343_v17 }
 0x5ba   : > { %v5023_v23 = vmul.f32 %v8985_v11, %v4991_v34 }
 0x5bb   : > { %v5502_v28 = vsel %vm5438_vm4, %v5406_v22, %v5470_v29  ;;  %v6746_v22 = vmax.f32 %v6309_v8, %v7776_v40 }
 0x5bc   : > { %v5534_v57 = vadd.f32 1.0, %v5502_v28  ;;  %v5055_v27 = vadd.f32 1.4214138, %v5023_v23  ;;  %v6747_v28 = vmax.f32 %v6317_v54, %v7777_v7 }
 0x5be   : > { %v5566_v38 = vmul.f32 %v5534_v57, %v4734_v31  ;;  %v5087_v39 = vmul.f32 %v8985_v11, %v5055_v27  ;;  %v6748_v31 = vmax.f32 %v6316_v19, %v7778_v6 }
 0x5c0   : > { %v5759_v49 = vadd.f32 %v14029_v42, %v5566_v38  ;;  %v5119_v41 = vadd.f32 -0.28449672, %v5087_v39 }
 0x5c1   : > { %v8987_v25 = vpop.eup %8986 }
 0x5c2   : > { %v5151_v13 = vmul.f32 %v8985_v11, %v5119_v41  ;;  %v4960_v24 = vmul.f32 1.0614054, %v8987_v25  ;;  %v8989_v45 = vpop.eup %8988  ;;  %v5791_v46 = vmul.f32 0.70710677, %v5759_v49  ;;  %v6749_v41 = vmax.f32 %v6318_v37, %v7779_v53 }
 0x5c3   : > { %v8991_v30 = vpop.eup %8990 }
 0x5c4   : > { %v5183_v36 = vadd.f32 0.2548296, %v5151_v13  ;;  %v4992_v58 = vadd.f32 -1.4531521, %v4960_v24  ;;  %v6319_v33 = vcombine.high %v5791_v46, %v5791_v46 }
 0x5c6   : > { %v5215_v44 = vmul.f32 %v8985_v11, %v5183_v36  ;;  %v5024_v35 = vmul.f32 %v8987_v25, %v4992_v58  ;;  %v6333_v15 = vrot.slane %v6319_v33, %v12216_v60 }
 0x5c8   : > { %v5375_v61 = vmul.f32 %v8989_v45, %v5215_v44  ;;  %v5056_v0 = vadd.f32 1.4214138, %v5024_v35  ;;  %v6326_v44 = vrot.slane %v5791_v46, %v12216_v60  ;;  %v7782_v19 = vrot.slane %v6333_v15, 9 }
 0x5ca   : > { %v5407_v1 = vsub.f32 1.0, %v5375_v61  ;;  %v5088_v62 = vmul.f32 %v8987_v25, %v5056_v0  ;;  %v14031_v0 = vld [vmem:[#allocation89_spill] sm:$0xff]  ;;  %v6334_v55 = vcombine.high %v6326_v44, %v6326_v44 }
 0x5cc   : > { %v5471_v14 = vsub.f32 0.0, %v5407_v1  ;;  %v5120_v56 = vadd.f32 -0.28449672, %v5088_v62 }
 0x5ce   : > { %v5503_v59 = vsel %vm5439_vm9, %v5407_v1, %v5471_v14  ;;  %v5152_v32 = vmul.f32 %v8987_v25, %v5120_v56 }
 0x5cf   : > { %v5535_v16 = vadd.f32 1.0, %v5503_v59 }
 0x5d0   : > { %v5184_v9 = vadd.f32 0.2548296, %v5152_v32 }
 0x5d1   : > { %v5567_v21 = vmul.f32 %v5535_v16, %v4735_v3  ;;  %v6335_v3 = vcombine.high %v6333_v15, %v6333_v15  ;;  %v7780_v16 = vrot.slane %v6326_v44, 9 }
 0x5d2   : > { %v5216_v12 = vmul.f32 %v8987_v25, %v5184_v9 }
 0x5d3   : > { %v5760_v48 = vadd.f32 %v14030_v43, %v5567_v21  ;;  %v7781_v21 = vrot.slane %v6334_v55, 9  ;;  %v7783_v54 = vrot.slane %v6335_v3, 9  ;;  %v6750_v9 = vmax.f32 %v6326_v44, %v7780_v16 }
 0x5d4   : > { %v5376_v11 = vmul.f32 %v8991_v30, %v5216_v12 }
 0x5d5   : > { %v5792_v4 = vmul.f32 0.70710677, %v5760_v48  ;;  %v6751_v30 = vmax.f32 %v6334_v55, %v7781_v21 }
 0x5d6   : > { %v5408_v34 = vsub.f32 1.0, %v5376_v11 }
 0x5d7   : > { %v6336_v5 = vcombine.high %v5792_v4, %v5792_v4  ;;  %v6343_v26 = vrot.slane %v5792_v4, %v12216_v60 }
 0x5d8   : > { %v5472_v57 = vsub.f32 0.0, %v5408_v34 }
 0x5d9   : > { %v6350_v50 = vrot.slane %v6336_v5, %v12216_v60  ;;  %v6351_v52 = vcombine.high %v6343_v26, %v6343_v26  ;;  %v7840_v18 = vrot.slane %v6343_v26, 9  ;;  %v6752_v5 = vmax.f32 %v6333_v15, %v7782_v19 }
 0x5da   : > { %v5504_v13 = vsel %vm5440_vm14, %v5408_v34, %v5472_v57 }
 0x5db   : > { %v6352_v29 = vcombine.high %v6350_v50, %v6350_v50  ;;  %v7841_v63 = vrot.slane %v6351_v52, 9  ;;  %v7842_v23 = vrot.slane %v6350_v50, 9  ;;  %v7002_v10 = vmax.f32 %v6343_v26, %v7840_v18 }
 0x5dc   : > { %v5536_v24 = vadd.f32 1.0, %v5504_v13 }
 0x5dd   : > { %v7843_v27 = vrot.slane %v6352_v29, 9  ;;  %v7003_v38 = vmax.f32 %v6351_v52, %v7841_v63  ;;  %v7004_v39 = vmax.f32 %v6350_v50, %v7842_v23  ;;  %v7066_v42 = vmax.f32 %v6746_v22, %v7002_v10 }
 0x5de   : > { %v5568_v17 = vmul.f32 %v5536_v24, %v4736_v51  ;;  %v6753_v50 = vmax.f32 %v6335_v3, %v7783_v54 }
 0x5df   : > { %v7005_v36 = vmax.f32 %v6352_v29, %v7843_v27  ;;  %v7067_v25 = vmax.f32 %v6747_v28, %v7003_v38  ;;  %v7068_v49 = vmax.f32 %v6748_v31, %v7004_v39  ;;  %v7365_v61 = vrot.slane %v7066_v42, %v12223_v2 }
 0x5e0   : > { %v5761_v47 = vadd.f32 %v14031_v0, %v5568_v17 }
 0x5e1   : > { %v7069_v45 = vmax.f32 %v6749_v41, %v7005_v36  ;;  %v7369_v20 = vrot.slane %v7067_v25, %v12223_v2  ;;  %v7373_v58 = vrot.slane %v7068_v49, %v12223_v2 }
 0x5e2   : > { %v5793_v62 = vmul.f32 0.70710677, %v5761_v47 }
 0x5e3   : > { %v7377_v1 = vrot.slane %v7069_v45, %v12223_v2  ;;  %v7450_v35 = vsel %vm7394_vm5, %v7369_v20, %v7365_v61 }
 0x5e4   : > { %v7451_v14 = vsel %vm7396_vm6, %v7373_v58, %v7450_v35  ;;  %v6353_v8 = vcombine.high %v5793_v62, %v5793_v62  ;;  %v6360_v56 = vrot.slane %v5793_v62, %v12216_v60 }
 0x5e5   : > { %v7452_v59 = vsel %vm7398_vm7, %v7377_v1, %v7451_v14 }
 0x5e6   : > { %v6367_v32 = vrot.slane %v6353_v8, %v12216_v60  ;;  %v6368_v43 = vcombine.high %v6360_v56, %v6360_v56  ;;  %v7844_v48 = vrot.slane %v6360_v56, 9 }
 0x5e8   : > { %v6369_v4 = vcombine.high %v6367_v32, %v6367_v32  ;;  %v7845_v37 = vrot.slane %v6368_v43, 9  ;;  %v7846_v40 = vrot.slane %v6367_v32, 9  ;;  %v7006_v12 = vmax.f32 %v6360_v56, %v7844_v48 }
 0x5ea   : > { %v7847_v26 = vrot.slane %v6369_v4, 9  ;;  %v7007_v7 = vmax.f32 %v6368_v43, %v7845_v37  ;;  %v7008_v6 = vmax.f32 %v6367_v32, %v7846_v40  ;;  %v7070_v11 = vmax.f32 %v6750_v9, %v7006_v12 }
 0x5ec   : > { %v7009_v52 = vmax.f32 %v6369_v4, %v7847_v26  ;;  %v7071_v18 = vmax.f32 %v6751_v30, %v7007_v7  ;;  %v7072_v53 = vmax.f32 %v6752_v5, %v7008_v6  ;;  %v7381_v60 = vrot.slane %v7070_v11, %v12223_v2 }
 0x5ee   : > { %v7073_v22 = vmax.f32 %v6753_v50, %v7009_v52  ;;  %v7385_v46 = vrot.slane %v7071_v18, %v12223_v2  ;;  %v7453_v34 = vsel %vm7400_vm10, %v7381_v60, %v7452_v59  ;;  %v7389_v29 = vrot.slane %v7072_v53, %v12223_v2 }
 0x5f0   : > { %v7393_v63 = vrot.slane %v7073_v22, %v12223_v2  ;;  %v7454_v23 = vsel %vm7402_vm11, %v7385_v46, %v7453_v34 }
 0x5f1   : > { %v7455_v10 = vsel %vm7404_vm12, %v7389_v29, %v7454_v23 }
 0x5f2   : > { %v7456_v28 = vsel %vm7406_vm13, %v7393_v63, %v7455_v10 }
 0x5f3   : > { %7472 = vst [vmem:[%s12444_s13 + $0x38] sm:$0xff] %v7456_v28 }
 0x5f4 PF: > { %s18_s29 = sadd.s32 1, %s9026_s29   ;;  %s14032_s27 = smov %s9022_s28 }
 0x5f5   : > { %p15_p5 = scmp.ge.s32.totalorder %s18_s29, 4   ;;  %s14033_s28 = smov %s14035_s30 }
 0x5f7   :  { %17 = sbr.rel (!%p15_p5) target bundleno = 2 (0x2), region = 85 }

</bundles_post_ra>
